<compile_context>
chip_gen: v5e
topology: v5e:2x2
jax: 0.10.0
libtpu: 0.0.40
codegen_flags: <defaults>
</compile_context>

<pallas_src>
import functools

import jax
import jax.numpy as jnp
from jax.experimental import pallas as pl
from jax.experimental.pallas import tpu as pltpu


LANE = 128
SUBLANE = 8


def _round_up(n, m):
    return ((n + m - 1) // m) * m


# ---------------------------------------------------------------------------
# Parameter padding helpers (XLA glue)
# ---------------------------------------------------------------------------
def _pad_gate_cols(w, H, Hp):
    """[R, 4H] -> [R, 4Hp]; each PyTorch gate block (i,f,g,o) is placed at a
    128-aligned column slot so in-kernel gate slices are free vreg views."""
    if Hp == H:
        return w
    R = w.shape[0]
    out = jnp.zeros((R, 4 * Hp), w.dtype)
    for k in range(4):
        out = out.at[:, k * Hp:k * Hp + H].set(w[:, k * H:(k + 1) * H])
    return out


def _pad_rows(w, Rp):
    R = w.shape[0]
    if Rp == R:
        return w
    return jnp.pad(w, ((0, Rp - R), (0, 0)))


def _time_major_blocks(xp, nb, tm, T, Dp):
    """[Mp, T, Dp] -> [nb*T*tm, Dp]; each grid block reads a contiguous,
    time-major row range (clean sublane slices inside the kernel)."""
    return (xp.reshape(nb, tm, T, Dp)
              .transpose(0, 2, 1, 3)
              .reshape(nb * T * tm, Dp))


# ---------------------------------------------------------------------------
# LSTM gate -> state helper (traced inside kernels; Hp-aligned gate slices)
# ---------------------------------------------------------------------------
def _lstm_gates_to_state(gates, c, Hp):
    i = jax.nn.sigmoid(gates[:, 0 * Hp:1 * Hp])
    f = jax.nn.sigmoid(gates[:, 1 * Hp:2 * Hp])
    g = jnp.tanh(gates[:, 2 * Hp:3 * Hp])
    o = jax.nn.sigmoid(gates[:, 3 * Hp:4 * Hp])
    c_new = f * c + i * g
    h_new = o * jnp.tanh(c_new)
    return h_new, c_new


# ---------------------------------------------------------------------------
# Bidirectional LSTM kernel (one layer, fixed short seq length T, unrolled)
#   x_ref   : [T*TM, Dp]  time-major rows for this block (t outer, row inner)
#   wih_fb  : [Dp, 8*Hp]  fwd | bwd input projections (gate blocks 128-aligned)
#   whh_f/b : [Hp, 4*Hp]
#   b_fb    : [1, 8*Hp]
#   o_ref   : [TM, T*2*Hp]  per timestep: [h_fwd_t | h_bwd_t] (each Hp wide)
# ---------------------------------------------------------------------------
def bilstm_kernel(x_ref, wih_fb_ref, whh_f_ref, whh_b_ref, b_fb_ref, o_ref, *, Hp, T):
    rows = x_ref.shape[0]
    TM = rows // T
    G4 = 4 * Hp

    # Hoisted input projection: one MXU pass for both directions & all timesteps.
    gx = (jnp.dot(x_ref[...], wih_fb_ref[...], preferred_element_type=jnp.float32)
          + b_fb_ref[...])                                   # [T*TM, 8*Hp]

    whh_f = whh_f_ref[...]
    whh_b = whh_b_ref[...]

    h = jnp.zeros((TM, Hp), jnp.float32)
    c = jnp.zeros((TM, Hp), jnp.float32)
    fwd = []
    for t in range(T):
        gates = gx[t * TM:(t + 1) * TM, 0:G4] + jnp.dot(
            h, whh_f, preferred_element_type=jnp.float32)
        h, c = _lstm_gates_to_state(gates, c, Hp)
        fwd.append(h)

    h = jnp.zeros((TM, Hp), jnp.float32)
    c = jnp.zeros((TM, Hp), jnp.float32)
    bwd = [None] * T
    for t in reversed(range(T)):
        gates = gx[t * TM:(t + 1) * TM, G4:2 * G4] + jnp.dot(
            h, whh_b, preferred_element_type=jnp.float32)
        h, c = _lstm_gates_to_state(gates, c, Hp)
        bwd[t] = h

    pieces = []
    for t in range(T):
        pieces.append(fwd[t])
        pieces.append(bwd[t])
    # 128-aligned pieces -> lane-dense [TM, T*2*Hp] store (no masked vst).
    o_ref[...] = jnp.concatenate(pieces, axis=1)


def bilstm_forward(x, layer_params, H):
    """x: [M, T, D] -> [M, T*2H] (matches torch out.reshape(-1, 2H*T))."""
    M, T, _ = x.shape
    Hp = _round_up(H, LANE)
    tm = min(_round_up(M, SUBLANE), 256)
    Mp = _round_up(M, tm)
    nb = Mp // tm

    cur = x
    for (wih_f, whh_f, b_f, wih_b, whh_b, b_b) in layer_params:
        din = cur.shape[-1]
        Dp = _round_up(din, LANE)

        xp = jnp.pad(cur, ((0, Mp - M), (0, 0), (0, Dp - din)))
        x2d = _time_major_blocks(xp, nb, tm, T, Dp)

        wih = jnp.concatenate(
            [_pad_rows(_pad_gate_cols(wih_f, H, Hp), Dp),
             _pad_rows(_pad_gate_cols(wih_b, H, Hp), Dp)], axis=1)     # [Dp, 8Hp]
        whhf = _pad_rows(_pad_gate_cols(whh_f, H, Hp), Hp)             # [Hp, 4Hp]
        whhb = _pad_rows(_pad_gate_cols(whh_b, H, Hp), Hp)
        bias = jnp.concatenate(
            [_pad_gate_cols(b_f, H, Hp), _pad_gate_cols(b_b, H, Hp)], axis=1)

        flops = int(2 * Mp * T * Dp * 8 * Hp + 2 * 2 * T * Mp * Hp * 4 * Hp)
        trans = int(5 * Mp * T * 2 * Hp)
        bytes_acc = int(4 * (Mp * T * Dp + Dp * 8 * Hp + 2 * Hp * 4 * Hp
                             + 8 * Hp + Mp * T * 2 * Hp))

        out_p = pl.pallas_call(
            functools.partial(bilstm_kernel, Hp=Hp, T=T),
            out_shape=jax.ShapeDtypeStruct((Mp, T * 2 * Hp), jnp.float32),
            grid=(nb,),
            in_specs=[
                pl.BlockSpec((T * tm, Dp), lambda m: (m, 0)),
                pl.BlockSpec((Dp, 8 * Hp), lambda m: (0, 0)),
                pl.BlockSpec((Hp, 4 * Hp), lambda m: (0, 0)),
                pl.BlockSpec((Hp, 4 * Hp), lambda m: (0, 0)),
                pl.BlockSpec((1, 8 * Hp), lambda m: (0, 0)),
            ],
            out_specs=pl.BlockSpec((tm, T * 2 * Hp), lambda m: (m, 0)),
            compiler_params=pltpu.CompilerParams(
                dimension_semantics=("parallel",)),
            cost_estimate=pl.CostEstimate(
                flops=flops, transcendentals=trans, bytes_accessed=bytes_acc),
        )(x2d, wih, whhf, whhb, bias)

        # Drop the hidden padding, back to the torch per-timestep layout.
        cur = out_p[:M].reshape(M, T, 2, Hp)[:, :, :, :H].reshape(M, T, 2 * H)
    return cur.reshape(M, T * 2 * H)


# ---------------------------------------------------------------------------
# Unidirectional LSTM returning the last hidden state (ProcessLSTM.forward)
# ---------------------------------------------------------------------------
def lstm_last_kernel(x_ref, wih_ref, whh_ref, b_ref, o_ref, *, Hp, T):
    rows = x_ref.shape[0]
    TM = rows // T
    gx = (jnp.dot(x_ref[...], wih_ref[...], preferred_element_type=jnp.float32)
          + b_ref[...])                                      # [T*TM, 4*Hp]
    whh = whh_ref[...]
    h = jnp.zeros((TM, Hp), jnp.float32)
    c = jnp.zeros((TM, Hp), jnp.float32)
    for t in range(T):
        gates = gx[t * TM:(t + 1) * TM, :] + jnp.dot(
            h, whh, preferred_element_type=jnp.float32)
        h, c = _lstm_gates_to_state(gates, c, Hp)
    o_ref[...] = h                                           # == out[:, -1, :]


def lstm_last_forward(x, params, H):
    M, T, din = x.shape
    Hp = _round_up(H, LANE)
    Dp = _round_up(din, LANE)
    tm = min(_round_up(M, SUBLANE), 256)
    Mp = _round_up(M, tm)
    nb = Mp // tm
    wih, whh, b = params

    xp = jnp.pad(x, ((0, Mp - M), (0, 0), (0, Dp - din)))
    x2d = _time_major_blocks(xp, nb, tm, T, Dp)
    wih_p = _pad_rows(_pad_gate_cols(wih, H, Hp), Dp)
    whh_p = _pad_rows(_pad_gate_cols(whh, H, Hp), Hp)
    b_p = _pad_gate_cols(b, H, Hp)

    flops = int(2 * Mp * T * Dp * 4 * Hp + 2 * T * Mp * Hp * 4 * Hp)
    trans = int(5 * Mp * T * Hp)
    bytes_acc = int(4 * (Mp * T * Dp + Dp * 4 * Hp + Hp * 4 * Hp + 4 * Hp + Mp * Hp))

    out = pl.pallas_call(
        functools.partial(lstm_last_kernel, Hp=Hp, T=T),
        out_shape=jax.ShapeDtypeStruct((Mp, Hp), jnp.float32),
        grid=(nb,),
        in_specs=[
            pl.BlockSpec((T * tm, Dp), lambda m: (m, 0)),
            pl.BlockSpec((Dp, 4 * Hp), lambda m: (0, 0)),
            pl.BlockSpec((Hp, 4 * Hp), lambda m: (0, 0)),
            pl.BlockSpec((1, 4 * Hp), lambda m: (0, 0)),
        ],
        out_specs=pl.BlockSpec((tm, Hp), lambda m: (m, 0)),
        compiler_params=pltpu.CompilerParams(dimension_semantics=("parallel",)),
        cost_estimate=pl.CostEstimate(
            flops=flops, transcendentals=trans, bytes_accessed=bytes_acc),
    )(x2d, wih_p, whh_p, b_p)
    return out[:M, :H]


# ---------------------------------------------------------------------------
# GraphAttentionLayer1/2: dense h = X @ W over all groups, then per-group
# softmax attention (VPU/EUP only, unrolled over the N nodes).
# ---------------------------------------------------------------------------
def matmul_kernel(x_ref, w_ref, o_ref):
    o_ref[...] = jnp.dot(x_ref[...], w_ref[...], preferred_element_type=jnp.float32)


def _dense_matmul(x, w, tr):
    """x: [R, K] @ w: [K, N]; R is a multiple of tr; all dims 8/128 aligned."""
    R, K = x.shape
    N = w.shape[1]
    return pl.pallas_call(
        matmul_kernel,
        out_shape=jax.ShapeDtypeStruct((R, N), jnp.float32),
        grid=(R // tr,),
        in_specs=[pl.BlockSpec((tr, K), lambda i: (i, 0)),
                  pl.BlockSpec((K, N), lambda i: (0, 0))],
        out_specs=pl.BlockSpec((tr, N), lambda i: (i, 0)),
        compiler_params=pltpu.CompilerParams(dimension_semantics=("parallel",)),
        cost_estimate=pl.CostEstimate(
            flops=int(2 * R * K * N), transcendentals=0,
            bytes_accessed=int(4 * (R * K + K * N + R * N))),
    )(x, w)


def gat_attention_kernel(h_ref, a1_ref, a2_ref, o_ref, *, alpha, mu, N):
    h = h_ref[...]                                      # [TG, N, Fp]
    a1 = a1_ref[...]                                    # [1, Fp]
    a2 = a2_ref[...]                                    # [1, Fp]

    hs = [h[:, n, :] for n in range(N)]                 # each [TG, Fp]
    e0 = jnp.sum(hs[0] * a2, axis=-1, keepdims=True)    # h0 . a[F:]   -> [TG, 1]

    es = []
    for n in range(N):
        e = jnp.sum(hs[n] * a1, axis=-1, keepdims=True) + e0
        es.append(jnp.where(e > 0.0, e, alpha * e))     # LeakyReLU(alpha)

    m = es[0]
    for n in range(1, N):
        m = jnp.maximum(m, es[n])
    ps = [jnp.exp(e - m) for e in es]
    denom = ps[0]
    for n in range(1, N):
        denom = denom + ps[n]
    inv = pl.reciprocal(denom, approx=True)             # softmax denom on the EUP

    acc = jnp.zeros_like(hs[0])
    for n in range(N):
        att_n = jnp.maximum(ps[n] * inv - mu, 0.0)      # (att - mu + |att - mu|)/2
        acc = acc + att_n * hs[n]                       # broadcast-mul + accumulate
    # TODO(synk): F.dropout(attention, p, training=...) is identity at eval; not applied.
    o_ref[...] = acc                                    # [TG, Fp]


def gat_forward(inp, W, a_vec, alpha, mu):
    """GraphAttentionLayer with concat=False. inp: [G, N, F] -> [G, F]."""
    G, N, F = inp.shape
    Fp = _round_up(F, LANE)
    tg = min(_round_up(G, SUBLANE), 256)
    Gp = _round_up(G, tg)

    inp_p = jnp.pad(inp, ((0, Gp - G), (0, 0), (0, Fp - F)))
    Wp = jnp.zeros((Fp, Fp), jnp.float32).at[:F, :F].set(W)
    a1 = jnp.zeros((1, Fp), jnp.float32).at[0, :F].set(a_vec[:F, 0])
    a2 = jnp.zeros((1, Fp), jnp.float32).at[0, :F].set(a_vec[F:, 0])

    # h = X @ W for ALL groups in one dense, lane-aligned matmul.
    h2d = _dense_matmul(inp_p.reshape(Gp * N, Fp), Wp, tr=tg * N)
    h3 = h2d.reshape(Gp, N, Fp)

    flops = int(6 * Gp * N * Fp)
    trans = int(2 * Gp * N)
    bytes_acc = int(4 * (Gp * N * Fp + 2 * Fp + Gp * Fp))

    out = pl.pallas_call(
        functools.partial(gat_attention_kernel, alpha=alpha, mu=mu, N=N),
        out_shape=jax.ShapeDtypeStruct((Gp, Fp), jnp.float32),
        grid=(Gp // tg,),
        in_specs=[
            pl.BlockSpec((tg, N, Fp), lambda g: (g, 0, 0)),
            pl.BlockSpec((1, Fp), lambda g: (0, 0)),
            pl.BlockSpec((1, Fp), lambda g: (0, 0)),
        ],
        out_specs=pl.BlockSpec((tg, Fp), lambda g: (g, 0)),
        compiler_params=pltpu.CompilerParams(dimension_semantics=("parallel",)),
        cost_estimate=pl.CostEstimate(
            flops=flops, transcendentals=trans, bytes_accessed=bytes_acc),
    )(h3, a1, a2)
    return out[:G, :F]


# ---------------------------------------------------------------------------
# Full BiLSTM_Attention.forward
# ---------------------------------------------------------------------------
def bilstm_attention_forward(params, batch_h, batch_r, batch_t, *, cfg):
    T = 3
    H = cfg["hidden_size"]
    H1 = cfg["hidden_size1"]
    nn_ = cfg["num_neighbor"]
    F1 = H * 2 * T

    # ----- branch 1: embeddings -> BiLSTM -> GAT1 -----
    head = params["ent_emb"][batch_h]
    rel = params["rel_emb"][batch_r]
    tail = params["ent_emb"][batch_t]
    trip = jnp.concatenate([head, rel, tail], axis=1)
    x = trip.reshape(-1, T, cfg["BiLSTM_input_size"])

    out = bilstm_forward(x, params["bilstm"], H)                           # [M, 6H]
    out_groups = out.reshape(-1, nn_ + 1, F1)
    out_att = gat_forward(out_groups, params["gat1_W"], params["gat1_a"],
                          cfg["alpha"], cfg["mu"])                         # [2B, 6H]
    out2 = out.reshape(-1, nn_ * 2 + 2, F1)                                # [B, 2(nn+1), 6H]

    # ----- branch 2: embeddings1 -> ProcessLSTM -> GAT2 -----
    head1 = params["ent_emb1"][batch_h]
    rel1 = params["rel_emb1"][batch_r]
    tail1 = params["ent_emb1"][batch_t]
    trip1 = jnp.concatenate([head1, rel1, tail1], axis=1)
    x1 = trip1.reshape(-1, T, cfg["BiLSTM_input_size"])

    output = lstm_last_forward(x1, params["plstm"], cfg["embedding_dim"])  # [M, emb]
    output_groups = output.reshape(-1, nn_ + 1, H1)
    output_att = gat_forward(output_groups, params["gat2_W"], params["gat2_a"],
                             cfg["alpha"], cfg["mu"])                      # [2B, H1]
    output2 = output.reshape(-1, nn_ * 2 + 2, H1)                          # [B, 2(nn+1), H1]

    return out2[:, 0, :], out_att, output2[:, 0, :], output_att


# ---------------------------------------------------------------------------
# Deterministic parameter construction + demo
# ---------------------------------------------------------------------------
def _uni(key, shape, scale):
    return jax.random.uniform(key, shape, jnp.float32, -scale, scale)


def make_params(cfg, key):
    keys = iter(jax.random.split(key, 32))
    emb = cfg["embedding_dim"]
    H = cfg["hidden_size"]
    T = 3
    F1 = H * 2 * T
    H1 = cfg["hidden_size1"]
    emb_range = 6.0 / (emb ** 0.5)

    params = {
        "ent_emb": _uni(next(keys), (cfg["total_ent"], emb), emb_range),
        "rel_emb": _uni(next(keys), (cfg["total_rel"], emb), emb_range),
        "ent_emb1": _uni(next(keys), (cfg["total_ent"], emb), emb_range),
        "rel_emb1": _uni(next(keys), (cfg["total_rel"], emb), emb_range),
        "gat1_W": _uni(next(keys), (F1, F1), (6.0 / (2 * F1)) ** 0.5 * 1.414),
        "gat1_a": _uni(next(keys), (2 * F1, 1), (6.0 / (2 * F1 + 1)) ** 0.5 * 1.414),
        "gat2_W": _uni(next(keys), (H1, H1), (6.0 / (2 * H1)) ** 0.5 * 1.414),
        "gat2_a": _uni(next(keys), (2 * H1, 1), (6.0 / (2 * H1 + 1)) ** 0.5 * 1.414),
    }

    # Bidirectional LSTM layers (weights stored transposed: [in, 4H], [H, 4H],
    # merged bias [1, 4H]; PyTorch gate order i,f,g,o).
    bilstm = []
    din = cfg["BiLSTM_input_size"]
    scale = 1.0 / (H ** 0.5)
    for _ in range(cfg["num_layers"]):
        layer = (
            _uni(next(keys), (din, 4 * H), scale),
            _uni(next(keys), (H, 4 * H), scale),
            _uni(next(keys), (1, 4 * H), scale),
            _uni(next(keys), (din, 4 * H), scale),
            _uni(next(keys), (H, 4 * H), scale),
            _uni(next(keys), (1, 4 * H), scale),
        )
        bilstm.append(layer)
        din = 2 * H
    params["bilstm"] = bilstm

    # ProcessLSTM (input=emb, hidden=emb)
    scale_p = 1.0 / (emb ** 0.5)
    params["plstm"] = (
        _uni(next(keys), (emb, 4 * emb), scale_p),
        _uni(next(keys), (emb, 4 * emb), scale_p),
        _uni(next(keys), (1, 4 * emb), scale_p),
    )
    return params


if __name__ == "__main__":
    cfg = dict(
        embedding_dim=100,       # ProcessLSTM hidden must equal hidden_size1 = 100
        BiLSTM_input_size=100,
        hidden_size=32,
        hidden_size1=100,
        num_layers=1,
        num_neighbor=3,
        alpha=0.2,
        mu=0.001,
        total_ent=50,
        total_rel=20,
    )
    B = 2
    M = B * 2 * (cfg["num_neighbor"] + 1)   # 16 triples

    root = jax.random.PRNGKey(0)
    kp, kh, kr, kt = jax.random.split(root, 4)
    params = make_params(cfg, kp)
    batch_h = jax.random.randint(kh, (M,), 0, cfg["total_ent"], jnp.int32)
    batch_r = jax.random.randint(kr, (M,), 0, cfg["total_rel"], jnp.int32)
    batch_t = jax.random.randint(kt, (M,), 0, cfg["total_ent"], jnp.int32)

    forward = jax.jit(functools.partial(bilstm_attention_forward, cfg=cfg))
    out0, out_att, out1, output_att = forward(params, batch_h, batch_r, batch_t)
    for o in (out0, out_att, out1, output_att):
        jax.block_until_ready(o)

    expected = {
        "out[:,0,:]": (B, cfg["hidden_size"] * 2 * 3),
        "out_att": (2 * B, cfg["hidden_size"] * 2 * 3),
        "output[:,0,:]": (B, cfg["hidden_size1"]),
        "output_att": (2 * B, cfg["hidden_size1"]),
    }
    got = {
        "out[:,0,:]": tuple(out0.shape),
        "out_att": tuple(out_att.shape),
        "output[:,0,:]": tuple(out1.shape),
        "output_att": tuple(output_att.shape),
    }
    assert got == expected, (got, expected)
    assert all(bool(jnp.all(jnp.isfinite(o))) for o in (out0, out_att, out1, output_att))
    print("KERNEL_OK")
</pallas_src>

<mosaic_0001>
module attributes {stable_mosaic.version = 11 : i64} {
  func.func @lstm_last_kernel(%arg0: i32, %arg1: memref<48x128xf32, #tpu.memory_space<vmem>>, %arg2: memref<128x512xf32, #tpu.memory_space<vmem>>, %arg3: memref<128x512xf32, #tpu.memory_space<vmem>>, %arg4: memref<1x512xf32, #tpu.memory_space<vmem>>, %arg5: memref<16x128xf32, #tpu.memory_space<vmem>>) attributes {dimension_semantics = [#tpu.dimension_semantics<parallel>], iteration_bounds = array<i64: 1>, scalar_prefetch = 0 : i64, scratch_operands = 0 : i64, tpu.core_type = #tpu.core_type<tc>, window_params = [{transform_indices = @transform_0, window_bounds = array<i64: 48, 128>}, {pipeline_mode = #tpu.pipeline_mode<synchronous>, transform_indices = @transform_1, window_bounds = array<i64: 128, 512>}, {pipeline_mode = #tpu.pipeline_mode<synchronous>, transform_indices = @transform_2, window_bounds = array<i64: 128, 512>}, {pipeline_mode = #tpu.pipeline_mode<synchronous>, transform_indices = @transform_3, window_bounds = array<i64: 1, 512>}, {transform_indices = @transform_4, window_bounds = array<i64: 16, 128>}]} {
    %c0 = arith.constant 0 : index
    %c0_0 = arith.constant 0 : index
    %0 = vector.load %arg1[%c0, %c0_0] : memref<48x128xf32, #tpu.memory_space<vmem>>, vector<48x128xf32>
    %c0_1 = arith.constant 0 : index
    %c0_2 = arith.constant 0 : index
    %1 = vector.load %arg2[%c0_1, %c0_2] : memref<128x512xf32, #tpu.memory_space<vmem>>, vector<128x512xf32>
    %cst = arith.constant dense<0.000000e+00> : vector<48x512xf32>
    %2 = tpu.matmul %0, %1, %cst {dimension_numbers = #tpu.dot_dimension_numbers<[1], [0], [0], [1], [0, 0, 1, 1], [], []>} : vector<48x128xf32>, vector<128x512xf32>, vector<48x512xf32> -> vector<48x512xf32>
    %c0_3 = arith.constant 0 : index
    %c0_4 = arith.constant 0 : index
    %3 = vector.load %arg4[%c0_3, %c0_4] : memref<1x512xf32, #tpu.memory_space<vmem>>, vector<1x512xf32>
    %4 = vector.broadcast %3 : vector<1x512xf32> to vector<48x512xf32>
    %5 = arith.addf %2, %4 : vector<48x512xf32>
    %c0_5 = arith.constant 0 : index
    %c0_6 = arith.constant 0 : index
    %6 = vector.load %arg3[%c0_5, %c0_6] : memref<128x512xf32, #tpu.memory_space<vmem>>, vector<128x512xf32>
    %cst_7 = arith.constant 0.000000e+00 : f32
    %7 = vector.broadcast %cst_7 : f32 to vector<16x128xf32>
    %cst_8 = arith.constant 0.000000e+00 : f32
    %8 = vector.broadcast %cst_8 : f32 to vector<16x128xf32>
    %9 = vector.extract_strided_slice %5 {offsets = [0, 0], sizes = [16, 512], strides = [1, 1]} : vector<48x512xf32> to vector<16x512xf32>
    %cst_9 = arith.constant dense<0.000000e+00> : vector<16x512xf32>
    %10 = tpu.matmul %7, %6, %cst_9 {dimension_numbers = #tpu.dot_dimension_numbers<[1], [0], [0], [1], [0, 0, 1, 1], [], []>} : vector<16x128xf32>, vector<128x512xf32>, vector<16x512xf32> -> vector<16x512xf32>
    %11 = arith.addf %9, %10 : vector<16x512xf32>
    %12 = vector.extract_strided_slice %11 {offsets = [0, 0], sizes = [16, 128], strides = [1, 1]} : vector<16x512xf32> to vector<16x128xf32>
    %13 = arith.negf %12 : vector<16x128xf32>
    %14 = math.exp %13 : vector<16x128xf32>
    %cst_10 = arith.constant 1.000000e+00 : f32
    %15 = vector.broadcast %cst_10 : f32 to vector<16x128xf32>
    %16 = arith.addf %15, %14 : vector<16x128xf32>
    %17 = arith.divf %15, %16 : vector<16x128xf32>
    %18 = vector.extract_strided_slice %11 {offsets = [0, 128], sizes = [16, 128], strides = [1, 1]} : vector<16x512xf32> to vector<16x128xf32>
    %19 = arith.negf %18 : vector<16x128xf32>
    %20 = math.exp %19 : vector<16x128xf32>
    %cst_11 = arith.constant 1.000000e+00 : f32
    %21 = vector.broadcast %cst_11 : f32 to vector<16x128xf32>
    %22 = arith.addf %21, %20 : vector<16x128xf32>
    %23 = arith.divf %21, %22 : vector<16x128xf32>
    %24 = vector.extract_strided_slice %11 {offsets = [0, 256], sizes = [16, 128], strides = [1, 1]} : vector<16x512xf32> to vector<16x128xf32>
    %25 = math.tanh %24 : vector<16x128xf32>
    %26 = vector.extract_strided_slice %11 {offsets = [0, 384], sizes = [16, 128], strides = [1, 1]} : vector<16x512xf32> to vector<16x128xf32>
    %27 = arith.negf %26 : vector<16x128xf32>
    %28 = math.exp %27 : vector<16x128xf32>
    %cst_12 = arith.constant 1.000000e+00 : f32
    %29 = vector.broadcast %cst_12 : f32 to vector<16x128xf32>
    %30 = arith.addf %29, %28 : vector<16x128xf32>
    %31 = arith.divf %29, %30 : vector<16x128xf32>
    %32 = arith.mulf %23, %8 : vector<16x128xf32>
    %33 = arith.mulf %17, %25 : vector<16x128xf32>
    %34 = arith.addf %32, %33 : vector<16x128xf32>
    %35 = math.tanh %34 : vector<16x128xf32>
    %36 = arith.mulf %31, %35 : vector<16x128xf32>
    %37 = vector.extract_strided_slice %5 {offsets = [16, 0], sizes = [16, 512], strides = [1, 1]} : vector<48x512xf32> to vector<16x512xf32>
    %cst_13 = arith.constant dense<0.000000e+00> : vector<16x512xf32>
    %38 = tpu.matmul %36, %6, %cst_13 {dimension_numbers = #tpu.dot_dimension_numbers<[1], [0], [0], [1], [0, 0, 1, 1], [], []>} : vector<16x128xf32>, vector<128x512xf32>, vector<16x512xf32> -> vector<16x512xf32>
    %39 = arith.addf %37, %38 : vector<16x512xf32>
    %40 = vector.extract_strided_slice %39 {offsets = [0, 0], sizes = [16, 128], strides = [1, 1]} : vector<16x512xf32> to vector<16x128xf32>
    %41 = arith.negf %40 : vector<16x128xf32>
    %42 = math.exp %41 : vector<16x128xf32>
    %cst_14 = arith.constant 1.000000e+00 : f32
    %43 = vector.broadcast %cst_14 : f32 to vector<16x128xf32>
    %44 = arith.addf %43, %42 : vector<16x128xf32>
    %45 = arith.divf %43, %44 : vector<16x128xf32>
    %46 = vector.extract_strided_slice %39 {offsets = [0, 128], sizes = [16, 128], strides = [1, 1]} : vector<16x512xf32> to vector<16x128xf32>
    %47 = arith.negf %46 : vector<16x128xf32>
    %48 = math.exp %47 : vector<16x128xf32>
    %cst_15 = arith.constant 1.000000e+00 : f32
    %49 = vector.broadcast %cst_15 : f32 to vector<16x128xf32>
    %50 = arith.addf %49, %48 : vector<16x128xf32>
    %51 = arith.divf %49, %50 : vector<16x128xf32>
    %52 = vector.extract_strided_slice %39 {offsets = [0, 256], sizes = [16, 128], strides = [1, 1]} : vector<16x512xf32> to vector<16x128xf32>
    %53 = math.tanh %52 : vector<16x128xf32>
    %54 = vector.extract_strided_slice %39 {offsets = [0, 384], sizes = [16, 128], strides = [1, 1]} : vector<16x512xf32> to vector<16x128xf32>
    %55 = arith.negf %54 : vector<16x128xf32>
    %56 = math.exp %55 : vector<16x128xf32>
    %cst_16 = arith.constant 1.000000e+00 : f32
    %57 = vector.broadcast %cst_16 : f32 to vector<16x128xf32>
    %58 = arith.addf %57, %56 : vector<16x128xf32>
    %59 = arith.divf %57, %58 : vector<16x128xf32>
    %60 = arith.mulf %51, %34 : vector<16x128xf32>
    %61 = arith.mulf %45, %53 : vector<16x128xf32>
    %62 = arith.addf %60, %61 : vector<16x128xf32>
    %63 = math.tanh %62 : vector<16x128xf32>
    %64 = arith.mulf %59, %63 : vector<16x128xf32>
    %65 = vector.extract_strided_slice %5 {offsets = [32, 0], sizes = [16, 512], strides = [1, 1]} : vector<48x512xf32> to vector<16x512xf32>
    %cst_17 = arith.constant dense<0.000000e+00> : vector<16x512xf32>
    %66 = tpu.matmul %64, %6, %cst_17 {dimension_numbers = #tpu.dot_dimension_numbers<[1], [0], [0], [1], [0, 0, 1, 1], [], []>} : vector<16x128xf32>, vector<128x512xf32>, vector<16x512xf32> -> vector<16x512xf32>
    %67 = arith.addf %65, %66 : vector<16x512xf32>
    %68 = vector.extract_strided_slice %67 {offsets = [0, 0], sizes = [16, 128], strides = [1, 1]} : vector<16x512xf32> to vector<16x128xf32>
    %69 = arith.negf %68 : vector<16x128xf32>
    %70 = math.exp %69 : vector<16x128xf32>
    %cst_18 = arith.constant 1.000000e+00 : f32
    %71 = vector.broadcast %cst_18 : f32 to vector<16x128xf32>
    %72 = arith.addf %71, %70 : vector<16x128xf32>
    %73 = arith.divf %71, %72 : vector<16x128xf32>
    %74 = vector.extract_strided_slice %67 {offsets = [0, 128], sizes = [16, 128], strides = [1, 1]} : vector<16x512xf32> to vector<16x128xf32>
    %75 = arith.negf %74 : vector<16x128xf32>
    %76 = math.exp %75 : vector<16x128xf32>
    %cst_19 = arith.constant 1.000000e+00 : f32
    %77 = vector.broadcast %cst_19 : f32 to vector<16x128xf32>
    %78 = arith.addf %77, %76 : vector<16x128xf32>
    %79 = arith.divf %77, %78 : vector<16x128xf32>
    %80 = vector.extract_strided_slice %67 {offsets = [0, 256], sizes = [16, 128], strides = [1, 1]} : vector<16x512xf32> to vector<16x128xf32>
    %81 = math.tanh %80 : vector<16x128xf32>
    %82 = vector.extract_strided_slice %67 {offsets = [0, 384], sizes = [16, 128], strides = [1, 1]} : vector<16x512xf32> to vector<16x128xf32>
    %83 = arith.negf %82 : vector<16x128xf32>
    %84 = math.exp %83 : vector<16x128xf32>
    %cst_20 = arith.constant 1.000000e+00 : f32
    %85 = vector.broadcast %cst_20 : f32 to vector<16x128xf32>
    %86 = arith.addf %85, %84 : vector<16x128xf32>
    %87 = arith.divf %85, %86 : vector<16x128xf32>
    %88 = arith.mulf %79, %62 : vector<16x128xf32>
    %89 = arith.mulf %73, %81 : vector<16x128xf32>
    %90 = arith.addf %88, %89 : vector<16x128xf32>
    %91 = math.tanh %90 : vector<16x128xf32>
    %92 = arith.mulf %87, %91 : vector<16x128xf32>
    %c0_21 = arith.constant 0 : index
    %c0_22 = arith.constant 0 : index
    %93 = vector.load %arg5[%c0_21, %c0_22] : memref<16x128xf32, #tpu.memory_space<vmem>>, vector<16x128xf32>
    tpu.vector_store %arg5[%c0_21, %c0_22], %92 {strides = array<i32>} : memref<16x128xf32, #tpu.memory_space<vmem>>, vector<16x128xf32>,
    return
  }
  func.func @transform_0(%arg0: i32) -> (i32, i32) {
    %c0_i32 = arith.constant 0 : i32
    %c0_i32_0 = arith.constant 0 : i32
    return %arg0, %c0_i32 : i32, i32
  }
  func.func @transform_1(%arg0: i32) -> (i32, i32) {
    %c0_i32 = arith.constant 0 : i32
    %c0_i32_0 = arith.constant 0 : i32
    %c0_i32_1 = arith.constant 0 : i32
    return %c0_i32, %c0_i32_0 : i32, i32
  }
  func.func @transform_2(%arg0: i32) -> (i32, i32) {
    %c0_i32 = arith.constant 0 : i32
    %c0_i32_0 = arith.constant 0 : i32
    %c0_i32_1 = arith.constant 0 : i32
    return %c0_i32, %c0_i32_0 : i32, i32
  }
  func.func @transform_3(%arg0: i32) -> (i32, i32) {
    %c0_i32 = arith.constant 0 : i32
    %c0_i32_0 = arith.constant 0 : i32
    %c0_i32_1 = arith.constant 0 : i32
    return %c0_i32, %c0_i32_0 : i32, i32
  }
  func.func @transform_4(%arg0: i32) -> (i32, i32) {
    %c0_i32 = arith.constant 0 : i32
    %c0_i32_0 = arith.constant 0 : i32
    return %arg0, %c0_i32 : i32, i32
  }
}

module attributes {stable_mosaic.version = 11 : i64} {
  func.func @matmul_kernel(%arg0: i32, %arg1: memref<32x128xf32, #tpu.memory_space<vmem>>, %arg2: memref<128x128xf32, #tpu.memory_space<vmem>>, %arg3: memref<32x128xf32, #tpu.memory_space<vmem>>) attributes {dimension_semantics = [#tpu.dimension_semantics<parallel>], iteration_bounds = array<i64: 1>, scalar_prefetch = 0 : i64, scratch_operands = 0 : i64, tpu.core_type = #tpu.core_type<tc>, window_params = [{transform_indices = @transform_0, window_bounds = array<i64: 32, 128>}, {pipeline_mode = #tpu.pipeline_mode<synchronous>, transform_indices = @transform_1, window_bounds = array<i64: 128, 128>}, {transform_indices = @transform_2, window_bounds = array<i64: 32, 128>}]} {
    %c0 = arith.constant 0 : index
    %c0_0 = arith.constant 0 : index
    %0 = vector.load %arg1[%c0, %c0_0] : memref<32x128xf32, #tpu.memory_space<vmem>>, vector<32x128xf32>
    %c0_1 = arith.constant 0 : index
    %c0_2 = arith.constant 0 : index
    %1 = vector.load %arg2[%c0_1, %c0_2] : memref<128x128xf32, #tpu.memory_space<vmem>>, vector<128x128xf32>
    %cst = arith.constant dense<0.000000e+00> : vector<32x128xf32>
    %2 = tpu.matmul %0, %1, %cst {dimension_numbers = #tpu.dot_dimension_numbers<[1], [0], [0], [1], [0, 0, 1, 1], [], []>} : vector<32x128xf32>, vector<128x128xf32>, vector<32x128xf32> -> vector<32x128xf32>
    %c0_3 = arith.constant 0 : index
    %c0_4 = arith.constant 0 : index
    %3 = vector.load %arg3[%c0_3, %c0_4] : memref<32x128xf32, #tpu.memory_space<vmem>>, vector<32x128xf32>
    tpu.vector_store %arg3[%c0_3, %c0_4], %2 {strides = array<i32>} : memref<32x128xf32, #tpu.memory_space<vmem>>, vector<32x128xf32>,
    return
  }
  func.func @transform_0(%arg0: i32) -> (i32, i32) {
    %c0_i32 = arith.constant 0 : i32
    %c0_i32_0 = arith.constant 0 : i32
    return %arg0, %c0_i32 : i32, i32
  }
  func.func @transform_1(%arg0: i32) -> (i32, i32) {
    %c0_i32 = arith.constant 0 : i32
    %c0_i32_0 = arith.constant 0 : i32
    %c0_i32_1 = arith.constant 0 : i32
    return %c0_i32, %c0_i32_0 : i32, i32
  }
  func.func @transform_2(%arg0: i32) -> (i32, i32) {
    %c0_i32 = arith.constant 0 : i32
    %c0_i32_0 = arith.constant 0 : i32
    return %arg0, %c0_i32 : i32, i32
  }
}

module attributes {stable_mosaic.version = 11 : i64} {
  func.func @gat_attention_kernel(%arg0: i32, %arg1: memref<8x4x128xf32, #tpu.memory_space<vmem>>, %arg2: memref<1x128xf32, #tpu.memory_space<vmem>>, %arg3: memref<1x128xf32, #tpu.memory_space<vmem>>, %arg4: memref<8x128xf32, #tpu.memory_space<vmem>>) attributes {dimension_semantics = [#tpu.dimension_semantics<parallel>], iteration_bounds = array<i64: 1>, scalar_prefetch = 0 : i64, scratch_operands = 0 : i64, tpu.core_type = #tpu.core_type<tc>, window_params = [{transform_indices = @transform_0, window_bounds = array<i64: 8, 4, 128>}, {pipeline_mode = #tpu.pipeline_mode<synchronous>, transform_indices = @transform_1, window_bounds = array<i64: 1, 128>}, {pipeline_mode = #tpu.pipeline_mode<synchronous>, transform_indices = @transform_2, window_bounds = array<i64: 1, 128>}, {transform_indices = @transform_3, window_bounds = array<i64: 8, 128>}]} {
    %c0 = arith.constant 0 : index
    %c0_0 = arith.constant 0 : index
    %c0_1 = arith.constant 0 : index
    %0 = vector.load %arg1[%c0, %c0_0, %c0_1] : memref<8x4x128xf32, #tpu.memory_space<vmem>>, vector<8x4x128xf32>
    %c0_2 = arith.constant 0 : index
    %c0_3 = arith.constant 0 : index
    %1 = vector.load %arg2[%c0_2, %c0_3] : memref<1x128xf32, #tpu.memory_space<vmem>>, vector<1x128xf32>
    %c0_4 = arith.constant 0 : index
    %c0_5 = arith.constant 0 : index
    %2 = vector.load %arg3[%c0_4, %c0_5] : memref<1x128xf32, #tpu.memory_space<vmem>>, vector<1x128xf32>
    %3 = vector.extract_strided_slice %0 {offsets = [0, 0, 0], sizes = [8, 1, 128], strides = [1, 1, 1]} : vector<8x4x128xf32> to vector<8x1x128xf32>
    %4 = vector.shape_cast %3 : vector<8x1x128xf32> to vector<8x128xf32>
    %5 = vector.extract_strided_slice %0 {offsets = [0, 1, 0], sizes = [8, 1, 128], strides = [1, 1, 1]} : vector<8x4x128xf32> to vector<8x1x128xf32>
    %6 = vector.shape_cast %5 : vector<8x1x128xf32> to vector<8x128xf32>
    %7 = vector.extract_strided_slice %0 {offsets = [0, 2, 0], sizes = [8, 1, 128], strides = [1, 1, 1]} : vector<8x4x128xf32> to vector<8x1x128xf32>
    %8 = vector.shape_cast %7 : vector<8x1x128xf32> to vector<8x128xf32>
    %9 = vector.extract_strided_slice %0 {offsets = [0, 3, 0], sizes = [8, 1, 128], strides = [1, 1, 1]} : vector<8x4x128xf32> to vector<8x1x128xf32>
    %10 = vector.shape_cast %9 : vector<8x1x128xf32> to vector<8x128xf32>
    %11 = vector.broadcast %2 : vector<1x128xf32> to vector<8x128xf32>
    %12 = arith.mulf %4, %11 : vector<8x128xf32>
    %cst = arith.constant dense<0.000000e+00> : vector<8xf32>
    %13 = vector.multi_reduction <add>, %12, %cst [1] : vector<8x128xf32> to vector<8xf32>
    %14 = vector.shape_cast %13 : vector<8xf32> to vector<8x1xf32>
    %15 = vector.broadcast %1 : vector<1x128xf32> to vector<8x128xf32>
    %16 = arith.mulf %4, %15 : vector<8x128xf32>
    %cst_6 = arith.constant dense<0.000000e+00> : vector<8xf32>
    %17 = vector.multi_reduction <add>, %16, %cst_6 [1] : vector<8x128xf32> to vector<8xf32>
    %18 = vector.shape_cast %17 : vector<8xf32> to vector<8x1xf32>
    %19 = arith.addf %18, %14 : vector<8x1xf32>
    %cst_7 = arith.constant 0.000000e+00 : f32
    %20 = vector.broadcast %cst_7 : f32 to vector<8x1xf32>
    %21 = arith.cmpf ogt, %19, %20 : vector<8x1xf32>
    %cst_8 = arith.constant 2.000000e-01 : f32
    %22 = vector.broadcast %cst_8 : f32 to vector<8x1xf32>
    %23 = arith.mulf %22, %19 : vector<8x1xf32>
    %24 = arith.select %21, %19, %23 : vector<8x1xi1>, vector<8x1xf32>
    %25 = vector.broadcast %1 : vector<1x128xf32> to vector<8x128xf32>
    %26 = arith.mulf %6, %25 : vector<8x128xf32>
    %cst_9 = arith.constant dense<0.000000e+00> : vector<8xf32>
    %27 = vector.multi_reduction <add>, %26, %cst_9 [1] : vector<8x128xf32> to vector<8xf32>
    %28 = vector.shape_cast %27 : vector<8xf32> to vector<8x1xf32>
    %29 = arith.addf %28, %14 : vector<8x1xf32>
    %cst_10 = arith.constant 0.000000e+00 : f32
    %30 = vector.broadcast %cst_10 : f32 to vector<8x1xf32>
    %31 = arith.cmpf ogt, %29, %30 : vector<8x1xf32>
    %cst_11 = arith.constant 2.000000e-01 : f32
    %32 = vector.broadcast %cst_11 : f32 to vector<8x1xf32>
    %33 = arith.mulf %32, %29 : vector<8x1xf32>
    %34 = arith.select %31, %29, %33 : vector<8x1xi1>, vector<8x1xf32>
    %35 = vector.broadcast %1 : vector<1x128xf32> to vector<8x128xf32>
    %36 = arith.mulf %8, %35 : vector<8x128xf32>
    %cst_12 = arith.constant dense<0.000000e+00> : vector<8xf32>
    %37 = vector.multi_reduction <add>, %36, %cst_12 [1] : vector<8x128xf32> to vector<8xf32>
    %38 = vector.shape_cast %37 : vector<8xf32> to vector<8x1xf32>
    %39 = arith.addf %38, %14 : vector<8x1xf32>
    %cst_13 = arith.constant 0.000000e+00 : f32
    %40 = vector.broadcast %cst_13 : f32 to vector<8x1xf32>
    %41 = arith.cmpf ogt, %39, %40 : vector<8x1xf32>
    %cst_14 = arith.constant 2.000000e-01 : f32
    %42 = vector.broadcast %cst_14 : f32 to vector<8x1xf32>
    %43 = arith.mulf %42, %39 : vector<8x1xf32>
    %44 = arith.select %41, %39, %43 : vector<8x1xi1>, vector<8x1xf32>
    %45 = vector.broadcast %1 : vector<1x128xf32> to vector<8x128xf32>
    %46 = arith.mulf %10, %45 : vector<8x128xf32>
    %cst_15 = arith.constant dense<0.000000e+00> : vector<8xf32>
    %47 = vector.multi_reduction <add>, %46, %cst_15 [1] : vector<8x128xf32> to vector<8xf32>
    %48 = vector.shape_cast %47 : vector<8xf32> to vector<8x1xf32>
    %49 = arith.addf %48, %14 : vector<8x1xf32>
    %cst_16 = arith.constant 0.000000e+00 : f32
    %50 = vector.broadcast %cst_16 : f32 to vector<8x1xf32>
    %51 = arith.cmpf ogt, %49, %50 : vector<8x1xf32>
    %cst_17 = arith.constant 2.000000e-01 : f32
    %52 = vector.broadcast %cst_17 : f32 to vector<8x1xf32>
    %53 = arith.mulf %52, %49 : vector<8x1xf32>
    %54 = arith.select %51, %49, %53 : vector<8x1xi1>, vector<8x1xf32>
    %55 = arith.maximumf %24, %34 : vector<8x1xf32>
    %56 = arith.maximumf %55, %44 : vector<8x1xf32>
    %57 = arith.maximumf %56, %54 : vector<8x1xf32>
    %58 = arith.subf %24, %57 : vector<8x1xf32>
    %59 = math.exp %58 : vector<8x1xf32>
    %60 = arith.subf %34, %57 : vector<8x1xf32>
    %61 = math.exp %60 : vector<8x1xf32>
    %62 = arith.subf %44, %57 : vector<8x1xf32>
    %63 = math.exp %62 : vector<8x1xf32>
    %64 = arith.subf %54, %57 : vector<8x1xf32>
    %65 = math.exp %64 : vector<8x1xf32>
    %66 = arith.addf %59, %61 : vector<8x1xf32>
    %67 = arith.addf %66, %63 : vector<8x1xf32>
    %68 = arith.addf %67, %65 : vector<8x1xf32>
    %69 = tpu.reciprocal %68 {approx = true} : vector<8x1xf32> -> vector<8x1xf32>
    %cst_18 = arith.constant 0.000000e+00 : f32
    %70 = vector.broadcast %cst_18 : f32 to vector<8x128xf32>
    %71 = arith.mulf %59, %69 : vector<8x1xf32>
    %cst_19 = arith.constant 1.000000e-03 : f32
    %72 = vector.broadcast %cst_19 : f32 to vector<8x1xf32>
    %73 = arith.subf %71, %72 : vector<8x1xf32>
    %cst_20 = arith.constant 0.000000e+00 : f32
    %74 = vector.broadcast %cst_20 : f32 to vector<8x1xf32>
    %75 = arith.maximumf %73, %74 : vector<8x1xf32>
    %76 = vector.broadcast %75 : vector<8x1xf32> to vector<8x128xf32>
    %77 = arith.mulf %76, %4 : vector<8x128xf32>
    %78 = arith.addf %70, %77 : vector<8x128xf32>
    %79 = arith.mulf %61, %69 : vector<8x1xf32>
    %cst_21 = arith.constant 1.000000e-03 : f32
    %80 = vector.broadcast %cst_21 : f32 to vector<8x1xf32>
    %81 = arith.subf %79, %80 : vector<8x1xf32>
    %cst_22 = arith.constant 0.000000e+00 : f32
    %82 = vector.broadcast %cst_22 : f32 to vector<8x1xf32>
    %83 = arith.maximumf %81, %82 : vector<8x1xf32>
    %84 = vector.broadcast %83 : vector<8x1xf32> to vector<8x128xf32>
    %85 = arith.mulf %84, %6 : vector<8x128xf32>
    %86 = arith.addf %78, %85 : vector<8x128xf32>
    %87 = arith.mulf %63, %69 : vector<8x1xf32>
    %cst_23 = arith.constant 1.000000e-03 : f32
    %88 = vector.broadcast %cst_23 : f32 to vector<8x1xf32>
    %89 = arith.subf %87, %88 : vector<8x1xf32>
    %cst_24 = arith.constant 0.000000e+00 : f32
    %90 = vector.broadcast %cst_24 : f32 to vector<8x1xf32>
    %91 = arith.maximumf %89, %90 : vector<8x1xf32>
    %92 = vector.broadcast %91 : vector<8x1xf32> to vector<8x128xf32>
    %93 = arith.mulf %92, %8 : vector<8x128xf32>
    %94 = arith.addf %86, %93 : vector<8x128xf32>
    %95 = arith.mulf %65, %69 : vector<8x1xf32>
    %cst_25 = arith.constant 1.000000e-03 : f32
    %96 = vector.broadcast %cst_25 : f32 to vector<8x1xf32>
    %97 = arith.subf %95, %96 : vector<8x1xf32>
    %cst_26 = arith.constant 0.000000e+00 : f32
    %98 = vector.broadcast %cst_26 : f32 to vector<8x1xf32>
    %99 = arith.maximumf %97, %98 : vector<8x1xf32>
    %100 = vector.broadcast %99 : vector<8x1xf32> to vector<8x128xf32>
    %101 = arith.mulf %100, %10 : vector<8x128xf32>
    %102 = arith.addf %94, %101 : vector<8x128xf32>
    %c0_27 = arith.constant 0 : index
    %c0_28 = arith.constant 0 : index
    %103 = vector.load %arg4[%c0_27, %c0_28] : memref<8x128xf32, #tpu.memory_space<vmem>>, vector<8x128xf32>
    tpu.vector_store %arg4[%c0_27, %c0_28], %102 {strides = array<i32>} : memref<8x128xf32, #tpu.memory_space<vmem>>, vector<8x128xf32>,
    return
  }
  func.func @transform_0(%arg0: i32) -> (i32, i32, i32) {
    %c0_i32 = arith.constant 0 : i32
    %c0_i32_0 = arith.constant 0 : i32
    %c0_i32_1 = arith.constant 0 : i32
    return %arg0, %c0_i32, %c0_i32_0 : i32, i32, i32
  }
  func.func @transform_1(%arg0: i32) -> (i32, i32) {
    %c0_i32 = arith.constant 0 : i32
    %c0_i32_0 = arith.constant 0 : i32
    %c0_i32_1 = arith.constant 0 : i32
    return %c0_i32, %c0_i32_0 : i32, i32
  }
  func.func @transform_2(%arg0: i32) -> (i32, i32) {
    %c0_i32 = arith.constant 0 : i32
    %c0_i32_0 = arith.constant 0 : i32
    %c0_i32_1 = arith.constant 0 : i32
    return %c0_i32, %c0_i32_0 : i32, i32
  }
  func.func @transform_3(%arg0: i32) -> (i32, i32) {
    %c0_i32 = arith.constant 0 : i32
    %c0_i32_0 = arith.constant 0 : i32
    return %arg0, %c0_i32 : i32, i32
  }
}

module attributes {stable_mosaic.version = 11 : i64} {
  func.func @bilstm_kernel(%arg0: i32, %arg1: memref<48x128xf32, #tpu.memory_space<vmem>>, %arg2: memref<128x1024xf32, #tpu.memory_space<vmem>>, %arg3: memref<128x512xf32, #tpu.memory_space<vmem>>, %arg4: memref<128x512xf32, #tpu.memory_space<vmem>>, %arg5: memref<1x1024xf32, #tpu.memory_space<vmem>>, %arg6: memref<16x768xf32, #tpu.memory_space<vmem>>) attributes {dimension_semantics = [#tpu.dimension_semantics<parallel>], iteration_bounds = array<i64: 1>, scalar_prefetch = 0 : i64, scratch_operands = 0 : i64, tpu.core_type = #tpu.core_type<tc>, window_params = [{transform_indices = @transform_0, window_bounds = array<i64: 48, 128>}, {pipeline_mode = #tpu.pipeline_mode<synchronous>, transform_indices = @transform_1, window_bounds = array<i64: 128, 1024>}, {pipeline_mode = #tpu.pipeline_mode<synchronous>, transform_indices = @transform_2, window_bounds = array<i64: 128, 512>}, {pipeline_mode = #tpu.pipeline_mode<synchronous>, transform_indices = @transform_3, window_bounds = array<i64: 128, 512>}, {pipeline_mode = #tpu.pipeline_mode<synchronous>, transform_indices = @transform_4, window_bounds = array<i64: 1, 1024>}, {transform_indices = @transform_5, window_bounds = array<i64: 16, 768>}]} {
    %c0 = arith.constant 0 : index
    %c0_0 = arith.constant 0 : index
    %0 = vector.load %arg1[%c0, %c0_0] : memref<48x128xf32, #tpu.memory_space<vmem>>, vector<48x128xf32>
    %c0_1 = arith.constant 0 : index
    %c0_2 = arith.constant 0 : index
    %1 = vector.load %arg2[%c0_1, %c0_2] : memref<128x1024xf32, #tpu.memory_space<vmem>>, vector<128x1024xf32>
    %cst = arith.constant dense<0.000000e+00> : vector<48x1024xf32>
    %2 = tpu.matmul %0, %1, %cst {dimension_numbers = #tpu.dot_dimension_numbers<[1], [0], [0], [1], [0, 0, 1, 1], [], []>} : vector<48x128xf32>, vector<128x1024xf32>, vector<48x1024xf32> -> vector<48x1024xf32>
    %c0_3 = arith.constant 0 : index
    %c0_4 = arith.constant 0 : index
    %3 = vector.load %arg5[%c0_3, %c0_4] : memref<1x1024xf32, #tpu.memory_space<vmem>>, vector<1x1024xf32>
    %4 = vector.broadcast %3 : vector<1x1024xf32> to vector<48x1024xf32>
    %5 = arith.addf %2, %4 : vector<48x1024xf32>
    %c0_5 = arith.constant 0 : index
    %c0_6 = arith.constant 0 : index
    %6 = vector.load %arg3[%c0_5, %c0_6] : memref<128x512xf32, #tpu.memory_space<vmem>>, vector<128x512xf32>
    %c0_7 = arith.constant 0 : index
    %c0_8 = arith.constant 0 : index
    %7 = vector.load %arg4[%c0_7, %c0_8] : memref<128x512xf32, #tpu.memory_space<vmem>>, vector<128x512xf32>
    %cst_9 = arith.constant 0.000000e+00 : f32
    %8 = vector.broadcast %cst_9 : f32 to vector<16x128xf32>
    %cst_10 = arith.constant 0.000000e+00 : f32
    %9 = vector.broadcast %cst_10 : f32 to vector<16x128xf32>
    %10 = vector.extract_strided_slice %5 {offsets = [0, 0], sizes = [16, 512], strides = [1, 1]} : vector<48x1024xf32> to vector<16x512xf32>
    %cst_11 = arith.constant dense<0.000000e+00> : vector<16x512xf32>
    %11 = tpu.matmul %8, %6, %cst_11 {dimension_numbers = #tpu.dot_dimension_numbers<[1], [0], [0], [1], [0, 0, 1, 1], [], []>} : vector<16x128xf32>, vector<128x512xf32>, vector<16x512xf32> -> vector<16x512xf32>
    %12 = arith.addf %10, %11 : vector<16x512xf32>
    %13 = vector.extract_strided_slice %12 {offsets = [0, 0], sizes = [16, 128], strides = [1, 1]} : vector<16x512xf32> to vector<16x128xf32>
    %14 = arith.negf %13 : vector<16x128xf32>
    %15 = math.exp %14 : vector<16x128xf32>
    %cst_12 = arith.constant 1.000000e+00 : f32
    %16 = vector.broadcast %cst_12 : f32 to vector<16x128xf32>
    %17 = arith.addf %16, %15 : vector<16x128xf32>
    %18 = arith.divf %16, %17 : vector<16x128xf32>
    %19 = vector.extract_strided_slice %12 {offsets = [0, 128], sizes = [16, 128], strides = [1, 1]} : vector<16x512xf32> to vector<16x128xf32>
    %20 = arith.negf %19 : vector<16x128xf32>
    %21 = math.exp %20 : vector<16x128xf32>
    %cst_13 = arith.constant 1.000000e+00 : f32
    %22 = vector.broadcast %cst_13 : f32 to vector<16x128xf32>
    %23 = arith.addf %22, %21 : vector<16x128xf32>
    %24 = arith.divf %22, %23 : vector<16x128xf32>
    %25 = vector.extract_strided_slice %12 {offsets = [0, 256], sizes = [16, 128], strides = [1, 1]} : vector<16x512xf32> to vector<16x128xf32>
    %26 = math.tanh %25 : vector<16x128xf32>
    %27 = vector.extract_strided_slice %12 {offsets = [0, 384], sizes = [16, 128], strides = [1, 1]} : vector<16x512xf32> to vector<16x128xf32>
    %28 = arith.negf %27 : vector<16x128xf32>
    %29 = math.exp %28 : vector<16x128xf32>
    %cst_14 = arith.constant 1.000000e+00 : f32
    %30 = vector.broadcast %cst_14 : f32 to vector<16x128xf32>
    %31 = arith.addf %30, %29 : vector<16x128xf32>
    %32 = arith.divf %30, %31 : vector<16x128xf32>
    %33 = arith.mulf %24, %9 : vector<16x128xf32>
    %34 = arith.mulf %18, %26 : vector<16x128xf32>
    %35 = arith.addf %33, %34 : vector<16x128xf32>
    %36 = math.tanh %35 : vector<16x128xf32>
    %37 = arith.mulf %32, %36 : vector<16x128xf32>
    %38 = vector.extract_strided_slice %5 {offsets = [16, 0], sizes = [16, 512], strides = [1, 1]} : vector<48x1024xf32> to vector<16x512xf32>
    %cst_15 = arith.constant dense<0.000000e+00> : vector<16x512xf32>
    %39 = tpu.matmul %37, %6, %cst_15 {dimension_numbers = #tpu.dot_dimension_numbers<[1], [0], [0], [1], [0, 0, 1, 1], [], []>} : vector<16x128xf32>, vector<128x512xf32>, vector<16x512xf32> -> vector<16x512xf32>
    %40 = arith.addf %38, %39 : vector<16x512xf32>
    %41 = vector.extract_strided_slice %40 {offsets = [0, 0], sizes = [16, 128], strides = [1, 1]} : vector<16x512xf32> to vector<16x128xf32>
    %42 = arith.negf %41 : vector<16x128xf32>
    %43 = math.exp %42 : vector<16x128xf32>
    %cst_16 = arith.constant 1.000000e+00 : f32
    %44 = vector.broadcast %cst_16 : f32 to vector<16x128xf32>
    %45 = arith.addf %44, %43 : vector<16x128xf32>
    %46 = arith.divf %44, %45 : vector<16x128xf32>
    %47 = vector.extract_strided_slice %40 {offsets = [0, 128], sizes = [16, 128], strides = [1, 1]} : vector<16x512xf32> to vector<16x128xf32>
    %48 = arith.negf %47 : vector<16x128xf32>
    %49 = math.exp %48 : vector<16x128xf32>
    %cst_17 = arith.constant 1.000000e+00 : f32
    %50 = vector.broadcast %cst_17 : f32 to vector<16x128xf32>
    %51 = arith.addf %50, %49 : vector<16x128xf32>
    %52 = arith.divf %50, %51 : vector<16x128xf32>
    %53 = vector.extract_strided_slice %40 {offsets = [0, 256], sizes = [16, 128], strides = [1, 1]} : vector<16x512xf32> to vector<16x128xf32>
    %54 = math.tanh %53 : vector<16x128xf32>
    %55 = vector.extract_strided_slice %40 {offsets = [0, 384], sizes = [16, 128], strides = [1, 1]} : vector<16x512xf32> to vector<16x128xf32>
    %56 = arith.negf %55 : vector<16x128xf32>
    %57 = math.exp %56 : vector<16x128xf32>
    %cst_18 = arith.constant 1.000000e+00 : f32
    %58 = vector.broadcast %cst_18 : f32 to vector<16x128xf32>
    %59 = arith.addf %58, %57 : vector<16x128xf32>
    %60 = arith.divf %58, %59 : vector<16x128xf32>
    %61 = arith.mulf %52, %35 : vector<16x128xf32>
    %62 = arith.mulf %46, %54 : vector<16x128xf32>
    %63 = arith.addf %61, %62 : vector<16x128xf32>
    %64 = math.tanh %63 : vector<16x128xf32>
    %65 = arith.mulf %60, %64 : vector<16x128xf32>
    %66 = vector.extract_strided_slice %5 {offsets = [32, 0], sizes = [16, 512], strides = [1, 1]} : vector<48x1024xf32> to vector<16x512xf32>
    %cst_19 = arith.constant dense<0.000000e+00> : vector<16x512xf32>
    %67 = tpu.matmul %65, %6, %cst_19 {dimension_numbers = #tpu.dot_dimension_numbers<[1], [0], [0], [1], [0, 0, 1, 1], [], []>} : vector<16x128xf32>, vector<128x512xf32>, vector<16x512xf32> -> vector<16x512xf32>
    %68 = arith.addf %66, %67 : vector<16x512xf32>
    %69 = vector.extract_strided_slice %68 {offsets = [0, 0], sizes = [16, 128], strides = [1, 1]} : vector<16x512xf32> to vector<16x128xf32>
    %70 = arith.negf %69 : vector<16x128xf32>
    %71 = math.exp %70 : vector<16x128xf32>
    %cst_20 = arith.constant 1.000000e+00 : f32
    %72 = vector.broadcast %cst_20 : f32 to vector<16x128xf32>
    %73 = arith.addf %72, %71 : vector<16x128xf32>
    %74 = arith.divf %72, %73 : vector<16x128xf32>
    %75 = vector.extract_strided_slice %68 {offsets = [0, 128], sizes = [16, 128], strides = [1, 1]} : vector<16x512xf32> to vector<16x128xf32>
    %76 = arith.negf %75 : vector<16x128xf32>
    %77 = math.exp %76 : vector<16x128xf32>
    %cst_21 = arith.constant 1.000000e+00 : f32
    %78 = vector.broadcast %cst_21 : f32 to vector<16x128xf32>
    %79 = arith.addf %78, %77 : vector<16x128xf32>
    %80 = arith.divf %78, %79 : vector<16x128xf32>
    %81 = vector.extract_strided_slice %68 {offsets = [0, 256], sizes = [16, 128], strides = [1, 1]} : vector<16x512xf32> to vector<16x128xf32>
    %82 = math.tanh %81 : vector<16x128xf32>
    %83 = vector.extract_strided_slice %68 {offsets = [0, 384], sizes = [16, 128], strides = [1, 1]} : vector<16x512xf32> to vector<16x128xf32>
    %84 = arith.negf %83 : vector<16x128xf32>
    %85 = math.exp %84 : vector<16x128xf32>
    %cst_22 = arith.constant 1.000000e+00 : f32
    %86 = vector.broadcast %cst_22 : f32 to vector<16x128xf32>
    %87 = arith.addf %86, %85 : vector<16x128xf32>
    %88 = arith.divf %86, %87 : vector<16x128xf32>
    %89 = arith.mulf %80, %63 : vector<16x128xf32>
    %90 = arith.mulf %74, %82 : vector<16x128xf32>
    %91 = arith.addf %89, %90 : vector<16x128xf32>
    %92 = math.tanh %91 : vector<16x128xf32>
    %93 = arith.mulf %88, %92 : vector<16x128xf32>
    %cst_23 = arith.constant 0.000000e+00 : f32
    %94 = vector.broadcast %cst_23 : f32 to vector<16x128xf32>
    %cst_24 = arith.constant 0.000000e+00 : f32
    %95 = vector.broadcast %cst_24 : f32 to vector<16x128xf32>
    %96 = vector.extract_strided_slice %5 {offsets = [32, 512], sizes = [16, 512], strides = [1, 1]} : vector<48x1024xf32> to vector<16x512xf32>
    %cst_25 = arith.constant dense<0.000000e+00> : vector<16x512xf32>
    %97 = tpu.matmul %94, %7, %cst_25 {dimension_numbers = #tpu.dot_dimension_numbers<[1], [0], [0], [1], [0, 0, 1, 1], [], []>} : vector<16x128xf32>, vector<128x512xf32>, vector<16x512xf32> -> vector<16x512xf32>
    %98 = arith.addf %96, %97 : vector<16x512xf32>
    %99 = vector.extract_strided_slice %98 {offsets = [0, 0], sizes = [16, 128], strides = [1, 1]} : vector<16x512xf32> to vector<16x128xf32>
    %100 = arith.negf %99 : vector<16x128xf32>
    %101 = math.exp %100 : vector<16x128xf32>
    %cst_26 = arith.constant 1.000000e+00 : f32
    %102 = vector.broadcast %cst_26 : f32 to vector<16x128xf32>
    %103 = arith.addf %102, %101 : vector<16x128xf32>
    %104 = arith.divf %102, %103 : vector<16x128xf32>
    %105 = vector.extract_strided_slice %98 {offsets = [0, 128], sizes = [16, 128], strides = [1, 1]} : vector<16x512xf32> to vector<16x128xf32>
    %106 = arith.negf %105 : vector<16x128xf32>
    %107 = math.exp %106 : vector<16x128xf32>
    %cst_27 = arith.constant 1.000000e+00 : f32
    %108 = vector.broadcast %cst_27 : f32 to vector<16x128xf32>
    %109 = arith.addf %108, %107 : vector<16x128xf32>
    %110 = arith.divf %108, %109 : vector<16x128xf32>
    %111 = vector.extract_strided_slice %98 {offsets = [0, 256], sizes = [16, 128], strides = [1, 1]} : vector<16x512xf32> to vector<16x128xf32>
    %112 = math.tanh %111 : vector<16x128xf32>
    %113 = vector.extract_strided_slice %98 {offsets = [0, 384], sizes = [16, 128], strides = [1, 1]} : vector<16x512xf32> to vector<16x128xf32>
    %114 = arith.negf %113 : vector<16x128xf32>
    %115 = math.exp %114 : vector<16x128xf32>
    %cst_28 = arith.constant 1.000000e+00 : f32
    %116 = vector.broadcast %cst_28 : f32 to vector<16x128xf32>
    %117 = arith.addf %116, %115 : vector<16x128xf32>
    %118 = arith.divf %116, %117 : vector<16x128xf32>
    %119 = arith.mulf %110, %95 : vector<16x128xf32>
    %120 = arith.mulf %104, %112 : vector<16x128xf32>
    %121 = arith.addf %119, %120 : vector<16x128xf32>
    %122 = math.tanh %121 : vector<16x128xf32>
    %123 = arith.mulf %118, %122 : vector<16x128xf32>
    %124 = vector.extract_strided_slice %5 {offsets = [16, 512], sizes = [16, 512], strides = [1, 1]} : vector<48x1024xf32> to vector<16x512xf32>
    %cst_29 = arith.constant dense<0.000000e+00> : vector<16x512xf32>
    %125 = tpu.matmul %123, %7, %cst_29 {dimension_numbers = #tpu.dot_dimension_numbers<[1], [0], [0], [1], [0, 0, 1, 1], [], []>} : vector<16x128xf32>, vector<128x512xf32>, vector<16x512xf32> -> vector<16x512xf32>
    %126 = arith.addf %124, %125 : vector<16x512xf32>
    %127 = vector.extract_strided_slice %126 {offsets = [0, 0], sizes = [16, 128], strides = [1, 1]} : vector<16x512xf32> to vector<16x128xf32>
    %128 = arith.negf %127 : vector<16x128xf32>
    %129 = math.exp %128 : vector<16x128xf32>
    %cst_30 = arith.constant 1.000000e+00 : f32
    %130 = vector.broadcast %cst_30 : f32 to vector<16x128xf32>
    %131 = arith.addf %130, %129 : vector<16x128xf32>
    %132 = arith.divf %130, %131 : vector<16x128xf32>
    %133 = vector.extract_strided_slice %126 {offsets = [0, 128], sizes = [16, 128], strides = [1, 1]} : vector<16x512xf32> to vector<16x128xf32>
    %134 = arith.negf %133 : vector<16x128xf32>
    %135 = math.exp %134 : vector<16x128xf32>
    %cst_31 = arith.constant 1.000000e+00 : f32
    %136 = vector.broadcast %cst_31 : f32 to vector<16x128xf32>
    %137 = arith.addf %136, %135 : vector<16x128xf32>
    %138 = arith.divf %136, %137 : vector<16x128xf32>
    %139 = vector.extract_strided_slice %126 {offsets = [0, 256], sizes = [16, 128], strides = [1, 1]} : vector<16x512xf32> to vector<16x128xf32>
    %140 = math.tanh %139 : vector<16x128xf32>
    %141 = vector.extract_strided_slice %126 {offsets = [0, 384], sizes = [16, 128], strides = [1, 1]} : vector<16x512xf32> to vector<16x128xf32>
    %142 = arith.negf %141 : vector<16x128xf32>
    %143 = math.exp %142 : vector<16x128xf32>
    %cst_32 = arith.constant 1.000000e+00 : f32
    %144 = vector.broadcast %cst_32 : f32 to vector<16x128xf32>
    %145 = arith.addf %144, %143 : vector<16x128xf32>
    %146 = arith.divf %144, %145 : vector<16x128xf32>
    %147 = arith.mulf %138, %121 : vector<16x128xf32>
    %148 = arith.mulf %132, %140 : vector<16x128xf32>
    %149 = arith.addf %147, %148 : vector<16x128xf32>
    %150 = math.tanh %149 : vector<16x128xf32>
    %151 = arith.mulf %146, %150 : vector<16x128xf32>
    %152 = vector.extract_strided_slice %5 {offsets = [0, 512], sizes = [16, 512], strides = [1, 1]} : vector<48x1024xf32> to vector<16x512xf32>
    %cst_33 = arith.constant dense<0.000000e+00> : vector<16x512xf32>
    %153 = tpu.matmul %151, %7, %cst_33 {dimension_numbers = #tpu.dot_dimension_numbers<[1], [0], [0], [1], [0, 0, 1, 1], [], []>} : vector<16x128xf32>, vector<128x512xf32>, vector<16x512xf32> -> vector<16x512xf32>
    %154 = arith.addf %152, %153 : vector<16x512xf32>
    %155 = vector.extract_strided_slice %154 {offsets = [0, 0], sizes = [16, 128], strides = [1, 1]} : vector<16x512xf32> to vector<16x128xf32>
    %156 = arith.negf %155 : vector<16x128xf32>
    %157 = math.exp %156 : vector<16x128xf32>
    %cst_34 = arith.constant 1.000000e+00 : f32
    %158 = vector.broadcast %cst_34 : f32 to vector<16x128xf32>
    %159 = arith.addf %158, %157 : vector<16x128xf32>
    %160 = arith.divf %158, %159 : vector<16x128xf32>
    %161 = vector.extract_strided_slice %154 {offsets = [0, 128], sizes = [16, 128], strides = [1, 1]} : vector<16x512xf32> to vector<16x128xf32>
    %162 = arith.negf %161 : vector<16x128xf32>
    %163 = math.exp %162 : vector<16x128xf32>
    %cst_35 = arith.constant 1.000000e+00 : f32
    %164 = vector.broadcast %cst_35 : f32 to vector<16x128xf32>
    %165 = arith.addf %164, %163 : vector<16x128xf32>
    %166 = arith.divf %164, %165 : vector<16x128xf32>
    %167 = vector.extract_strided_slice %154 {offsets = [0, 256], sizes = [16, 128], strides = [1, 1]} : vector<16x512xf32> to vector<16x128xf32>
    %168 = math.tanh %167 : vector<16x128xf32>
    %169 = vector.extract_strided_slice %154 {offsets = [0, 384], sizes = [16, 128], strides = [1, 1]} : vector<16x512xf32> to vector<16x128xf32>
    %170 = arith.negf %169 : vector<16x128xf32>
    %171 = math.exp %170 : vector<16x128xf32>
    %cst_36 = arith.constant 1.000000e+00 : f32
    %172 = vector.broadcast %cst_36 : f32 to vector<16x128xf32>
    %173 = arith.addf %172, %171 : vector<16x128xf32>
    %174 = arith.divf %172, %173 : vector<16x128xf32>
    %175 = arith.mulf %166, %149 : vector<16x128xf32>
    %176 = arith.mulf %160, %168 : vector<16x128xf32>
    %177 = arith.addf %175, %176 : vector<16x128xf32>
    %178 = math.tanh %177 : vector<16x128xf32>
    %179 = arith.mulf %174, %178 : vector<16x128xf32>
    %180 = tpu.concatenate %37, %179, %65, %151, %93, %123 in 1 : vector<16x128xf32>, vector<16x128xf32>, vector<16x128xf32>, vector<16x128xf32>, vector<16x128xf32>, vector<16x128xf32> -> vector<16x768xf32>
    %c0_37 = arith.constant 0 : index
    %c0_38 = arith.constant 0 : index
    %181 = vector.load %arg6[%c0_37, %c0_38] : memref<16x768xf32, #tpu.memory_space<vmem>>, vector<16x768xf32>
    tpu.vector_store %arg6[%c0_37, %c0_38], %180 {strides = array<i32>} : memref<16x768xf32, #tpu.memory_space<vmem>>, vector<16x768xf32>,
    return
  }
  func.func @transform_0(%arg0: i32) -> (i32, i32) {
    %c0_i32 = arith.constant 0 : i32
    %c0_i32_0 = arith.constant 0 : i32
    return %arg0, %c0_i32 : i32, i32
  }
  func.func @transform_1(%arg0: i32) -> (i32, i32) {
    %c0_i32 = arith.constant 0 : i32
    %c0_i32_0 = arith.constant 0 : i32
    %c0_i32_1 = arith.constant 0 : i32
    return %c0_i32, %c0_i32_0 : i32, i32
  }
  func.func @transform_2(%arg0: i32) -> (i32, i32) {
    %c0_i32 = arith.constant 0 : i32
    %c0_i32_0 = arith.constant 0 : i32
    %c0_i32_1 = arith.constant 0 : i32
    return %c0_i32, %c0_i32_0 : i32, i32
  }
  func.func @transform_3(%arg0: i32) -> (i32, i32) {
    %c0_i32 = arith.constant 0 : i32
    %c0_i32_0 = arith.constant 0 : i32
    %c0_i32_1 = arith.constant 0 : i32
    return %c0_i32, %c0_i32_0 : i32, i32
  }
  func.func @transform_4(%arg0: i32) -> (i32, i32) {
    %c0_i32 = arith.constant 0 : i32
    %c0_i32_0 = arith.constant 0 : i32
    %c0_i32_1 = arith.constant 0 : i32
    return %c0_i32, %c0_i32_0 : i32, i32
  }
  func.func @transform_5(%arg0: i32) -> (i32, i32) {
    %c0_i32 = arith.constant 0 : i32
    %c0_i32_0 = arith.constant 0 : i32
    return %arg0, %c0_i32 : i32, i32
  }
}

module attributes {stable_mosaic.version = 11 : i64} {
  func.func @matmul_kernel(%arg0: i32, %arg1: memref<32x256xf32, #tpu.memory_space<vmem>>, %arg2: memref<256x256xf32, #tpu.memory_space<vmem>>, %arg3: memref<32x256xf32, #tpu.memory_space<vmem>>) attributes {dimension_semantics = [#tpu.dimension_semantics<parallel>], iteration_bounds = array<i64: 1>, scalar_prefetch = 0 : i64, scratch_operands = 0 : i64, tpu.core_type = #tpu.core_type<tc>, window_params = [{transform_indices = @transform_0, window_bounds = array<i64: 32, 256>}, {pipeline_mode = #tpu.pipeline_mode<synchronous>, transform_indices = @transform_1, window_bounds = array<i64: 256, 256>}, {transform_indices = @transform_2, window_bounds = array<i64: 32, 256>}]} {
    %c0 = arith.constant 0 : index
    %c0_0 = arith.constant 0 : index
    %0 = vector.load %arg1[%c0, %c0_0] : memref<32x256xf32, #tpu.memory_space<vmem>>, vector<32x256xf32>
    %c0_1 = arith.constant 0 : index
    %c0_2 = arith.constant 0 : index
    %1 = vector.load %arg2[%c0_1, %c0_2] : memref<256x256xf32, #tpu.memory_space<vmem>>, vector<256x256xf32>
    %cst = arith.constant dense<0.000000e+00> : vector<32x256xf32>
    %2 = tpu.matmul %0, %1, %cst {dimension_numbers = #tpu.dot_dimension_numbers<[1], [0], [0], [1], [0, 0, 1, 1], [], []>} : vector<32x256xf32>, vector<256x256xf32>, vector<32x256xf32> -> vector<32x256xf32>
    %c0_3 = arith.constant 0 : index
    %c0_4 = arith.constant 0 : index
    %3 = vector.load %arg3[%c0_3, %c0_4] : memref<32x256xf32, #tpu.memory_space<vmem>>, vector<32x256xf32>
    tpu.vector_store %arg3[%c0_3, %c0_4], %2 {strides = array<i32>} : memref<32x256xf32, #tpu.memory_space<vmem>>, vector<32x256xf32>,
    return
  }
  func.func @transform_0(%arg0: i32) -> (i32, i32) {
    %c0_i32 = arith.constant 0 : i32
    %c0_i32_0 = arith.constant 0 : i32
    return %arg0, %c0_i32 : i32, i32
  }
  func.func @transform_1(%arg0: i32) -> (i32, i32) {
    %c0_i32 = arith.constant 0 : i32
    %c0_i32_0 = arith.constant 0 : i32
    %c0_i32_1 = arith.constant 0 : i32
    return %c0_i32, %c0_i32_0 : i32, i32
  }
  func.func @transform_2(%arg0: i32) -> (i32, i32) {
    %c0_i32 = arith.constant 0 : i32
    %c0_i32_0 = arith.constant 0 : i32
    return %arg0, %c0_i32 : i32, i32
  }
}

module attributes {stable_mosaic.version = 11 : i64} {
  func.func @gat_attention_kernel(%arg0: i32, %arg1: memref<8x4x256xf32, #tpu.memory_space<vmem>>, %arg2: memref<1x256xf32, #tpu.memory_space<vmem>>, %arg3: memref<1x256xf32, #tpu.memory_space<vmem>>, %arg4: memref<8x256xf32, #tpu.memory_space<vmem>>) attributes {dimension_semantics = [#tpu.dimension_semantics<parallel>], iteration_bounds = array<i64: 1>, scalar_prefetch = 0 : i64, scratch_operands = 0 : i64, tpu.core_type = #tpu.core_type<tc>, window_params = [{transform_indices = @transform_0, window_bounds = array<i64: 8, 4, 256>}, {pipeline_mode = #tpu.pipeline_mode<synchronous>, transform_indices = @transform_1, window_bounds = array<i64: 1, 256>}, {pipeline_mode = #tpu.pipeline_mode<synchronous>, transform_indices = @transform_2, window_bounds = array<i64: 1, 256>}, {transform_indices = @transform_3, window_bounds = array<i64: 8, 256>}]} {
    %c0 = arith.constant 0 : index
    %c0_0 = arith.constant 0 : index
    %c0_1 = arith.constant 0 : index
    %0 = vector.load %arg1[%c0, %c0_0, %c0_1] : memref<8x4x256xf32, #tpu.memory_space<vmem>>, vector<8x4x256xf32>
    %c0_2 = arith.constant 0 : index
    %c0_3 = arith.constant 0 : index
    %1 = vector.load %arg2[%c0_2, %c0_3] : memref<1x256xf32, #tpu.memory_space<vmem>>, vector<1x256xf32>
    %c0_4 = arith.constant 0 : index
    %c0_5 = arith.constant 0 : index
    %2 = vector.load %arg3[%c0_4, %c0_5] : memref<1x256xf32, #tpu.memory_space<vmem>>, vector<1x256xf32>
    %3 = vector.extract_strided_slice %0 {offsets = [0, 0, 0], sizes = [8, 1, 256], strides = [1, 1, 1]} : vector<8x4x256xf32> to vector<8x1x256xf32>
    %4 = vector.shape_cast %3 : vector<8x1x256xf32> to vector<8x256xf32>
    %5 = vector.extract_strided_slice %0 {offsets = [0, 1, 0], sizes = [8, 1, 256], strides = [1, 1, 1]} : vector<8x4x256xf32> to vector<8x1x256xf32>
    %6 = vector.shape_cast %5 : vector<8x1x256xf32> to vector<8x256xf32>
    %7 = vector.extract_strided_slice %0 {offsets = [0, 2, 0], sizes = [8, 1, 256], strides = [1, 1, 1]} : vector<8x4x256xf32> to vector<8x1x256xf32>
    %8 = vector.shape_cast %7 : vector<8x1x256xf32> to vector<8x256xf32>
    %9 = vector.extract_strided_slice %0 {offsets = [0, 3, 0], sizes = [8, 1, 256], strides = [1, 1, 1]} : vector<8x4x256xf32> to vector<8x1x256xf32>
    %10 = vector.shape_cast %9 : vector<8x1x256xf32> to vector<8x256xf32>
    %11 = vector.broadcast %2 : vector<1x256xf32> to vector<8x256xf32>
    %12 = arith.mulf %4, %11 : vector<8x256xf32>
    %cst = arith.constant dense<0.000000e+00> : vector<8xf32>
    %13 = vector.multi_reduction <add>, %12, %cst [1] : vector<8x256xf32> to vector<8xf32>
    %14 = vector.shape_cast %13 : vector<8xf32> to vector<8x1xf32>
    %15 = vector.broadcast %1 : vector<1x256xf32> to vector<8x256xf32>
    %16 = arith.mulf %4, %15 : vector<8x256xf32>
    %cst_6 = arith.constant dense<0.000000e+00> : vector<8xf32>
    %17 = vector.multi_reduction <add>, %16, %cst_6 [1] : vector<8x256xf32> to vector<8xf32>
    %18 = vector.shape_cast %17 : vector<8xf32> to vector<8x1xf32>
    %19 = arith.addf %18, %14 : vector<8x1xf32>
    %cst_7 = arith.constant 0.000000e+00 : f32
    %20 = vector.broadcast %cst_7 : f32 to vector<8x1xf32>
    %21 = arith.cmpf ogt, %19, %20 : vector<8x1xf32>
    %cst_8 = arith.constant 2.000000e-01 : f32
    %22 = vector.broadcast %cst_8 : f32 to vector<8x1xf32>
    %23 = arith.mulf %22, %19 : vector<8x1xf32>
    %24 = arith.select %21, %19, %23 : vector<8x1xi1>, vector<8x1xf32>
    %25 = vector.broadcast %1 : vector<1x256xf32> to vector<8x256xf32>
    %26 = arith.mulf %6, %25 : vector<8x256xf32>
    %cst_9 = arith.constant dense<0.000000e+00> : vector<8xf32>
    %27 = vector.multi_reduction <add>, %26, %cst_9 [1] : vector<8x256xf32> to vector<8xf32>
    %28 = vector.shape_cast %27 : vector<8xf32> to vector<8x1xf32>
    %29 = arith.addf %28, %14 : vector<8x1xf32>
    %cst_10 = arith.constant 0.000000e+00 : f32
    %30 = vector.broadcast %cst_10 : f32 to vector<8x1xf32>
    %31 = arith.cmpf ogt, %29, %30 : vector<8x1xf32>
    %cst_11 = arith.constant 2.000000e-01 : f32
    %32 = vector.broadcast %cst_11 : f32 to vector<8x1xf32>
    %33 = arith.mulf %32, %29 : vector<8x1xf32>
    %34 = arith.select %31, %29, %33 : vector<8x1xi1>, vector<8x1xf32>
    %35 = vector.broadcast %1 : vector<1x256xf32> to vector<8x256xf32>
    %36 = arith.mulf %8, %35 : vector<8x256xf32>
    %cst_12 = arith.constant dense<0.000000e+00> : vector<8xf32>
    %37 = vector.multi_reduction <add>, %36, %cst_12 [1] : vector<8x256xf32> to vector<8xf32>
    %38 = vector.shape_cast %37 : vector<8xf32> to vector<8x1xf32>
    %39 = arith.addf %38, %14 : vector<8x1xf32>
    %cst_13 = arith.constant 0.000000e+00 : f32
    %40 = vector.broadcast %cst_13 : f32 to vector<8x1xf32>
    %41 = arith.cmpf ogt, %39, %40 : vector<8x1xf32>
    %cst_14 = arith.constant 2.000000e-01 : f32
    %42 = vector.broadcast %cst_14 : f32 to vector<8x1xf32>
    %43 = arith.mulf %42, %39 : vector<8x1xf32>
    %44 = arith.select %41, %39, %43 : vector<8x1xi1>, vector<8x1xf32>
    %45 = vector.broadcast %1 : vector<1x256xf32> to vector<8x256xf32>
    %46 = arith.mulf %10, %45 : vector<8x256xf32>
    %cst_15 = arith.constant dense<0.000000e+00> : vector<8xf32>
    %47 = vector.multi_reduction <add>, %46, %cst_15 [1] : vector<8x256xf32> to vector<8xf32>
    %48 = vector.shape_cast %47 : vector<8xf32> to vector<8x1xf32>
    %49 = arith.addf %48, %14 : vector<8x1xf32>
    %cst_16 = arith.constant 0.000000e+00 : f32
    %50 = vector.broadcast %cst_16 : f32 to vector<8x1xf32>
    %51 = arith.cmpf ogt, %49, %50 : vector<8x1xf32>
    %cst_17 = arith.constant 2.000000e-01 : f32
    %52 = vector.broadcast %cst_17 : f32 to vector<8x1xf32>
    %53 = arith.mulf %52, %49 : vector<8x1xf32>
    %54 = arith.select %51, %49, %53 : vector<8x1xi1>, vector<8x1xf32>
    %55 = arith.maximumf %24, %34 : vector<8x1xf32>
    %56 = arith.maximumf %55, %44 : vector<8x1xf32>
    %57 = arith.maximumf %56, %54 : vector<8x1xf32>
    %58 = arith.subf %24, %57 : vector<8x1xf32>
    %59 = math.exp %58 : vector<8x1xf32>
    %60 = arith.subf %34, %57 : vector<8x1xf32>
    %61 = math.exp %60 : vector<8x1xf32>
    %62 = arith.subf %44, %57 : vector<8x1xf32>
    %63 = math.exp %62 : vector<8x1xf32>
    %64 = arith.subf %54, %57 : vector<8x1xf32>
    %65 = math.exp %64 : vector<8x1xf32>
    %66 = arith.addf %59, %61 : vector<8x1xf32>
    %67 = arith.addf %66, %63 : vector<8x1xf32>
    %68 = arith.addf %67, %65 : vector<8x1xf32>
    %69 = tpu.reciprocal %68 {approx = true} : vector<8x1xf32> -> vector<8x1xf32>
    %cst_18 = arith.constant 0.000000e+00 : f32
    %70 = vector.broadcast %cst_18 : f32 to vector<8x256xf32>
    %71 = arith.mulf %59, %69 : vector<8x1xf32>
    %cst_19 = arith.constant 1.000000e-03 : f32
    %72 = vector.broadcast %cst_19 : f32 to vector<8x1xf32>
    %73 = arith.subf %71, %72 : vector<8x1xf32>
    %cst_20 = arith.constant 0.000000e+00 : f32
    %74 = vector.broadcast %cst_20 : f32 to vector<8x1xf32>
    %75 = arith.maximumf %73, %74 : vector<8x1xf32>
    %76 = vector.broadcast %75 : vector<8x1xf32> to vector<8x256xf32>
    %77 = arith.mulf %76, %4 : vector<8x256xf32>
    %78 = arith.addf %70, %77 : vector<8x256xf32>
    %79 = arith.mulf %61, %69 : vector<8x1xf32>
    %cst_21 = arith.constant 1.000000e-03 : f32
    %80 = vector.broadcast %cst_21 : f32 to vector<8x1xf32>
    %81 = arith.subf %79, %80 : vector<8x1xf32>
    %cst_22 = arith.constant 0.000000e+00 : f32
    %82 = vector.broadcast %cst_22 : f32 to vector<8x1xf32>
    %83 = arith.maximumf %81, %82 : vector<8x1xf32>
    %84 = vector.broadcast %83 : vector<8x1xf32> to vector<8x256xf32>
    %85 = arith.mulf %84, %6 : vector<8x256xf32>
    %86 = arith.addf %78, %85 : vector<8x256xf32>
    %87 = arith.mulf %63, %69 : vector<8x1xf32>
    %cst_23 = arith.constant 1.000000e-03 : f32
    %88 = vector.broadcast %cst_23 : f32 to vector<8x1xf32>
    %89 = arith.subf %87, %88 : vector<8x1xf32>
    %cst_24 = arith.constant 0.000000e+00 : f32
    %90 = vector.broadcast %cst_24 : f32 to vector<8x1xf32>
    %91 = arith.maximumf %89, %90 : vector<8x1xf32>
    %92 = vector.broadcast %91 : vector<8x1xf32> to vector<8x256xf32>
    %93 = arith.mulf %92, %8 : vector<8x256xf32>
    %94 = arith.addf %86, %93 : vector<8x256xf32>
    %95 = arith.mulf %65, %69 : vector<8x1xf32>
    %cst_25 = arith.constant 1.000000e-03 : f32
    %96 = vector.broadcast %cst_25 : f32 to vector<8x1xf32>
    %97 = arith.subf %95, %96 : vector<8x1xf32>
    %cst_26 = arith.constant 0.000000e+00 : f32
    %98 = vector.broadcast %cst_26 : f32 to vector<8x1xf32>
    %99 = arith.maximumf %97, %98 : vector<8x1xf32>
    %100 = vector.broadcast %99 : vector<8x1xf32> to vector<8x256xf32>
    %101 = arith.mulf %100, %10 : vector<8x256xf32>
    %102 = arith.addf %94, %101 : vector<8x256xf32>
    %c0_27 = arith.constant 0 : index
    %c0_28 = arith.constant 0 : index
    %103 = vector.load %arg4[%c0_27, %c0_28] : memref<8x256xf32, #tpu.memory_space<vmem>>, vector<8x256xf32>
    tpu.vector_store %arg4[%c0_27, %c0_28], %102 {strides = array<i32>} : memref<8x256xf32, #tpu.memory_space<vmem>>, vector<8x256xf32>,
    return
  }
  func.func @transform_0(%arg0: i32) -> (i32, i32, i32) {
    %c0_i32 = arith.constant 0 : i32
    %c0_i32_0 = arith.constant 0 : i32
    %c0_i32_1 = arith.constant 0 : i32
    return %arg0, %c0_i32, %c0_i32_0 : i32, i32, i32
  }
  func.func @transform_1(%arg0: i32) -> (i32, i32) {
    %c0_i32 = arith.constant 0 : i32
    %c0_i32_0 = arith.constant 0 : i32
    %c0_i32_1 = arith.constant 0 : i32
    return %c0_i32, %c0_i32_0 : i32, i32
  }
  func.func @transform_2(%arg0: i32) -> (i32, i32) {
    %c0_i32 = arith.constant 0 : i32
    %c0_i32_0 = arith.constant 0 : i32
    %c0_i32_1 = arith.constant 0 : i32
    return %c0_i32, %c0_i32_0 : i32, i32
  }
  func.func @transform_3(%arg0: i32) -> (i32, i32) {
    %c0_i32 = arith.constant 0 : i32
    %c0_i32_0 = arith.constant 0 : i32
    return %arg0, %c0_i32 : i32, i32
  }
}

</mosaic_0001>

<bundles_post_ra>
// kernel: bilstm_attention_forward.10
= control target key start
LH: loop header
LB: loop body
LE: loop exit
PB: predicated region body
PF: predicated region fallthrough
CT: control target
= control target key end

     0   :  { %s203_s1 = inlined_call_operand.vmem [shape: f32[128,128], index: 1, kind: input, shape index: {}]   ;;  %s204_s0 = inlined_call_operand.vmem [shape: f32[32,128], index: 0, kind: input, shape index: {}]   ;;  %s205_s2 = inlined_call_operand.vmem [shape: f32[32,128], index: 2, kind: output, shape index: {}]  }
   0x1   :  { %v30_v0 = vld [vmem:[%s203_s1 + $0x78] sm:$0xff]  ;;  %v29_v1 = vld [vmem:[%s203_s1 + $0x70] sm:$0xff]  ;;  %v28_v2 = vld [vmem:[%s203_s1 + $0x68] sm:$0xff] }
   0x2   :  { %69 = vmatpush.msra.mxu2 %v30_v0  ;;  %70 = vmatpush.msra.mxu3 %v30_v0  ;;  %v27_v3 = vld [vmem:[%s203_s1 + $0x60] sm:$0xff]  ;;  %v26_v4 = vld [vmem:[%s203_s1 + $0x58] sm:$0xff]  ;;  %v25_v5 = vld [vmem:[%s203_s1 + $0x50] sm:$0xff] }
   0x3   :  { %31 = vmatpush.msra.mxu0 %v30_v0  ;;  %68 = vmatpush.msra.mxu1 %v30_v0  ;;  %v24_v6 = vld [vmem:[%s203_s1 + $0x48] sm:$0xff]  ;;  %v23_v7 = vld [vmem:[%s203_s1 + $0x40] sm:$0xff]  ;;  %v22_v8 = vld [vmem:[%s203_s1 + $0x38] sm:$0xff] }
   0x4   :  { %72 = vmatpush.msra.mxu2 %v29_v1  ;;  %73 = vmatpush.msra.mxu3 %v29_v1  ;;  %v21_v9 = vld [vmem:[%s203_s1 + $0x30] sm:$0xff]  ;;  %v20_v10 = vld [vmem:[%s203_s1 + $0x28] sm:$0xff]  ;;  %v19_v11 = vld [vmem:[%s203_s1 + $0x20] sm:$0xff] }
   0x5   :  { %32 = vmatpush.msra.mxu0 %v29_v1  ;;  %71 = vmatpush.msra.mxu1 %v29_v1  ;;  %v18_v12 = vld [vmem:[%s203_s1 + $0x18] sm:$0xff]  ;;  %v17_v13 = vld [vmem:[%s203_s1 + $0x10] sm:$0xff]  ;;  %v16_v14 = vld [vmem:[%s203_s1 + $0x8] sm:$0xff] }
   0x6   :  { %75 = vmatpush.msra.mxu2 %v28_v2  ;;  %76 = vmatpush.msra.mxu3 %v28_v2  ;;  %v15_v15 = vld [vmem:[%s203_s1] sm:$0xff]  ;;  %v13_v16 = vld [vmem:[%s204_s0 + $0x10] sm:$0xff]  ;;  %v14_v17 = vld [vmem:[%s204_s0 + $0x18] sm:$0xff] }
   0x7   :  { %33 = vmatpush.msra.mxu0 %v28_v2  ;;  %74 = vmatpush.msra.mxu1 %v28_v2  ;;  %v11_v18 = vld [vmem:[%s204_s0] sm:$0xff]  ;;  %v12_v19 = vld [vmem:[%s204_s0 + $0x8] sm:$0xff] }
   0x8   :  { %78 = vmatpush.msra.mxu2 %v27_v3  ;;  %79 = vmatpush.msra.mxu3 %v27_v3 }
   0x9   :  { %34 = vmatpush.msra.mxu0 %v27_v3  ;;  %77 = vmatpush.msra.mxu1 %v27_v3 }
   0xa   :  { %81 = vmatpush.msra.mxu2 %v26_v4  ;;  %82 = vmatpush.msra.mxu3 %v26_v4 }
   0xb   :  { %35 = vmatpush.msra.mxu0 %v26_v4  ;;  %80 = vmatpush.msra.mxu1 %v26_v4 }
   0xc   :  { %84 = vmatpush.msra.mxu2 %v25_v5  ;;  %85 = vmatpush.msra.mxu3 %v25_v5 }
   0xd   :  { %36 = vmatpush.msra.mxu0 %v25_v5  ;;  %83 = vmatpush.msra.mxu1 %v25_v5 }
   0xe   :  { %87 = vmatpush.msra.mxu2 %v24_v6  ;;  %88 = vmatpush.msra.mxu3 %v24_v6 }
   0xf   :  { %37 = vmatpush.msra.mxu0 %v24_v6  ;;  %86 = vmatpush.msra.mxu1 %v24_v6 }
  0x10   :  { %90 = vmatpush.msra.mxu2 %v23_v7  ;;  %91 = vmatpush.msra.mxu3 %v23_v7 }
  0x11   :  { %38 = vmatpush.msra.mxu0 %v23_v7  ;;  %89 = vmatpush.msra.mxu1 %v23_v7 }
  0x12   :  { %93 = vmatpush.msra.mxu2 %v22_v8  ;;  %94 = vmatpush.msra.mxu3 %v22_v8 }
  0x13   :  { %39 = vmatpush.msra.mxu0 %v22_v8  ;;  %92 = vmatpush.msra.mxu1 %v22_v8 }
  0x14   :  { %96 = vmatpush.msra.mxu2 %v21_v9  ;;  %97 = vmatpush.msra.mxu3 %v21_v9 }
  0x15   :  { %40 = vmatpush.msra.mxu0 %v21_v9  ;;  %95 = vmatpush.msra.mxu1 %v21_v9 }
  0x16   :  { %99 = vmatpush.msra.mxu2 %v20_v10  ;;  %100 = vmatpush.msra.mxu3 %v20_v10 }
  0x17   :  { %41 = vmatpush.msra.mxu0 %v20_v10  ;;  %98 = vmatpush.msra.mxu1 %v20_v10 }
  0x18   :  { %102 = vmatpush.msra.mxu2 %v19_v11  ;;  %103 = vmatpush.msra.mxu3 %v19_v11 }
  0x19   :  { %42 = vmatpush.msra.mxu0 %v19_v11  ;;  %101 = vmatpush.msra.mxu1 %v19_v11 }
  0x1a   :  { %105 = vmatpush.msra.mxu2 %v18_v12  ;;  %106 = vmatpush.msra.mxu3 %v18_v12 }
  0x1b   :  { %43 = vmatpush.msra.mxu0 %v18_v12  ;;  %104 = vmatpush.msra.mxu1 %v18_v12 }
  0x1c   :  { %108 = vmatpush.msra.mxu2 %v17_v13  ;;  %109 = vmatpush.msra.mxu3 %v17_v13 }
  0x1d   :  { %44 = vmatpush.msra.mxu0 %v17_v13  ;;  %107 = vmatpush.msra.mxu1 %v17_v13 }
  0x1e   :  { %111 = vmatpush.msra.mxu2 %v16_v14  ;;  %112 = vmatpush.msra.mxu3 %v16_v14 }
  0x1f   :  { %45 = vmatpush.msra.mxu0 %v16_v14  ;;  %110 = vmatpush.msra.mxu1 %v16_v14 }
  0x20   :  { %114 = vmatpush.msra.mxu2 %v15_v15  ;;  %115 = vmatpush.msra.mxu3 %v15_v15 }
  0x21   :  { %53 = vmatmul.f32.vlgmr.msra.gmra.mxu2 %v13_v16  ;;  %56 = vmatmul.f32.vlgmr.msra.gmra.mxu3 %v14_v17 }
  0x22   :  { %46 = vmatpush.msra.mxu0 %v15_v15  ;;  %113 = vmatpush.msra.mxu1 %v15_v15 }
  0x23   :  { %47 = vmatmul.f32.vlgmr.msra.gmra.mxu0 %v11_v18  ;;  %50 = vmatmul.f32.vlgmr.msra.gmra.mxu1 %v12_v19 }
  0xa0   :  { %v48_v20 = vpop.f32.mrf.mxu0  ;;  %v51_v21 = vpop.f32.mrf.mxu1 }
  0xa1   :  { %60 = vst [vmem:[%s205_s2] sm:$0xff] %v48_v20 }
  0xa2   :  { %61 = vst [vmem:[%s205_s2 + $0x8] sm:$0xff] %v51_v21 }
  0xa4   :  { %v54_v22 = vpop.f32.mrf.mxu2  ;;  %v57_v23 = vpop.f32.mrf.mxu3 }
  0xa5   :  { %62 = vst [vmem:[%s205_s2 + $0x10] sm:$0xff] %v54_v22 }
  0xa6   :  { %63 = vst [vmem:[%s205_s2 + $0x18] sm:$0xff] %v57_v23 }

// kernel: bilstm_attention_forward.11
= control target key start
LH: loop header
LB: loop body
LE: loop exit
PB: predicated region body
PF: predicated region fallthrough
CT: control target
= control target key end

     0   :  { %vm119_vm0 = vcmask 1040384   ;;  %vm44_vm1 = vcmask 1041409   ;;  %vm146_vm2 = vcmask 1041408   ;;  %vm47_vm3 = vcmask 1042434   ;;  %s611_s0 = inlined_call_operand.vmem [shape: f32[8,4,128], index: 0, kind: input, shape index: {}]   ;;  %s612_s1 = inlined_call_operand.vmem [shape: f32[1,128], index: 1, kind: input, shape index: {}]   ;;  %s613_s2 = inlined_call_operand.vmem [shape: f32[1,128], index: 2, kind: input, shape index: {}]   ;;  %s614_s3 = inlined_call_operand.vmem [shape: f32[8,128], index: 3, kind: output, shape index: {}]  }
   0x1   :  { %v457_v0 = vld [vmem:[%s611_s0 + $0x1c] sm:$0xf]  ;;  %v415_v1 = vld [vmem:[%s612_s1] ss:$0 sm:$0xff]  ;;  %v465_v2 = vld [vmem:[%s611_s0 + $0x18] sm:$0xf] }
   0x2   :  { %v470_v3 = vld [vmem:[%s611_s0] sm:$0xf]  ;;  %v475_v4 = vld [vmem:[%s611_s0 + $0x4] sm:$0xf]  ;;  %v77_v5 = vmul.f32 %v415_v1, %v457_v0  ;;  %v76_v6 = vmul.f32 %v415_v1, %v465_v2  ;;  %v482_v7 = vld [vmem:[%s611_s0 + $0x8] sm:$0xf] }
   0x3   :  { %v487_v8 = vld [vmem:[%s611_s0 + $0xc] sm:$0xf]  ;;  %v492_v9 = vld [vmem:[%s611_s0 + $0x10] sm:$0xf]  ;;  %v495_v10 = vmul.f32 %v415_v1, %v470_v3  ;;  %v500_v11 = vld [vmem:[%s611_s0 + $0x14] sm:$0xf]  ;;  %v71_v13 = vmul.f32 %v415_v1, %v475_v4  ;;  %v72_v14 = vmul.f32 %v415_v1, %v482_v7 }
   0x4   :  { %v416_v12 = vld [vmem:[%s613_s2] ss:$0 sm:$0xff]  ;;  %v73_v15 = vmul.f32 %v415_v1, %v487_v8  ;;  %v74_v16 = vmul.f32 %v415_v1, %v492_v9  ;;  %v509_v17 = vrot.slane %v77_v5, 1  ;;  %v96_v18 = vrot.slane %v76_v6, 2 }
   0x5   :  { %vm50_vm4 = vcmask 1043459   ;;  %vm53_vm5 = vcmask 1044484   ;;  %v27_v19 = vmul.f32 %v416_v12, %v470_v3  ;;  %v28_v20 = vmul.f32 %v416_v12, %v475_v4 }
   0x6   :  { %v29_v21 = vmul.f32 %v416_v12, %v482_v7  ;;  %v30_v22 = vmul.f32 %v416_v12, %v487_v8  ;;  %v120_v23 = vsel %vm119_vm0, %v509_v17, 0.0  ;;  %v139_v24 = vsel %vm44_vm1, %v509_v17, %v96_v18 }
   0x7   :  { %v31_v25 = vmul.f32 %v416_v12, %v492_v9  ;;  %v32_v26 = vmul.f32 %v416_v12, %v500_v11  ;;  %121 = vadd.xlane.f32.xlu1 %v120_v23  ;;  %v147_v27 = vsel %vm146_vm2, %v139_v24, 0.0  ;;  %v33_v28 = vmul.f32 %v416_v12, %v465_v2 }
   0x8   :  { %v34_v29 = vmul.f32 %v416_v12, %v457_v0  ;;  %v43_v30 = vrot.slane %v28_v20, 7  ;;  %148 = vadd.xlane.f32.xlu2 %v147_v27  ;;  %v46_v31 = vrot.slane %v29_v21, 6  ;;  %v49_v32 = vrot.slane %v30_v22, 5 }
   0x9   :  { %v52_v33 = vrot.slane %v31_v25, 4  ;;  %v55_v34 = vrot.slane %v32_v26, 3  ;;  %vm56_vm6 = vcmask 1045509   ;;  %v58_v36 = vrot.slane %v33_v28, 2 }
   0xa   :  { %v45_v35 = vsel %vm44_vm1, %v43_v30, %v27_v19  ;;  %vm59_vm7 = vcmask 1046534   ;;  %v61_v38 = vrot.slane %v34_v29, 1  ;;  %vm62_vm8 = vcmask 1047559  }
   0xb   :  { %v48_v37 = vsel %vm47_vm3, %v46_v31, %v45_v35  ;;  %v75_v39 = vmul.f32 %v415_v1, %v500_v11  ;;  %v86_v41 = vrot.slane %v71_v13, 7  ;;  %v88_v42 = vrot.slane %v72_v14, 6 }
   0xc   :  { %v51_v40 = vsel %vm50_vm4, %v49_v32, %v48_v37  ;;  %v90_v43 = vrot.slane %v73_v15, 5  ;;  %v92_v45 = vrot.slane %v74_v16, 4  ;;  %vm142_vm9 = vcmask 1047554  }
   0xd   :  { %v54_v44 = vsel %vm53_vm5, %v52_v33, %v51_v40  ;;  %v94_v46 = vrot.slane %v75_v39, 3  ;;  %v134_v48 = vsel %vm50_vm4, %v86_v41, %v495_v10  ;;  %v87_v49 = vsel %vm44_vm1, %v86_v41, %v495_v10 }
   0xe   :  { %v57_v47 = vsel %vm56_vm6, %v55_v34, %v54_v44  ;;  %v107_v50 = vsel %vm47_vm3, %v86_v41, %v495_v10  ;;  %v135_v52 = vsel %vm53_vm5, %v88_v42, %v134_v48  ;;  %v89_v53 = vsel %vm47_vm3, %v88_v42, %v87_v49 }
   0xf   :  { %v60_v51 = vsel %vm59_vm7, %v58_v36, %v57_v47  ;;  %v108_v54 = vsel %vm50_vm4, %v88_v42, %v107_v50  ;;  %v136_v56 = vsel %vm56_vm6, %v90_v43, %v135_v52  ;;  %v91_v57 = vsel %vm50_vm4, %v90_v43, %v89_v53 }
  0x10   :  { %v63_v55 = vsel %vm62_vm8, %v61_v38, %v60_v51  ;;  %v109_v58 = vsel %vm53_vm5, %v90_v43, %v108_v54  ;;  %v137_v59 = vsel %vm59_vm7, %v92_v45, %v136_v56  ;;  %v93_v60 = vsel %vm53_vm5, %v92_v45, %v91_v57 }
  0x11   :  { %65 = vadd.xlane.f32.xlu0 %v63_v55  ;;  %v110_v61 = vsel %vm56_vm6, %v92_v45, %v109_v58  ;;  %v138_v62 = vsel %vm62_vm8, %v94_v46, %v137_v59  ;;  %v95_v63 = vsel %vm56_vm6, %v94_v46, %v93_v60  ;;  %vm115_vm10 = vcmask 1047553  }
  0x12   :  { %v111_v1 = vsel %vm59_vm7, %v94_v46, %v110_v61  ;;  %v143_v5 = vsel %vm142_vm9, %v138_v62, 0.0  ;;  %v97_v6 = vsel %vm59_vm7, %v96_v18, %v95_v63  ;;  %v164_v13 = vsel %vm44_vm1, %v96_v18, %v94_v46 }
  0x13   :  { %v112_v12 = vsel %vm62_vm8, %v96_v18, %v111_v1  ;;  %144 = vadd.xlane.f32.xlu1 %v143_v5  ;;  %v99_v14 = vsel %vm62_vm8, %v509_v17, %v97_v6  ;;  %v160_v15 = vsel %vm53_vm5, %v86_v41, %v495_v10  ;;  %v165_v20 = vsel %vm47_vm3, %v509_v17, %v164_v13 }
  0x14   :  { %101 = vadd.xlane.f32.xlu2 %v99_v14  ;;  %v161_v16 = vsel %vm56_vm6, %v88_v42, %v160_v15  ;;  %v116_v19 = vsel %vm115_vm10, %v112_v12, 0.0  ;;  %vm172_vm11 = vcmask 1042432   ;;  %vm168_vm12 = vcmask 1047555  }
  0x15   :  { %v162_v21 = vsel %vm59_vm7, %v90_v43, %v161_v16  ;;  %v173_v22 = vsel %vm172_vm11, %v165_v20, 0.0  ;;  %vm188_vm2 = vcmask 1046528   ;;  %v433_v47 = vmov 0  }
  0x16   :  { %v163_v18 = vsel %vm62_vm8, %v92_v45, %v162_v21  ;;  %414 = vset.pattern.permute.xlu1 %v433_v47  ;;  %413 = vset.pattern.permute.xlu0 %v433_v47  ;;  %vm196_vm11 = vcmask 1045504  }
  0x17   :  { %v169_v23 = vsel %vm168_vm12, %v163_v18, 0.0  ;;  %412 = vset.pattern.permute.xlu2 %v433_v47 }
  0x19   :  { %117 = vadd.xlane.f32.xlu0 %v116_v19 }
  0x1b   :  { %174 = vadd.xlane.f32.xlu1 %v173_v22 }
  0x21   :  { %170 = vadd.xlane.f32.xlu0 %v169_v23 }
  0x7a   :  { %v122_v24 = vpop.xlane.xlu1 %121 }
  0x7b   :  { %v149_v10 = vpop.xlane.xlu2 %148 }
  0x84   :  { %v66_v25 = vpop.xlane.xlu0 %65 }
  0x85   :  { %v124_v26 = vrot.slane %v66_v25, 7  ;;  %v150_v27 = vrot.slane %v66_v25, 6  ;;  %v176_v37 = vrot.slane %v66_v25, 5 }
  0x86   :  { %v145_v28 = vpop.xlane.xlu1 %144 }
  0x87   :  { %v127_v29 = vadd.f32 %v124_v26, %v122_v24  ;;  %v153_v30 = vadd.f32 %v150_v27, %v149_v10  ;;  %v152_v17 = vadd.f32 %v150_v27, %v145_v28  ;;  %v102_v31 = vpop.xlane.xlu2 %101 }
  0x88   :  { %v103_v36 = vadd.f32 %v102_v31, %v66_v25 }
  0x89   :  { %v131_v32 = vmul.f32 0.2, %v127_v29  ;;  %vm129_vm13 = vcmp.gt.f32.partialorder %v127_v29, 0.0  ;;  %v157_v35 = vmul.f32 0.2, %v153_v30  ;;  %vm154_vm15 = vcmp.gt.f32.partialorder %v152_v17, 0.0 }
  0x8a   :  { %v156_v38 = vmul.f32 0.2, %v152_v17  ;;  %vm155_vm0 = vcmp.gt.f32.partialorder %v153_v30, 0.0  ;;  %v105_v44 = vmul.f32 0.2, %v103_v36  ;;  %vm104_vm9 = vcmp.gt.f32.partialorder %v103_v36, 0.0 }
  0x8b   :  { %v133_v39 = vsel %vm129_vm13, %v127_v29, %v131_v32  ;;  %v159_v49 = vsel %vm155_vm0, %v153_v30, %v157_v35  ;;  %vm204_vm13 = vcmask 1044480  }
  0x8c   :  { %v118_v33 = vpop.xlane.xlu0 %117  ;;  %v190_v45 = vrot.slane %v133_v39, 1  ;;  %v158_v48 = vsel %vm154_vm15, %v152_v17, %v156_v38  ;;  %v198_v55 = vrot.slane %v159_v49, 2  ;;  %v106_v56 = vsel %vm104_vm9, %v103_v36, %v105_v44 }
  0x8d   :  { %v126_v34 = vadd.f32 %v124_v26, %v118_v33  ;;  %v197_v54 = vrot.slane %v158_v48, 2 }
  0x8e   :  { %v175_v41 = vpop.xlane.xlu1 %174 }
  0x8f   :  { %vm128_vm14 = vcmp.gt.f32.partialorder %v126_v34, 0.0  ;;  %v130_v40 = vmul.f32 0.2, %v126_v34  ;;  %v179_v42 = vadd.f32 %v176_v37, %v175_v41  ;;  %v199_v61 = vsel %vm196_vm11, %v197_v54, %v198_v55 }
  0x91   :  { %v132_v43 = vsel %vm128_vm14, %v126_v34, %v130_v40  ;;  %v183_v50 = vmul.f32 0.2, %v179_v42  ;;  %vm181_vm10 = vcmp.gt.f32.partialorder %v179_v42, 0.0 }
  0x92   :  { %v189_v46 = vrot.slane %v132_v43, 1 }
  0x93   :  { %v185_v58 = vsel %vm181_vm10, %v179_v42, %v183_v50 }
  0x94   :  { %v191_v51 = vsel %vm188_vm2, %v189_v46, %v190_v45  ;;  %v171_v52 = vpop.xlane.xlu0 %170  ;;  %v206_v62 = vrot.slane %v185_v58, 3 }
  0x95   :  { %v178_v53 = vadd.f32 %v176_v37, %v171_v52  ;;  %v193_v57 = vmax.f32 %v106_v56, %v191_v51 }
  0x97   :  { %vm180_vm12 = vcmp.gt.f32.partialorder %v178_v53, 0.0  ;;  %v182_v59 = vmul.f32 0.2, %v178_v53  ;;  %v201_v1 = vmax.f32 %v193_v57, %v199_v61 }
  0x99   :  { %v184_v60 = vsel %vm180_vm12, %v178_v53, %v182_v59 }
  0x9a   :  { %v205_v63 = vrot.slane %v184_v60, 3 }
  0x9c   :  { %v207_v5 = vsel %vm204_vm13, %v205_v63, %v206_v62 }
  0x9d   :  { %v209_v6 = vmax.f32 %v201_v1, %v207_v5 }
  0x9f   :  { %v210_v12 = vsub.f32 %v106_v56, %v209_v6  ;;  %v214_v13 = vrot.slane %v209_v6, 7  ;;  %v230_v14 = vrot.slane %v209_v6, 5  ;;  %v222_v15 = vrot.slane %v209_v6, 6 }
  0xa1   :  { %v211_v16 = vmul.f32 1.442695, %v210_v12  ;;  %v216_v19 = vsub.f32 %v132_v43, %v214_v13  ;;  %v217_v20 = vsub.f32 %v133_v39, %v214_v13  ;;  %v232_v21 = vsub.f32 %v184_v60, %v230_v14 }
  0xa2   :  { %v233_v22 = vsub.f32 %v185_v58, %v230_v14  ;;  %v224_v18 = vsub.f32 %v158_v48, %v222_v15  ;;  %v225_v23 = vsub.f32 %v159_v49, %v222_v15 }
  0xa3   :  { %v218_v24 = vmul.f32 1.442695, %v216_v19  ;;  %v220_v10 = vmul.f32 1.442695, %v217_v20  ;;  %v234_v25 = vmul.f32 1.442695, %v232_v21  ;;  %417 = vpow2.f32 %v211_v16 }
  0xa4   :  { %v236_v26 = vmul.f32 1.442695, %v233_v22  ;;  %v226_v27 = vmul.f32 1.442695, %v224_v18  ;;  %v228_v28 = vmul.f32 1.442695, %v225_v23 }
  0xa5   :  { %419 = vpow2.f32 %v218_v24  ;;  %v276_v19 = vrot.slane %v475_v4, 7  ;;  %v278_v21 = vrot.slane %v482_v7, 6  ;;  %v280_v18 = vrot.slane %v487_v8, 5 }
  0xa6   :  { %421 = vpow2.f32 %v220_v10 }
  0xa7   :  { %423 = vpow2.f32 %v234_v25  ;;  %v312_v22 = vsel %vm47_vm3, %v276_v19, %v470_v3  ;;  %v277_v24 = vsel %vm44_vm1, %v276_v19, %v470_v3  ;;  %v282_v25 = vrot.slane %v492_v9, 4 }
  0xa8   :  { %425 = vpow2.f32 %v236_v26  ;;  %v313_v23 = vsel %vm50_vm4, %v278_v21, %v312_v22  ;;  %v279_v4 = vsel %vm47_vm3, %v278_v21, %v277_v24  ;;  %v347_v7 = vsel %vm50_vm4, %v276_v19, %v470_v3 }
  0xa9   :  { %427 = vpow2.f32 %v226_v27  ;;  %v418_v29 = vpop.eup %417  ;;  %v314_v26 = vsel %vm53_vm5, %v280_v18, %v313_v23  ;;  %v284_v27 = vrot.slane %v500_v11, 3  ;;  %v281_v8 = vsel %vm50_vm4, %v280_v18, %v279_v4 }
  0xaa   :  { %429 = vpow2.f32 %v228_v28  ;;  %v315_v28 = vsel %vm56_vm6, %v282_v25, %v314_v26  ;;  %v283_v9 = vsel %vm53_vm5, %v282_v25, %v281_v8 }
  0xab   :  { %v420_v30 = vpop.eup %419 }
  0xac   :  { %v422_v17 = vpop.eup %421  ;;  %v240_v31 = vrot.slane %v420_v30, 1 }
  0xad   :  { %v424_v32 = vpop.eup %423  ;;  %v241_v33 = vrot.slane %v422_v17, 1 }
  0xae   :  { %v426_v34 = vpop.eup %425  ;;  %v254_v40 = vrot.slane %v424_v32, 3 }
  0xaf   :  { %v428_v35 = vpop.eup %427  ;;  %v242_v36 = vsel %vm188_vm2, %v240_v31, %v241_v33  ;;  %v255_v41 = vrot.slane %v426_v34, 3 }
  0xb0   :  { %v430_v37 = vpop.eup %429  ;;  %v244_v38 = vadd.f32 %v418_v29, %v242_v36  ;;  %v247_v39 = vrot.slane %v428_v35, 2  ;;  %v288_v36 = vrot.slane %v457_v0, 1 }
  0xb1   :  { %v248_v42 = vrot.slane %v430_v37, 2  ;;  %v256_v45 = vsel %vm204_vm13, %v254_v40, %v255_v41 }
  0xb3   :  { %v249_v43 = vsel %vm196_vm11, %v247_v39, %v248_v42 }
  0xb4   :  { %v251_v44 = vadd.f32 %v249_v43, %v244_v38 }
  0xb6   :  { %v258_v46 = vadd.f32 %v256_v45, %v251_v44 }
  0xb8   :  { %431 = vrcp.f32 %v258_v46 }
  0xbe   :  { %v432_v47 = vpop.eup %431 }
  0xbf   :  { %v329_v48 = vrot.slane %v432_v47, 6  ;;  %v294_v49 = vrot.slane %v432_v47, 7  ;;  %v364_v53 = vrot.slane %v432_v47, 5  ;;  %v260_v61 = vmul.f32 %v432_v47, %v418_v29 }
  0xc0   :  { %v348_v29 = vsel %vm53_vm5, %v278_v21, %v347_v7 }
  0xc1   :  { %v331_v50 = vmul.f32 %v428_v35, %v329_v48  ;;  %v297_v51 = vmul.f32 %v422_v17, %v294_v49  ;;  %v296_v52 = vmul.f32 %v420_v30, %v294_v49  ;;  %v366_v60 = vmul.f32 %v424_v32, %v364_v53 }
  0xc2   :  { %v404_v63 = vadd.f32 -0.001, %v260_v61  ;;  %v332_v6 = vmul.f32 %v430_v37, %v329_v48  ;;  %v367_v14 = vmul.f32 %v426_v34, %v364_v53  ;;  %v286_v30 = vrot.slane %v465_v2, 2 }
  0xc3   :  { %v407_v54 = vadd.f32 -0.001, %v331_v50  ;;  %v406_v55 = vadd.f32 -0.001, %v297_v51  ;;  %v405_v56 = vadd.f32 -0.001, %v296_v52  ;;  %v316_v17 = vsel %vm59_vm7, %v284_v27, %v315_v28 }
  0xc4   :  { %v409_v62 = vadd.f32 -0.001, %v366_v60  ;;  %v262_v5 = vmax.f32 %v404_v63, 0.0  ;;  %v408_v12 = vadd.f32 -0.001, %v332_v6  ;;  %v349_v32 = vsel %vm56_vm6, %v280_v18, %v348_v29 }
  0xc5   :  { %v335_v57 = vmax.f32 %v407_v54, 0.0  ;;  %v301_v58 = vmax.f32 %v406_v55, 0.0  ;;  %v300_v59 = vmax.f32 %v405_v56, 0.0  ;;  %v410_v15 = vadd.f32 -0.001, %v367_v14 }
  0xc6   :  { %v370_v1 = vmax.f32 %v409_v62, 0.0  ;;  %v336_v13 = vmax.f32 %v408_v12, 0.0  ;;  %v317_v33 = vsel %vm62_vm8, %v286_v30, %v316_v17  ;;  %v285_v34 = vsel %vm56_vm6, %v284_v27, %v283_v9 }
  0xc7   :  { %339 = vperm.xlu1 %414, %v335_v57   ;;  %309 = vperm.xlu0 %413, %v301_v58   ;;  %v371_v16 = vmax.f32 %v410_v15, 0.0  ;;  %v350_v11 = vsel %vm59_vm7, %v282_v25, %v349_v32  ;;  %v382_v35 = vsel %vm53_vm5, %v276_v19, %v470_v3  ;;  %v287_v2 = vsel %vm59_vm7, %v286_v30, %v285_v34 }
  0xc8   :  { %304 = vperm.xlu2 %412, %v300_v59   ;;  %v351_v38 = vsel %vm62_vm8, %v284_v27, %v350_v11  ;;  %v383_v41 = vsel %vm56_vm6, %v278_v21, %v382_v35  ;;  %v386_v43 = vsel %vm44_vm1, %v286_v30, %v284_v27  ;;  %v289_v44 = vsel %vm62_vm8, %v288_v36, %v287_v2 }
  0xc9   :  { %v352_v45 = vsel %vm44_vm1, %v288_v36, %v286_v30  ;;  %v384_v0 = vsel %vm59_vm7, %v280_v18, %v383_v41  ;;  %v387_v48 = vsel %vm47_vm3, %v288_v36, %v386_v43 }
  0xca   :  { %v385_v53 = vsel %vm62_vm8, %v282_v25, %v384_v0 }
  0xcf   :  { %374 = vperm.xlu1 %414, %v370_v1  }
  0xd0   :  { %265 = vperm.xlu2 %412, %v262_v5  }
  0xd8   :  { %344 = vperm.xlu2 %412, %v336_v13  }
  0xe0   :  { %379 = vperm.xlu2 %412, %v371_v16  }
 0x122   :  { %v305_v20 = vpop.permute.xlu2 %304 }
 0x123   :  { %v320_v37 = vmul.f32 %v317_v33, %v305_v20 }
 0x125   :  { %v324_v46 = vrot.slane %v320_v37, 1 }
 0x12a   :  { %v266_v10 = vpop.permute.xlu2 %265 }
 0x12b   :  { %v291_v52 = vmul.f32 %v289_v44, %v266_v10 }
 0x132   :  { %v345_v31 = vpop.permute.xlu2 %344 }
 0x133   :  { %v356_v50 = vmul.f32 %v352_v45, %v345_v31 }
 0x135   :  { %v360_v58 = vrot.slane %v356_v50, 2 }
 0x139   :  { %v340_v39 = vpop.permute.xlu1 %339  ;;  %v310_v40 = vpop.permute.xlu0 %309 }
 0x13a   :  { %v321_v42 = vmul.f32 %v310_v40, %v288_v36  ;;  %v355_v3 = vmul.f32 %v351_v38, %v340_v39  ;;  %v380_v49 = vpop.permute.xlu2 %379 }
 0x13b   :  { %v391_v55 = vmul.f32 %v387_v48, %v380_v49 }
 0x13c   :  { %v325_v47 = vrot.slane %v321_v42, 1  ;;  %v359_v54 = vrot.slane %v355_v3, 2 }
 0x13d   :  { %v395_v61 = vrot.slane %v391_v55, 3 }
 0x13e   :  { %v326_v51 = vsel %vm188_vm2, %v324_v46, %v325_v47  ;;  %v361_v60 = vsel %vm196_vm11, %v359_v54, %v360_v58 }
 0x13f   :  { %v328_v56 = vadd.f32 %v326_v51, %v291_v52 }
 0x141   :  { %v375_v57 = vpop.permute.xlu1 %374  ;;  %v363_v63 = vadd.f32 %v361_v60, %v328_v56 }
 0x142   :  { %v390_v59 = vmul.f32 %v385_v53, %v375_v57 }
 0x144   :  { %v394_v62 = vrot.slane %v390_v59, 3 }
 0x146   :  { %v396_v1 = vsel %vm204_vm13, %v394_v62, %v395_v61 }
 0x147   :  { %v398_v5 = vadd.f32 %v396_v1, %v363_v63 }
 0x149   :  { %399 = vst [vmem:[%s614_s3] sm:$0xff] %v398_v5 }

// kernel: bilstm_attention_forward.9
= control target key start
LH: loop header
LB: loop body
LE: loop exit
PB: predicated region body
PF: predicated region fallthrough
CT: control target
= control target key end

     0   :  { %s2060_s1 = inlined_call_operand.vmem [shape: f32[128,512], index: 1, kind: input, shape index: {}]   ;;  %s2061_s0 = inlined_call_operand.vmem [shape: f32[48,128], index: 0, kind: input, shape index: {}]   ;;  %s2062_s2 = inlined_call_operand.vmem [shape: f32[128,512], index: 2, kind: input, shape index: {}]   ;;  %s2063_s3 = inlined_call_operand.vmem [shape: f32[1,512], index: 3, kind: input, shape index: {}]   ;;  %s2064_s4 = inlined_call_operand.vmem [shape: f32[16,128], index: 4, kind: output, shape index: {}]  }
   0x1   :  { %v83_v0 = vld [vmem:[%s2060_s1 + $0x1e0] sm:$0xff]  ;;  %v84_v1 = vld [vmem:[%s2060_s1 + $0x1e8] sm:$0xff]  ;;  %v85_v2 = vld [vmem:[%s2060_s1 + $0x1f0] sm:$0xff] }
   0x2   :  { %97 = vmatpush.msra.mxu0 %v83_v0  ;;  %132 = vmatpush.msra.mxu1 %v84_v1  ;;  %v86_v3 = vld [vmem:[%s2060_s1 + $0x1f8] sm:$0xff]  ;;  %v79_v4 = vld [vmem:[%s2060_s1 + $0x1c0] sm:$0xff]  ;;  %v80_v5 = vld [vmem:[%s2060_s1 + $0x1c8] sm:$0xff] }
   0x3   :  { %167 = vmatpush.msra.mxu2 %v85_v2  ;;  %202 = vmatpush.msra.mxu3 %v86_v3  ;;  %v81_v6 = vld [vmem:[%s2060_s1 + $0x1d0] sm:$0xff]  ;;  %v82_v7 = vld [vmem:[%s2060_s1 + $0x1d8] sm:$0xff]  ;;  %v75_v8 = vld [vmem:[%s2060_s1 + $0x1a0] sm:$0xff] }
   0x4   :  { %98 = vmatpush.msra.mxu0 %v79_v4  ;;  %133 = vmatpush.msra.mxu1 %v80_v5  ;;  %v76_v9 = vld [vmem:[%s2060_s1 + $0x1a8] sm:$0xff]  ;;  %v77_v10 = vld [vmem:[%s2060_s1 + $0x1b0] sm:$0xff]  ;;  %v78_v11 = vld [vmem:[%s2060_s1 + $0x1b8] sm:$0xff] }
   0x5   :  { %168 = vmatpush.msra.mxu2 %v81_v6  ;;  %203 = vmatpush.msra.mxu3 %v82_v7  ;;  %v71_v12 = vld [vmem:[%s2060_s1 + $0x180] sm:$0xff]  ;;  %v72_v13 = vld [vmem:[%s2060_s1 + $0x188] sm:$0xff]  ;;  %v73_v14 = vld [vmem:[%s2060_s1 + $0x190] sm:$0xff] }
   0x6   :  { %99 = vmatpush.msra.mxu0 %v75_v8  ;;  %134 = vmatpush.msra.mxu1 %v76_v9  ;;  %v74_v15 = vld [vmem:[%s2060_s1 + $0x198] sm:$0xff]  ;;  %v67_v16 = vld [vmem:[%s2060_s1 + $0x160] sm:$0xff]  ;;  %v68_v17 = vld [vmem:[%s2060_s1 + $0x168] sm:$0xff] }
   0x7   :  { %169 = vmatpush.msra.mxu2 %v77_v10  ;;  %204 = vmatpush.msra.mxu3 %v78_v11  ;;  %v69_v18 = vld [vmem:[%s2060_s1 + $0x170] sm:$0xff]  ;;  %v70_v19 = vld [vmem:[%s2060_s1 + $0x178] sm:$0xff]  ;;  %v63_v20 = vld [vmem:[%s2060_s1 + $0x140] sm:$0xff] }
   0x8   :  { %100 = vmatpush.msra.mxu0 %v71_v12  ;;  %135 = vmatpush.msra.mxu1 %v72_v13  ;;  %v64_v21 = vld [vmem:[%s2060_s1 + $0x148] sm:$0xff]  ;;  %v65_v22 = vld [vmem:[%s2060_s1 + $0x150] sm:$0xff]  ;;  %v66_v23 = vld [vmem:[%s2060_s1 + $0x158] sm:$0xff] }
   0x9   :  { %170 = vmatpush.msra.mxu2 %v73_v14  ;;  %205 = vmatpush.msra.mxu3 %v74_v15  ;;  %v59_v24 = vld [vmem:[%s2060_s1 + $0x120] sm:$0xff]  ;;  %v60_v25 = vld [vmem:[%s2060_s1 + $0x128] sm:$0xff]  ;;  %v61_v26 = vld [vmem:[%s2060_s1 + $0x130] sm:$0xff] }
   0xa   :  { %101 = vmatpush.msra.mxu0 %v67_v16  ;;  %136 = vmatpush.msra.mxu1 %v68_v17  ;;  %v62_v27 = vld [vmem:[%s2060_s1 + $0x138] sm:$0xff]  ;;  %v55_v28 = vld [vmem:[%s2060_s1 + $0x100] sm:$0xff]  ;;  %v56_v29 = vld [vmem:[%s2060_s1 + $0x108] sm:$0xff] }
   0xb   :  { %171 = vmatpush.msra.mxu2 %v69_v18  ;;  %206 = vmatpush.msra.mxu3 %v70_v19  ;;  %v57_v30 = vld [vmem:[%s2060_s1 + $0x110] sm:$0xff]  ;;  %v58_v31 = vld [vmem:[%s2060_s1 + $0x118] sm:$0xff]  ;;  %v51_v32 = vld [vmem:[%s2060_s1 + $0xe0] sm:$0xff] }
   0xc   :  { %102 = vmatpush.msra.mxu0 %v63_v20  ;;  %137 = vmatpush.msra.mxu1 %v64_v21  ;;  %v52_v33 = vld [vmem:[%s2060_s1 + $0xe8] sm:$0xff]  ;;  %v53_v34 = vld [vmem:[%s2060_s1 + $0xf0] sm:$0xff]  ;;  %v54_v35 = vld [vmem:[%s2060_s1 + $0xf8] sm:$0xff] }
   0xd   :  { %172 = vmatpush.msra.mxu2 %v65_v22  ;;  %207 = vmatpush.msra.mxu3 %v66_v23  ;;  %v47_v36 = vld [vmem:[%s2060_s1 + $0xc0] sm:$0xff]  ;;  %v48_v37 = vld [vmem:[%s2060_s1 + $0xc8] sm:$0xff]  ;;  %v49_v38 = vld [vmem:[%s2060_s1 + $0xd0] sm:$0xff] }
   0xe   :  { %103 = vmatpush.msra.mxu0 %v59_v24  ;;  %138 = vmatpush.msra.mxu1 %v60_v25  ;;  %v50_v39 = vld [vmem:[%s2060_s1 + $0xd8] sm:$0xff]  ;;  %v43_v40 = vld [vmem:[%s2060_s1 + $0xa0] sm:$0xff]  ;;  %v44_v41 = vld [vmem:[%s2060_s1 + $0xa8] sm:$0xff] }
   0xf   :  { %173 = vmatpush.msra.mxu2 %v61_v26  ;;  %208 = vmatpush.msra.mxu3 %v62_v27  ;;  %v45_v42 = vld [vmem:[%s2060_s1 + $0xb0] sm:$0xff]  ;;  %v46_v43 = vld [vmem:[%s2060_s1 + $0xb8] sm:$0xff]  ;;  %v39_v44 = vld [vmem:[%s2060_s1 + $0x80] sm:$0xff] }
  0x10   :  { %104 = vmatpush.msra.mxu0 %v55_v28  ;;  %139 = vmatpush.msra.mxu1 %v56_v29  ;;  %v40_v45 = vld [vmem:[%s2060_s1 + $0x88] sm:$0xff]  ;;  %v41_v46 = vld [vmem:[%s2060_s1 + $0x90] sm:$0xff]  ;;  %v42_v47 = vld [vmem:[%s2060_s1 + $0x98] sm:$0xff] }
  0x11   :  { %174 = vmatpush.msra.mxu2 %v57_v30  ;;  %209 = vmatpush.msra.mxu3 %v58_v31  ;;  %v35_v48 = vld [vmem:[%s2060_s1 + $0x60] sm:$0xff]  ;;  %v36_v49 = vld [vmem:[%s2060_s1 + $0x68] sm:$0xff]  ;;  %v37_v50 = vld [vmem:[%s2060_s1 + $0x70] sm:$0xff] }
  0x12   :  { %105 = vmatpush.msra.mxu0 %v51_v32  ;;  %140 = vmatpush.msra.mxu1 %v52_v33  ;;  %v38_v51 = vld [vmem:[%s2060_s1 + $0x78] sm:$0xff]  ;;  %v31_v52 = vld [vmem:[%s2060_s1 + $0x40] sm:$0xff]  ;;  %v32_v53 = vld [vmem:[%s2060_s1 + $0x48] sm:$0xff] }
  0x13   :  { %175 = vmatpush.msra.mxu2 %v53_v34  ;;  %210 = vmatpush.msra.mxu3 %v54_v35  ;;  %v33_v54 = vld [vmem:[%s2060_s1 + $0x50] sm:$0xff]  ;;  %v34_v55 = vld [vmem:[%s2060_s1 + $0x58] sm:$0xff]  ;;  %v27_v56 = vld [vmem:[%s2060_s1 + $0x20] sm:$0xff] }
  0x14   :  { %106 = vmatpush.msra.mxu0 %v47_v36  ;;  %141 = vmatpush.msra.mxu1 %v48_v37  ;;  %v28_v57 = vld [vmem:[%s2060_s1 + $0x28] sm:$0xff]  ;;  %v29_v58 = vld [vmem:[%s2060_s1 + $0x30] sm:$0xff]  ;;  %v30_v59 = vld [vmem:[%s2060_s1 + $0x38] sm:$0xff] }
  0x15   :  { %176 = vmatpush.msra.mxu2 %v49_v38  ;;  %211 = vmatpush.msra.mxu3 %v50_v39  ;;  %v23_v60 = vld [vmem:[%s2060_s1] sm:$0xff]  ;;  %v24_v61 = vld [vmem:[%s2060_s1 + $0x8] sm:$0xff]  ;;  %v25_v62 = vld [vmem:[%s2060_s1 + $0x10] sm:$0xff] }
  0x16   :  { %107 = vmatpush.msra.mxu0 %v43_v40  ;;  %142 = vmatpush.msra.mxu1 %v44_v41  ;;  %v26_v63 = vld [vmem:[%s2060_s1 + $0x18] sm:$0xff]  ;;  %v17_v0 = vld [vmem:[%s2061_s0] sm:$0xff]  ;;  %v1329_v2 = vld [vmem:[%s2062_s2 + $0x1e8] sm:$0xff] }
  0x17   :  { %177 = vmatpush.msra.mxu2 %v45_v42  ;;  %212 = vmatpush.msra.mxu3 %v46_v43  ;;  %v1324_v1 = vld [vmem:[%s2062_s2 + $0x1e0] sm:$0xff]  ;;  %v1334_v3 = vld [vmem:[%s2062_s2 + $0x1f8] sm:$0xff]  ;;  %v1339_v4 = vld [vmem:[%s2062_s2 + $0x1f0] sm:$0xff] }
  0x18   :  { %108 = vmatpush.msra.mxu0 %v39_v44  ;;  %143 = vmatpush.msra.mxu1 %v40_v45  ;;  %v1344_v5 = vld [vmem:[%s2062_s2 + $0x1c0] sm:$0xff]  ;;  %v1349_v6 = vld [vmem:[%s2062_s2 + $0x1c8] sm:$0xff]  ;;  %v1356_v7 = vld [vmem:[%s2062_s2 + $0x1d8] sm:$0xff] }
  0x19   :  { %178 = vmatpush.msra.mxu2 %v41_v46  ;;  %213 = vmatpush.msra.mxu3 %v42_v47  ;;  %v1361_v8 = vld [vmem:[%s2062_s2 + $0x1d0] sm:$0xff]  ;;  %v1367_v9 = vld [vmem:[%s2062_s2 + $0x1a0] sm:$0xff]  ;;  %v1372_v10 = vld [vmem:[%s2062_s2 + $0x1a8] sm:$0xff] }
  0x1a   :  { %109 = vmatpush.msra.mxu0 %v35_v48  ;;  %144 = vmatpush.msra.mxu1 %v36_v49  ;;  %v1380_v11 = vld [vmem:[%s2062_s2 + $0x1b8] sm:$0xff]  ;;  %v1385_v12 = vld [vmem:[%s2062_s2 + $0x1b0] sm:$0xff]  ;;  %v18_v13 = vld [vmem:[%s2061_s0 + $0x8] sm:$0xff] }
  0x1b   :  { %179 = vmatpush.msra.mxu2 %v37_v50  ;;  %214 = vmatpush.msra.mxu3 %v38_v51  ;;  %v1397_v14 = vld [vmem:[%s2062_s2 + $0x180] sm:$0xff]  ;;  %v1402_v15 = vld [vmem:[%s2062_s2 + $0x188] sm:$0xff]  ;;  %v1409_v16 = vld [vmem:[%s2062_s2 + $0x198] sm:$0xff] }
  0x1c   :  { %110 = vmatpush.msra.mxu0 %v31_v52  ;;  %145 = vmatpush.msra.mxu1 %v32_v53  ;;  %v1414_v17 = vld [vmem:[%s2062_s2 + $0x190] sm:$0xff]  ;;  %v1419_v18 = vld [vmem:[%s2062_s2 + $0x160] sm:$0xff]  ;;  %v1424_v19 = vld [vmem:[%s2062_s2 + $0x168] sm:$0xff] }
  0x1d   :  { %180 = vmatpush.msra.mxu2 %v33_v54  ;;  %215 = vmatpush.msra.mxu3 %v34_v55  ;;  %v1431_v20 = vld [vmem:[%s2062_s2 + $0x178] sm:$0xff]  ;;  %v1436_v21 = vld [vmem:[%s2062_s2 + $0x170] sm:$0xff]  ;;  %v1442_v22 = vld [vmem:[%s2062_s2 + $0x140] sm:$0xff] }
  0x1e   :  { %111 = vmatpush.msra.mxu0 %v27_v56  ;;  %146 = vmatpush.msra.mxu1 %v28_v57  ;;  %v1447_v23 = vld [vmem:[%s2062_s2 + $0x148] sm:$0xff]  ;;  %v1455_v24 = vld [vmem:[%s2062_s2 + $0x158] sm:$0xff]  ;;  %v1460_v25 = vld [vmem:[%s2062_s2 + $0x150] sm:$0xff] }
  0x1f   :  { %181 = vmatpush.msra.mxu2 %v29_v58  ;;  %216 = vmatpush.msra.mxu3 %v30_v59  ;;  %v19_v26 = vld [vmem:[%s2061_s0 + $0x10] sm:$0xff]  ;;  %v1472_v27 = vld [vmem:[%s2062_s2 + $0x120] sm:$0xff]  ;;  %v1477_v28 = vld [vmem:[%s2062_s2 + $0x128] sm:$0xff] }
  0x20   :  { %112 = vmatpush.msra.mxu0 %v23_v60  ;;  %147 = vmatpush.msra.mxu1 %v24_v61  ;;  %v1484_v29 = vld [vmem:[%s2062_s2 + $0x138] sm:$0xff]  ;;  %v1489_v30 = vld [vmem:[%s2062_s2 + $0x130] sm:$0xff]  ;;  %v1494_v31 = vld [vmem:[%s2062_s2 + $0x100] sm:$0xff] }
  0x21   :  { %182 = vmatpush.msra.mxu2 %v25_v62  ;;  %217 = vmatpush.msra.mxu3 %v26_v63  ;;  %v1499_v32 = vld [vmem:[%s2062_s2 + $0x108] sm:$0xff]  ;;  %v1506_v33 = vld [vmem:[%s2062_s2 + $0x118] sm:$0xff]  ;;  %v1511_v34 = vld [vmem:[%s2062_s2 + $0x110] sm:$0xff] }
  0x22   :  { %113 = vmatmul.f32.vlgmr.msra.gmra.mxu0 %v17_v0  ;;  %148 = vmatmul.f32.vlgmr.msra.gmra.mxu1 %v17_v0  ;;  %v1517_v35 = vld [vmem:[%s2062_s2 + $0xe0] sm:$0xff]  ;;  %v1522_v36 = vld [vmem:[%s2062_s2 + $0xe8] sm:$0xff]  ;;  %v1530_v37 = vld [vmem:[%s2062_s2 + $0xf8] sm:$0xff] }
  0x23   :  { %183 = vmatmul.f32.vlgmr.msra.gmra.mxu2 %v17_v0  ;;  %218 = vmatmul.f32.vlgmr.msra.gmra.mxu3 %v17_v0  ;;  %v1535_v38 = vld [vmem:[%s2062_s2 + $0xf0] sm:$0xff]  ;;  %v20_v39 = vld [vmem:[%s2061_s0 + $0x18] sm:$0xff]  ;;  %v1547_v40 = vld [vmem:[%s2062_s2 + $0xc0] sm:$0xff] }
  0x24   :  { %301 = vmatpush.msrb.mxu0 %v1324_v1  ;;  %324 = vmatpush.msrb.mxu1 %v1329_v2  ;;  %v1552_v41 = vld [vmem:[%s2062_s2 + $0xc8] sm:$0xff]  ;;  %v1559_v42 = vld [vmem:[%s2062_s2 + $0xd8] sm:$0xff]  ;;  %v1564_v43 = vld [vmem:[%s2062_s2 + $0xd0] sm:$0xff] }
  0x25   :  { %370 = vmatpush.msrb.mxu3 %v1334_v3  ;;  %347 = vmatpush.msrb.mxu2 %v1339_v4  ;;  %v1569_v44 = vld [vmem:[%s2062_s2 + $0xa0] sm:$0xff]  ;;  %v1574_v45 = vld [vmem:[%s2062_s2 + $0xa8] sm:$0xff]  ;;  %v1581_v46 = vld [vmem:[%s2062_s2 + $0xb8] sm:$0xff] }
  0x26   :  { %302 = vmatpush.msrb.mxu0 %v1344_v5  ;;  %325 = vmatpush.msrb.mxu1 %v1349_v6  ;;  %v1586_v47 = vld [vmem:[%s2062_s2 + $0xb0] sm:$0xff]  ;;  %v1592_v48 = vld [vmem:[%s2062_s2 + $0x80] sm:$0xff]  ;;  %v1597_v49 = vld [vmem:[%s2062_s2 + $0x88] sm:$0xff] }
  0x27   :  { %371 = vmatpush.msrb.mxu3 %v1356_v7  ;;  %348 = vmatpush.msrb.mxu2 %v1361_v8  ;;  %v1605_v50 = vld [vmem:[%s2062_s2 + $0x98] sm:$0xff]  ;;  %v1610_v51 = vld [vmem:[%s2062_s2 + $0x90] sm:$0xff]  ;;  %v21_v52 = vld [vmem:[%s2061_s0 + $0x20] sm:$0xff] }
  0x28   :  { %303 = vmatpush.msrb.mxu0 %v1367_v9  ;;  %326 = vmatpush.msrb.mxu1 %v1372_v10  ;;  %v1622_v53 = vld [vmem:[%s2062_s2 + $0x60] sm:$0xff]  ;;  %v1627_v54 = vld [vmem:[%s2062_s2 + $0x68] sm:$0xff]  ;;  %v1634_v55 = vld [vmem:[%s2062_s2 + $0x70] sm:$0xff] }
  0x29   :  { %372 = vmatpush.msrb.mxu3 %v1380_v11  ;;  %349 = vmatpush.msrb.mxu2 %v1385_v12  ;;  %v1639_v56 = vld [vmem:[%s2062_s2 + $0x78] sm:$0xff]  ;;  %v1644_v57 = vld [vmem:[%s2062_s2 + $0x40] sm:$0xff]  ;;  %v1649_v58 = vld [vmem:[%s2062_s2 + $0x48] sm:$0xff] }
  0x2a   :  { %116 = vmatmul.f32.gmra.mxu0 %v18_v13  ;;  %151 = vmatmul.f32.gmra.mxu1 %v18_v13  ;;  %v1656_v59 = vld [vmem:[%s2062_s2 + $0x50] sm:$0xff]  ;;  %v1661_v60 = vld [vmem:[%s2062_s2 + $0x58] sm:$0xff]  ;;  %v1668_v61 = vld [vmem:[%s2062_s2 + $0x20] sm:$0xff] }
  0x2b   :  { %186 = vmatmul.f32.gmra.mxu2 %v18_v13  ;;  %221 = vmatmul.f32.gmra.mxu3 %v18_v13  ;;  %v1673_v62 = vld [vmem:[%s2062_s2 + $0x28] sm:$0xff]  ;;  %v1680_v63 = vld [vmem:[%s2062_s2 + $0x30] sm:$0xff]  ;;  %v1685_v0 = vld [vmem:[%s2062_s2 + $0x38] sm:$0xff] }
  0x2c   :  { %304 = vmatpush.msrb.mxu0 %v1397_v14  ;;  %327 = vmatpush.msrb.mxu1 %v1402_v15  ;;  %2067 = vst [vmem:[#allocation2_spill] sm:$0xff] %v1673_v62  ;;  %v22_v13 = vld [vmem:[%s2061_s0 + $0x28] sm:$0xff] }
  0x2d   :  { %373 = vmatpush.msrb.mxu3 %v1409_v16  ;;  %350 = vmatpush.msrb.mxu2 %v1414_v17 }
  0x2e   :  { %305 = vmatpush.msrb.mxu0 %v1419_v18  ;;  %328 = vmatpush.msrb.mxu1 %v1424_v19 }
  0x2f   :  { %374 = vmatpush.msrb.mxu3 %v1431_v20  ;;  %351 = vmatpush.msrb.mxu2 %v1436_v21 }
  0x30   :  { %306 = vmatpush.msrb.mxu0 %v1442_v22  ;;  %329 = vmatpush.msrb.mxu1 %v1447_v23 }
  0x31   :  { %375 = vmatpush.msrb.mxu3 %v1455_v24  ;;  %352 = vmatpush.msrb.mxu2 %v1460_v25 }
  0x32   :  { %119 = vmatmul.f32.gmra.mxu0 %v19_v26  ;;  %154 = vmatmul.f32.gmra.mxu1 %v19_v26 }
  0x33   :  { %189 = vmatmul.f32.gmra.mxu2 %v19_v26  ;;  %224 = vmatmul.f32.gmra.mxu3 %v19_v26  ;;  %v1697_v26 = vld [vmem:[%s2062_s2] sm:$0xff] }
  0x34   :  { %307 = vmatpush.msrb.mxu0 %v1472_v27  ;;  %330 = vmatpush.msrb.mxu1 %v1477_v28 }
  0x35   :  { %376 = vmatpush.msrb.mxu3 %v1484_v29  ;;  %353 = vmatpush.msrb.mxu2 %v1489_v30 }
  0x36   :  { %308 = vmatpush.msrb.mxu0 %v1494_v31  ;;  %331 = vmatpush.msrb.mxu1 %v1499_v32 }
  0x37   :  { %377 = vmatpush.msrb.mxu3 %v1506_v33  ;;  %354 = vmatpush.msrb.mxu2 %v1511_v34 }
  0x38   :  { %309 = vmatpush.msrb.mxu0 %v1517_v35  ;;  %332 = vmatpush.msrb.mxu1 %v1522_v36 }
  0x39   :  { %378 = vmatpush.msrb.mxu3 %v1530_v37  ;;  %355 = vmatpush.msrb.mxu2 %v1535_v38 }
  0x3a   :  { %122 = vmatmul.f32.gmra.mxu0 %v20_v39  ;;  %157 = vmatmul.f32.gmra.mxu1 %v20_v39 }
  0x3b   :  { %192 = vmatmul.f32.gmra.mxu2 %v20_v39  ;;  %227 = vmatmul.f32.gmra.mxu3 %v20_v39  ;;  %v1702_v39 = vld [vmem:[%s2062_s2 + $0x8] sm:$0xff] }
  0x3c   :  { %310 = vmatpush.msrb.mxu0 %v1547_v40  ;;  %333 = vmatpush.msrb.mxu1 %v1552_v41 }
  0x3d   :  { %379 = vmatpush.msrb.mxu3 %v1559_v42  ;;  %356 = vmatpush.msrb.mxu2 %v1564_v43 }
  0x3e   :  { %311 = vmatpush.msrb.mxu0 %v1569_v44  ;;  %334 = vmatpush.msrb.mxu1 %v1574_v45 }
  0x3f   :  { %380 = vmatpush.msrb.mxu3 %v1581_v46  ;;  %357 = vmatpush.msrb.mxu2 %v1586_v47 }
  0x40   :  { %312 = vmatpush.msrb.mxu0 %v1592_v48  ;;  %335 = vmatpush.msrb.mxu1 %v1597_v49 }
  0x41   :  { %381 = vmatpush.msrb.mxu3 %v1605_v50  ;;  %358 = vmatpush.msrb.mxu2 %v1610_v51 }
  0x42   :  { %125 = vmatmul.f32.gmra.mxu0 %v21_v52  ;;  %160 = vmatmul.f32.gmra.mxu1 %v21_v52 }
  0x43   :  { %195 = vmatmul.f32.gmra.mxu2 %v21_v52  ;;  %230 = vmatmul.f32.gmra.mxu3 %v21_v52  ;;  %v1709_v52 = vld [vmem:[%s2062_s2 + $0x10] sm:$0xff] }
  0x44   :  { %313 = vmatpush.msrb.mxu0 %v1622_v53  ;;  %336 = vmatpush.msrb.mxu1 %v1627_v54 }
  0x45   :  { %359 = vmatpush.msrb.mxu2 %v1634_v55  ;;  %382 = vmatpush.msrb.mxu3 %v1639_v56 }
  0x46   :  { %314 = vmatpush.msrb.mxu0 %v1644_v57  ;;  %337 = vmatpush.msrb.mxu1 %v1649_v58 }
  0x47   :  { %360 = vmatpush.msrb.mxu2 %v1656_v59  ;;  %383 = vmatpush.msrb.mxu3 %v1661_v60 }
  0x48   :  { %315 = vmatpush.msrb.mxu0 %v1668_v61  ;;  %338 = vmatpush.msrb.mxu1 %v1673_v62  ;;  %v1714_v62 = vld [vmem:[%s2062_s2 + $0x18] sm:$0xff] }
  0x49   :  { %361 = vmatpush.msrb.mxu2 %v1680_v63  ;;  %384 = vmatpush.msrb.mxu3 %v1685_v0 }
  0x4a   :  { %128 = vmatmul.f32.gmra.mxu0 %v22_v13  ;;  %163 = vmatmul.f32.gmra.mxu1 %v22_v13 }
  0x4b   :  { %198 = vmatmul.f32.gmra.mxu2 %v22_v13  ;;  %233 = vmatmul.f32.gmra.mxu3 %v22_v13  ;;  %v1100_v13 = vmov 0.0  }
  0x4c   :  { %316 = vmatpush.msrb.mxu0 %v1697_v26  ;;  %339 = vmatpush.msrb.mxu1 %v1702_v39 }
  0x4d   :  { %362 = vmatpush.msrb.mxu2 %v1709_v52  ;;  %385 = vmatpush.msrb.mxu3 %v1714_v62 }
  0x4e   :  { %527 = vmatpush.msra.mxu0 %v1324_v1  ;;  %550 = vmatpush.msra.mxu1 %v1329_v2 }
  0x4f   :  { %573 = vmatpush.msra.mxu2 %v1339_v4  ;;  %596 = vmatpush.msra.mxu3 %v1334_v3 }
  0x50   :  { %528 = vmatpush.msra.mxu0 %v1344_v5  ;;  %551 = vmatpush.msra.mxu1 %v1349_v6 }
  0x51   :  { %574 = vmatpush.msra.mxu2 %v1361_v8  ;;  %597 = vmatpush.msra.mxu3 %v1356_v7 }
  0x52   :  { %317 = vmatmul.f32.vlgmr.msrb.gmra.mxu0 %v1100_v13  ;;  %340 = vmatmul.f32.vlgmr.msrb.gmra.mxu1 %v1100_v13 }
  0x53   :  { %363 = vmatmul.f32.vlgmr.msrb.gmra.mxu2 %v1100_v13  ;;  %386 = vmatmul.f32.vlgmr.msrb.gmra.mxu3 %v1100_v13 }
  0x54   :  { %529 = vmatpush.msra.mxu0 %v1367_v9  ;;  %552 = vmatpush.msra.mxu1 %v1372_v10 }
  0x55   :  { %575 = vmatpush.msra.mxu2 %v1385_v12  ;;  %598 = vmatpush.msra.mxu3 %v1380_v11 }
  0x56   :  { %530 = vmatpush.msra.mxu0 %v1397_v14  ;;  %553 = vmatpush.msra.mxu1 %v1402_v15 }
  0x57   :  { %576 = vmatpush.msra.mxu2 %v1414_v17  ;;  %599 = vmatpush.msra.mxu3 %v1409_v16 }
  0x58   :  { %531 = vmatpush.msra.mxu0 %v1419_v18  ;;  %554 = vmatpush.msra.mxu1 %v1424_v19 }
  0x59   :  { %577 = vmatpush.msra.mxu2 %v1436_v21  ;;  %600 = vmatpush.msra.mxu3 %v1431_v20 }
  0x5a   :  { %320 = vmatmul.f32.gmra.mxu0 %v1100_v13  ;;  %343 = vmatmul.f32.gmra.mxu1 %v1100_v13 }
  0x5b   :  { %366 = vmatmul.f32.gmra.mxu2 %v1100_v13  ;;  %389 = vmatmul.f32.gmra.mxu3 %v1100_v13  ;;  %v2068_v13 = vld [vmem:[#allocation2_spill] sm:$0xff] }
  0x5c   :  { %532 = vmatpush.msra.mxu0 %v1442_v22  ;;  %555 = vmatpush.msra.mxu1 %v1447_v23 }
  0x5d   :  { %578 = vmatpush.msra.mxu2 %v1460_v25  ;;  %601 = vmatpush.msra.mxu3 %v1455_v24 }
  0x5e   :  { %533 = vmatpush.msra.mxu0 %v1472_v27  ;;  %556 = vmatpush.msra.mxu1 %v1477_v28 }
  0x5f   :  { %579 = vmatpush.msra.mxu2 %v1489_v30  ;;  %602 = vmatpush.msra.mxu3 %v1484_v29 }
  0x60   :  { %534 = vmatpush.msra.mxu0 %v1494_v31  ;;  %557 = vmatpush.msra.mxu1 %v1499_v32 }
  0x61   :  { %580 = vmatpush.msra.mxu2 %v1511_v34  ;;  %603 = vmatpush.msra.mxu3 %v1506_v33 }
  0x62   :  { %535 = vmatpush.msra.mxu0 %v1517_v35  ;;  %558 = vmatpush.msra.mxu1 %v1522_v36 }
  0x63   :  { %581 = vmatpush.msra.mxu2 %v1535_v38  ;;  %604 = vmatpush.msra.mxu3 %v1530_v37 }
  0x64   :  { %536 = vmatpush.msra.mxu0 %v1547_v40  ;;  %559 = vmatpush.msra.mxu1 %v1552_v41 }
  0x65   :  { %582 = vmatpush.msra.mxu2 %v1564_v43  ;;  %605 = vmatpush.msra.mxu3 %v1559_v42 }
  0x66   :  { %537 = vmatpush.msra.mxu0 %v1569_v44  ;;  %560 = vmatpush.msra.mxu1 %v1574_v45 }
  0x67   :  { %583 = vmatpush.msra.mxu2 %v1586_v47  ;;  %606 = vmatpush.msra.mxu3 %v1581_v46 }
  0x68   :  { %538 = vmatpush.msra.mxu0 %v1592_v48  ;;  %561 = vmatpush.msra.mxu1 %v1597_v49 }
  0x69   :  { %584 = vmatpush.msra.mxu2 %v1610_v51  ;;  %607 = vmatpush.msra.mxu3 %v1605_v50 }
  0x6a   :  { %539 = vmatpush.msra.mxu0 %v1622_v53  ;;  %562 = vmatpush.msra.mxu1 %v1627_v54 }
  0x6b   :  { %585 = vmatpush.msra.mxu2 %v1634_v55  ;;  %608 = vmatpush.msra.mxu3 %v1639_v56 }
  0x6c   :  { %540 = vmatpush.msra.mxu0 %v1644_v57  ;;  %563 = vmatpush.msra.mxu1 %v1649_v58 }
  0x6d   :  { %586 = vmatpush.msra.mxu2 %v1656_v59  ;;  %609 = vmatpush.msra.mxu3 %v1661_v60 }
  0x6e   :  { %541 = vmatpush.msra.mxu0 %v1668_v61  ;;  %564 = vmatpush.msra.mxu1 %v2068_v13 }
  0x6f   :  { %587 = vmatpush.msra.mxu2 %v1680_v63  ;;  %610 = vmatpush.msra.mxu3 %v1685_v0 }
  0x70   :  { %542 = vmatpush.msra.mxu0 %v1697_v26  ;;  %565 = vmatpush.msra.mxu1 %v1702_v39 }
  0x71   :  { %588 = vmatpush.msra.mxu2 %v1709_v52  ;;  %611 = vmatpush.msra.mxu3 %v1714_v62 }
  0x72   :  { %753 = vmatpush.msrb.mxu0 %v1324_v1  ;;  %776 = vmatpush.msrb.mxu1 %v1329_v2 }
  0x73   :  { %799 = vmatpush.msrb.mxu2 %v1339_v4  ;;  %822 = vmatpush.msrb.mxu3 %v1334_v3 }
  0x74   :  { %754 = vmatpush.msrb.mxu0 %v1344_v5  ;;  %777 = vmatpush.msrb.mxu1 %v1349_v6 }
  0x75   :  { %800 = vmatpush.msrb.mxu2 %v1361_v8  ;;  %823 = vmatpush.msrb.mxu3 %v1356_v7  ;;  %v87_v7 = vld [vmem:[%s2063_s3] sm:$0xf] }
  0x76   :  { %755 = vmatpush.msrb.mxu0 %v1367_v9  ;;  %778 = vmatpush.msrb.mxu1 %v1372_v10  ;;  %v89_v8 = vperm.slane %v87_v7, 0  ;;  %v90_v9 = vperm.slane %v87_v7, 1 }
  0x77   :  { %801 = vmatpush.msrb.mxu2 %v1385_v12  ;;  %824 = vmatpush.msrb.mxu3 %v1380_v11 }
  0x78   :  { %756 = vmatpush.msrb.mxu0 %v1397_v14  ;;  %779 = vmatpush.msrb.mxu1 %v1402_v15 }
  0x79   :  { %802 = vmatpush.msrb.mxu2 %v1414_v17  ;;  %825 = vmatpush.msrb.mxu3 %v1409_v16  ;;  %v1861_v17 = vperm.slane %v87_v7, 2 }
  0x7a   :  { %757 = vmatpush.msrb.mxu0 %v1419_v18  ;;  %780 = vmatpush.msrb.mxu1 %v1424_v19  ;;  %v92_v18 = vperm.slane %v87_v7, 3 }
  0x7b   :  { %803 = vmatpush.msrb.mxu2 %v1436_v21  ;;  %826 = vmatpush.msrb.mxu3 %v1431_v20 }
  0x7c   :  { %758 = vmatpush.msrb.mxu0 %v1442_v22  ;;  %781 = vmatpush.msrb.mxu1 %v1447_v23 }
  0x7d   :  { %804 = vmatpush.msrb.mxu2 %v1460_v25  ;;  %827 = vmatpush.msrb.mxu3 %v1455_v24 }
  0x7e   :  { %759 = vmatpush.msrb.mxu0 %v1472_v27  ;;  %782 = vmatpush.msrb.mxu1 %v1477_v28 }
  0x7f   :  { %805 = vmatpush.msrb.mxu2 %v1489_v30  ;;  %828 = vmatpush.msrb.mxu3 %v1484_v29 }
  0x80   :  { %760 = vmatpush.msrb.mxu0 %v1494_v31  ;;  %783 = vmatpush.msrb.mxu1 %v1499_v32 }
  0x81   :  { %806 = vmatpush.msrb.mxu2 %v1511_v34  ;;  %829 = vmatpush.msrb.mxu3 %v1506_v33 }
  0x82   :  { %761 = vmatpush.msrb.mxu0 %v1517_v35  ;;  %784 = vmatpush.msrb.mxu1 %v1522_v36 }
  0x83   :  { %807 = vmatpush.msrb.mxu2 %v1535_v38  ;;  %830 = vmatpush.msrb.mxu3 %v1530_v37 }
  0x84   :  { %762 = vmatpush.msrb.mxu0 %v1547_v40  ;;  %785 = vmatpush.msrb.mxu1 %v1552_v41 }
  0x85   :  { %808 = vmatpush.msrb.mxu2 %v1564_v43  ;;  %831 = vmatpush.msrb.mxu3 %v1559_v42 }
  0x86   :  { %763 = vmatpush.msrb.mxu0 %v1569_v44  ;;  %786 = vmatpush.msrb.mxu1 %v1574_v45 }
  0x87   :  { %809 = vmatpush.msrb.mxu2 %v1586_v47  ;;  %832 = vmatpush.msrb.mxu3 %v1581_v46 }
  0x88   :  { %764 = vmatpush.msrb.mxu0 %v1592_v48  ;;  %787 = vmatpush.msrb.mxu1 %v1597_v49 }
  0x89   :  { %810 = vmatpush.msrb.mxu2 %v1610_v51  ;;  %833 = vmatpush.msrb.mxu3 %v1605_v50 }
  0x8a   :  { %765 = vmatpush.msrb.mxu0 %v1622_v53  ;;  %788 = vmatpush.msrb.mxu1 %v1627_v54 }
  0x8b   :  { %811 = vmatpush.msrb.mxu2 %v1634_v55  ;;  %834 = vmatpush.msrb.mxu3 %v1639_v56 }
  0x8c   :  { %766 = vmatpush.msrb.mxu0 %v1644_v57  ;;  %789 = vmatpush.msrb.mxu1 %v1649_v58 }
  0x8d   :  { %812 = vmatpush.msrb.mxu2 %v1656_v59  ;;  %835 = vmatpush.msrb.mxu3 %v1661_v60 }
  0x8e   :  { %767 = vmatpush.msrb.mxu0 %v1668_v61  ;;  %790 = vmatpush.msrb.mxu1 %v2068_v13 }
  0x8f   :  { %813 = vmatpush.msrb.mxu2 %v1680_v63  ;;  %836 = vmatpush.msrb.mxu3 %v1685_v0 }
  0x90   :  { %768 = vmatpush.msrb.mxu0 %v1697_v26  ;;  %791 = vmatpush.msrb.mxu1 %v1702_v39 }
  0x91   :  { %814 = vmatpush.msrb.mxu2 %v1709_v52  ;;  %837 = vmatpush.msrb.mxu3 %v1714_v62 }
  0x9f   :  { %v114_v1 = vpop.f32.mrf.mxu0  ;;  %v149_v2 = vpop.f32.mrf.mxu1 }
  0xa0   :  { %v115_v45 = vadd.f32 %v114_v1, %v89_v8  ;;  %v150_v46 = vadd.f32 %v149_v2, %v90_v9 }
  0xa6   :  { %v1848_v3 = vpop.f32.mrf.mxu2  ;;  %v219_v4 = vpop.f32.mrf.mxu3 }
  0xa7   :  { %v117_v5 = vpop.f32.mrf.mxu0  ;;  %v152_v6 = vpop.f32.mrf.mxu1  ;;  %v220_v58 = vadd.f32 %v219_v4, %v92_v18  ;;  %v185_v4 = vadd.f32 %v1848_v3, %v1861_v17 }
  0xa8   :  { %v118_v59 = vadd.f32 %v117_v5, %v89_v8  ;;  %v153_v60 = vadd.f32 %v152_v6, %v90_v9 }
  0xae   :  { %v1853_v10 = vpop.f32.mrf.mxu2  ;;  %v1855_v11 = vpop.f32.mrf.mxu3 }
  0xaf   :  { %v120_v12 = vpop.f32.mrf.mxu0  ;;  %v155_v14 = vpop.f32.mrf.mxu1  ;;  %v223_v5 = vadd.f32 %v1855_v11, %v92_v18  ;;  %v188_v11 = vadd.f32 %v1853_v10, %v1861_v17 }
  0xb0   :  { %v1857_v15 = vadd.f32 %v120_v12, %v89_v8  ;;  %v1859_v16 = vadd.f32 %v155_v14, %v90_v9 }
  0xb6   :  { %v190_v19 = vpop.f32.mrf.mxu2  ;;  %v225_v20 = vpop.f32.mrf.mxu3 }
  0xb7   :  { %v1864_v21 = vadd.f32 %v190_v19, %v1861_v17  ;;  %v1866_v22 = vadd.f32 %v225_v20, %v92_v18  ;;  %v123_v23 = vpop.f32.mrf.mxu0  ;;  %v158_v24 = vpop.f32.mrf.mxu1 }
  0xb8   :  { %v1868_v25 = vadd.f32 %v123_v23, %v89_v8  ;;  %v1870_v27 = vadd.f32 %v158_v24, %v90_v9 }
  0xbe   :  { %v193_v28 = vpop.f32.mrf.mxu2  ;;  %v228_v29 = vpop.f32.mrf.mxu3 }
  0xbf   :  { %v1873_v30 = vadd.f32 %v193_v28, %v1861_v17  ;;  %v1875_v31 = vadd.f32 %v228_v29, %v92_v18  ;;  %v126_v32 = vpop.f32.mrf.mxu0  ;;  %v161_v33 = vpop.f32.mrf.mxu1 }
  0xc0   :  { %v1877_v34 = vadd.f32 %v126_v32, %v89_v8  ;;  %v1879_v35 = vadd.f32 %v161_v33, %v90_v9 }
  0xc6   :  { %v196_v36 = vpop.f32.mrf.mxu2  ;;  %v231_v37 = vpop.f32.mrf.mxu3 }
  0xc7   :  { %v1882_v38 = vadd.f32 %v196_v36, %v1861_v17  ;;  %v1884_v40 = vadd.f32 %v231_v37, %v92_v18  ;;  %v129_v41 = vpop.f32.mrf.mxu0  ;;  %v164_v42 = vpop.f32.mrf.mxu1 }
  0xc8   :  { %v1886_v43 = vadd.f32 %v129_v41, %v89_v8  ;;  %v1888_v44 = vadd.f32 %v164_v42, %v90_v9 }
  0xce   :  { %v199_v47 = vpop.f32.mrf.mxu2  ;;  %v234_v48 = vpop.f32.mrf.mxu3 }
  0xcf   :  { %v1891_v49 = vadd.f32 %v199_v47, %v1861_v17  ;;  %v1893_v50 = vadd.f32 %v234_v48, %v92_v18  ;;  %v318_v51 = vpop.f32.mrf.mxu0  ;;  %v341_v53 = vpop.f32.mrf.mxu1 }
  0xd0   :  { %v393_v54 = vadd.f32 %v318_v51, %v115_v45  ;;  %v394_v55 = vadd.f32 %v341_v53, %v150_v46 }
  0xd2   :  { %v985_v56 = vmul.f32 -1.442695, %v393_v54  ;;  %v987_v57 = vmul.f32 -1.442695, %v394_v55 }
  0xd4   :  { %1004 = vpow2.f32 %v985_v56 }
  0xd5   :  { %1006 = vpow2.f32 %v987_v57 }
  0xd6   :  { %v387_v61 = vpop.f32.mrf.mxu3  ;;  %v364_v12 = vpop.f32.mrf.mxu2 }
  0xd7   :  { %v396_v62 = vadd.f32 %v387_v61, %v220_v58  ;;  %v321_v63 = vpop.f32.mrf.mxu0  ;;  %v344_v0 = vpop.f32.mrf.mxu1  ;;  %v395_v8 = vadd.f32 %v364_v12, %v185_v4 }
  0xd8   :  { %v397_v26 = vadd.f32 %v321_v63, %v118_v59  ;;  %v398_v39 = vadd.f32 %v344_v0, %v153_v60 }
  0xd9   :  { %v989_v52 = vmul.f32 -1.442695, %v396_v62 }
  0xda   :  { %v1005_v13 = vpop.eup %1004  ;;  %v986_v1 = vmul.f32 -1.442695, %v397_v26  ;;  %v988_v14 = vmul.f32 -1.442695, %v398_v39 }
  0xdb   :  { %v1007_v2 = vpop.eup %1006  ;;  %v407_v7 = vadd.f32 1.0, %v1005_v13  ;;  %1008 = vpow2.f32 %v989_v52 }
  0xdc   :  { %v445_v19 = vadd.f32 1.0, %v1007_v2  ;;  %1010 = vpow2.f32 %v986_v1 }
  0xdd   :  { %1012 = vrcp.f32 %v407_v7  ;;  %v418_v42 = vand.u32 2147483647, %v407_v7  ;;  %v420_v45 = vand.u32 2147483648, %v407_v7  ;;  %vm414_vm3 = vweird.f32 %v407_v7 }
  0xde   :  { %1014 = vrcp.f32 %v445_v19  ;;  %v390_v6 = vpop.f32.mrf.mxu3  ;;  %v367_v37 = vpop.f32.mrf.mxu2  ;;  %v458_v48 = vand.u32 2147483648, %v445_v19  ;;  %v456_v51 = vand.u32 2147483647, %v445_v19  ;;  %vm452_vm2 = vweird.f32 %v445_v19 }
  0xdf   :  { %1016 = vpow2.f32 %v988_v14  ;;  %v400_v9 = vadd.f32 %v390_v6, %v223_v5  ;;  %v399_v54 = vadd.f32 %v367_v37, %v188_v11  ;;  %vm419_vm4 = vcmp.eq.f32.partialorder %v418_v42, 8.507059e+37 }
  0xe0   :  { %1018 = vtanh.f32 %v395_v8  ;;  %v459_v58 = vor.u32 1.1754944e-38, %v458_v48  ;;  %v421_v59 = vor.u32 1.1754944e-38, %v420_v45  ;;  %vm457_vm7 = vcmp.eq.f32.partialorder %v456_v51, 8.507059e+37 }
  0xe1   :  { %v1009_v20 = vpop.eup %1008  ;;  %v990_v32 = vmul.f32 -1.442695, %v400_v9 }
  0xe2   :  { %v1011_v23 = vpop.eup %1010  ;;  %v1898_v24 = vadd.f32 1.0, %v1009_v20 }
  0xe3   :  { %v1013_v28 = vpop.eup %1012  ;;  %v1900_v29 = vadd.f32 1.0, %v1011_v23 }
  0xe4   :  { %v1015_v33 = vpop.eup %1014  ;;  %v410_v36 = vmul.f32 %v1013_v28, %v407_v7  ;;  %1020 = vrcp.f32 %v1898_v24  ;;  %vm415_vm0 = vweird.f32 %v1013_v28  ;;  %vm492_vm14 = vweird.f32 %v1898_v24 }
  0xe5   :  { %v1017_v3 = vpop.eup %1016  ;;  %v448_v18 = vmul.f32 %v1015_v33, %v445_v19  ;;  %1022 = vrcp.f32 %v1900_v29  ;;  %vm453_vm1 = vweird.f32 %v1015_v33  ;;  %vm416_vm5 = vmor %vm414_vm3, %vm415_vm0  ;;  %v435_v13 = vand.u32 2147483648, %v1900_v29 }
  0xe6   :  { %v411_v41 = vsub.f32 1.0, %v410_v36  ;;  %v1906_v46 = vadd.f32 1.0, %v1017_v3  ;;  %1024 = vpow2.f32 %v990_v32  ;;  %v1019_v55 = vpop.eup %1018  ;;  %vm454_vm6 = vmor %vm452_vm2, %vm453_vm1  ;;  %vm429_vm8 = vweird.f32 %v1900_v29 }
  0xe7   :  { %v449_v47 = vsub.f32 1.0, %v448_v18  ;;  %v433_v8 = vand.u32 2147483647, %v1900_v29  ;;  %v436_v36 = vor.u32 1.1754944e-38, %v435_v13 }
  0xe8   :  { %v412_v53 = vmul.f32 %v1013_v28, %v411_v41  ;;  %1026 = vrcp.f32 %v1906_v46  ;;  %v473_v23 = vand.u32 2147483648, %v1906_v46  ;;  %v471_v18 = vand.u32 2147483647, %v1906_v46 }
  0xe9   :  { %v450_v10 = vmul.f32 %v1015_v33, %v449_v47  ;;  %1028 = vtanh.f32 %v399_v54  ;;  %vm434_vm13 = vcmp.eq.f32.partialorder %v433_v8, 8.507059e+37  ;;  %v496_v41 = vand.u32 2147483647, %v1898_v24 }
  0xea   :  { %v1909_v17 = vpop.eup %1020  ;;  %v413_v56 = vadd.f32 %v1013_v28, %v412_v53  ;;  %vm467_vm15 = vweird.f32 %v1906_v46  ;;  %vm472_vm2 = vcmp.eq.f32.partialorder %v471_v18, 8.507059e+37 }
  0xeb   :  { %v1023_v57 = vpop.eup %1022  ;;  %v451_v60 = vadd.f32 %v1015_v33, %v450_v10  ;;  %v488_v61 = vmul.f32 %v1909_v17, %v1898_v24  ;;  %vm493_vm10 = vweird.f32 %v1909_v17  ;;  %vm497_vm3 = vcmp.eq.f32.partialorder %v496_v41, 8.507059e+37 }
  0xec   :  { %v417_v62 = vsel %vm416_vm5, %v1013_v28, %v413_v56  ;;  %v425_v63 = vmul.f32 %v1023_v57, %v1900_v29  ;;  %v1025_v0 = vpop.eup %1024  ;;  %vm430_vm9 = vweird.f32 %v1023_v57  ;;  %v498_v28 = vand.u32 2147483648, %v1898_v24  ;;  %vm1932_vm0 = vmor %vm492_vm14, %vm493_vm10 }
  0xed   :  { %v422_v26 = vsel %vm419_vm4, %v421_v59, %v417_v62  ;;  %v455_v39 = vsel %vm454_vm6, %v1015_v33, %v451_v60  ;;  %v489_v52 = vsub.f32 1.0, %v488_v61  ;;  %v486_v14 = vadd.f32 1.0, %v1025_v0  ;;  %vm431_vm11 = vmor %vm429_vm8, %vm430_vm9 }
  0xee   :  { %v1027_v1 = vpop.eup %1026  ;;  %v460_v2 = vsel %vm457_vm7, %v459_v58, %v455_v39  ;;  %v519_v7 = vmul.f32 %v1019_v55, %v422_v26  ;;  %v426_v12 = vsub.f32 1.0, %v425_v63  ;;  %v474_v29 = vor.u32 1.1754944e-38, %v473_v23 }
  0xef   :  { %v517_v19 = vmul.f32 0.0, %v460_v2  ;;  %v463_v4 = vmul.f32 %v1027_v1, %v1906_v46  ;;  %v490_v5 = vmul.f32 %v1909_v17, %v489_v52  ;;  %1030 = vrcp.f32 %v486_v14  ;;  %v1029_v32 = vpop.eup %1028 }
  0xf0   :  { %v427_v6 = vmul.f32 %v1023_v57, %v426_v12  ;;  %vm468_vm12 = vweird.f32 %v1027_v1  ;;  %v499_v53 = vor.u32 1.1754944e-38, %v498_v28  ;;  %v513_v62 = vand.u32 2147483648, %v486_v14 }
  0xf1   :  { %v1919_v9 = vadd.f32 %v519_v7, %v517_v19  ;;  %v464_v20 = vsub.f32 1.0, %v463_v4  ;;  %v491_v3 = vadd.f32 %v1909_v17, %v490_v5  ;;  %vm469_vm1 = vmor %vm467_vm15, %vm468_vm12  ;;  %vm507_vm5 = vweird.f32 %v486_v14 }
  0xf2   :  { %v428_v33 = vadd.f32 %v1023_v57, %v427_v6  ;;  %v511_v63 = vand.u32 2147483647, %v486_v14  ;;  %v514_v26 = vor.u32 1.1754944e-38, %v513_v62 }
  0xf3   :  { %1032 = vtanh.f32 %v1919_v9  ;;  %v465_v11 = vmul.f32 %v1027_v1, %v464_v20  ;;  %v495_v51 = vsel %vm1932_vm0, %v1909_v17, %v491_v3 }
  0xf4   :  { %v432_v37 = vsel %vm431_vm11, %v1023_v57, %v428_v33  ;;  %v500_v58 = vsel %vm497_vm3, %v499_v53, %v495_v51  ;;  %vm512_vm7 = vcmp.eq.f32.partialorder %v511_v63, 8.507059e+37 }
  0xf5   :  { %v437_v42 = vsel %vm434_vm13, %v436_v36, %v432_v37  ;;  %v466_v45 = vadd.f32 %v1027_v1, %v465_v11  ;;  %v1031_v48 = vpop.eup %1030 }
  0xf6   :  { %v520_v55 = vmul.f32 %v1029_v32, %v437_v42  ;;  %v503_v24 = vmul.f32 %v1031_v48, %v486_v14  ;;  %vm508_vm4 = vweird.f32 %v1031_v48 }
  0xf7   :  { %v470_v54 = vsel %vm469_vm1, %v1027_v1, %v466_v45  ;;  %vm509_vm6 = vmor %vm507_vm5, %vm508_vm4 }
  0xf8   :  { %v475_v10 = vsel %vm472_vm2, %v474_v29, %v470_v54  ;;  %v504_v57 = vsub.f32 1.0, %v503_v24 }
  0xf9   :  { %v1033_v46 = vpop.eup %1032  ;;  %v518_v56 = vmul.f32 0.0, %v475_v10 }
  0xfa   :  { %v525_v59 = vmul.f32 %v1033_v46, %v500_v58  ;;  %v505_v61 = vmul.f32 %v1031_v48, %v504_v57 }
  0xfb   :  { %v1939_v60 = vadd.f32 %v520_v55, %v518_v56 }
  0xfc   :  { %543 = vmatmul.f32.vlgmr.msra.gmra.mxu0 %v525_v59  ;;  %566 = vmatmul.f32.vlgmr.msra.gmra.mxu1 %v525_v59  ;;  %v506_v17 = vadd.f32 %v1031_v48, %v505_v61 }
  0xfd   :  { %1034 = vtanh.f32 %v1939_v60  ;;  %589 = vmatmul.f32.vlgmr.msra.gmra.mxu2 %v525_v59  ;;  %612 = vmatmul.f32.vlgmr.msra.gmra.mxu3 %v525_v59 }
  0xfe   :  { %v510_v0 = vsel %vm509_vm6, %v1031_v48, %v506_v17 }
  0xff   :  { %v515_v52 = vsel %vm512_vm7, %v514_v26, %v510_v0 }
 0x103   :  { %v1035_v39 = vpop.eup %1034 }
 0x104   :  { %v526_v13 = vmul.f32 %v1035_v39, %v515_v52 }
 0x106   :  { %546 = vmatmul.f32.gmra.mxu0 %v526_v13  ;;  %569 = vmatmul.f32.gmra.mxu1 %v526_v13 }
 0x107   :  { %592 = vmatmul.f32.gmra.mxu2 %v526_v13  ;;  %615 = vmatmul.f32.gmra.mxu3 %v526_v13 }
 0x179   :  { %v544_v1 = vpop.f32.mrf.mxu0  ;;  %v567_v2 = vpop.f32.mrf.mxu1 }
 0x17a   :  { %v619_v7 = vadd.f32 %v544_v1, %v1857_v15  ;;  %v620_v12 = vadd.f32 %v567_v2, %v1859_v16 }
 0x17c   :  { %v991_v19 = vmul.f32 -1.442695, %v619_v7  ;;  %v993_v4 = vmul.f32 -1.442695, %v620_v12 }
 0x17e   :  { %1036 = vpow2.f32 %v991_v19 }
 0x17f   :  { %1038 = vpow2.f32 %v993_v4 }
 0x180   :  { %v613_v14 = vpop.f32.mrf.mxu3  ;;  %v590_v11 = vpop.f32.mrf.mxu2 }
 0x181   :  { %v622_v5 = vadd.f32 %v613_v14, %v1866_v22  ;;  %v621_v41 = vadd.f32 %v590_v11, %v1864_v21 }
 0x183   :  { %v995_v6 = vmul.f32 -1.442695, %v622_v5  ;;  %v547_v8 = vpop.f32.mrf.mxu0  ;;  %v570_v20 = vpop.f32.mrf.mxu1 }
 0x184   :  { %v1037_v23 = vpop.eup %1036  ;;  %v623_v28 = vadd.f32 %v547_v8, %v1868_v25  ;;  %v624_v32 = vadd.f32 %v570_v20, %v1870_v27 }
 0x185   :  { %v1039_v33 = vpop.eup %1038  ;;  %v633_v36 = vadd.f32 1.0, %v1037_v23  ;;  %1040 = vpow2.f32 %v995_v6 }
 0x186   :  { %v671_v15 = vadd.f32 1.0, %v1039_v33  ;;  %v992_v16 = vmul.f32 -1.442695, %v623_v28  ;;  %v994_v3 = vmul.f32 -1.442695, %v624_v32 }
 0x187   :  { %1042 = vrcp.f32 %v633_v36  ;;  %v646_v24 = vand.u32 2147483648, %v633_v36  ;;  %vm640_vm11 = vweird.f32 %v633_v36 }
 0x188   :  { %1044 = vrcp.f32 %v671_v15  ;;  %v684_v10 = vand.u32 2147483648, %v671_v15  ;;  %v682_v57 = vand.u32 2147483647, %v671_v15  ;;  %vm678_vm10 = vweird.f32 %v671_v15 }
 0x189   :  { %1046 = vpow2.f32 %v992_v16  ;;  %v647_v62 = vor.u32 1.1754944e-38, %v646_v24 }
 0x18a   :  { %1048 = vpow2.f32 %v994_v3  ;;  %v616_v22 = vpop.f32.mrf.mxu3  ;;  %v593_v58 = vpop.f32.mrf.mxu2  ;;  %v685_v39 = vor.u32 1.1754944e-38, %v684_v10  ;;  %vm683_vm15 = vcmp.eq.f32.partialorder %v682_v57, 8.507059e+37 }
 0x18b   :  { %v1041_v18 = vpop.eup %1040  ;;  %v626_v37 = vadd.f32 %v616_v22, %v1875_v31  ;;  %v644_v31 = vand.u32 2147483647, %v633_v36  ;;  %v625_v13 = vadd.f32 %v593_v58, %v1873_v30 }
 0x18c   :  { %v1949_v25 = vadd.f32 1.0, %v1041_v18 }
 0x18d   :  { %v1043_v27 = vpop.eup %1042  ;;  %v996_v42 = vmul.f32 -1.442695, %v626_v37  ;;  %vm645_vm13 = vcmp.eq.f32.partialorder %v644_v31, 8.507059e+37 }
 0x18e   :  { %v1045_v45 = vpop.eup %1044  ;;  %v636_v47 = vmul.f32 %v1043_v27, %v633_v36  ;;  %1050 = vrcp.f32 %v1949_v25  ;;  %vm641_vm8 = vweird.f32 %v1043_v27  ;;  %vm718_vm0 = vweird.f32 %v1949_v25 }
 0x18f   :  { %v1047_v48 = vpop.eup %1046  ;;  %v674_v29 = vmul.f32 %v1045_v45, %v671_v15  ;;  %1052 = vpow2.f32 %v996_v42  ;;  %vm679_vm9 = vweird.f32 %v1045_v45  ;;  %vm642_vm12 = vmor %vm640_vm11, %vm641_vm8  ;;  %v724_v33 = vand.u32 2147483648, %v1949_v25 }
 0x190   :  { %v1049_v51 = vpop.eup %1048  ;;  %v637_v53 = vsub.f32 1.0, %v636_v47  ;;  %1054 = vtanh.f32 %v621_v41  ;;  %v1952_v54 = vadd.f32 1.0, %v1047_v48  ;;  %vm680_vm14 = vmor %vm678_vm10, %vm679_vm9  ;;  %v722_v37 = vand.u32 2147483647, %v1949_v25 }
 0x191   :  { %v675_v55 = vsub.f32 1.0, %v674_v29  ;;  %v1954_v21 = vadd.f32 1.0, %v1049_v51 }
 0x192   :  { %v638_v46 = vmul.f32 %v1043_v27, %v637_v53  ;;  %1056 = vrcp.f32 %v1952_v54  ;;  %v659_v32 = vand.u32 2147483647, %v1952_v54  ;;  %v661_v15 = vand.u32 2147483648, %v1952_v54 }
 0x193   :  { %v676_v56 = vmul.f32 %v1045_v45, %v675_v55  ;;  %1058 = vrcp.f32 %v1954_v21  ;;  %v699_v16 = vand.u32 2147483648, %v1954_v21  ;;  %v697_v18 = vand.u32 2147483647, %v1954_v21 }
 0x194   :  { %v1958_v59 = vpop.eup %1050  ;;  %v639_v61 = vadd.f32 %v1043_v27, %v638_v46  ;;  %vm693_vm4 = vweird.f32 %v1954_v21  ;;  %vm655_vm5 = vweird.f32 %v1952_v54  ;;  %vm660_vm8 = vcmp.eq.f32.partialorder %v659_v32, 8.507059e+37 }
 0x195   :  { %v1053_v17 = vpop.eup %1052  ;;  %v677_v63 = vadd.f32 %v1045_v45, %v676_v56  ;;  %v714_v0 = vmul.f32 %v1958_v59, %v1949_v25  ;;  %vm719_vm1 = vweird.f32 %v1958_v59  ;;  %v662_v47 = vor.u32 1.1754944e-38, %v661_v15 }
 0x196   :  { %v1055_v26 = vpop.eup %1054  ;;  %v643_v52 = vsel %vm642_vm12, %v1043_v27, %v639_v61  ;;  %v1964_v1 = vadd.f32 1.0, %v1053_v17  ;;  %vm1988_vm6 = vmor %vm718_vm0, %vm719_vm1  ;;  %v700_v51 = vor.u32 1.1754944e-38, %v699_v16  ;;  %v725_v55 = vor.u32 1.1754944e-38, %v724_v33 }
 0x197   :  { %v648_v2 = vsel %vm645_vm13, %v647_v62, %v643_v52  ;;  %v681_v7 = vsel %vm680_vm14, %v1045_v45, %v677_v63  ;;  %v715_v12 = vsub.f32 1.0, %v714_v0  ;;  %vm698_vm10 = vcmp.eq.f32.partialorder %v697_v18, 8.507059e+37 }
 0x198   :  { %v1057_v19 = vpop.eup %1056  ;;  %v686_v4 = vsel %vm683_vm15, %v685_v39, %v681_v7  ;;  %v745_v14 = vmul.f32 %v1055_v26, %v648_v2  ;;  %1060 = vrcp.f32 %v1964_v1  ;;  %vm723_vm11 = vcmp.eq.f32.partialorder %v722_v37, 8.507059e+37 }
 0x199   :  { %v1059_v5 = vpop.eup %1058  ;;  %v743_v6 = vmul.f32 %v686_v4, %v1919_v9  ;;  %v651_v8 = vmul.f32 %v1057_v19, %v1952_v54  ;;  %v716_v20 = vmul.f32 %v1958_v59, %v715_v12  ;;  %1062 = vtanh.f32 %v625_v13 }
 0x19a   :  { %v689_v30 = vmul.f32 %v1059_v5, %v1954_v21  ;;  %vm656_vm2 = vweird.f32 %v1057_v19  ;;  %vm694_vm3 = vweird.f32 %v1059_v5  ;;  %v739_v17 = vand.u32 2147483648, %v1964_v1 }
 0x19b   :  { %v1972_v23 = vadd.f32 %v745_v14, %v743_v6  ;;  %v652_v28 = vsub.f32 1.0, %v651_v8  ;;  %v717_v9 = vadd.f32 %v1958_v59, %v716_v20  ;;  %vm657_vm7 = vmor %vm655_vm5, %vm656_vm2  ;;  %vm733_vm13 = vweird.f32 %v1964_v1 }
 0x19c   :  { %v690_v36 = vsub.f32 1.0, %v689_v30  ;;  %vm695_vm9 = vmor %vm693_vm4, %vm694_vm3  ;;  %v737_v62 = vand.u32 2147483647, %v1964_v1 }
 0x19d   :  { %1064 = vtanh.f32 %v1972_v23  ;;  %v653_v3 = vmul.f32 %v1057_v19, %v652_v28  ;;  %v721_v29 = vsel %vm1988_vm6, %v1958_v59, %v717_v9 }
 0x19e   :  { %v1061_v11 = vpop.eup %1060  ;;  %v691_v22 = vmul.f32 %v1059_v5, %v690_v36  ;;  %v726_v46 = vsel %vm723_vm11, %v725_v55, %v721_v29  ;;  %vm738_vm15 = vcmp.eq.f32.partialorder %v737_v62, 8.507059e+37 }
 0x19f   :  { %v654_v41 = vadd.f32 %v1057_v19, %v653_v3  ;;  %v729_v27 = vmul.f32 %v1061_v11, %v1964_v1  ;;  %v1063_v45 = vpop.eup %1062  ;;  %vm734_vm12 = vweird.f32 %v1061_v11 }
 0x1a0   :  { %v692_v48 = vadd.f32 %v1059_v5, %v691_v22  ;;  %vm735_vm14 = vmor %vm733_vm13, %vm734_vm12 }
 0x1a1   :  { %v658_v53 = vsel %vm657_vm7, %v1057_v19, %v654_v41  ;;  %v730_v54 = vsub.f32 1.0, %v729_v27 }
 0x1a2   :  { %v663_v31 = vsel %vm660_vm8, %v662_v47, %v658_v53  ;;  %v696_v25 = vsel %vm695_vm9, %v1059_v5, %v692_v48 }
 0x1a3   :  { %v1065_v24 = vpop.eup %1064  ;;  %v701_v21 = vsel %vm698_vm10, %v700_v51, %v696_v25  ;;  %v746_v10 = vmul.f32 %v1063_v45, %v663_v31  ;;  %v731_v56 = vmul.f32 %v1061_v11, %v730_v54 }
 0x1a4   :  { %v744_v57 = vmul.f32 %v701_v21, %v1939_v60  ;;  %v751_v58 = vmul.f32 %v1065_v24, %v726_v46  ;;  %v740_v60 = vor.u32 1.1754944e-38, %v739_v17 }
 0x1a5   :  { %v732_v59 = vadd.f32 %v1061_v11, %v731_v56 }
 0x1a6   :  { %v1996_v61 = vadd.f32 %v746_v10, %v744_v57  ;;  %769 = vmatmul.f32.vlgmr.msrb.gmra.mxu0 %v751_v58  ;;  %792 = vmatmul.f32.vlgmr.msrb.gmra.mxu1 %v751_v58 }
 0x1a7   :  { %815 = vmatmul.f32.vlgmr.msrb.gmra.mxu2 %v751_v58  ;;  %838 = vmatmul.f32.vlgmr.msrb.gmra.mxu3 %v751_v58  ;;  %v736_v63 = vsel %vm735_vm14, %v1061_v11, %v732_v59 }
 0x1a8   :  { %1066 = vtanh.f32 %v1996_v61  ;;  %v741_v26 = vsel %vm738_vm15, %v740_v60, %v736_v63 }
 0x1ae   :  { %v1067_v0 = vpop.eup %1066 }
 0x1af   :  { %v752_v39 = vmul.f32 %v1067_v0, %v741_v26 }
 0x1b1   :  { %772 = vmatmul.f32.gmra.mxu0 %v752_v39  ;;  %795 = vmatmul.f32.gmra.mxu1 %v752_v39 }
 0x1b2   :  { %818 = vmatmul.f32.gmra.mxu2 %v752_v39  ;;  %841 = vmatmul.f32.gmra.mxu3 %v752_v39 }
 0x223   :  { %v770_v52 = vpop.f32.mrf.mxu0  ;;  %v793_v13 = vpop.f32.mrf.mxu1 }
 0x224   :  { %v845_v2 = vadd.f32 %v770_v52, %v1877_v34  ;;  %v846_v7 = vadd.f32 %v793_v13, %v1879_v35 }
 0x226   :  { %v997_v12 = vmul.f32 -1.442695, %v845_v2  ;;  %v999_v19 = vmul.f32 -1.442695, %v846_v7 }
 0x228   :  { %1068 = vpow2.f32 %v997_v12 }
 0x229   :  { %1070 = vpow2.f32 %v999_v19 }
 0x22a   :  { %v839_v1 = vpop.f32.mrf.mxu3  ;;  %v816_v35 = vpop.f32.mrf.mxu2 }
 0x22b   :  { %v848_v4 = vadd.f32 %v839_v1, %v1884_v40  ;;  %v847_v9 = vadd.f32 %v816_v35, %v1882_v38 }
 0x22d   :  { %v1001_v14 = vmul.f32 -1.442695, %v848_v4 }
 0x22e   :  { %v1069_v5 = vpop.eup %1068  ;;  %v773_v6 = vpop.f32.mrf.mxu0 }
 0x22f   :  { %v796_v8 = vpop.f32.mrf.mxu1  ;;  %v1071_v20 = vpop.eup %1070  ;;  %v859_v30 = vadd.f32 1.0, %v1069_v5  ;;  %1072 = vpow2.f32 %v1001_v14  ;;  %v849_v28 = vadd.f32 %v773_v6, %v1886_v43 }
 0x230   :  { %v850_v34 = vadd.f32 %v796_v8, %v1888_v44  ;;  %v897_v32 = vadd.f32 1.0, %v1071_v20 }
 0x231   :  { %1074 = vrcp.f32 %v859_v30  ;;  %v998_v33 = vmul.f32 -1.442695, %v849_v28  ;;  %v870_v45 = vand.u32 2147483647, %v859_v30  ;;  %v872_v47 = vand.u32 2147483648, %v859_v30 }
 0x232   :  { %1076 = vrcp.f32 %v897_v32  ;;  %v1000_v36 = vmul.f32 -1.442695, %v850_v34  ;;  %v910_v42 = vand.u32 2147483648, %v897_v32  ;;  %v908_v51 = vand.u32 2147483647, %v897_v32 }
 0x233   :  { %1078 = vpow2.f32 %v998_v33  ;;  %vm904_vm2 = vweird.f32 %v897_v32  ;;  %vm866_vm3 = vweird.f32 %v859_v30  ;;  %v873_v31 = vor.u32 1.1754944e-38, %v872_v47 }
 0x234   :  { %1080 = vpow2.f32 %v1000_v36  ;;  %v911_v10 = vor.u32 1.1754944e-38, %v910_v42  ;;  %vm871_vm6 = vcmp.eq.f32.partialorder %v870_v45, 8.507059e+37  ;;  %vm909_vm7 = vcmp.eq.f32.partialorder %v908_v51, 8.507059e+37 }
 0x235   :  { %v1073_v15 = vpop.eup %1072  ;;  %v842_v40 = vpop.f32.mrf.mxu3 }
 0x236   :  { %v2008_v16 = vadd.f32 1.0, %v1073_v15  ;;  %v852_v3 = vadd.f32 %v842_v40, %v1893_v50  ;;  %v819_v59 = vpop.f32.mrf.mxu2 }
 0x237   :  { %v1075_v11 = vpop.eup %1074  ;;  %v851_v52 = vadd.f32 %v819_v59, %v1891_v49 }
 0x238   :  { %v1077_v43 = vpop.eup %1076  ;;  %v862_v22 = vmul.f32 %v1075_v11, %v859_v30  ;;  %1082 = vrcp.f32 %v2008_v16  ;;  %v1002_v37 = vmul.f32 -1.442695, %v852_v3  ;;  %vm867_vm0 = vweird.f32 %v1075_v11 }
 0x239   :  { %v900_v44 = vmul.f32 %v1077_v43, %v897_v32  ;;  %1084 = vtanh.f32 %v847_v9  ;;  %v1079_v41 = vpop.eup %1078  ;;  %vm905_vm1 = vweird.f32 %v1077_v43  ;;  %vm868_vm4 = vmor %vm866_vm3, %vm867_vm0  ;;  %vm944_vm8 = vweird.f32 %v2008_v16 }
 0x23a   :  { %v863_v18 = vsub.f32 1.0, %v862_v22  ;;  %v1081_v38 = vpop.eup %1080  ;;  %v2012_v29 = vadd.f32 1.0, %v1079_v41  ;;  %1086 = vpow2.f32 %v1002_v37  ;;  %vm906_vm5 = vmor %vm904_vm2, %vm905_vm1  ;;  %v950_v1 = vand.u32 2147483648, %v2008_v16 }
 0x23b   :  { %v901_v27 = vsub.f32 1.0, %v900_v44  ;;  %v2014_v53 = vadd.f32 1.0, %v1081_v38 }
 0x23c   :  { %v864_v48 = vmul.f32 %v1075_v11, %v863_v18  ;;  %1088 = vrcp.f32 %v2012_v29  ;;  %v885_v14 = vand.u32 2147483647, %v2012_v29  ;;  %v887_v5 = vand.u32 2147483648, %v2012_v29 }
 0x23d   :  { %v902_v50 = vmul.f32 %v1077_v43, %v901_v27  ;;  %1090 = vrcp.f32 %v2014_v53  ;;  %v925_v8 = vand.u32 2147483648, %v2014_v53  ;;  %v923_v34 = vand.u32 2147483647, %v2014_v53 }
 0x23e   :  { %v2016_v54 = vpop.eup %1082  ;;  %v865_v55 = vadd.f32 %v1075_v11, %v864_v48  ;;  %v951_v32 = vor.u32 1.1754944e-38, %v950_v1  ;;  %vm881_vm14 = vweird.f32 %v2012_v29  ;;  %vm919_vm15 = vweird.f32 %v2014_v53 }
 0x23f   :  { %v903_v25 = vadd.f32 %v1077_v43, %v902_v50  ;;  %v940_v24 = vmul.f32 %v2016_v54, %v2008_v16  ;;  %v1085_v21 = vpop.eup %1084  ;;  %vm945_vm9 = vweird.f32 %v2016_v54  ;;  %vm886_vm1 = vcmp.eq.f32.partialorder %v885_v14, 8.507059e+37 }
 0x240   :  { %v869_v46 = vsel %vm868_vm4, %v1075_v11, %v865_v55  ;;  %v1087_v17 = vpop.eup %1086  ;;  %vm2037_vm10 = vmor %vm944_vm8, %vm945_vm9  ;;  %v888_v36 = vor.u32 1.1754944e-38, %v887_v5  ;;  %vm924_vm3 = vcmp.eq.f32.partialorder %v923_v34, 8.507059e+37 }
 0x241   :  { %v874_v56 = vsel %vm871_vm6, %v873_v31, %v869_v46  ;;  %v907_v57 = vsel %vm906_vm5, %v1077_v43, %v903_v25  ;;  %v941_v58 = vsub.f32 1.0, %v940_v24  ;;  %v2024_v26 = vadd.f32 1.0, %v1087_v17 }
 0x242   :  { %v912_v62 = vsel %vm909_vm7, %v911_v10, %v907_v57  ;;  %v971_v63 = vmul.f32 %v1085_v21, %v874_v56  ;;  %v1089_v39 = vpop.eup %1088 }
 0x243   :  { %v969_v60 = vmul.f32 %v912_v62, %v1972_v23  ;;  %v942_v0 = vmul.f32 %v2016_v54, %v941_v58  ;;  %v1091_v13 = vpop.eup %1090  ;;  %v877_v7 = vmul.f32 %v1089_v39, %v2012_v29  ;;  %1092 = vrcp.f32 %v2024_v26 }
 0x244   :  { %v915_v19 = vmul.f32 %v1091_v13, %v2014_v53  ;;  %v948_v23 = vand.u32 2147483647, %v2008_v16  ;;  %vm882_vm11 = vweird.f32 %v1089_v39  ;;  %vm920_vm12 = vweird.f32 %v1091_v13 }
 0x245   :  { %v973_v2 = vadd.f32 %v971_v63, %v969_v60  ;;  %v943_v12 = vadd.f32 %v2016_v54, %v942_v0  ;;  %v878_v49 = vsub.f32 1.0, %v877_v7  ;;  %vm883_vm0 = vmor %vm881_vm14, %vm882_vm11  ;;  %v926_v16 = vor.u32 1.1754944e-38, %v925_v8 }
 0x246   :  { %v916_v4 = vsub.f32 1.0, %v915_v19  ;;  %vm949_vm13 = vcmp.eq.f32.partialorder %v948_v23, 8.507059e+37  ;;  %vm921_vm2 = vmor %vm919_vm15, %vm920_vm12  ;;  %v965_v48 = vand.u32 2147483648, %v2024_v26  ;;  %vm959_vm5 = vweird.f32 %v2024_v26 }
 0x247   :  { %1094 = vtanh.f32 %v973_v2  ;;  %v879_v20 = vmul.f32 %v1089_v39, %v878_v49  ;;  %v947_v30 = vsel %vm2037_vm10, %v2016_v54, %v943_v12  ;;  %v963_v29 = vand.u32 2147483647, %v2024_v26 }
 0x248   :  { %1096 = vtanh.f32 %v851_v52  ;;  %v917_v28 = vmul.f32 %v1091_v13, %v916_v4  ;;  %v952_v9 = vsel %vm949_vm13, %v951_v32, %v947_v30  ;;  %v966_v51 = vor.u32 1.1754944e-38, %v965_v48 }
 0x249   :  { %v880_v35 = vadd.f32 %v1089_v39, %v879_v20  ;;  %v1093_v33 = vpop.eup %1092  ;;  %vm964_vm7 = vcmp.eq.f32.partialorder %v963_v29, 8.507059e+37 }
 0x24a   :  { %v918_v15 = vadd.f32 %v1091_v13, %v917_v28  ;;  %v955_v11 = vmul.f32 %v1093_v33, %v2024_v26  ;;  %vm960_vm4 = vweird.f32 %v1093_v33 }
 0x24b   :  { %v884_v3 = vsel %vm883_vm0, %v1089_v39, %v880_v35  ;;  %vm961_vm6 = vmor %vm959_vm5, %vm960_vm4 }
 0x24c   :  { %v889_v44 = vsel %vm886_vm1, %v888_v36, %v884_v3  ;;  %v922_v18 = vsel %vm921_vm2, %v1091_v13, %v918_v15  ;;  %v956_v27 = vsub.f32 1.0, %v955_v11 }
 0x24d   :  { %v1095_v40 = vpop.eup %1094  ;;  %v927_v37 = vsel %vm924_vm3, %v926_v16, %v922_v18 }
 0x24e   :  { %v1097_v43 = vpop.eup %1096  ;;  %v977_v22 = vmul.f32 %v1095_v40, %v952_v9  ;;  %v970_v42 = vmul.f32 %v927_v37, %v1996_v61  ;;  %v957_v45 = vmul.f32 %v1093_v33, %v956_v27 }
 0x24f   :  { %v972_v41 = vmul.f32 %v1097_v43, %v889_v44 }
 0x250   :  { %979 = vst [vmem:[%s2064_s4] sm:$0xff] %v977_v22  ;;  %v958_v38 = vadd.f32 %v1093_v33, %v957_v45 }
 0x251   :  { %v974_v47 = vadd.f32 %v972_v41, %v970_v42 }
 0x252   :  { %v962_v50 = vsel %vm961_vm6, %v1093_v33, %v958_v38 }
 0x253   :  { %1098 = vtanh.f32 %v974_v47  ;;  %v967_v54 = vsel %vm964_vm7, %v966_v51, %v962_v50 }
 0x259   :  { %v1099_v53 = vpop.eup %1098 }
 0x25a   :  { %v978_v55 = vmul.f32 %v1099_v53, %v967_v54 }
 0x25c   :  { %980 = vst [vmem:[%s2064_s4 + $0x8] sm:$0xff] %v978_v55 }

// kernel: bilstm_attention_forward.7
= control target key start
LH: loop header
LB: loop body
LE: loop exit
PB: predicated region body
PF: predicated region fallthrough
CT: control target
= control target key end

     0   :  { %s466_s1 = inlined_call_operand.vmem [shape: f32[256,256], index: 1, kind: input, shape index: {}]   ;;  %s467_s0 = inlined_call_operand.vmem [shape: f32[32,256], index: 0, kind: input, shape index: {}]   ;;  %s468_s2 = inlined_call_operand.vmem [shape: f32[32,256], index: 2, kind: output, shape index: {}]  }
   0x1   :  { %v50_v0 = vld [vmem:[%s466_s1 + $0xf8] sm:$0xff]  ;;  %v48_v2 = vld [vmem:[%s466_s1 + $0xe8] sm:$0xff]  ;;  %v49_v6 = vld [vmem:[%s466_s1 + $0xf0] sm:$0xff] }
   0x2   :  { %v82_v1 = vld [vmem:[%s466_s1 + $0x1f8] sm:$0xff]  ;;  %141 = vmatpush.msra.mxu2 %v50_v0  ;;  %v80_v3 = vld [vmem:[%s466_s1 + $0x1e8] sm:$0xff]  ;;  %v81_v7 = vld [vmem:[%s466_s1 + $0x1f0] sm:$0xff]  ;;  %83 = vmatpush.msra.mxu0 %v49_v6 }
   0x3   :  { %170 = vmatpush.msra.mxu3 %v82_v1  ;;  %v46_v4 = vld [vmem:[%s466_s1 + $0xd8] sm:$0xff]  ;;  %v47_v8 = vld [vmem:[%s466_s1 + $0xe0] sm:$0xff]  ;;  %112 = vmatpush.msra.mxu1 %v81_v7  ;;  %v44_v10 = vld [vmem:[%s466_s1 + $0xc8] sm:$0xff] }
   0x4   :  { %v78_v5 = vld [vmem:[%s466_s1 + $0x1d8] sm:$0xff]  ;;  %142 = vmatpush.msra.mxu2 %v48_v2  ;;  %v79_v9 = vld [vmem:[%s466_s1 + $0x1e0] sm:$0xff]  ;;  %v76_v11 = vld [vmem:[%s466_s1 + $0x1c8] sm:$0xff]  ;;  %84 = vmatpush.msra.mxu0 %v47_v8 }
   0x5   :  { %171 = vmatpush.msra.mxu3 %v80_v3  ;;  %v45_v12 = vld [vmem:[%s466_s1 + $0xd0] sm:$0xff]  ;;  %113 = vmatpush.msra.mxu1 %v79_v9  ;;  %v42_v14 = vld [vmem:[%s466_s1 + $0xb8] sm:$0xff]  ;;  %v43_v16 = vld [vmem:[%s466_s1 + $0xc0] sm:$0xff] }
   0x6   :  { %143 = vmatpush.msra.mxu2 %v46_v4  ;;  %v77_v13 = vld [vmem:[%s466_s1 + $0x1d0] sm:$0xff]  ;;  %v74_v15 = vld [vmem:[%s466_s1 + $0x1b8] sm:$0xff]  ;;  %v75_v17 = vld [vmem:[%s466_s1 + $0x1c0] sm:$0xff]  ;;  %85 = vmatpush.msra.mxu0 %v45_v12 }
   0x7   :  { %172 = vmatpush.msra.mxu3 %v78_v5  ;;  %114 = vmatpush.msra.mxu1 %v77_v13  ;;  %v40_v18 = vld [vmem:[%s466_s1 + $0xa8] sm:$0xff]  ;;  %v41_v20 = vld [vmem:[%s466_s1 + $0xb0] sm:$0xff]  ;;  %v38_v22 = vld [vmem:[%s466_s1 + $0x98] sm:$0xff] }
   0x8   :  { %144 = vmatpush.msra.mxu2 %v44_v10  ;;  %v72_v19 = vld [vmem:[%s466_s1 + $0x1a8] sm:$0xff]  ;;  %v73_v21 = vld [vmem:[%s466_s1 + $0x1b0] sm:$0xff]  ;;  %86 = vmatpush.msra.mxu0 %v43_v16  ;;  %v70_v23 = vld [vmem:[%s466_s1 + $0x198] sm:$0xff] }
   0x9   :  { %173 = vmatpush.msra.mxu3 %v76_v11  ;;  %115 = vmatpush.msra.mxu1 %v75_v17  ;;  %v39_v24 = vld [vmem:[%s466_s1 + $0xa0] sm:$0xff]  ;;  %v36_v26 = vld [vmem:[%s466_s1 + $0x88] sm:$0xff]  ;;  %v37_v28 = vld [vmem:[%s466_s1 + $0x90] sm:$0xff] }
   0xa   :  { %145 = vmatpush.msra.mxu2 %v42_v14  ;;  %v71_v25 = vld [vmem:[%s466_s1 + $0x1a0] sm:$0xff]  ;;  %87 = vmatpush.msra.mxu0 %v41_v20  ;;  %v68_v27 = vld [vmem:[%s466_s1 + $0x188] sm:$0xff]  ;;  %v69_v29 = vld [vmem:[%s466_s1 + $0x190] sm:$0xff] }
   0xb   :  { %174 = vmatpush.msra.mxu3 %v74_v15  ;;  %116 = vmatpush.msra.mxu1 %v73_v21  ;;  %v34_v30 = vld [vmem:[%s466_s1 + $0x78] sm:$0xff]  ;;  %v35_v32 = vld [vmem:[%s466_s1 + $0x80] sm:$0xff]  ;;  %v32_v34 = vld [vmem:[%s466_s1 + $0x68] sm:$0xff] }
   0xc   :  { %146 = vmatpush.msra.mxu2 %v40_v18  ;;  %88 = vmatpush.msra.mxu0 %v39_v24  ;;  %v66_v31 = vld [vmem:[%s466_s1 + $0x178] sm:$0xff]  ;;  %v67_v33 = vld [vmem:[%s466_s1 + $0x180] sm:$0xff]  ;;  %v64_v35 = vld [vmem:[%s466_s1 + $0x168] sm:$0xff] }
   0xd   :  { %175 = vmatpush.msra.mxu3 %v72_v19  ;;  %117 = vmatpush.msra.mxu1 %v71_v25  ;;  %v33_v36 = vld [vmem:[%s466_s1 + $0x70] sm:$0xff]  ;;  %v30_v38 = vld [vmem:[%s466_s1 + $0x58] sm:$0xff]  ;;  %v31_v40 = vld [vmem:[%s466_s1 + $0x60] sm:$0xff] }
   0xe   :  { %147 = vmatpush.msra.mxu2 %v38_v22  ;;  %89 = vmatpush.msra.mxu0 %v37_v28  ;;  %v65_v37 = vld [vmem:[%s466_s1 + $0x170] sm:$0xff]  ;;  %v62_v39 = vld [vmem:[%s466_s1 + $0x158] sm:$0xff]  ;;  %v63_v41 = vld [vmem:[%s466_s1 + $0x160] sm:$0xff] }
   0xf   :  { %176 = vmatpush.msra.mxu3 %v70_v23  ;;  %118 = vmatpush.msra.mxu1 %v69_v29  ;;  %v28_v42 = vld [vmem:[%s466_s1 + $0x48] sm:$0xff]  ;;  %v29_v44 = vld [vmem:[%s466_s1 + $0x50] sm:$0xff]  ;;  %v26_v46 = vld [vmem:[%s466_s1 + $0x38] sm:$0xff] }
  0x10   :  { %148 = vmatpush.msra.mxu2 %v36_v26  ;;  %90 = vmatpush.msra.mxu0 %v35_v32  ;;  %v60_v43 = vld [vmem:[%s466_s1 + $0x148] sm:$0xff]  ;;  %v61_v45 = vld [vmem:[%s466_s1 + $0x150] sm:$0xff]  ;;  %v58_v47 = vld [vmem:[%s466_s1 + $0x138] sm:$0xff] }
  0x11   :  { %177 = vmatpush.msra.mxu3 %v68_v27  ;;  %119 = vmatpush.msra.mxu1 %v67_v33  ;;  %v27_v48 = vld [vmem:[%s466_s1 + $0x40] sm:$0xff]  ;;  %v24_v50 = vld [vmem:[%s466_s1 + $0x28] sm:$0xff]  ;;  %v25_v52 = vld [vmem:[%s466_s1 + $0x30] sm:$0xff] }
  0x12   :  { %149 = vmatpush.msra.mxu2 %v34_v30  ;;  %91 = vmatpush.msra.mxu0 %v33_v36  ;;  %v59_v49 = vld [vmem:[%s466_s1 + $0x140] sm:$0xff]  ;;  %v56_v51 = vld [vmem:[%s466_s1 + $0x128] sm:$0xff]  ;;  %v57_v53 = vld [vmem:[%s466_s1 + $0x130] sm:$0xff] }
  0x13   :  { %178 = vmatpush.msra.mxu3 %v66_v31  ;;  %120 = vmatpush.msra.mxu1 %v65_v37  ;;  %v22_v54 = vld [vmem:[%s466_s1 + $0x18] sm:$0xff]  ;;  %v23_v56 = vld [vmem:[%s466_s1 + $0x20] sm:$0xff]  ;;  %v20_v58 = vld [vmem:[%s466_s1 + $0x8] sm:$0xff] }
  0x14   :  { %150 = vmatpush.msra.mxu2 %v32_v34  ;;  %92 = vmatpush.msra.mxu0 %v31_v40  ;;  %v54_v55 = vld [vmem:[%s466_s1 + $0x118] sm:$0xff]  ;;  %v55_v57 = vld [vmem:[%s466_s1 + $0x120] sm:$0xff]  ;;  %v52_v59 = vld [vmem:[%s466_s1 + $0x108] sm:$0xff] }
  0x15   :  { %179 = vmatpush.msra.mxu3 %v64_v35  ;;  %121 = vmatpush.msra.mxu1 %v63_v41  ;;  %v11_v60 = vld [vmem:[%s467_s0] sm:$0xff]  ;;  %v12_v61 = vld [vmem:[%s467_s0 + $0x8] sm:$0xff]  ;;  %v21_v62 = vld [vmem:[%s466_s1 + $0x10] sm:$0xff] }
  0x16   :  { %151 = vmatpush.msra.mxu2 %v30_v38  ;;  %93 = vmatpush.msra.mxu0 %v29_v44  ;;  %v53_v63 = vld [vmem:[%s466_s1 + $0x110] sm:$0xff]  ;;  %v19_v0 = vld [vmem:[%s466_s1] sm:$0xff]  ;;  %v14_v3 = vld [vmem:[%s467_s0 + $0x18] sm:$0xff] }
  0x17   :  { %180 = vmatpush.msra.mxu3 %v62_v39  ;;  %122 = vmatpush.msra.mxu1 %v61_v45  ;;  %v51_v1 = vld [vmem:[%s466_s1 + $0x100] sm:$0xff]  ;;  %v13_v2 = vld [vmem:[%s467_s0 + $0x10] sm:$0xff]  ;;  %v16_v5 = vld [vmem:[%s467_s0 + $0x28] sm:$0xff] }
  0x18   :  { %152 = vmatpush.msra.mxu2 %v28_v42  ;;  %94 = vmatpush.msra.mxu0 %v27_v48  ;;  %v15_v4 = vld [vmem:[%s467_s0 + $0x20] sm:$0xff]  ;;  %v17_v6 = vld [vmem:[%s467_s0 + $0x30] sm:$0xff]  ;;  %v18_v7 = vld [vmem:[%s467_s0 + $0x38] sm:$0xff] }
  0x19   :  { %181 = vmatpush.msra.mxu3 %v60_v43  ;;  %123 = vmatpush.msra.mxu1 %v59_v49 }
  0x1a   :  { %153 = vmatpush.msra.mxu2 %v26_v46  ;;  %95 = vmatpush.msra.mxu0 %v25_v52 }
  0x1b   :  { %182 = vmatpush.msra.mxu3 %v58_v47  ;;  %124 = vmatpush.msra.mxu1 %v57_v53 }
  0x1c   :  { %154 = vmatpush.msra.mxu2 %v24_v50  ;;  %96 = vmatpush.msra.mxu0 %v23_v56 }
  0x1d   :  { %183 = vmatpush.msra.mxu3 %v56_v51  ;;  %125 = vmatpush.msra.mxu1 %v55_v57 }
  0x1e   :  { %155 = vmatpush.msra.mxu2 %v22_v54  ;;  %97 = vmatpush.msra.mxu0 %v21_v62 }
  0x1f   :  { %184 = vmatpush.msra.mxu3 %v54_v55  ;;  %126 = vmatpush.msra.mxu1 %v53_v63 }
  0x20   :  { %156 = vmatpush.msra.mxu2 %v20_v58  ;;  %98 = vmatpush.msra.mxu0 %v19_v0 }
  0x21   :  { %185 = vmatpush.msra.mxu3 %v52_v59  ;;  %157 = vmatmul.f32.vlgmr.msra.gmra.mxu2 %v11_v60 }
  0x22   :  { %186 = vmatmul.f32.vlgmr.msra.gmra.mxu3 %v12_v61  ;;  %127 = vmatpush.msra.mxu1 %v51_v1 }
  0x23   :  { %99 = vmatmul.f32.vlgmr.msra.gmra.mxu0 %v11_v60  ;;  %128 = vmatmul.f32.vlgmr.msra.gmra.mxu1 %v12_v61 }
  0x29   :  { %160 = vmatmul.f32.gmra.mxu2 %v13_v2 }
  0x2a   :  { %189 = vmatmul.f32.gmra.mxu3 %v14_v3 }
  0x2b   :  { %102 = vmatmul.f32.gmra.mxu0 %v13_v2  ;;  %131 = vmatmul.f32.gmra.mxu1 %v14_v3 }
  0x31   :  { %163 = vmatmul.f32.gmra.mxu2 %v15_v4 }
  0x32   :  { %192 = vmatmul.f32.gmra.mxu3 %v16_v5 }
  0x33   :  { %105 = vmatmul.f32.gmra.mxu0 %v15_v4  ;;  %134 = vmatmul.f32.gmra.mxu1 %v16_v5 }
  0x39   :  { %166 = vmatmul.f32.gmra.mxu2 %v17_v6 }
  0x3a   :  { %195 = vmatmul.f32.gmra.mxu3 %v18_v7 }
  0x3b   :  { %108 = vmatmul.f32.gmra.mxu0 %v17_v6  ;;  %137 = vmatmul.f32.gmra.mxu1 %v18_v7 }
  0xa0   :  { %v100_v8 = vpop.f32.mrf.mxu0  ;;  %v129_v9 = vpop.f32.mrf.mxu1 }
  0xa1   :  { %v130_v10 = vadd.f32 %v129_v9, %v100_v8 }
  0xa3   :  { %199 = vst [vmem:[%s468_s2] sm:$0xff] %v130_v10 }
  0xa4   :  { %v158_v11 = vpop.f32.mrf.mxu2 }
  0xa5   :  { %v187_v12 = vpop.f32.mrf.mxu3 }
  0xa6   :  { %v188_v13 = vadd.f32 %v187_v12, %v158_v11 }
  0xa8   :  { %200 = vst [vmem:[%s468_s2 + $0x8] sm:$0xff] %v188_v13  ;;  %v103_v14 = vpop.f32.mrf.mxu0  ;;  %v132_v15 = vpop.f32.mrf.mxu1 }
  0xa9   :  { %v133_v16 = vadd.f32 %v132_v15, %v103_v14 }
  0xab   :  { %201 = vst [vmem:[%s468_s2 + $0x10] sm:$0xff] %v133_v16 }
  0xac   :  { %v161_v17 = vpop.f32.mrf.mxu2 }
  0xad   :  { %v190_v18 = vpop.f32.mrf.mxu3 }
  0xae   :  { %v191_v19 = vadd.f32 %v190_v18, %v161_v17 }
  0xb0   :  { %202 = vst [vmem:[%s468_s2 + $0x18] sm:$0xff] %v191_v19  ;;  %v106_v20 = vpop.f32.mrf.mxu0  ;;  %v135_v21 = vpop.f32.mrf.mxu1 }
  0xb1   :  { %v136_v22 = vadd.f32 %v135_v21, %v106_v20 }
  0xb3   :  { %203 = vst [vmem:[%s468_s2 + $0x20] sm:$0xff] %v136_v22 }
  0xb4   :  { %v164_v23 = vpop.f32.mrf.mxu2 }
  0xb5   :  { %v193_v24 = vpop.f32.mrf.mxu3 }
  0xb6   :  { %v194_v25 = vadd.f32 %v193_v24, %v164_v23 }
  0xb8   :  { %204 = vst [vmem:[%s468_s2 + $0x28] sm:$0xff] %v194_v25  ;;  %v109_v26 = vpop.f32.mrf.mxu0  ;;  %v138_v27 = vpop.f32.mrf.mxu1 }
  0xb9   :  { %v139_v28 = vadd.f32 %v138_v27, %v109_v26 }
  0xbb   :  { %205 = vst [vmem:[%s468_s2 + $0x30] sm:$0xff] %v139_v28 }
  0xbc   :  { %v167_v29 = vpop.f32.mrf.mxu2 }
  0xbd   :  { %v196_v30 = vpop.f32.mrf.mxu3 }
  0xbe   :  { %v197_v31 = vadd.f32 %v196_v30, %v167_v29 }
  0xc0   :  { %206 = vst [vmem:[%s468_s2 + $0x38] sm:$0xff] %v197_v31 }

// kernel: bilstm_attention_forward.6
= control target key start
LH: loop header
LB: loop body
LE: loop exit
PB: predicated region body
PF: predicated region fallthrough
CT: control target
= control target key end

     0   :  { %s4316_s1 = inlined_call_operand.vmem [shape: f32[128,1024], index: 1, kind: input, shape index: {}]   ;;  %s4317_s0 = inlined_call_operand.vmem [shape: f32[48,128], index: 0, kind: input, shape index: {}]   ;;  %s4318_s2 = inlined_call_operand.vmem [shape: f32[128,512], index: 2, kind: input, shape index: {}]   ;;  %s4319_s4 = inlined_call_operand.vmem [shape: f32[1,1024], index: 4, kind: input, shape index: {}]   ;;  %s4320_s5 = inlined_call_operand.vmem [shape: f32[16,768], index: 5, kind: output, shape index: {}]   ;;  %s4321_s3 = inlined_call_operand.vmem [shape: f32[128,512], index: 3, kind: input, shape index: {}]  }
   0x1   :  { %v146_v0 = vld [vmem:[%s4316_s1 + $0x3c0] sm:$0xff]  ;;  %v147_v1 = vld [vmem:[%s4316_s1 + $0x3c8] sm:$0xff]  ;;  %v148_v2 = vld [vmem:[%s4316_s1 + $0x3d0] sm:$0xff] }
   0x2   :  { %172 = vmatpush.msra.mxu0 %v146_v0  ;;  %207 = vmatpush.msra.mxu1 %v147_v1  ;;  %v149_v3 = vld [vmem:[%s4316_s1 + $0x3d8] sm:$0xff]  ;;  %v138_v4 = vld [vmem:[%s4316_s1 + $0x380] sm:$0xff]  ;;  %v139_v5 = vld [vmem:[%s4316_s1 + $0x388] sm:$0xff] }
   0x3   :  { %242 = vmatpush.msra.mxu2 %v148_v2  ;;  %277 = vmatpush.msra.mxu3 %v149_v3  ;;  %v140_v6 = vld [vmem:[%s4316_s1 + $0x390] sm:$0xff]  ;;  %v141_v7 = vld [vmem:[%s4316_s1 + $0x398] sm:$0xff]  ;;  %v130_v8 = vld [vmem:[%s4316_s1 + $0x340] sm:$0xff] }
   0x4   :  { %173 = vmatpush.msra.mxu0 %v138_v4  ;;  %208 = vmatpush.msra.mxu1 %v139_v5  ;;  %v131_v9 = vld [vmem:[%s4316_s1 + $0x348] sm:$0xff]  ;;  %v132_v10 = vld [vmem:[%s4316_s1 + $0x350] sm:$0xff]  ;;  %v133_v11 = vld [vmem:[%s4316_s1 + $0x358] sm:$0xff] }
   0x5   :  { %243 = vmatpush.msra.mxu2 %v140_v6  ;;  %278 = vmatpush.msra.mxu3 %v141_v7  ;;  %v122_v12 = vld [vmem:[%s4316_s1 + $0x300] sm:$0xff]  ;;  %v123_v13 = vld [vmem:[%s4316_s1 + $0x308] sm:$0xff]  ;;  %v124_v14 = vld [vmem:[%s4316_s1 + $0x310] sm:$0xff] }
   0x6   :  { %174 = vmatpush.msra.mxu0 %v130_v8  ;;  %209 = vmatpush.msra.mxu1 %v131_v9  ;;  %v125_v15 = vld [vmem:[%s4316_s1 + $0x318] sm:$0xff]  ;;  %v114_v16 = vld [vmem:[%s4316_s1 + $0x2c0] sm:$0xff]  ;;  %v115_v17 = vld [vmem:[%s4316_s1 + $0x2c8] sm:$0xff] }
   0x7   :  { %244 = vmatpush.msra.mxu2 %v132_v10  ;;  %279 = vmatpush.msra.mxu3 %v133_v11  ;;  %v116_v18 = vld [vmem:[%s4316_s1 + $0x2d0] sm:$0xff]  ;;  %v117_v19 = vld [vmem:[%s4316_s1 + $0x2d8] sm:$0xff]  ;;  %v106_v20 = vld [vmem:[%s4316_s1 + $0x280] sm:$0xff] }
   0x8   :  { %175 = vmatpush.msra.mxu0 %v122_v12  ;;  %210 = vmatpush.msra.mxu1 %v123_v13  ;;  %v107_v21 = vld [vmem:[%s4316_s1 + $0x288] sm:$0xff]  ;;  %v108_v22 = vld [vmem:[%s4316_s1 + $0x290] sm:$0xff]  ;;  %v109_v23 = vld [vmem:[%s4316_s1 + $0x298] sm:$0xff] }
   0x9   :  { %245 = vmatpush.msra.mxu2 %v124_v14  ;;  %280 = vmatpush.msra.mxu3 %v125_v15  ;;  %v98_v24 = vld [vmem:[%s4316_s1 + $0x240] sm:$0xff]  ;;  %v99_v25 = vld [vmem:[%s4316_s1 + $0x248] sm:$0xff]  ;;  %v100_v26 = vld [vmem:[%s4316_s1 + $0x250] sm:$0xff] }
   0xa   :  { %176 = vmatpush.msra.mxu0 %v114_v16  ;;  %211 = vmatpush.msra.mxu1 %v115_v17  ;;  %v101_v27 = vld [vmem:[%s4316_s1 + $0x258] sm:$0xff]  ;;  %v90_v28 = vld [vmem:[%s4316_s1 + $0x200] sm:$0xff]  ;;  %v91_v29 = vld [vmem:[%s4316_s1 + $0x208] sm:$0xff] }
   0xb   :  { %246 = vmatpush.msra.mxu2 %v116_v18  ;;  %281 = vmatpush.msra.mxu3 %v117_v19  ;;  %v92_v30 = vld [vmem:[%s4316_s1 + $0x210] sm:$0xff]  ;;  %v93_v31 = vld [vmem:[%s4316_s1 + $0x218] sm:$0xff]  ;;  %v82_v32 = vld [vmem:[%s4316_s1 + $0x1c0] sm:$0xff] }
   0xc   :  { %177 = vmatpush.msra.mxu0 %v106_v20  ;;  %212 = vmatpush.msra.mxu1 %v107_v21  ;;  %v83_v33 = vld [vmem:[%s4316_s1 + $0x1c8] sm:$0xff]  ;;  %v84_v34 = vld [vmem:[%s4316_s1 + $0x1d0] sm:$0xff]  ;;  %v85_v35 = vld [vmem:[%s4316_s1 + $0x1d8] sm:$0xff] }
   0xd   :  { %247 = vmatpush.msra.mxu2 %v108_v22  ;;  %282 = vmatpush.msra.mxu3 %v109_v23  ;;  %v74_v36 = vld [vmem:[%s4316_s1 + $0x180] sm:$0xff]  ;;  %v75_v37 = vld [vmem:[%s4316_s1 + $0x188] sm:$0xff]  ;;  %v76_v38 = vld [vmem:[%s4316_s1 + $0x190] sm:$0xff] }
   0xe   :  { %178 = vmatpush.msra.mxu0 %v98_v24  ;;  %213 = vmatpush.msra.mxu1 %v99_v25  ;;  %v77_v39 = vld [vmem:[%s4316_s1 + $0x198] sm:$0xff]  ;;  %v66_v40 = vld [vmem:[%s4316_s1 + $0x140] sm:$0xff]  ;;  %v67_v41 = vld [vmem:[%s4316_s1 + $0x148] sm:$0xff] }
   0xf   :  { %248 = vmatpush.msra.mxu2 %v100_v26  ;;  %283 = vmatpush.msra.mxu3 %v101_v27  ;;  %v68_v42 = vld [vmem:[%s4316_s1 + $0x150] sm:$0xff]  ;;  %v69_v43 = vld [vmem:[%s4316_s1 + $0x158] sm:$0xff]  ;;  %v58_v44 = vld [vmem:[%s4316_s1 + $0x100] sm:$0xff] }
  0x10   :  { %179 = vmatpush.msra.mxu0 %v90_v28  ;;  %214 = vmatpush.msra.mxu1 %v91_v29  ;;  %v59_v45 = vld [vmem:[%s4316_s1 + $0x108] sm:$0xff]  ;;  %v60_v46 = vld [vmem:[%s4316_s1 + $0x110] sm:$0xff]  ;;  %v61_v47 = vld [vmem:[%s4316_s1 + $0x118] sm:$0xff] }
  0x11   :  { %249 = vmatpush.msra.mxu2 %v92_v30  ;;  %284 = vmatpush.msra.mxu3 %v93_v31  ;;  %v50_v48 = vld [vmem:[%s4316_s1 + $0xc0] sm:$0xff]  ;;  %v51_v49 = vld [vmem:[%s4316_s1 + $0xc8] sm:$0xff]  ;;  %v52_v50 = vld [vmem:[%s4316_s1 + $0xd0] sm:$0xff] }
  0x12   :  { %180 = vmatpush.msra.mxu0 %v82_v32  ;;  %215 = vmatpush.msra.mxu1 %v83_v33  ;;  %v53_v51 = vld [vmem:[%s4316_s1 + $0xd8] sm:$0xff]  ;;  %v42_v52 = vld [vmem:[%s4316_s1 + $0x80] sm:$0xff]  ;;  %v43_v53 = vld [vmem:[%s4316_s1 + $0x88] sm:$0xff] }
  0x13   :  { %250 = vmatpush.msra.mxu2 %v84_v34  ;;  %285 = vmatpush.msra.mxu3 %v85_v35  ;;  %v44_v54 = vld [vmem:[%s4316_s1 + $0x90] sm:$0xff]  ;;  %v45_v55 = vld [vmem:[%s4316_s1 + $0x98] sm:$0xff]  ;;  %v34_v56 = vld [vmem:[%s4316_s1 + $0x40] sm:$0xff] }
  0x14   :  { %181 = vmatpush.msra.mxu0 %v74_v36  ;;  %216 = vmatpush.msra.mxu1 %v75_v37  ;;  %v35_v57 = vld [vmem:[%s4316_s1 + $0x48] sm:$0xff]  ;;  %v36_v58 = vld [vmem:[%s4316_s1 + $0x50] sm:$0xff]  ;;  %v37_v59 = vld [vmem:[%s4316_s1 + $0x58] sm:$0xff] }
  0x15   :  { %251 = vmatpush.msra.mxu2 %v76_v38  ;;  %286 = vmatpush.msra.mxu3 %v77_v39  ;;  %v26_v60 = vld [vmem:[%s4316_s1] sm:$0xff]  ;;  %v27_v61 = vld [vmem:[%s4316_s1 + $0x8] sm:$0xff]  ;;  %v28_v62 = vld [vmem:[%s4316_s1 + $0x10] sm:$0xff] }
  0x16   :  { %182 = vmatpush.msra.mxu0 %v66_v40  ;;  %217 = vmatpush.msra.mxu1 %v67_v41  ;;  %v29_v63 = vld [vmem:[%s4316_s1 + $0x18] sm:$0xff]  ;;  %v2407_v0 = vld [vmem:[%s4317_s0] sm:$0xff]  ;;  %v151_v2 = vld [vmem:[%s4316_s1 + $0x3e8] sm:$0xff] }
  0x17   :  { %252 = vmatpush.msra.mxu2 %v68_v42  ;;  %287 = vmatpush.msra.mxu3 %v69_v43  ;;  %v150_v1 = vld [vmem:[%s4316_s1 + $0x3e0] sm:$0xff]  ;;  %v153_v3 = vld [vmem:[%s4316_s1 + $0x3f8] sm:$0xff]  ;;  %v152_v4 = vld [vmem:[%s4316_s1 + $0x3f0] sm:$0xff] }
  0x18   :  { %183 = vmatpush.msra.mxu0 %v58_v44  ;;  %218 = vmatpush.msra.mxu1 %v59_v45  ;;  %v142_v5 = vld [vmem:[%s4316_s1 + $0x3a0] sm:$0xff]  ;;  %v143_v6 = vld [vmem:[%s4316_s1 + $0x3a8] sm:$0xff]  ;;  %v145_v7 = vld [vmem:[%s4316_s1 + $0x3b8] sm:$0xff] }
  0x19   :  { %253 = vmatpush.msra.mxu2 %v60_v46  ;;  %288 = vmatpush.msra.mxu3 %v61_v47  ;;  %v144_v8 = vld [vmem:[%s4316_s1 + $0x3b0] sm:$0xff]  ;;  %v134_v9 = vld [vmem:[%s4316_s1 + $0x360] sm:$0xff]  ;;  %v135_v10 = vld [vmem:[%s4316_s1 + $0x368] sm:$0xff] }
  0x1a   :  { %184 = vmatpush.msra.mxu0 %v50_v48  ;;  %219 = vmatpush.msra.mxu1 %v51_v49  ;;  %v137_v11 = vld [vmem:[%s4316_s1 + $0x378] sm:$0xff]  ;;  %v136_v12 = vld [vmem:[%s4316_s1 + $0x370] sm:$0xff]  ;;  %v2452_v13 = vld [vmem:[%s4317_s0 + $0x8] sm:$0xff] }
  0x1b   :  { %254 = vmatpush.msra.mxu2 %v52_v50  ;;  %289 = vmatpush.msra.mxu3 %v53_v51  ;;  %v126_v14 = vld [vmem:[%s4316_s1 + $0x320] sm:$0xff]  ;;  %v127_v15 = vld [vmem:[%s4316_s1 + $0x328] sm:$0xff]  ;;  %v129_v16 = vld [vmem:[%s4316_s1 + $0x338] sm:$0xff] }
  0x1c   :  { %185 = vmatpush.msra.mxu0 %v42_v52  ;;  %220 = vmatpush.msra.mxu1 %v43_v53  ;;  %v128_v17 = vld [vmem:[%s4316_s1 + $0x330] sm:$0xff]  ;;  %v118_v18 = vld [vmem:[%s4316_s1 + $0x2e0] sm:$0xff]  ;;  %v119_v19 = vld [vmem:[%s4316_s1 + $0x2e8] sm:$0xff] }
  0x1d   :  { %255 = vmatpush.msra.mxu2 %v44_v54  ;;  %290 = vmatpush.msra.mxu3 %v45_v55  ;;  %v121_v20 = vld [vmem:[%s4316_s1 + $0x2f8] sm:$0xff]  ;;  %v120_v21 = vld [vmem:[%s4316_s1 + $0x2f0] sm:$0xff]  ;;  %v110_v22 = vld [vmem:[%s4316_s1 + $0x2a0] sm:$0xff] }
  0x1e   :  { %186 = vmatpush.msra.mxu0 %v34_v56  ;;  %221 = vmatpush.msra.mxu1 %v35_v57  ;;  %v111_v23 = vld [vmem:[%s4316_s1 + $0x2a8] sm:$0xff]  ;;  %v113_v24 = vld [vmem:[%s4316_s1 + $0x2b8] sm:$0xff]  ;;  %v112_v25 = vld [vmem:[%s4316_s1 + $0x2b0] sm:$0xff] }
  0x1f   :  { %256 = vmatpush.msra.mxu2 %v36_v58  ;;  %291 = vmatpush.msra.mxu3 %v37_v59  ;;  %v2497_v26 = vld [vmem:[%s4317_s0 + $0x10] sm:$0xff]  ;;  %v102_v27 = vld [vmem:[%s4316_s1 + $0x260] sm:$0xff]  ;;  %v103_v28 = vld [vmem:[%s4316_s1 + $0x268] sm:$0xff] }
  0x20   :  { %187 = vmatpush.msra.mxu0 %v26_v60  ;;  %222 = vmatpush.msra.mxu1 %v27_v61  ;;  %v105_v29 = vld [vmem:[%s4316_s1 + $0x278] sm:$0xff]  ;;  %v104_v30 = vld [vmem:[%s4316_s1 + $0x270] sm:$0xff]  ;;  %v94_v31 = vld [vmem:[%s4316_s1 + $0x220] sm:$0xff] }
  0x21   :  { %257 = vmatpush.msra.mxu2 %v28_v62  ;;  %292 = vmatpush.msra.mxu3 %v29_v63  ;;  %v95_v32 = vld [vmem:[%s4316_s1 + $0x228] sm:$0xff]  ;;  %v97_v33 = vld [vmem:[%s4316_s1 + $0x238] sm:$0xff]  ;;  %v96_v34 = vld [vmem:[%s4316_s1 + $0x230] sm:$0xff] }
  0x22   :  { %188 = vmatmul.f32.vlgmr.msra.gmra.mxu0 %v2407_v0  ;;  %223 = vmatmul.f32.vlgmr.msra.gmra.mxu1 %v2407_v0  ;;  %v86_v35 = vld [vmem:[%s4316_s1 + $0x1e0] sm:$0xff]  ;;  %v87_v36 = vld [vmem:[%s4316_s1 + $0x1e8] sm:$0xff]  ;;  %v89_v37 = vld [vmem:[%s4316_s1 + $0x1f8] sm:$0xff] }
  0x23   :  { %258 = vmatmul.f32.vlgmr.msra.gmra.mxu2 %v2407_v0  ;;  %293 = vmatmul.f32.vlgmr.msra.gmra.mxu3 %v2407_v0  ;;  %v88_v38 = vld [vmem:[%s4316_s1 + $0x1f0] sm:$0xff]  ;;  %v2542_v39 = vld [vmem:[%s4317_s0 + $0x18] sm:$0xff]  ;;  %v78_v40 = vld [vmem:[%s4316_s1 + $0x1a0] sm:$0xff] }
  0x24   :  { %312 = vmatpush.msrb.mxu0 %v150_v1  ;;  %347 = vmatpush.msrb.mxu1 %v151_v2  ;;  %v79_v41 = vld [vmem:[%s4316_s1 + $0x1a8] sm:$0xff]  ;;  %v81_v42 = vld [vmem:[%s4316_s1 + $0x1b8] sm:$0xff]  ;;  %v80_v43 = vld [vmem:[%s4316_s1 + $0x1b0] sm:$0xff] }
  0x25   :  { %417 = vmatpush.msrb.mxu3 %v153_v3  ;;  %382 = vmatpush.msrb.mxu2 %v152_v4  ;;  %v70_v44 = vld [vmem:[%s4316_s1 + $0x160] sm:$0xff]  ;;  %v71_v45 = vld [vmem:[%s4316_s1 + $0x168] sm:$0xff]  ;;  %v73_v46 = vld [vmem:[%s4316_s1 + $0x178] sm:$0xff] }
  0x26   :  { %313 = vmatpush.msrb.mxu0 %v142_v5  ;;  %348 = vmatpush.msrb.mxu1 %v143_v6  ;;  %v72_v47 = vld [vmem:[%s4316_s1 + $0x170] sm:$0xff]  ;;  %v62_v48 = vld [vmem:[%s4316_s1 + $0x120] sm:$0xff]  ;;  %v63_v49 = vld [vmem:[%s4316_s1 + $0x128] sm:$0xff] }
  0x27   :  { %418 = vmatpush.msrb.mxu3 %v145_v7  ;;  %383 = vmatpush.msrb.mxu2 %v144_v8  ;;  %v65_v50 = vld [vmem:[%s4316_s1 + $0x138] sm:$0xff]  ;;  %v64_v51 = vld [vmem:[%s4316_s1 + $0x130] sm:$0xff]  ;;  %v2587_v52 = vld [vmem:[%s4317_s0 + $0x20] sm:$0xff] }
  0x28   :  { %314 = vmatpush.msrb.mxu0 %v134_v9  ;;  %349 = vmatpush.msrb.mxu1 %v135_v10  ;;  %v54_v53 = vld [vmem:[%s4316_s1 + $0xe0] sm:$0xff]  ;;  %v55_v54 = vld [vmem:[%s4316_s1 + $0xe8] sm:$0xff]  ;;  %v56_v55 = vld [vmem:[%s4316_s1 + $0xf0] sm:$0xff] }
  0x29   :  { %419 = vmatpush.msrb.mxu3 %v137_v11  ;;  %384 = vmatpush.msrb.mxu2 %v136_v12  ;;  %v57_v56 = vld [vmem:[%s4316_s1 + $0xf8] sm:$0xff]  ;;  %v46_v57 = vld [vmem:[%s4316_s1 + $0xa0] sm:$0xff]  ;;  %v47_v58 = vld [vmem:[%s4316_s1 + $0xa8] sm:$0xff] }
  0x2a   :  { %191 = vmatmul.f32.gmra.mxu0 %v2452_v13  ;;  %226 = vmatmul.f32.gmra.mxu1 %v2452_v13  ;;  %v48_v59 = vld [vmem:[%s4316_s1 + $0xb0] sm:$0xff]  ;;  %v49_v60 = vld [vmem:[%s4316_s1 + $0xb8] sm:$0xff]  ;;  %v38_v61 = vld [vmem:[%s4316_s1 + $0x60] sm:$0xff] }
  0x2b   :  { %261 = vmatmul.f32.gmra.mxu2 %v2452_v13  ;;  %296 = vmatmul.f32.gmra.mxu3 %v2452_v13  ;;  %v39_v62 = vld [vmem:[%s4316_s1 + $0x68] sm:$0xff]  ;;  %v40_v63 = vld [vmem:[%s4316_s1 + $0x70] sm:$0xff]  ;;  %v41_v1 = vld [vmem:[%s4316_s1 + $0x78] sm:$0xff] }
  0x2c   :  { %315 = vmatpush.msrb.mxu0 %v126_v14  ;;  %350 = vmatpush.msrb.mxu1 %v127_v15  ;;  %v2632_v2 = vld [vmem:[%s4317_s0 + $0x28] sm:$0xff]  ;;  %v30_v3 = vld [vmem:[%s4316_s1 + $0x20] sm:$0xff]  ;;  %v32_v5 = vld [vmem:[%s4316_s1 + $0x30] sm:$0xff] }
  0x2d   :  { %420 = vmatpush.msrb.mxu3 %v129_v16  ;;  %385 = vmatpush.msrb.mxu2 %v128_v17  ;;  %v31_v4 = vld [vmem:[%s4316_s1 + $0x28] sm:$0xff]  ;;  %v33_v6 = vld [vmem:[%s4316_s1 + $0x38] sm:$0xff]  ;;  %v2653_v7 = vld [vmem:[%s4318_s2 + $0x1e0] sm:$0xff] }
  0x2e   :  { %316 = vmatpush.msrb.mxu0 %v118_v18  ;;  %351 = vmatpush.msrb.mxu1 %v119_v19  ;;  %v2658_v8 = vld [vmem:[%s4318_s2 + $0x1e8] sm:$0xff]  ;;  %v2663_v9 = vld [vmem:[%s4318_s2 + $0x1f8] sm:$0xff]  ;;  %v2668_v10 = vld [vmem:[%s4318_s2 + $0x1f0] sm:$0xff] }
  0x2f   :  { %421 = vmatpush.msrb.mxu3 %v121_v20  ;;  %386 = vmatpush.msrb.mxu2 %v120_v21  ;;  %v2673_v11 = vld [vmem:[%s4318_s2 + $0x1c0] sm:$0xff]  ;;  %v2678_v12 = vld [vmem:[%s4318_s2 + $0x1c8] sm:$0xff]  ;;  %v2685_v14 = vld [vmem:[%s4318_s2 + $0x1d8] sm:$0xff] }
  0x30   :  { %317 = vmatpush.msrb.mxu0 %v110_v22  ;;  %352 = vmatpush.msrb.mxu1 %v111_v23  ;;  %v2690_v15 = vld [vmem:[%s4318_s2 + $0x1d0] sm:$0xff]  ;;  %v2699_v16 = vld [vmem:[%s4318_s2 + $0x1a0] sm:$0xff]  ;;  %v2704_v17 = vld [vmem:[%s4318_s2 + $0x1a8] sm:$0xff] }
  0x31   :  { %422 = vmatpush.msrb.mxu3 %v113_v24  ;;  %387 = vmatpush.msrb.mxu2 %v112_v25  ;;  %v2713_v18 = vld [vmem:[%s4318_s2 + $0x1b8] sm:$0xff]  ;;  %v2718_v19 = vld [vmem:[%s4318_s2 + $0x1b0] sm:$0xff]  ;;  %v2725_v20 = vld [vmem:[%s4318_s2 + $0x180] sm:$0xff] }
  0x32   :  { %194 = vmatmul.f32.gmra.mxu0 %v2497_v26  ;;  %229 = vmatmul.f32.gmra.mxu1 %v2497_v26  ;;  %v2730_v21 = vld [vmem:[%s4318_s2 + $0x188] sm:$0xff]  ;;  %v2737_v22 = vld [vmem:[%s4318_s2 + $0x198] sm:$0xff]  ;;  %v2748_v23 = vld [vmem:[%s4318_s2 + $0x160] sm:$0xff] }
  0x33   :  { %264 = vmatmul.f32.gmra.mxu2 %v2497_v26  ;;  %299 = vmatmul.f32.gmra.mxu3 %v2497_v26  ;;  %v2753_v24 = vld [vmem:[%s4318_s2 + $0x168] sm:$0xff]  ;;  %v2761_v25 = vld [vmem:[%s4318_s2 + $0x178] sm:$0xff] }
  0x34   :  { %318 = vmatpush.msrb.mxu0 %v102_v27  ;;  %353 = vmatpush.msrb.mxu1 %v103_v28  ;;  %v2766_v27 = vld [vmem:[%s4318_s2 + $0x170] sm:$0xff]  ;;  %v2775_v28 = vld [vmem:[%s4318_s2 + $0x140] sm:$0xff] }
  0x35   :  { %423 = vmatpush.msrb.mxu3 %v105_v29  ;;  %388 = vmatpush.msrb.mxu2 %v104_v30  ;;  %v2780_v29 = vld [vmem:[%s4318_s2 + $0x148] sm:$0xff]  ;;  %v2789_v30 = vld [vmem:[%s4318_s2 + $0x158] sm:$0xff] }
  0x36   :  { %319 = vmatpush.msrb.mxu0 %v94_v31  ;;  %354 = vmatpush.msrb.mxu1 %v95_v32  ;;  %v2794_v31 = vld [vmem:[%s4318_s2 + $0x150] sm:$0xff]  ;;  %v2801_v32 = vld [vmem:[%s4318_s2 + $0x120] sm:$0xff] }
  0x37   :  { %424 = vmatpush.msrb.mxu3 %v97_v33  ;;  %389 = vmatpush.msrb.mxu2 %v96_v34  ;;  %v2806_v33 = vld [vmem:[%s4318_s2 + $0x128] sm:$0xff]  ;;  %v2813_v34 = vld [vmem:[%s4318_s2 + $0x138] sm:$0xff] }
  0x38   :  { %320 = vmatpush.msrb.mxu0 %v86_v35  ;;  %355 = vmatpush.msrb.mxu1 %v87_v36  ;;  %v2824_v35 = vld [vmem:[%s4318_s2 + $0x100] sm:$0xff]  ;;  %v2829_v36 = vld [vmem:[%s4318_s2 + $0x108] sm:$0xff] }
  0x39   :  { %425 = vmatpush.msrb.mxu3 %v89_v37  ;;  %390 = vmatpush.msrb.mxu2 %v88_v38  ;;  %v2837_v37 = vld [vmem:[%s4318_s2 + $0x118] sm:$0xff]  ;;  %v2842_v38 = vld [vmem:[%s4318_s2 + $0x110] sm:$0xff] }
  0x3a   :  { %197 = vmatmul.f32.gmra.mxu0 %v2542_v39  ;;  %232 = vmatmul.f32.gmra.mxu1 %v2542_v39 }
  0x3b   :  { %267 = vmatmul.f32.gmra.mxu2 %v2542_v39  ;;  %302 = vmatmul.f32.gmra.mxu3 %v2542_v39 }
  0x3c   :  { %321 = vmatpush.msrb.mxu0 %v78_v40  ;;  %356 = vmatpush.msrb.mxu1 %v79_v41  ;;  %v2851_v40 = vld [vmem:[%s4318_s2 + $0xe0] sm:$0xff]  ;;  %v2856_v41 = vld [vmem:[%s4318_s2 + $0xe8] sm:$0xff] }
  0x3d   :  { %426 = vmatpush.msrb.mxu3 %v81_v42  ;;  %391 = vmatpush.msrb.mxu2 %v80_v43  ;;  %v2865_v42 = vld [vmem:[%s4318_s2 + $0xf8] sm:$0xff]  ;;  %v2870_v43 = vld [vmem:[%s4318_s2 + $0xf0] sm:$0xff] }
  0x3e   :  { %322 = vmatpush.msrb.mxu0 %v70_v44  ;;  %357 = vmatpush.msrb.mxu1 %v71_v45  ;;  %v2877_v44 = vld [vmem:[%s4318_s2 + $0xc0] sm:$0xff]  ;;  %v2882_v45 = vld [vmem:[%s4318_s2 + $0xc8] sm:$0xff] }
  0x3f   :  { %427 = vmatpush.msrb.mxu3 %v73_v46  ;;  %392 = vmatpush.msrb.mxu2 %v72_v47  ;;  %v2889_v46 = vld [vmem:[%s4318_s2 + $0xd8] sm:$0xff]  ;;  %v2900_v47 = vld [vmem:[%s4318_s2 + $0xa0] sm:$0xff] }
  0x40   :  { %323 = vmatpush.msrb.mxu0 %v62_v48  ;;  %358 = vmatpush.msrb.mxu1 %v63_v49  ;;  %v2905_v48 = vld [vmem:[%s4318_s2 + $0xa8] sm:$0xff]  ;;  %v2913_v49 = vld [vmem:[%s4318_s2 + $0xb8] sm:$0xff] }
  0x41   :  { %428 = vmatpush.msrb.mxu3 %v65_v50  ;;  %393 = vmatpush.msrb.mxu2 %v64_v51  ;;  %v2918_v50 = vld [vmem:[%s4318_s2 + $0xb0] sm:$0xff]  ;;  %v2927_v51 = vld [vmem:[%s4318_s2 + $0x80] sm:$0xff] }
  0x42   :  { %200 = vmatmul.f32.gmra.mxu0 %v2587_v52  ;;  %235 = vmatmul.f32.gmra.mxu1 %v2587_v52 }
  0x43   :  { %270 = vmatmul.f32.gmra.mxu2 %v2587_v52  ;;  %305 = vmatmul.f32.gmra.mxu3 %v2587_v52 }
  0x44   :  { %324 = vmatpush.msrb.mxu0 %v54_v53  ;;  %359 = vmatpush.msrb.mxu1 %v55_v54  ;;  %v2932_v53 = vld [vmem:[%s4318_s2 + $0x88] sm:$0xff]  ;;  %v2941_v54 = vld [vmem:[%s4318_s2 + $0x98] sm:$0xff] }
  0x45   :  { %394 = vmatpush.msrb.mxu2 %v56_v55  ;;  %429 = vmatpush.msrb.mxu3 %v57_v56  ;;  %v2946_v55 = vld [vmem:[%s4318_s2 + $0x90] sm:$0xff]  ;;  %v2953_v56 = vld [vmem:[%s4318_s2 + $0x60] sm:$0xff] }
  0x46   :  { %325 = vmatpush.msrb.mxu0 %v46_v57  ;;  %360 = vmatpush.msrb.mxu1 %v47_v58  ;;  %v2958_v57 = vld [vmem:[%s4318_s2 + $0x68] sm:$0xff]  ;;  %v2965_v58 = vld [vmem:[%s4318_s2 + $0x70] sm:$0xff] }
  0x47   :  { %395 = vmatpush.msrb.mxu2 %v48_v59  ;;  %430 = vmatpush.msrb.mxu3 %v49_v60  ;;  %v2976_v59 = vld [vmem:[%s4318_s2 + $0x40] sm:$0xff]  ;;  %v2981_v60 = vld [vmem:[%s4318_s2 + $0x48] sm:$0xff] }
  0x48   :  { %326 = vmatpush.msrb.mxu0 %v38_v61  ;;  %361 = vmatpush.msrb.mxu1 %v39_v62  ;;  %v2989_v61 = vld [vmem:[%s4318_s2 + $0x50] sm:$0xff]  ;;  %v2994_v62 = vld [vmem:[%s4318_s2 + $0x58] sm:$0xff] }
  0x49   :  { %396 = vmatpush.msrb.mxu2 %v40_v63  ;;  %431 = vmatpush.msrb.mxu3 %v41_v1  ;;  %4399 = vst [vmem:[#allocation2_spill] sm:$0xff] %v2994_v62  ;;  %v3003_v63 = vld [vmem:[%s4318_s2 + $0x20] sm:$0xff]  ;;  %v3008_v1 = vld [vmem:[%s4318_s2 + $0x28] sm:$0xff] }
  0x4a   :  { %203 = vmatmul.f32.gmra.mxu0 %v2632_v2  ;;  %238 = vmatmul.f32.gmra.mxu1 %v2632_v2  ;;  %4400 = vst [vmem:[#allocation3_spill] sm:$0xff] %v3003_v63 }
  0x4b   :  { %273 = vmatmul.f32.gmra.mxu2 %v2632_v2  ;;  %308 = vmatmul.f32.gmra.mxu3 %v2632_v2 }
  0x4c   :  { %327 = vmatpush.msrb.mxu0 %v30_v3  ;;  %362 = vmatpush.msrb.mxu1 %v31_v4  ;;  %v3017_v3 = vld [vmem:[%s4318_s2 + $0x30] sm:$0xff]  ;;  %v3022_v4 = vld [vmem:[%s4318_s2 + $0x38] sm:$0xff] }
  0x4d   :  { %397 = vmatpush.msrb.mxu2 %v32_v5  ;;  %432 = vmatpush.msrb.mxu3 %v33_v6  ;;  %v3029_v5 = vld [vmem:[%s4318_s2] sm:$0xff]  ;;  %v3034_v6 = vld [vmem:[%s4318_s2 + $0x8] sm:$0xff] }
  0x4e   :  { %580 = vmatpush.msra.mxu0 %v2653_v7  ;;  %603 = vmatpush.msra.mxu1 %v2658_v8 }
  0x4f   :  { %649 = vmatpush.msra.mxu3 %v2663_v9  ;;  %626 = vmatpush.msra.mxu2 %v2668_v10 }
  0x50   :  { %581 = vmatpush.msra.mxu0 %v2673_v11  ;;  %604 = vmatpush.msra.mxu1 %v2678_v12 }
  0x51   :  { %650 = vmatpush.msra.mxu3 %v2685_v14  ;;  %627 = vmatpush.msra.mxu2 %v2690_v15 }
  0x52   :  { %328 = vmatmul.f32.vlgmr.msrb.gmra.mxu0 %v2407_v0  ;;  %363 = vmatmul.f32.vlgmr.msrb.gmra.mxu1 %v2407_v0 }
  0x53   :  { %398 = vmatmul.f32.vlgmr.msrb.gmra.mxu2 %v2407_v0  ;;  %433 = vmatmul.f32.vlgmr.msrb.gmra.mxu3 %v2407_v0  ;;  %v2742_v0 = vld [vmem:[%s4318_s2 + $0x190] sm:$0xff] }
  0x54   :  { %582 = vmatpush.msra.mxu0 %v2699_v16  ;;  %605 = vmatpush.msra.mxu1 %v2704_v17 }
  0x55   :  { %651 = vmatpush.msra.mxu3 %v2713_v18  ;;  %628 = vmatpush.msra.mxu2 %v2718_v19 }
  0x56   :  { %583 = vmatpush.msra.mxu0 %v2725_v20  ;;  %606 = vmatpush.msra.mxu1 %v2730_v21 }
  0x57   :  { %652 = vmatpush.msra.mxu3 %v2737_v22  ;;  %629 = vmatpush.msra.mxu2 %v2742_v0 }
  0x58   :  { %584 = vmatpush.msra.mxu0 %v2748_v23  ;;  %607 = vmatpush.msra.mxu1 %v2753_v24 }
  0x59   :  { %653 = vmatpush.msra.mxu3 %v2761_v25  ;;  %630 = vmatpush.msra.mxu2 %v2766_v27 }
  0x5a   :  { %331 = vmatmul.f32.gmra.mxu0 %v2452_v13  ;;  %366 = vmatmul.f32.gmra.mxu1 %v2452_v13 }
  0x5b   :  { %401 = vmatmul.f32.gmra.mxu2 %v2452_v13  ;;  %436 = vmatmul.f32.gmra.mxu3 %v2452_v13  ;;  %v2818_v13 = vld [vmem:[%s4318_s2 + $0x130] sm:$0xff] }
  0x5c   :  { %585 = vmatpush.msra.mxu0 %v2775_v28  ;;  %608 = vmatpush.msra.mxu1 %v2780_v29 }
  0x5d   :  { %654 = vmatpush.msra.mxu3 %v2789_v30  ;;  %631 = vmatpush.msra.mxu2 %v2794_v31 }
  0x5e   :  { %586 = vmatpush.msra.mxu0 %v2801_v32  ;;  %609 = vmatpush.msra.mxu1 %v2806_v33 }
  0x5f   :  { %655 = vmatpush.msra.mxu3 %v2813_v34  ;;  %632 = vmatpush.msra.mxu2 %v2818_v13 }
  0x60   :  { %587 = vmatpush.msra.mxu0 %v2824_v35  ;;  %610 = vmatpush.msra.mxu1 %v2829_v36 }
  0x61   :  { %656 = vmatpush.msra.mxu3 %v2837_v37  ;;  %633 = vmatpush.msra.mxu2 %v2842_v38 }
  0x62   :  { %334 = vmatmul.f32.gmra.mxu0 %v2497_v26  ;;  %369 = vmatmul.f32.gmra.mxu1 %v2497_v26 }
  0x63   :  { %404 = vmatmul.f32.gmra.mxu2 %v2497_v26  ;;  %439 = vmatmul.f32.gmra.mxu3 %v2497_v26  ;;  %v2894_v26 = vld [vmem:[%s4318_s2 + $0xd0] sm:$0xff] }
  0x64   :  { %588 = vmatpush.msra.mxu0 %v2851_v40  ;;  %611 = vmatpush.msra.mxu1 %v2856_v41 }
  0x65   :  { %657 = vmatpush.msra.mxu3 %v2865_v42  ;;  %634 = vmatpush.msra.mxu2 %v2870_v43 }
  0x66   :  { %589 = vmatpush.msra.mxu0 %v2877_v44  ;;  %612 = vmatpush.msra.mxu1 %v2882_v45 }
  0x67   :  { %658 = vmatpush.msra.mxu3 %v2889_v46  ;;  %635 = vmatpush.msra.mxu2 %v2894_v26 }
  0x68   :  { %590 = vmatpush.msra.mxu0 %v2900_v47  ;;  %613 = vmatpush.msra.mxu1 %v2905_v48 }
  0x69   :  { %659 = vmatpush.msra.mxu3 %v2913_v49  ;;  %636 = vmatpush.msra.mxu2 %v2918_v50 }
  0x6a   :  { %337 = vmatmul.f32.gmra.mxu0 %v2542_v39  ;;  %372 = vmatmul.f32.gmra.mxu1 %v2542_v39 }
  0x6b   :  { %407 = vmatmul.f32.gmra.mxu2 %v2542_v39  ;;  %442 = vmatmul.f32.gmra.mxu3 %v2542_v39  ;;  %v2970_v39 = vld [vmem:[%s4318_s2 + $0x78] sm:$0xff] }
  0x6c   :  { %591 = vmatpush.msra.mxu0 %v2927_v51  ;;  %614 = vmatpush.msra.mxu1 %v2932_v53 }
  0x6d   :  { %660 = vmatpush.msra.mxu3 %v2941_v54  ;;  %637 = vmatpush.msra.mxu2 %v2946_v55 }
  0x6e   :  { %592 = vmatpush.msra.mxu0 %v2953_v56  ;;  %615 = vmatpush.msra.mxu1 %v2958_v57 }
  0x6f   :  { %638 = vmatpush.msra.mxu2 %v2965_v58  ;;  %661 = vmatpush.msra.mxu3 %v2970_v39 }
  0x70   :  { %593 = vmatpush.msra.mxu0 %v2976_v59  ;;  %616 = vmatpush.msra.mxu1 %v2981_v60 }
  0x71   :  { %639 = vmatpush.msra.mxu2 %v2989_v61  ;;  %662 = vmatpush.msra.mxu3 %v2994_v62  ;;  %v3041_v62 = vld [vmem:[%s4318_s2 + $0x10] sm:$0xff] }
  0x72   :  { %340 = vmatmul.f32.gmra.mxu0 %v2587_v52  ;;  %375 = vmatmul.f32.gmra.mxu1 %v2587_v52 }
  0x73   :  { %410 = vmatmul.f32.gmra.mxu2 %v2587_v52  ;;  %445 = vmatmul.f32.gmra.mxu3 %v2587_v52  ;;  %v3046_v52 = vld [vmem:[%s4318_s2 + $0x18] sm:$0xff] }
  0x74   :  { %594 = vmatpush.msra.mxu0 %v3003_v63  ;;  %617 = vmatpush.msra.mxu1 %v3008_v1 }
  0x75   :  { %640 = vmatpush.msra.mxu2 %v3017_v3  ;;  %663 = vmatpush.msra.mxu3 %v3022_v4 }
  0x76   :  { %595 = vmatpush.msra.mxu0 %v3029_v5  ;;  %618 = vmatpush.msra.mxu1 %v3034_v6 }
  0x77   :  { %641 = vmatpush.msra.mxu2 %v3041_v62  ;;  %664 = vmatpush.msra.mxu3 %v3046_v52 }
  0x78   :  { %806 = vmatpush.msrb.mxu0 %v2653_v7  ;;  %829 = vmatpush.msrb.mxu1 %v2658_v8 }
  0x79   :  { %852 = vmatpush.msrb.mxu2 %v2668_v10  ;;  %875 = vmatpush.msrb.mxu3 %v2663_v9 }
  0x7a   :  { %343 = vmatmul.f32.gmra.mxu0 %v2632_v2  ;;  %378 = vmatmul.f32.gmra.mxu1 %v2632_v2 }
  0x7b   :  { %413 = vmatmul.f32.gmra.mxu2 %v2632_v2  ;;  %448 = vmatmul.f32.gmra.mxu3 %v2632_v2  ;;  %v4324_v2 = vmov 0.0  }
  0x7c   :  { %807 = vmatpush.msrb.mxu0 %v2673_v11  ;;  %830 = vmatpush.msrb.mxu1 %v2678_v12 }
  0x7d   :  { %853 = vmatpush.msrb.mxu2 %v2690_v15  ;;  %876 = vmatpush.msrb.mxu3 %v2685_v14 }
  0x7e   :  { %808 = vmatpush.msrb.mxu0 %v2699_v16  ;;  %831 = vmatpush.msrb.mxu1 %v2704_v17 }
  0x7f   :  { %854 = vmatpush.msrb.mxu2 %v2718_v19  ;;  %877 = vmatpush.msrb.mxu3 %v2713_v18 }
  0x80   :  { %809 = vmatpush.msrb.mxu0 %v2725_v20  ;;  %832 = vmatpush.msrb.mxu1 %v2730_v21 }
  0x81   :  { %855 = vmatpush.msrb.mxu2 %v2742_v0  ;;  %878 = vmatpush.msrb.mxu3 %v2737_v22 }
  0x82   :  { %596 = vmatmul.f32.vlgmr.msra.gmra.mxu0 %v4324_v2  ;;  %619 = vmatmul.f32.vlgmr.msra.gmra.mxu1 %v4324_v2 }
  0x83   :  { %642 = vmatmul.f32.vlgmr.msra.gmra.mxu2 %v4324_v2  ;;  %665 = vmatmul.f32.vlgmr.msra.gmra.mxu3 %v4324_v2 }
  0x84   :  { %810 = vmatpush.msrb.mxu0 %v2748_v23  ;;  %833 = vmatpush.msrb.mxu1 %v2753_v24 }
  0x85   :  { %856 = vmatpush.msrb.mxu2 %v2766_v27  ;;  %879 = vmatpush.msrb.mxu3 %v2761_v25 }
  0x86   :  { %811 = vmatpush.msrb.mxu0 %v2775_v28  ;;  %834 = vmatpush.msrb.mxu1 %v2780_v29 }
  0x87   :  { %857 = vmatpush.msrb.mxu2 %v2794_v31  ;;  %880 = vmatpush.msrb.mxu3 %v2789_v30 }
  0x88   :  { %812 = vmatpush.msrb.mxu0 %v2801_v32  ;;  %835 = vmatpush.msrb.mxu1 %v2806_v33 }
  0x89   :  { %858 = vmatpush.msrb.mxu2 %v2818_v13  ;;  %881 = vmatpush.msrb.mxu3 %v2813_v34 }
  0x8a   :  { %599 = vmatmul.f32.gmra.mxu0 %v4324_v2  ;;  %622 = vmatmul.f32.gmra.mxu1 %v4324_v2 }
  0x8b   :  { %645 = vmatmul.f32.gmra.mxu2 %v4324_v2  ;;  %668 = vmatmul.f32.gmra.mxu3 %v4324_v2  ;;  %v4401_v2 = vld [vmem:[#allocation2_spill] sm:$0xff] }
  0x8c   :  { %813 = vmatpush.msrb.mxu0 %v2824_v35  ;;  %836 = vmatpush.msrb.mxu1 %v2829_v36 }
  0x8d   :  { %859 = vmatpush.msrb.mxu2 %v2842_v38  ;;  %882 = vmatpush.msrb.mxu3 %v2837_v37 }
  0x8e   :  { %814 = vmatpush.msrb.mxu0 %v2851_v40  ;;  %837 = vmatpush.msrb.mxu1 %v2856_v41 }
  0x8f   :  { %860 = vmatpush.msrb.mxu2 %v2870_v43  ;;  %883 = vmatpush.msrb.mxu3 %v2865_v42 }
  0x90   :  { %815 = vmatpush.msrb.mxu0 %v2877_v44  ;;  %838 = vmatpush.msrb.mxu1 %v2882_v45 }
  0x91   :  { %861 = vmatpush.msrb.mxu2 %v2894_v26  ;;  %884 = vmatpush.msrb.mxu3 %v2889_v46 }
  0x92   :  { %816 = vmatpush.msrb.mxu0 %v2900_v47  ;;  %839 = vmatpush.msrb.mxu1 %v2905_v48 }
  0x93   :  { %862 = vmatpush.msrb.mxu2 %v2918_v50  ;;  %885 = vmatpush.msrb.mxu3 %v2913_v49 }
  0x94   :  { %817 = vmatpush.msrb.mxu0 %v2927_v51  ;;  %840 = vmatpush.msrb.mxu1 %v2932_v53 }
  0x95   :  { %863 = vmatpush.msrb.mxu2 %v2946_v55  ;;  %886 = vmatpush.msrb.mxu3 %v2941_v54 }
  0x96   :  { %818 = vmatpush.msrb.mxu0 %v2953_v56  ;;  %841 = vmatpush.msrb.mxu1 %v2958_v57 }
  0x97   :  { %864 = vmatpush.msrb.mxu2 %v2965_v58  ;;  %887 = vmatpush.msrb.mxu3 %v2970_v39 }
  0x98   :  { %819 = vmatpush.msrb.mxu0 %v2976_v59  ;;  %842 = vmatpush.msrb.mxu1 %v2981_v60 }
  0x99   :  { %865 = vmatpush.msrb.mxu2 %v2989_v61  ;;  %888 = vmatpush.msrb.mxu3 %v4401_v2 }
  0x9a   :  { %820 = vmatpush.msrb.mxu0 %v3003_v63  ;;  %843 = vmatpush.msrb.mxu1 %v3008_v1 }
  0x9b   :  { %866 = vmatpush.msrb.mxu2 %v3017_v3  ;;  %889 = vmatpush.msrb.mxu3 %v3022_v4 }
  0x9c   :  { %821 = vmatpush.msrb.mxu0 %v3029_v5  ;;  %844 = vmatpush.msrb.mxu1 %v3034_v6 }
  0x9d   :  { %867 = vmatpush.msrb.mxu2 %v3041_v62  ;;  %890 = vmatpush.msrb.mxu3 %v3046_v52 }
  0x9e   :  { %1032 = vmatpush.msra.mxu0 %v2653_v7  ;;  %1055 = vmatpush.msra.mxu1 %v2658_v8 }
  0x9f   :  { %v3132_v2 = vpop.f32.mrf.mxu0  ;;  %v3134_v63 = vpop.f32.mrf.mxu1  ;;  %1078 = vmatpush.msra.mxu2 %v2668_v10  ;;  %1101 = vmatpush.msra.mxu3 %v2663_v9 }
  0xa0   :  { %1033 = vmatpush.msra.mxu0 %v2673_v11  ;;  %1056 = vmatpush.msra.mxu1 %v2678_v12  ;;  %v3171_v11 = vld [vmem:[%s4319_s4] sm:$0xff] }
  0xa1   :  { %1079 = vmatpush.msra.mxu2 %v2690_v15  ;;  %1102 = vmatpush.msra.mxu3 %v2685_v14  ;;  %v3180_v12 = vperm.slane %v3171_v11, 0  ;;  %v3183_v14 = vperm.slane %v3171_v11, 1 }
  0xa2   :  { %1034 = vmatpush.msra.mxu0 %v2699_v16  ;;  %1057 = vmatpush.msra.mxu1 %v2704_v17 }
  0xa3   :  { %1080 = vmatpush.msra.mxu2 %v2718_v19  ;;  %1103 = vmatpush.msra.mxu3 %v2713_v18 }
  0xa4   :  { %1035 = vmatpush.msra.mxu0 %v2725_v20  ;;  %1058 = vmatpush.msra.mxu1 %v2730_v21  ;;  %v3210_v21 = vperm.slane %v3171_v11, 2 }
  0xa5   :  { %1081 = vmatpush.msra.mxu2 %v2742_v0  ;;  %1104 = vmatpush.msra.mxu3 %v2737_v22  ;;  %v3213_v22 = vperm.slane %v3171_v11, 3 }
  0xa6   :  { %v3150_v7 = vpop.f32.mrf.mxu2  ;;  %v3152_v8 = vpop.f32.mrf.mxu3  ;;  %1036 = vmatpush.msra.mxu0 %v2748_v23  ;;  %1059 = vmatpush.msra.mxu1 %v2753_v24 }
  0xa7   :  { %v3156_v9 = vpop.f32.mrf.mxu0  ;;  %v3158_v10 = vpop.f32.mrf.mxu1  ;;  %1082 = vmatpush.msra.mxu2 %v2766_v27  ;;  %1105 = vmatpush.msra.mxu3 %v2761_v25 }
  0xa8   :  { %1037 = vmatpush.msra.mxu0 %v2775_v28  ;;  %1060 = vmatpush.msra.mxu1 %v2780_v29 }
  0xa9   :  { %1083 = vmatpush.msra.mxu2 %v2794_v31  ;;  %1106 = vmatpush.msra.mxu3 %v2789_v30  ;;  %v4402_v31 = vld [vmem:[#allocation2_spill] sm:$0xff] }
  0xaa   :  { %1038 = vmatpush.msra.mxu0 %v2801_v32  ;;  %1061 = vmatpush.msra.mxu1 %v2806_v33  ;;  %v4403_v32 = vld [vmem:[#allocation3_spill] sm:$0xff] }
  0xab   :  { %1084 = vmatpush.msra.mxu2 %v2818_v13  ;;  %1107 = vmatpush.msra.mxu3 %v2813_v34 }
  0xac   :  { %1039 = vmatpush.msra.mxu0 %v2824_v35  ;;  %1062 = vmatpush.msra.mxu1 %v2829_v36 }
  0xad   :  { %1085 = vmatpush.msra.mxu2 %v2842_v38  ;;  %1108 = vmatpush.msra.mxu3 %v2837_v37 }
  0xae   :  { %v3185_v15 = vpop.f32.mrf.mxu2  ;;  %v3187_v16 = vpop.f32.mrf.mxu3  ;;  %1040 = vmatpush.msra.mxu0 %v2851_v40  ;;  %1063 = vmatpush.msra.mxu1 %v2856_v41 }
  0xaf   :  { %v195_v17 = vpop.f32.mrf.mxu0  ;;  %v230_v18 = vpop.f32.mrf.mxu1  ;;  %1086 = vmatpush.msra.mxu2 %v2870_v43  ;;  %1109 = vmatpush.msra.mxu3 %v2865_v42 }
  0xb0   :  { %v3194_v19 = vadd.f32 %v195_v17, %v3180_v12  ;;  %v3197_v20 = vadd.f32 %v230_v18, %v3183_v14  ;;  %1041 = vmatpush.msra.mxu0 %v2877_v44  ;;  %1064 = vmatpush.msra.mxu1 %v2882_v45 }
  0xb1   :  { %1087 = vmatpush.msra.mxu2 %v2894_v26  ;;  %1110 = vmatpush.msra.mxu3 %v2889_v46 }
  0xb2   :  { %1042 = vmatpush.msra.mxu0 %v2900_v47  ;;  %1065 = vmatpush.msra.mxu1 %v2905_v48  ;;  %v3270_v48 = vperm.slane %v3171_v11, 4 }
  0xb3   :  { %1088 = vmatpush.msra.mxu2 %v2918_v50  ;;  %1111 = vmatpush.msra.mxu3 %v2913_v49  ;;  %v3273_v49 = vperm.slane %v3171_v11, 5 }
  0xb4   :  { %1043 = vmatpush.msra.mxu0 %v2927_v51  ;;  %1066 = vmatpush.msra.mxu1 %v2932_v53  ;;  %4410 = vst [vmem:[#allocation8_spill] sm:$0xff] %v3270_v48 }
  0xb5   :  { %1089 = vmatpush.msra.mxu2 %v2946_v55  ;;  %1112 = vmatpush.msra.mxu3 %v2941_v54  ;;  %4411 = vst [vmem:[#allocation9_spill] sm:$0xff] %v3273_v49 }
  0xb6   :  { %v265_v0 = vpop.f32.mrf.mxu2  ;;  %v300_v23 = vpop.f32.mrf.mxu3  ;;  %1044 = vmatpush.msra.mxu0 %v2953_v56  ;;  %1067 = vmatpush.msra.mxu1 %v2958_v57 }
  0xb7   :  { %v3220_v24 = vadd.f32 %v265_v0, %v3210_v21  ;;  %v3223_v25 = vadd.f32 %v300_v23, %v3213_v22  ;;  %v198_v27 = vpop.f32.mrf.mxu0  ;;  %v233_v28 = vpop.f32.mrf.mxu1  ;;  %1090 = vmatpush.msra.mxu2 %v2965_v58  ;;  %1113 = vmatpush.msra.mxu3 %v2970_v39  ;;  %v3288_v39 = vperm.slane %v3171_v11, 6 }
  0xb8   :  { %v3228_v29 = vadd.f32 %v198_v27, %v3180_v12  ;;  %v3231_v30 = vadd.f32 %v233_v28, %v3183_v14  ;;  %1045 = vmatpush.msra.mxu0 %v2976_v59  ;;  %1068 = vmatpush.msra.mxu1 %v2981_v60  ;;  %v3291_v59 = vperm.slane %v3171_v11, 7 }
  0xb9   :  { %1091 = vmatpush.msra.mxu2 %v2989_v61  ;;  %1114 = vmatpush.msra.mxu3 %v4402_v31  ;;  %4416 = vst [vmem:[#allocation14_spill] sm:$0xff] %v3288_v39 }
  0xba   :  { %1046 = vmatpush.msra.mxu0 %v4403_v32  ;;  %1069 = vmatpush.msra.mxu1 %v3008_v1  ;;  %4417 = vst [vmem:[#allocation15_spill] sm:$0xff] %v3291_v59 }
  0xbb   :  { %1092 = vmatpush.msra.mxu2 %v3017_v3  ;;  %1115 = vmatpush.msra.mxu3 %v3022_v4 }
  0xbc   :  { %1047 = vmatpush.msra.mxu0 %v3029_v5  ;;  %1070 = vmatpush.msra.mxu1 %v3034_v6 }
  0xbd   :  { %1093 = vmatpush.msra.mxu2 %v3041_v62  ;;  %1116 = vmatpush.msra.mxu3 %v3046_v52 }
  0xbe   :  { %v268_v33 = vpop.f32.mrf.mxu2  ;;  %v303_v34 = vpop.f32.mrf.mxu3 }
  0xbf   :  { %v3246_v13 = vadd.f32 %v268_v33, %v3210_v21  ;;  %v3249_v35 = vadd.f32 %v303_v34, %v3213_v22  ;;  %v201_v36 = vpop.f32.mrf.mxu0  ;;  %v236_v37 = vpop.f32.mrf.mxu1 }
  0xc0   :  { %v3252_v38 = vadd.f32 %v201_v36, %v3180_v12  ;;  %v3255_v40 = vadd.f32 %v236_v37, %v3183_v14 }
  0xc2   :  { %4404 = vst [vmem:[#allocation2_spill] sm:$0xff] %v3252_v38 }
  0xc3   :  { %4405 = vst [vmem:[#allocation3_spill] sm:$0xff] %v3255_v40  ;;  %v3726_v40 = vld [vmem:[%s4321_s3 + $0x98] sm:$0xff] }
  0xc4   :  { %4457 = vst [vmem:[#allocation53_spill] sm:$0xff] %v3726_v40 }
  0xc6   :  { %v271_v41 = vpop.f32.mrf.mxu2  ;;  %v306_v42 = vpop.f32.mrf.mxu3 }
  0xc7   :  { %v3258_v43 = vadd.f32 %v271_v41, %v3210_v21  ;;  %v3261_v44 = vadd.f32 %v306_v42, %v3213_v22  ;;  %v204_v45 = vpop.f32.mrf.mxu0  ;;  %v239_v46 = vpop.f32.mrf.mxu1 }
  0xc8   :  { %v3264_v26 = vadd.f32 %v204_v45, %v3180_v12  ;;  %v3267_v47 = vadd.f32 %v239_v46, %v3183_v14 }
  0xc9   :  { %4406 = vst [vmem:[#allocation4_spill] sm:$0xff] %v3258_v43  ;;  %v3712_v43 = vld [vmem:[%s4321_s3 + $0x88] sm:$0xff] }
  0xca   :  { %4407 = vst [vmem:[#allocation5_spill] sm:$0xff] %v3261_v44 }
  0xcb   :  { %4408 = vst [vmem:[#allocation6_spill] sm:$0xff] %v3264_v26 }
  0xcc   :  { %4409 = vst [vmem:[#allocation7_spill] sm:$0xff] %v3267_v47 }
  0xcd   :  { %4455 = vst [vmem:[#allocation51_spill] sm:$0xff] %v3712_v43 }
  0xce   :  { %v274_v50 = vpop.f32.mrf.mxu2  ;;  %v309_v51 = vpop.f32.mrf.mxu3 }
  0xcf   :  { %v3276_v53 = vadd.f32 %v274_v50, %v3210_v21  ;;  %v3279_v54 = vadd.f32 %v309_v51, %v3213_v22  ;;  %v329_v55 = vpop.f32.mrf.mxu0  ;;  %v364_v56 = vpop.f32.mrf.mxu1 }
  0xd0   :  { %v3282_v57 = vadd.f32 %v329_v55, %v3270_v48  ;;  %v3285_v58 = vadd.f32 %v364_v56, %v3273_v49 }
  0xd1   :  { %4412 = vst [vmem:[#allocation10_spill] sm:$0xff] %v3276_v53  ;;  %v3639_v53 = vld [vmem:[%s4321_s3 + $0xf8] sm:$0xff] }
  0xd2   :  { %4413 = vst [vmem:[#allocation11_spill] sm:$0xff] %v3279_v54 }
  0xd3   :  { %4414 = vst [vmem:[#allocation12_spill] sm:$0xff] %v3282_v57 }
  0xd4   :  { %4415 = vst [vmem:[#allocation13_spill] sm:$0xff] %v3285_v58 }
  0xd5   :  { %4445 = vst [vmem:[#allocation41_spill] sm:$0xff] %v3639_v53 }
  0xd6   :  { %v399_v60 = vpop.f32.mrf.mxu2  ;;  %v434_v61 = vpop.f32.mrf.mxu3 }
  0xd7   :  { %v3294_v62 = vadd.f32 %v399_v60, %v3288_v39  ;;  %v3297_v1 = vadd.f32 %v434_v61, %v3291_v59  ;;  %v332_v3 = vpop.f32.mrf.mxu0  ;;  %v367_v4 = vpop.f32.mrf.mxu1 }
  0xd8   :  { %v3300_v5 = vadd.f32 %v332_v3, %v3270_v48  ;;  %v3303_v6 = vadd.f32 %v367_v4, %v3273_v49 }
  0xd9   :  { %4418 = vst [vmem:[#allocation16_spill] sm:$0xff] %v3294_v62 }
  0xda   :  { %4419 = vst [vmem:[#allocation17_spill] sm:$0xff] %v3297_v1 }
  0xdb   :  { %4420 = vst [vmem:[#allocation18_spill] sm:$0xff] %v3300_v5 }
  0xdc   :  { %4421 = vst [vmem:[#allocation19_spill] sm:$0xff] %v3303_v6 }
  0xde   :  { %v402_v52 = vpop.f32.mrf.mxu2  ;;  %v437_v17 = vpop.f32.mrf.mxu3 }
  0xdf   :  { %v3306_v11 = vadd.f32 %v402_v52, %v3288_v39  ;;  %v3309_v18 = vadd.f32 %v437_v17, %v3291_v59  ;;  %v335_v0 = vpop.f32.mrf.mxu0  ;;  %v370_v23 = vpop.f32.mrf.mxu1  ;;  %v190_v52 = vadd.f32 %v3132_v2, %v3180_v12  ;;  %v225_v17 = vadd.f32 %v3134_v63, %v3183_v14 }
  0xe0   :  { %v3312_v27 = vadd.f32 %v335_v0, %v3270_v48  ;;  %v3315_v28 = vadd.f32 %v370_v23, %v3273_v49  ;;  %v193_v2 = vadd.f32 %v3156_v9, %v3180_v12  ;;  %v228_v63 = vadd.f32 %v3158_v10, %v3183_v14 }
  0xe1   :  { %4422 = vst [vmem:[#allocation20_spill] sm:$0xff] %v3306_v11  ;;  %v295_v11 = vadd.f32 %v3152_v8, %v3213_v22  ;;  %v260_v9 = vadd.f32 %v3150_v7, %v3210_v21  ;;  %v298_v10 = vadd.f32 %v3187_v16, %v3213_v22  ;;  %v263_v16 = vadd.f32 %v3185_v15, %v3210_v21 }
  0xe2   :  { %4423 = vst [vmem:[#allocation21_spill] sm:$0xff] %v3309_v18 }
  0xe3   :  { %4424 = vst [vmem:[#allocation22_spill] sm:$0xff] %v3312_v27  ;;  %v3629_v27 = vld [vmem:[%s4321_s3 + $0xe8] sm:$0xff] }
  0xe4   :  { %4425 = vst [vmem:[#allocation23_spill] sm:$0xff] %v3315_v28  ;;  %v3622_v28 = vld [vmem:[%s4321_s3 + $0xe0] sm:$0xff] }
  0xe5   :  { %4442 = vst [vmem:[#allocation38_spill] sm:$0xff] %v3622_v28 }
  0xe6   :  { %v405_v31 = vpop.f32.mrf.mxu2  ;;  %v440_v32 = vpop.f32.mrf.mxu3  ;;  %4443 = vst [vmem:[#allocation39_spill] sm:$0xff] %v3629_v27 }
  0xe7   :  { %v3318_v33 = vadd.f32 %v405_v31, %v3288_v39  ;;  %v3321_v34 = vadd.f32 %v440_v32, %v3291_v59  ;;  %v338_v36 = vpop.f32.mrf.mxu0  ;;  %v373_v37 = vpop.f32.mrf.mxu1 }
  0xe8   :  { %v3324_v41 = vadd.f32 %v338_v36, %v3270_v48  ;;  %v3327_v42 = vadd.f32 %v373_v37, %v3273_v49  ;;  %v3707_v48 = vld [vmem:[%s4321_s3 + $0x80] sm:$0xff] }
  0xe9   :  { %4426 = vst [vmem:[#allocation24_spill] sm:$0xff] %v3318_v33  ;;  %v3605_v33 = vld [vmem:[%s4321_s3 + $0x108] sm:$0xff] }
  0xea   :  { %4427 = vst [vmem:[#allocation25_spill] sm:$0xff] %v3321_v34  ;;  %v3617_v34 = vld [vmem:[%s4321_s3 + $0x118] sm:$0xff] }
  0xeb   :  { %4428 = vst [vmem:[#allocation26_spill] sm:$0xff] %v3324_v41  ;;  %v3612_v41 = vld [vmem:[%s4321_s3 + $0x110] sm:$0xff] }
  0xec   :  { %4429 = vst [vmem:[#allocation27_spill] sm:$0xff] %v3327_v42 }
  0xed   :  { %4454 = vst [vmem:[#allocation50_spill] sm:$0xff] %v3707_v48 }
  0xee   :  { %v408_v45 = vpop.f32.mrf.mxu2  ;;  %v443_v46 = vpop.f32.mrf.mxu3 }
  0xef   :  { %v3330_v50 = vadd.f32 %v408_v45, %v3288_v39  ;;  %v3333_v51 = vadd.f32 %v443_v46, %v3291_v59  ;;  %v3335_v55 = vpop.f32.mrf.mxu0  ;;  %v3337_v56 = vpop.f32.mrf.mxu1 }
  0xf0   :  { %4432 = vst [vmem:[#allocation30_spill] sm:$0xff] %v3335_v55 }
  0xf1   :  { %4430 = vst [vmem:[#allocation28_spill] sm:$0xff] %v3330_v50  ;;  %v3595_v50 = vld [vmem:[%s4321_s3 + $0x138] sm:$0xff] }
  0xf2   :  { %4431 = vst [vmem:[#allocation29_spill] sm:$0xff] %v3333_v51  ;;  %v3600_v51 = vld [vmem:[%s4321_s3 + $0x100] sm:$0xff] }
  0xf3   :  { %4433 = vst [vmem:[#allocation31_spill] sm:$0xff] %v3337_v56  ;;  %v3698_v56 = vld [vmem:[%s4321_s3 + $0xb8] sm:$0xff] }
  0xf4   :  { %4453 = vst [vmem:[#allocation49_spill] sm:$0xff] %v3698_v56 }
  0xf6   :  { %v3339_v60 = vpop.f32.mrf.mxu2  ;;  %v3341_v61 = vpop.f32.mrf.mxu3 }
  0xf7   :  { %4434 = vst [vmem:[#allocation32_spill] sm:$0xff] %v3339_v60  ;;  %v3343_v3 = vpop.f32.mrf.mxu0  ;;  %v3345_v4 = vpop.f32.mrf.mxu1 }
  0xf8   :  { %4435 = vst [vmem:[#allocation33_spill] sm:$0xff] %v3341_v61 }
  0xf9   :  { %4436 = vst [vmem:[#allocation34_spill] sm:$0xff] %v3343_v3  ;;  %v3652_v3 = vld [vmem:[%s4321_s3 + $0xc8] sm:$0xff] }
  0xfa   :  { %4437 = vst [vmem:[#allocation35_spill] sm:$0xff] %v3345_v4  ;;  %v3647_v4 = vld [vmem:[%s4321_s3 + $0xc0] sm:$0xff] }
  0xfb   :  { %4446 = vst [vmem:[#allocation42_spill] sm:$0xff] %v3647_v4 }
  0xfc   :  { %4447 = vst [vmem:[#allocation43_spill] sm:$0xff] %v3652_v3 }
  0xfe   :  { %v3351_v0 = vpop.f32.mrf.mxu3  ;;  %v3353_v37 = vpop.f32.mrf.mxu2 }
  0xff   :  { %4438 = vst [vmem:[#allocation36_spill] sm:$0xff] %v3351_v0  ;;  %v597_v23 = vpop.f32.mrf.mxu0  ;;  %v620_v31 = vpop.f32.mrf.mxu1 }
 0x100   :  { %v672_v32 = vadd.f32 %v597_v23, %v190_v52  ;;  %v673_v36 = vadd.f32 %v620_v31, %v225_v17  ;;  %4439 = vst [vmem:[#allocation37_spill] sm:$0xff] %v3353_v37  ;;  %v3634_v37 = vld [vmem:[%s4321_s3 + $0xf0] sm:$0xff] }
 0x101   :  { %4444 = vst [vmem:[#allocation40_spill] sm:$0xff] %v3634_v37 }
 0x102   :  { %v1952_v45 = vmul.f32 -1.442695, %v672_v32  ;;  %v1954_v46 = vmul.f32 -1.442695, %v673_v36 }
 0x104   :  { %1989 = vpow2.f32 %v1952_v45 }
 0x105   :  { %1991 = vpow2.f32 %v1954_v46 }
 0x106   :  { %v666_v18 = vpop.f32.mrf.mxu3  ;;  %v643_v1 = vpop.f32.mrf.mxu2 }
 0x107   :  { %v675_v62 = vadd.f32 %v666_v18, %v295_v11  ;;  %v600_v6 = vpop.f32.mrf.mxu0  ;;  %v623_v52 = vpop.f32.mrf.mxu1  ;;  %v674_v14 = vadd.f32 %v643_v1, %v260_v9 }
 0x108   :  { %v676_v17 = vadd.f32 %v600_v6, %v193_v2  ;;  %v677_v23 = vadd.f32 %v623_v52, %v228_v63 }
 0x109   :  { %v1956_v31 = vmul.f32 -1.442695, %v675_v62 }
 0x10a   :  { %v1990_v32 = vpop.eup %1989  ;;  %v1953_v36 = vmul.f32 -1.442695, %v676_v17  ;;  %v1955_v8 = vmul.f32 -1.442695, %v677_v23 }
 0x10b   :  { %v1992_v45 = vpop.eup %1991  ;;  %v686_v5 = vadd.f32 1.0, %v1990_v32  ;;  %1993 = vpow2.f32 %v1956_v31 }
 0x10c   :  { %v724_v46 = vadd.f32 1.0, %v1992_v45  ;;  %1995 = vpow2.f32 %v1953_v36 }
 0x10d   :  { %1997 = vrcp.f32 %v686_v5  ;;  %v697_v32 = vand.u32 2147483647, %v686_v5  ;;  %v699_v36 = vand.u32 2147483648, %v686_v5  ;;  %vm693_vm3 = vweird.f32 %v686_v5 }
 0x10e   :  { %1999 = vrcp.f32 %v724_v46  ;;  %v669_v12 = vpop.f32.mrf.mxu3  ;;  %v646_v1 = vpop.f32.mrf.mxu2  ;;  %v737_v9 = vand.u32 2147483648, %v724_v46  ;;  %vm731_vm2 = vweird.f32 %v724_v46 }
 0x10f   :  { %2001 = vpow2.f32 %v1955_v8  ;;  %v679_v62 = vadd.f32 %v669_v12, %v298_v10  ;;  %v735_v10 = vand.u32 2147483647, %v724_v46  ;;  %vm698_vm4 = vcmp.eq.f32.partialorder %v697_v32, 8.507059e+37 }
 0x110   :  { %2003 = vtanh.f32 %v674_v14  ;;  %v678_v14 = vadd.f32 %v646_v1, %v263_v16 }
 0x111   :  { %v1994_v6 = vpop.eup %1993  ;;  %v1957_v52 = vmul.f32 -1.442695, %v679_v62  ;;  %vm736_vm7 = vcmp.eq.f32.partialorder %v735_v10, 8.507059e+37 }
 0x112   :  { %v1996_v11 = vpop.eup %1995  ;;  %v3365_v18 = vadd.f32 1.0, %v1994_v6 }
 0x113   :  { %v1998_v2 = vpop.eup %1997  ;;  %v3367_v63 = vadd.f32 1.0, %v1996_v11 }
 0x114   :  { %v2000_v17 = vpop.eup %1999  ;;  %v689_v7 = vmul.f32 %v1998_v2, %v686_v5  ;;  %2005 = vrcp.f32 %v3365_v18  ;;  %vm694_vm0 = vweird.f32 %v1998_v2  ;;  %v777_v10 = vand.u32 2147483648, %v3365_v18 }
 0x115   :  { %v2002_v23 = vpop.eup %2001  ;;  %v727_v22 = vmul.f32 %v2000_v17, %v724_v46  ;;  %2007 = vrcp.f32 %v3367_v63  ;;  %vm732_vm1 = vweird.f32 %v2000_v17  ;;  %vm695_vm5 = vmor %vm693_vm3, %vm694_vm0  ;;  %v714_v5 = vand.u32 2147483648, %v3367_v63 }
 0x116   :  { %v690_v31 = vsub.f32 1.0, %v689_v7  ;;  %v3373_v45 = vadd.f32 1.0, %v2002_v23  ;;  %2009 = vpow2.f32 %v1957_v52  ;;  %v2004_v62 = vpop.eup %2003  ;;  %v738_v7 = vor.u32 1.1754944e-38, %v737_v9  ;;  %vm733_vm6 = vmor %vm731_vm2, %vm732_vm1 }
 0x117   :  { %v728_v8 = vsub.f32 1.0, %v727_v22  ;;  %v700_v23 = vor.u32 1.1754944e-38, %v699_v36  ;;  %vm708_vm9 = vweird.f32 %v3367_v63  ;;  %vm771_vm13 = vweird.f32 %v3365_v18 }
 0x118   :  { %v691_v12 = vmul.f32 %v1998_v2, %v690_v31  ;;  %2011 = vrcp.f32 %v3373_v45  ;;  %vm746_vm0 = vweird.f32 %v3373_v45 }
 0x119   :  { %v729_v15 = vmul.f32 %v2000_v17, %v728_v8  ;;  %2013 = vtanh.f32 %v678_v14 }
 0x11a   :  { %v3376_v21 = vpop.eup %2005  ;;  %v692_v6 = vadd.f32 %v1998_v2, %v691_v12 }
 0x11b   :  { %v2008_v11 = vpop.eup %2007  ;;  %v730_v22 = vadd.f32 %v2000_v17, %v729_v15  ;;  %v767_v52 = vmul.f32 %v3376_v21, %v3365_v18  ;;  %vm772_vm10 = vweird.f32 %v3376_v21 }
 0x11c   :  { %v696_v31 = vsel %vm695_vm5, %v1998_v2, %v692_v6  ;;  %v704_v16 = vmul.f32 %v2008_v11, %v3367_v63  ;;  %v2010_v1 = vpop.eup %2009  ;;  %vm709_vm8 = vweird.f32 %v2008_v11  ;;  %vm3399_vm15 = vmor %vm771_vm13, %vm772_vm10 }
 0x11d   :  { %v701_v8 = vsel %vm698_vm4, %v700_v23, %v696_v31  ;;  %v734_v46 = vsel %vm733_vm6, %v2000_v17, %v730_v22  ;;  %v768_v12 = vsub.f32 1.0, %v767_v52  ;;  %v3382_v15 = vadd.f32 1.0, %v2010_v1  ;;  %vm710_vm11 = vmor %vm708_vm9, %vm709_vm8 }
 0x11e   :  { %v2012_v32 = vpop.eup %2011  ;;  %v739_v9 = vsel %vm736_vm7, %v738_v7, %v734_v46  ;;  %v798_v58 = vmul.f32 %v2004_v62, %v701_v8  ;;  %v705_v36 = vsub.f32 1.0, %v704_v16  ;;  %v712_v17 = vand.u32 2147483647, %v3367_v63 }
 0x11f   :  { %v796_v57 = vmul.f32 0.0, %v739_v9  ;;  %v769_v2 = vmul.f32 %v3376_v21, %v768_v12  ;;  %v742_v6 = vmul.f32 %v2012_v32, %v3373_v45  ;;  %2015 = vrcp.f32 %v3382_v15  ;;  %v2014_v22 = vpop.eup %2013 }
 0x120   :  { %v706_v14 = vmul.f32 %v2008_v11, %v705_v36  ;;  %v752_v62 = vand.u32 2147483648, %v3373_v45  ;;  %v715_v31 = vor.u32 1.1754944e-38, %v714_v5  ;;  %vm747_vm12 = vweird.f32 %v2012_v32 }
 0x121   :  { %v3389_v23 = vadd.f32 %v798_v58, %v796_v57  ;;  %v743_v7 = vsub.f32 1.0, %v742_v6  ;;  %v770_v16 = vadd.f32 %v3376_v21, %v769_v2  ;;  %v750_v57 = vand.u32 2147483647, %v3373_v45  ;;  %vm748_vm1 = vmor %vm746_vm0, %vm747_vm12 }
 0x122   :  { %v707_v52 = vadd.f32 %v2008_v11, %v706_v14  ;;  %vm713_vm14 = vcmp.eq.f32.partialorder %v712_v17, 8.507059e+37  ;;  %v775_v63 = vand.u32 2147483647, %v3365_v18  ;;  %v753_v9 = vor.u32 1.1754944e-38, %v752_v62 }
 0x123   :  { %2017 = vtanh.f32 %v3389_v23  ;;  %v744_v1 = vmul.f32 %v2012_v32, %v743_v7  ;;  %v774_v2 = vsel %vm3399_vm15, %v3376_v21, %v770_v16  ;;  %vm751_vm2 = vcmp.eq.f32.partialorder %v750_v57, 8.507059e+37 }
 0x124   :  { %v711_v58 = vsel %vm710_vm11, %v2008_v11, %v707_v52  ;;  %v778_v11 = vor.u32 1.1754944e-38, %v777_v10  ;;  %vm776_vm3 = vcmp.eq.f32.partialorder %v775_v63, 8.507059e+37  ;;  %v792_v21 = vand.u32 2147483648, %v3382_v15 }
 0x125   :  { %v716_v46 = vsel %vm713_vm14, %v715_v31, %v711_v58  ;;  %v745_v12 = vadd.f32 %v2012_v32, %v744_v1  ;;  %v2016_v5 = vpop.eup %2015  ;;  %vm786_vm5 = vweird.f32 %v3382_v15  ;;  %v790_v10 = vand.u32 2147483647, %v3382_v15 }
 0x126   :  { %v799_v36 = vmul.f32 %v2014_v22, %v716_v46  ;;  %v782_v18 = vmul.f32 %v2016_v5, %v3382_v15  ;;  %v779_v52 = vsel %vm776_vm3, %v778_v11, %v774_v2  ;;  %vm787_vm4 = vweird.f32 %v2016_v5 }
 0x127   :  { %v749_v6 = vsel %vm748_vm1, %v2012_v32, %v745_v12  ;;  %vm788_vm6 = vmor %vm786_vm5, %vm787_vm4  ;;  %v793_v16 = vor.u32 1.1754944e-38, %v792_v21  ;;  %vm791_vm7 = vcmp.eq.f32.partialorder %v790_v10, 8.507059e+37  ;;  %v3498_v21 = vld [vmem:[%s4321_s3 + $0x180] sm:$0xff]  ;;  %v3508_v10 = vld [vmem:[%s4321_s3 + $0x190] sm:$0xff] }
 0x128   :  { %v754_v14 = vsel %vm751_vm2, %v753_v9, %v749_v6  ;;  %v783_v45 = vsub.f32 1.0, %v782_v18  ;;  %v3430_v9 = vld [vmem:[%s4321_s3 + $0x1e8] sm:$0xff]  ;;  %v3459_v18 = vld [vmem:[%s4321_s3 + $0x1d0] sm:$0xff] }
 0x129   :  { %v2018_v17 = vpop.eup %2017  ;;  %v797_v7 = vmul.f32 0.0, %v754_v14  ;;  %v3454_v6 = vld [vmem:[%s4321_s3 + $0x1c8] sm:$0xff]  ;;  %v3466_v14 = vld [vmem:[%s4321_s3 + $0x1d8] sm:$0xff] }
 0x12a   :  { %v804_v31 = vmul.f32 %v2018_v17, %v779_v52  ;;  %v784_v62 = vmul.f32 %v2016_v5, %v783_v45  ;;  %v3473_v17 = vld [vmem:[%s4321_s3 + $0x1a0] sm:$0xff]  ;;  %v3483_v45 = vld [vmem:[%s4321_s3 + $0x1b0] sm:$0xff] }
 0x12b   :  { %v3408_v1 = vadd.f32 %v799_v36, %v797_v7  ;;  %v3435_v36 = vld [vmem:[%s4321_s3 + $0x1f0] sm:$0xff]  ;;  %v3478_v7 = vld [vmem:[%s4321_s3 + $0x1a8] sm:$0xff] }
 0x12c   :  { %822 = vmatmul.f32.vlgmr.msrb.gmra.mxu0 %v804_v31  ;;  %1936 = vst [vmem:[%s4320_s5] sm:$0xff] %v804_v31  ;;  %845 = vmatmul.f32.vlgmr.msrb.gmra.mxu1 %v804_v31  ;;  %v785_v32 = vadd.f32 %v2016_v5, %v784_v62 }
 0x12d   :  { %2019 = vtanh.f32 %v3408_v1  ;;  %868 = vmatmul.f32.vlgmr.msrb.gmra.mxu2 %v804_v31  ;;  %891 = vmatmul.f32.vlgmr.msrb.gmra.mxu3 %v804_v31  ;;  %v3490_v31 = vld [vmem:[%s4321_s3 + $0x1b8] sm:$0xff] }
 0x12e   :  { %v789_v22 = vsel %vm788_vm6, %v2016_v5, %v785_v32  ;;  %v3425_v5 = vld [vmem:[%s4321_s3 + $0x1e0] sm:$0xff]  ;;  %1281 = vmatpush.msrb.mxu1 %v3430_v9  ;;  %1304 = vmatpush.msrb.mxu2 %v3435_v36  ;;  %v3503_v32 = vld [vmem:[%s4321_s3 + $0x188] sm:$0xff] }
 0x12f   :  { %v794_v58 = vsel %vm791_vm7, %v793_v16, %v789_v22  ;;  %1258 = vmatpush.msrb.mxu0 %v3425_v5 }
 0x130   :  { %1282 = vmatpush.msrb.mxu1 %v3454_v6  ;;  %1305 = vmatpush.msrb.mxu2 %v3459_v18 }
 0x132   :  { %1283 = vmatpush.msrb.mxu1 %v3478_v7  ;;  %1306 = vmatpush.msrb.mxu2 %v3483_v45 }
 0x133   :  { %v2020_v57 = vpop.eup %2019 }
 0x134   :  { %v805_v63 = vmul.f32 %v2020_v57, %v794_v58  ;;  %1284 = vmatpush.msrb.mxu1 %v3503_v32  ;;  %1307 = vmatpush.msrb.mxu2 %v3508_v10  ;;  %v3522_v58 = vld [vmem:[%s4321_s3 + $0x160] sm:$0xff] }
 0x136   :  { %825 = vmatmul.f32.gmra.mxu0 %v805_v63  ;;  %1942 = vst [vmem:[%s4320_s5 + $0x30] sm:$0xff] %v805_v63  ;;  %848 = vmatmul.f32.gmra.mxu1 %v805_v63 }
 0x137   :  { %871 = vmatmul.f32.gmra.mxu2 %v805_v63  ;;  %894 = vmatmul.f32.gmra.mxu3 %v805_v63  ;;  %v3527_v63 = vld [vmem:[%s4321_s3 + $0x168] sm:$0xff] }
 0x138   :  { %1285 = vmatpush.msrb.mxu1 %v3527_v63 }
 0x1a9   :  { %v823_v8 = vpop.f32.mrf.mxu0  ;;  %v846_v46 = vpop.f32.mrf.mxu1 }
 0x1aa   :  { %v898_v12 = vadd.f32 %v823_v8, %v3194_v19  ;;  %v899_v15 = vadd.f32 %v846_v46, %v3197_v20  ;;  %v3442_v19 = vld [vmem:[%s4321_s3 + $0x1f8] sm:$0xff]  ;;  %v3449_v20 = vld [vmem:[%s4321_s3 + $0x1c0] sm:$0xff]  ;;  %v3532_v8 = vld [vmem:[%s4321_s3 + $0x170] sm:$0xff] }
 0x1ab   :  { %1327 = vmatpush.msrb.mxu3 %v3442_v19  ;;  %1259 = vmatpush.msrb.mxu0 %v3449_v20 }
 0x1ac   :  { %v1958_v2 = vmul.f32 -1.442695, %v898_v12  ;;  %v1960_v11 = vmul.f32 -1.442695, %v899_v15  ;;  %1308 = vmatpush.msrb.mxu2 %v3532_v8 }
 0x1ad   :  { %1328 = vmatpush.msrb.mxu3 %v3466_v14  ;;  %1260 = vmatpush.msrb.mxu0 %v3473_v17 }
 0x1ae   :  { %2021 = vpow2.f32 %v1958_v2  ;;  %v3541_v2 = vld [vmem:[%s4321_s3 + $0x178] sm:$0xff] }
 0x1af   :  { %2023 = vpow2.f32 %v1960_v11  ;;  %1329 = vmatpush.msrb.mxu3 %v3490_v31  ;;  %1261 = vmatpush.msrb.mxu0 %v3498_v21 }
 0x1b0   :  { %v892_v52 = vpop.f32.mrf.mxu3  ;;  %v869_v42 = vpop.f32.mrf.mxu2 }
 0x1b1   :  { %v901_v62 = vadd.f32 %v892_v52, %v3223_v25  ;;  %v3515_v25 = vld [vmem:[%s4321_s3 + $0x198] sm:$0xff]  ;;  %1262 = vmatpush.msrb.mxu0 %v3522_v58  ;;  %v900_v61 = vadd.f32 %v869_v42, %v3220_v24  ;;  %v3676_v24 = vld [vmem:[%s4321_s3 + $0xa0] sm:$0xff]  ;;  %v3681_v42 = vld [vmem:[%s4321_s3 + $0xa8] sm:$0xff] }
 0x1b2   :  { %1330 = vmatpush.msrb.mxu3 %v3515_v25  ;;  %4450 = vst [vmem:[#allocation46_spill] sm:$0xff] %v3676_v24 }
 0x1b3   :  { %v1962_v22 = vmul.f32 -1.442695, %v901_v62  ;;  %v826_v16 = vpop.f32.mrf.mxu0  ;;  %v849_v57 = vpop.f32.mrf.mxu1  ;;  %v3560_v62 = vld [vmem:[%s4321_s3 + $0x150] sm:$0xff]  ;;  %4451 = vst [vmem:[#allocation47_spill] sm:$0xff] %v3681_v42 }
 0x1b4   :  { %v2022_v46 = vpop.eup %2021  ;;  %v902_v12 = vadd.f32 %v826_v16, %v3228_v29  ;;  %v903_v15 = vadd.f32 %v849_v57, %v3231_v30  ;;  %1331 = vmatpush.msrb.mxu3 %v3541_v2  ;;  %v3550_v29 = vld [vmem:[%s4321_s3 + $0x140] sm:$0xff]  ;;  %v3555_v30 = vld [vmem:[%s4321_s3 + $0x148] sm:$0xff]  ;;  %1309 = vmatpush.msrb.mxu2 %v3560_v62 }
 0x1b5   :  { %v2024_v11 = vpop.eup %2023  ;;  %v3543_v52 = vadd.f32 1.0, %v2022_v46  ;;  %2025 = vpow2.f32 %v1962_v22  ;;  %1263 = vmatpush.msrb.mxu0 %v3550_v29  ;;  %1286 = vmatpush.msrb.mxu1 %v3555_v30  ;;  %v3569_v46 = vld [vmem:[%s4321_s3 + $0x158] sm:$0xff] }
 0x1b6   :  { %v3562_v22 = vadd.f32 1.0, %v2024_v11  ;;  %v1959_v16 = vmul.f32 -1.442695, %v902_v12  ;;  %v1961_v57 = vmul.f32 -1.442695, %v903_v15  ;;  %1332 = vmatpush.msrb.mxu3 %v3569_v46  ;;  %v3577_v12 = vld [vmem:[%s4321_s3 + $0x120] sm:$0xff] }
 0x1b7   :  { %2027 = vrcp.f32 %v3543_v52  ;;  %v3582_v15 = vld [vmem:[%s4321_s3 + $0x128] sm:$0xff]  ;;  %v3587_v11 = vld [vmem:[%s4321_s3 + $0x130] sm:$0xff]  ;;  %1264 = vmatpush.msrb.mxu0 %v3577_v12  ;;  %vm919_vm11 = vweird.f32 %v3543_v52 }
 0x1b8   :  { %2029 = vrcp.f32 %v3562_v22  ;;  %1287 = vmatpush.msrb.mxu1 %v3582_v15  ;;  %1310 = vmatpush.msrb.mxu2 %v3587_v11  ;;  %vm957_vm10 = vweird.f32 %v3562_v22 }
 0x1b9   :  { %2031 = vpow2.f32 %v1959_v16  ;;  %1333 = vmatpush.msrb.mxu3 %v3595_v50  ;;  %1265 = vmatpush.msrb.mxu0 %v3600_v51 }
 0x1ba   :  { %2033 = vpow2.f32 %v1961_v57  ;;  %v895_v16 = vpop.f32.mrf.mxu3  ;;  %1288 = vmatpush.msrb.mxu1 %v3605_v33  ;;  %1311 = vmatpush.msrb.mxu2 %v3612_v41 }
 0x1bb   :  { %v2026_v57 = vpop.eup %2025  ;;  %v905_v0 = vadd.f32 %v895_v16, %v3249_v35  ;;  %1334 = vmatpush.msrb.mxu3 %v3617_v34  ;;  %1266 = vmatpush.msrb.mxu0 %v3622_v28  ;;  %v3662_v35 = vld [vmem:[%s4321_s3 + $0xd0] sm:$0xff]  ;;  %v3667_v16 = vld [vmem:[%s4321_s3 + $0xd8] sm:$0xff] }
 0x1bc   :  { %v3655_v59 = vadd.f32 1.0, %v2026_v57  ;;  %1289 = vmatpush.msrb.mxu1 %v3629_v27  ;;  %4448 = vst [vmem:[#allocation44_spill] sm:$0xff] %v3662_v35  ;;  %1312 = vmatpush.msrb.mxu2 %v3634_v37  ;;  %v3811_v37 = vld [vmem:[%s4321_s3 + $0x20] sm:$0xff] }
 0x1bd   :  { %4449 = vst [vmem:[#allocation45_spill] sm:$0xff] %v3667_v16  ;;  %v3669_v54 = vpop.eup %2027  ;;  %v1963_v60 = vmul.f32 -1.442695, %v905_v0  ;;  %1335 = vmatpush.msrb.mxu3 %v3639_v53  ;;  %1267 = vmatpush.msrb.mxu0 %v3647_v4  ;;  %v3693_v0 = vld [vmem:[%s4321_s3 + $0xb0] sm:$0xff] }
 0x1be   :  { %v3683_v57 = vpop.eup %2029  ;;  %v915_v39 = vmul.f32 %v3669_v54, %v3543_v52  ;;  %2035 = vrcp.f32 %v3655_v59  ;;  %1290 = vmatpush.msrb.mxu1 %v3652_v3  ;;  %4452 = vst [vmem:[#allocation48_spill] sm:$0xff] %v3693_v0  ;;  %1313 = vmatpush.msrb.mxu2 %v3662_v35  ;;  %vm920_vm8 = vweird.f32 %v3669_v54  ;;  %v3791_v3 = vld [vmem:[%s4321_s3 + $0x58] sm:$0xff]  ;;  %vm997_vm0 = vweird.f32 %v3655_v59 }
 0x1bf   :  { %v2032_v49 = vpop.eup %2031  ;;  %v953_v55 = vmul.f32 %v3683_v57, %v3562_v22  ;;  %2037 = vpow2.f32 %v1963_v60  ;;  %1336 = vmatpush.msrb.mxu3 %v3667_v16  ;;  %1268 = vmatpush.msrb.mxu0 %v3676_v24  ;;  %v3721_v60 = vld [vmem:[%s4321_s3 + $0x90] sm:$0xff]  ;;  %vm958_vm9 = vweird.f32 %v3683_v57  ;;  %v3774_v16 = vld [vmem:[%s4321_s3 + $0x48] sm:$0xff]  ;;  %4464 = vst [vmem:[#allocation60_spill] sm:$0xff] %v3791_v3  ;;  %vm3795_vm12 = vmor %vm919_vm11, %vm920_vm8 }
 0x1c0   :  { %v2034_v47 = vpop.eup %2033  ;;  %v916_v26 = vsub.f32 1.0, %v915_v39  ;;  %2039 = vtanh.f32 %v900_v61  ;;  %v3714_v44 = vadd.f32 1.0, %v2032_v49  ;;  %1291 = vmatpush.msrb.mxu1 %v3681_v42  ;;  %4456 = vst [vmem:[#allocation52_spill] sm:$0xff] %v3721_v60  ;;  %v923_v39 = vand.u32 2147483647, %v3543_v52  ;;  %1314 = vmatpush.msrb.mxu2 %v3693_v0  ;;  %v3764_v0 = vld [vmem:[%s4321_s3 + $0x78] sm:$0xff]  ;;  %vm3822_vm14 = vmor %vm957_vm10, %vm958_vm9 }
 0x1c1   :  { %v954_v38 = vsub.f32 1.0, %v953_v55  ;;  %v925_v49 = vand.u32 2147483648, %v3543_v52  ;;  %v3730_v61 = vadd.f32 1.0, %v2034_v47  ;;  %1337 = vmatpush.msrb.mxu3 %v3698_v56  ;;  %v963_v42 = vand.u32 2147483648, %v3562_v22  ;;  %1269 = vmatpush.msrb.mxu0 %v3707_v48  ;;  %v3743_v47 = vld [vmem:[%s4321_s3 + $0x60] sm:$0xff]  ;;  %v3748_v55 = vld [vmem:[%s4321_s3 + $0x68] sm:$0xff]  ;;  %v872_v48 = vpop.f32.mrf.mxu2 }
 0x1c2   :  { %v917_v24 = vmul.f32 %v3669_v54, %v916_v26  ;;  %2041 = vrcp.f32 %v3714_v44  ;;  %1292 = vmatpush.msrb.mxu1 %v3712_v43  ;;  %4458 = vst [vmem:[#allocation54_spill] sm:$0xff] %v3743_v47  ;;  %v3753_v26 = vld [vmem:[%s4321_s3 + $0x70] sm:$0xff]  ;;  %v961_v43 = vand.u32 2147483647, %v3562_v22  ;;  %1315 = vmatpush.msrb.mxu2 %v3721_v60  ;;  %vm3799_vm13 = vcmp.eq.f32.partialorder %v923_v39, 8.507059e+37  ;;  %v3816_v39 = vld [vmem:[%s4321_s3 + $0x28] sm:$0xff] }
 0x1c3   :  { %4459 = vst [vmem:[#allocation55_spill] sm:$0xff] %v3748_v55  ;;  %v955_v56 = vmul.f32 %v3683_v57, %v954_v38  ;;  %2043 = vrcp.f32 %v3730_v61  ;;  %1338 = vmatpush.msrb.mxu3 %v3726_v40  ;;  %v3769_v38 = vld [vmem:[%s4321_s3 + $0x40] sm:$0xff]  ;;  %1270 = vmatpush.msrb.mxu0 %v3743_v47  ;;  %v3786_v60 = vld [vmem:[%s4321_s3 + $0x50] sm:$0xff]  ;;  %v904_v27 = vadd.f32 %v872_v48, %v3246_v13  ;;  %vm934_vm5 = vweird.f32 %v3714_v44 }
 0x1c4   :  { %4460 = vst [vmem:[#allocation56_spill] sm:$0xff] %v3753_v26  ;;  %v3776_v35 = vpop.eup %2035  ;;  %v918_v40 = vadd.f32 %v3669_v54, %v917_v24  ;;  %1293 = vmatpush.msrb.mxu1 %v3748_v55  ;;  %v926_v55 = vor.u32 1.1754944e-38, %v925_v49  ;;  %1316 = vmatpush.msrb.mxu2 %v3753_v26  ;;  %v3837_v22 = vld [vmem:[%s4321_s3 + $0x30] sm:$0xff]  ;;  %vm962_vm15 = vcmp.eq.f32.partialorder %v961_v43, 8.507059e+37  ;;  %vm972_vm6 = vweird.f32 %v3730_v61 }
 0x1c5   :  { %4461 = vst [vmem:[#allocation57_spill] sm:$0xff] %v3764_v0  ;;  %v2038_v4 = vpop.eup %2037  ;;  %v956_v47 = vadd.f32 %v3683_v57, %v955_v56  ;;  %v993_v53 = vmul.f32 %v3776_v35, %v3655_v59  ;;  %1339 = vmatpush.msrb.mxu3 %v3764_v0  ;;  %v964_v0 = vor.u32 1.1754944e-38, %v963_v42  ;;  %1271 = vmatpush.msrb.mxu0 %v3769_v38  ;;  %v3842_v42 = vld [vmem:[%s4321_s3 + $0x38] sm:$0xff]  ;;  %v3867_v43 = vld [vmem:[%s4321_s3 + $0x10] sm:$0xff]  ;;  %vm998_vm1 = vweird.f32 %v3776_v35 }
 0x1c6   :  { %4462 = vst [vmem:[#allocation58_spill] sm:$0xff] %v3774_v16  ;;  %v2040_v49 = vpop.eup %2039  ;;  %v922_v26 = vsel %vm3795_vm12, %v3669_v54, %v918_v40  ;;  %v3830_v28 = vadd.f32 1.0, %v2038_v4  ;;  %1294 = vmatpush.msrb.mxu1 %v3774_v16  ;;  %1317 = vmatpush.msrb.mxu2 %v3786_v60  ;;  %v3854_v54 = vld [vmem:[%s4321_s3] sm:$0xff]  ;;  %v3859_v4 = vld [vmem:[%s4321_s3 + $0x8] sm:$0xff]  ;;  %vm3900_vm4 = vmor %vm997_vm0, %vm998_vm1 }
 0x1c7   :  { %4463 = vst [vmem:[#allocation59_spill] sm:$0xff] %v3786_v60  ;;  %v927_v40 = vsel %vm3799_vm13, %v926_v55, %v922_v26  ;;  %v960_v13 = vsel %vm3822_vm14, %v3683_v57, %v956_v47  ;;  %v994_v48 = vsub.f32 1.0, %v993_v53  ;;  %1340 = vmatpush.msrb.mxu3 %v3791_v3  ;;  %1272 = vmatpush.msrb.mxu0 %v3811_v37  ;;  %v3872_v53 = vld [vmem:[%s4321_s3 + $0x18] sm:$0xff] }
 0x1c8   :  { %4469 = vst [vmem:[#allocation61_spill] sm:$0xff] %v3811_v37  ;;  %v2042_v55 = vpop.eup %2041  ;;  %v965_v26 = vsel %vm962_vm15, %v964_v0, %v960_v13  ;;  %v1024_v24 = vmul.f32 %v2040_v49, %v927_v40  ;;  %2045 = vrcp.f32 %v3830_v28  ;;  %1295 = vmatpush.msrb.mxu1 %v3816_v39  ;;  %1318 = vmatpush.msrb.mxu2 %v3837_v22  ;;  %v938_v13 = vand.u32 2147483647, %v3714_v44 }
 0x1c9   :  { %4470 = vst [vmem:[#allocation62_spill] sm:$0xff] %v3816_v39  ;;  %v2044_v57 = vpop.eup %2043  ;;  %v1022_v0 = vmul.f32 %v965_v26, %v3389_v23  ;;  %v995_v47 = vmul.f32 %v3776_v35, %v994_v48  ;;  %v930_v52 = vmul.f32 %v2042_v55, %v3714_v44  ;;  %1341 = vmatpush.msrb.mxu3 %v3842_v42  ;;  %2047 = vtanh.f32 %v904_v27 }
 0x1ca   :  { %4473 = vst [vmem:[#allocation63_spill] sm:$0xff] %v3837_v22  ;;  %v968_v49 = vmul.f32 %v2044_v57, %v3730_v61  ;;  %1273 = vmatpush.msrb.mxu0 %v3854_v54  ;;  %1296 = vmatpush.msrb.mxu1 %v3859_v4  ;;  %v1003_v23 = vand.u32 2147483648, %v3655_v59  ;;  %v940_v27 = vand.u32 2147483648, %v3714_v44  ;;  %vm935_vm2 = vweird.f32 %v2042_v55 }
 0x1cb   :  { %4474 = vst [vmem:[#allocation64_spill] sm:$0xff] %v3842_v42  ;;  %v3883_v56 = vadd.f32 %v1024_v24, %v1022_v0  ;;  %v931_v40 = vsub.f32 1.0, %v930_v52  ;;  %1319 = vmatpush.msrb.mxu2 %v3867_v43  ;;  %1342 = vmatpush.msrb.mxu3 %v3872_v53  ;;  %v996_v26 = vadd.f32 %v3776_v35, %v995_v47  ;;  %v978_v24 = vand.u32 2147483648, %v3730_v61  ;;  %vm936_vm7 = vmor %vm934_vm5, %vm935_vm2 }
 0x1cc   :  { %4475 = vst [vmem:[#allocation65_spill] sm:$0xff] %v3854_v54  ;;  %v969_v48 = vsub.f32 1.0, %v968_v49  ;;  %vm973_vm3 = vweird.f32 %v2044_v57  ;;  %v1004_v47 = vor.u32 1.1754944e-38, %v1003_v23  ;;  %vm939_vm9 = vcmp.eq.f32.partialorder %v938_v13, 8.507059e+37  ;;  %v4491_v13 = vld [vmem:[#allocation45_spill] sm:$0xff] }
 0x1cd   :  { %4476 = vst [vmem:[#allocation66_spill] sm:$0xff] %v3859_v4  ;;  %2049 = vtanh.f32 %v3883_v56  ;;  %v932_v0 = vmul.f32 %v2042_v55, %v931_v40  ;;  %vm974_vm8 = vmor %vm972_vm6, %vm973_vm3  ;;  %v979_v22 = vor.u32 1.1754944e-38, %v978_v24  ;;  %vm1012_vm13 = vweird.f32 %v3830_v28  ;;  %v4493_v24 = vld [vmem:[#allocation47_spill] sm:$0xff] }
 0x1ce   :  { %4477 = vst [vmem:[#allocation67_spill] sm:$0xff] %v3867_v43  ;;  %v3894_v52 = vpop.eup %2045  ;;  %v970_v4 = vmul.f32 %v2044_v57, %v969_v48  ;;  %v976_v43 = vand.u32 2147483647, %v3730_v61  ;;  %v941_v48 = vor.u32 1.1754944e-38, %v940_v27 }
 0x1cf   :  { %4478 = vst [vmem:[#allocation68_spill] sm:$0xff] %v3872_v53  ;;  %v1001_v53 = vand.u32 2147483647, %v3655_v59  ;;  %v1008_v40 = vmul.f32 %v3894_v52, %v3830_v28  ;;  %v2048_v54 = vpop.eup %2047  ;;  %v1000_v59 = vsel %vm3900_vm4, %v3776_v35, %v996_v26  ;;  %vm1013_vm12 = vweird.f32 %v3894_v52  ;;  %v4492_v26 = vld [vmem:[#allocation46_spill] sm:$0xff] }
 0x1d0   :  { %4479 = vst [vmem:[#allocation69_spill] sm:$0xff] %v3883_v56  ;;  %v933_v56 = vadd.f32 %v2042_v55, %v932_v0  ;;  %v971_v42 = vadd.f32 %v2044_v57, %v970_v4  ;;  %vm977_vm10 = vcmp.eq.f32.partialorder %v976_v43, 8.507059e+37  ;;  %vm1014_vm14 = vmor %vm1012_vm13, %vm1013_vm12  ;;  %v4487_v43 = vld [vmem:[#allocation41_spill] sm:$0xff] }
 0x1d1   :  { %v1009_v23 = vsub.f32 1.0, %v1008_v40  ;;  %vm1002_vm11 = vcmp.eq.f32.partialorder %v1001_v53, 8.507059e+37  ;;  %v4488_v53 = vld [vmem:[#allocation42_spill] sm:$0xff] }
 0x1d2   :  { %v937_v39 = vsel %vm936_vm7, %v2042_v55, %v933_v56  ;;  %v975_v44 = vsel %vm974_vm8, %v2044_v57, %v971_v42  ;;  %v1005_v27 = vsel %vm1002_vm11, %v1004_v47, %v1000_v59  ;;  %v4484_v42 = vld [vmem:[#allocation38_spill] sm:$0xff]  ;;  %v4486_v55 = vld [vmem:[#allocation40_spill] sm:$0xff]  ;;  %v4489_v57 = vld [vmem:[#allocation43_spill] sm:$0xff] }
 0x1d3   :  { %v942_v0 = vsel %vm939_vm9, %v941_v48, %v937_v39  ;;  %v2050_v37 = vpop.eup %2049  ;;  %v980_v3 = vsel %vm977_vm10, %v979_v22, %v975_v44  ;;  %v1010_v61 = vmul.f32 %v3894_v52, %v1009_v23  ;;  %v1018_v39 = vand.u32 2147483648, %v3830_v28  ;;  %v4490_v56 = vld [vmem:[#allocation44_spill] sm:$0xff]  ;;  %v4495_v47 = vld [vmem:[#allocation49_spill] sm:$0xff]  ;;  %v4496_v40 = vld [vmem:[#allocation50_spill] sm:$0xff] }
 0x1d4   :  { %v1025_v60 = vmul.f32 %v2048_v54, %v942_v0  ;;  %v1023_v4 = vmul.f32 %v980_v3, %v3408_v1  ;;  %v1030_v16 = vmul.f32 %v2050_v37, %v1005_v27  ;;  %v1016_v3 = vand.u32 2147483647, %v3830_v28  ;;  %v4485_v54 = vld [vmem:[#allocation39_spill] sm:$0xff]  ;;  %v4498_v59 = vld [vmem:[#allocation52_spill] sm:$0xff]  ;;  %v4499_v23 = vld [vmem:[#allocation53_spill] sm:$0xff] }
 0x1d5   :  { %v1011_v35 = vadd.f32 %v3894_v52, %v1010_v61  ;;  %v1019_v1 = vor.u32 1.1754944e-38, %v1018_v39  ;;  %v4483_v22 = vmov 0.0   ;;  %v4497_v48 = vld [vmem:[#allocation51_spill] sm:$0xff]  ;;  %v4500_v0 = vld [vmem:[#allocation54_spill] sm:$0xff]  ;;  %v4502_v61 = vld [vmem:[#allocation56_spill] sm:$0xff] }
 0x1d6   :  { %v3913_v49 = vadd.f32 %v1025_v60, %v1023_v4  ;;  %1048 = vmatmul.f32.vlgmr.msra.gmra.mxu0 %v1030_v16  ;;  %1938 = vst [vmem:[%s4320_s5 + $0x10] sm:$0xff] %v1030_v16  ;;  %1071 = vmatmul.f32.vlgmr.msra.gmra.mxu1 %v1030_v16  ;;  %vm1017_vm15 = vcmp.eq.f32.partialorder %v1016_v3, 8.507059e+37  ;;  %v4501_v44 = vld [vmem:[#allocation55_spill] sm:$0xff]  ;;  %v4503_v27 = vld [vmem:[#allocation57_spill] sm:$0xff]  ;;  %v4504_v4 = vld [vmem:[#allocation58_spill] sm:$0xff] }
 0x1d7   :  { %1094 = vmatmul.f32.vlgmr.msra.gmra.mxu2 %v1030_v16  ;;  %1117 = vmatmul.f32.vlgmr.msra.gmra.mxu3 %v1030_v16  ;;  %v1015_v37 = vsel %vm1014_vm14, %v3894_v52, %v1011_v35  ;;  %v4494_v52 = vld [vmem:[#allocation48_spill] sm:$0xff]  ;;  %v4505_v35 = vld [vmem:[#allocation59_spill] sm:$0xff]  ;;  %v4507_v3 = vld [vmem:[#allocation61_spill] sm:$0xff] }
 0x1d8   :  { %4482 = vst [vmem:[#allocation70_spill] sm:$0xff] %v3913_v49  ;;  %2051 = vtanh.f32 %v3913_v49  ;;  %1484 = vmatpush.msra.mxu0 %v3425_v5  ;;  %1507 = vmatpush.msra.mxu1 %v3430_v9  ;;  %v1020_v16 = vsel %vm1017_vm15, %v1019_v1, %v1015_v37  ;;  %v4506_v39 = vld [vmem:[#allocation60_spill] sm:$0xff]  ;;  %v4508_v37 = vld [vmem:[#allocation62_spill] sm:$0xff]  ;;  %v4509_v1 = vld [vmem:[#allocation63_spill] sm:$0xff] }
 0x1d9   :  { %1530 = vmatpush.msra.mxu2 %v3435_v36  ;;  %1553 = vmatpush.msra.mxu3 %v3442_v19  ;;  %v4514_v49 = vld [vmem:[#allocation68_spill] sm:$0xff] }
 0x1da   :  { %1485 = vmatpush.msra.mxu0 %v3449_v20  ;;  %1508 = vmatpush.msra.mxu1 %v3454_v6 }
 0x1db   :  { %1531 = vmatpush.msra.mxu2 %v3459_v18  ;;  %1554 = vmatpush.msra.mxu3 %v3466_v14 }
 0x1dc   :  { %1486 = vmatpush.msra.mxu0 %v3473_v17  ;;  %1509 = vmatpush.msra.mxu1 %v3478_v7 }
 0x1dd   :  { %1532 = vmatpush.msra.mxu2 %v3483_v45  ;;  %1555 = vmatpush.msra.mxu3 %v3490_v31 }
 0x1de   :  { %v2052_v28 = vpop.eup %2051  ;;  %1487 = vmatpush.msra.mxu0 %v3498_v21  ;;  %1510 = vmatpush.msra.mxu1 %v3503_v32 }
 0x1df   :  { %v1031_v60 = vmul.f32 %v2052_v28, %v1020_v16  ;;  %1533 = vmatpush.msra.mxu2 %v3508_v10  ;;  %1556 = vmatpush.msra.mxu3 %v3515_v25  ;;  %v4510_v28 = vld [vmem:[#allocation64_spill] sm:$0xff]  ;;  %v4511_v16 = vld [vmem:[#allocation65_spill] sm:$0xff] }
 0x1e0   :  { %1488 = vmatpush.msra.mxu0 %v3522_v58  ;;  %1511 = vmatpush.msra.mxu1 %v3527_v63 }
 0x1e1   :  { %1051 = vmatmul.f32.gmra.mxu0 %v1031_v60  ;;  %1944 = vst [vmem:[%s4320_s5 + $0x40] sm:$0xff] %v1031_v60  ;;  %1074 = vmatmul.f32.gmra.mxu1 %v1031_v60 }
 0x1e2   :  { %1097 = vmatmul.f32.gmra.mxu2 %v1031_v60  ;;  %1120 = vmatmul.f32.gmra.mxu3 %v1031_v60  ;;  %v4512_v60 = vld [vmem:[#allocation66_spill] sm:$0xff] }
 0x1e3   :  { %1534 = vmatpush.msra.mxu2 %v3532_v8  ;;  %1557 = vmatpush.msra.mxu3 %v3541_v2 }
 0x1e4   :  { %1489 = vmatpush.msra.mxu0 %v3550_v29  ;;  %1512 = vmatpush.msra.mxu1 %v3555_v30 }
 0x1e5   :  { %1535 = vmatpush.msra.mxu2 %v3560_v62  ;;  %1558 = vmatpush.msra.mxu3 %v3569_v46 }
 0x1e6   :  { %1490 = vmatpush.msra.mxu0 %v3577_v12  ;;  %1513 = vmatpush.msra.mxu1 %v3582_v15 }
 0x1e7   :  { %1536 = vmatpush.msra.mxu2 %v3587_v11  ;;  %1559 = vmatpush.msra.mxu3 %v3595_v50 }
 0x1e8   :  { %1491 = vmatpush.msra.mxu0 %v3600_v51  ;;  %1514 = vmatpush.msra.mxu1 %v3605_v33 }
 0x1e9   :  { %1274 = vmatmul.f32.vlgmr.msrb.gmra.mxu0 %v4483_v22  ;;  %1297 = vmatmul.f32.vlgmr.msrb.gmra.mxu1 %v4483_v22 }
 0x1ea   :  { %1320 = vmatmul.f32.vlgmr.msrb.gmra.mxu2 %v4483_v22  ;;  %1343 = vmatmul.f32.vlgmr.msrb.gmra.mxu3 %v4483_v22 }
 0x1eb   :  { %1537 = vmatpush.msra.mxu2 %v3612_v41  ;;  %1560 = vmatpush.msra.mxu3 %v3617_v34 }
 0x1ec   :  { %1492 = vmatpush.msra.mxu0 %v4484_v42  ;;  %1515 = vmatpush.msra.mxu1 %v4485_v54 }
 0x1ed   :  { %1538 = vmatpush.msra.mxu2 %v4486_v55  ;;  %1561 = vmatpush.msra.mxu3 %v4487_v43 }
 0x1ee   :  { %1493 = vmatpush.msra.mxu0 %v4488_v53  ;;  %1516 = vmatpush.msra.mxu1 %v4489_v57 }
 0x1ef   :  { %1539 = vmatpush.msra.mxu2 %v4490_v56  ;;  %1562 = vmatpush.msra.mxu3 %v4491_v13 }
 0x1f0   :  { %1494 = vmatpush.msra.mxu0 %v4492_v26  ;;  %1517 = vmatpush.msra.mxu1 %v4493_v24 }
 0x1f1   :  { %1277 = vmatmul.f32.gmra.mxu0 %v4483_v22  ;;  %1300 = vmatmul.f32.gmra.mxu1 %v4483_v22 }
 0x1f2   :  { %1323 = vmatmul.f32.gmra.mxu2 %v4483_v22  ;;  %1346 = vmatmul.f32.gmra.mxu3 %v4483_v22  ;;  %v4513_v22 = vld [vmem:[#allocation67_spill] sm:$0xff] }
 0x1f3   :  { %1540 = vmatpush.msra.mxu2 %v4494_v52  ;;  %1563 = vmatpush.msra.mxu3 %v4495_v47 }
 0x1f4   :  { %1495 = vmatpush.msra.mxu0 %v4496_v40  ;;  %1518 = vmatpush.msra.mxu1 %v4497_v48 }
 0x1f5   :  { %1541 = vmatpush.msra.mxu2 %v4498_v59  ;;  %1564 = vmatpush.msra.mxu3 %v4499_v23 }
 0x1f6   :  { %1496 = vmatpush.msra.mxu0 %v4500_v0  ;;  %1519 = vmatpush.msra.mxu1 %v4501_v44 }
 0x1f7   :  { %1542 = vmatpush.msra.mxu2 %v4502_v61  ;;  %1565 = vmatpush.msra.mxu3 %v4503_v27 }
 0x1f8   :  { %1497 = vmatpush.msra.mxu0 %v3769_v38  ;;  %1520 = vmatpush.msra.mxu1 %v4504_v4 }
 0x1f9   :  { %1543 = vmatpush.msra.mxu2 %v4505_v35  ;;  %1566 = vmatpush.msra.mxu3 %v4506_v39 }
 0x1fa   :  { %1498 = vmatpush.msra.mxu0 %v4507_v3  ;;  %1521 = vmatpush.msra.mxu1 %v4508_v37 }
 0x1fb   :  { %1544 = vmatpush.msra.mxu2 %v4509_v1  ;;  %1567 = vmatpush.msra.mxu3 %v4510_v28 }
 0x1fc   :  { %1499 = vmatpush.msra.mxu0 %v4511_v16  ;;  %1522 = vmatpush.msra.mxu1 %v4512_v60 }
 0x1fd   :  { %1545 = vmatpush.msra.mxu2 %v4513_v22  ;;  %1568 = vmatpush.msra.mxu3 %v4514_v49 }
 0x1fe   :  { %1710 = vmatpush.msrb.mxu0 %v3425_v5  ;;  %1733 = vmatpush.msrb.mxu1 %v3430_v9 }
 0x1ff   :  { %1756 = vmatpush.msrb.mxu2 %v3435_v36  ;;  %1779 = vmatpush.msrb.mxu3 %v3442_v19 }
 0x200   :  { %1711 = vmatpush.msrb.mxu0 %v3449_v20  ;;  %1734 = vmatpush.msrb.mxu1 %v3454_v6  ;;  %v4517_v20 = vld [vmem:[#allocation5_spill] sm:$0xff] }
 0x201   :  { %1757 = vmatpush.msrb.mxu2 %v3459_v18  ;;  %1780 = vmatpush.msrb.mxu3 %v3466_v14 }
 0x202   :  { %1712 = vmatpush.msrb.mxu0 %v3473_v17  ;;  %1735 = vmatpush.msrb.mxu1 %v3478_v7 }
 0x203   :  { %1758 = vmatpush.msrb.mxu2 %v3483_v45  ;;  %1781 = vmatpush.msrb.mxu3 %v3490_v31 }
 0x204   :  { %1713 = vmatpush.msrb.mxu0 %v3498_v21  ;;  %1736 = vmatpush.msrb.mxu1 %v3503_v32  ;;  %v4518_v21 = vld [vmem:[#allocation6_spill] sm:$0xff] }
 0x205   :  { %1759 = vmatpush.msrb.mxu2 %v3508_v10  ;;  %1782 = vmatpush.msrb.mxu3 %v3515_v25  ;;  %v4519_v10 = vld [vmem:[#allocation7_spill] sm:$0xff] }
 0x206   :  { %1714 = vmatpush.msrb.mxu0 %v3522_v58  ;;  %1737 = vmatpush.msrb.mxu1 %v3527_v63 }
 0x207   :  { %1760 = vmatpush.msrb.mxu2 %v3532_v8  ;;  %1783 = vmatpush.msrb.mxu3 %v3541_v2  ;;  %v4520_v8 = vld [vmem:[#allocation4_spill] sm:$0xff] }
 0x208   :  { %1715 = vmatpush.msrb.mxu0 %v3550_v29  ;;  %1738 = vmatpush.msrb.mxu1 %v3555_v30 }
 0x209   :  { %1761 = vmatpush.msrb.mxu2 %v3560_v62  ;;  %1784 = vmatpush.msrb.mxu3 %v3569_v46  ;;  %v4521_v46 = vld [vmem:[#allocation8_spill] sm:$0xff] }
 0x20a   :  { %1716 = vmatpush.msrb.mxu0 %v3577_v12  ;;  %1739 = vmatpush.msrb.mxu1 %v3582_v15  ;;  %v4522_v12 = vld [vmem:[#allocation30_spill] sm:$0xff] }
 0x20b   :  { %1762 = vmatpush.msrb.mxu2 %v3587_v11  ;;  %1785 = vmatpush.msrb.mxu3 %v3595_v50  ;;  %v342_v15 = vadd.f32 %v4522_v12, %v4521_v46  ;;  %v4523_v11 = vld [vmem:[#allocation9_spill] sm:$0xff] }
 0x20c   :  { %1717 = vmatpush.msrb.mxu0 %v3600_v51  ;;  %1740 = vmatpush.msrb.mxu1 %v3605_v33  ;;  %v4516_v51 = vld [vmem:[#allocation3_spill] sm:$0xff] }
 0x20d   :  { %1763 = vmatpush.msrb.mxu2 %v3612_v41  ;;  %1786 = vmatpush.msrb.mxu3 %v3617_v34  ;;  %v4515_v41 = vld [vmem:[#allocation2_spill] sm:$0xff] }
 0x20e   :  { %1718 = vmatpush.msrb.mxu0 %v4484_v42  ;;  %1741 = vmatpush.msrb.mxu1 %v4485_v54  ;;  %v4525_v54 = vld [vmem:[#allocation14_spill] sm:$0xff] }
 0x20f   :  { %1764 = vmatpush.msrb.mxu2 %v4486_v55  ;;  %1787 = vmatpush.msrb.mxu3 %v4487_v43  ;;  %v4526_v55 = vld [vmem:[#allocation32_spill] sm:$0xff] }
 0x210   :  { %1719 = vmatpush.msrb.mxu0 %v4488_v53  ;;  %1742 = vmatpush.msrb.mxu1 %v4489_v57  ;;  %v4079_v43 = vadd.f32 %v4526_v55, %v4525_v54  ;;  %v4527_v57 = vld [vmem:[#allocation11_spill] sm:$0xff] }
 0x211   :  { %1765 = vmatpush.msrb.mxu2 %v4490_v56  ;;  %1788 = vmatpush.msrb.mxu3 %v4491_v13 }
 0x212   :  { %1720 = vmatpush.msrb.mxu0 %v4492_v26  ;;  %1743 = vmatpush.msrb.mxu1 %v4493_v24  ;;  %v4528_v24 = vld [vmem:[#allocation15_spill] sm:$0xff] }
 0x213   :  { %1766 = vmatpush.msrb.mxu2 %v4494_v52  ;;  %1789 = vmatpush.msrb.mxu3 %v4495_v47  ;;  %v4529_v52 = vld [vmem:[#allocation33_spill] sm:$0xff] }
 0x214   :  { %1721 = vmatpush.msrb.mxu0 %v4496_v40  ;;  %1744 = vmatpush.msrb.mxu1 %v4497_v48  ;;  %v4086_v47 = vadd.f32 %v4529_v52, %v4528_v24  ;;  %v4530_v40 = vld [vmem:[#allocation34_spill] sm:$0xff] }
 0x215   :  { %1767 = vmatpush.msrb.mxu2 %v4498_v59  ;;  %1790 = vmatpush.msrb.mxu3 %v4499_v23  ;;  %v4090_v48 = vadd.f32 %v4530_v40, %v4521_v46 }
 0x216   :  { %1722 = vmatpush.msrb.mxu0 %v4500_v0  ;;  %1745 = vmatpush.msrb.mxu1 %v4501_v44  ;;  %v4531_v0 = vld [vmem:[#allocation35_spill] sm:$0xff] }
 0x217   :  { %1768 = vmatpush.msrb.mxu2 %v4502_v61  ;;  %1791 = vmatpush.msrb.mxu3 %v4503_v27  ;;  %v4094_v44 = vadd.f32 %v4531_v0, %v4523_v11  ;;  %v4532_v61 = vld [vmem:[#allocation36_spill] sm:$0xff] }
 0x218   :  { %1723 = vmatpush.msrb.mxu0 %v3769_v38  ;;  %1746 = vmatpush.msrb.mxu1 %v4504_v4  ;;  %v4524_v38 = vld [vmem:[#allocation31_spill] sm:$0xff]  ;;  %v4098_v27 = vadd.f32 %v4532_v61, %v4528_v24 }
 0x219   :  { %1769 = vmatpush.msrb.mxu2 %v4505_v35  ;;  %1792 = vmatpush.msrb.mxu3 %v4506_v39 }
 0x21a   :  { %1724 = vmatpush.msrb.mxu0 %v4507_v3  ;;  %1747 = vmatpush.msrb.mxu1 %v4508_v37 }
 0x21b   :  { %1770 = vmatpush.msrb.mxu2 %v4509_v1  ;;  %1793 = vmatpush.msrb.mxu3 %v4510_v28 }
 0x21c   :  { %1725 = vmatpush.msrb.mxu0 %v4511_v16  ;;  %1748 = vmatpush.msrb.mxu1 %v4512_v60 }
 0x21d   :  { %1771 = vmatpush.msrb.mxu2 %v4513_v22  ;;  %1794 = vmatpush.msrb.mxu3 %v4514_v49  ;;  %v377_v49 = vadd.f32 %v4524_v38, %v4523_v11 }
 0x253   :  { %v1049_v33 = vpop.f32.mrf.mxu0  ;;  %v1072_v34 = vpop.f32.mrf.mxu1 }
 0x254   :  { %v1124_v50 = vadd.f32 %v1049_v33, %v4515_v41  ;;  %v1125_v5 = vadd.f32 %v1072_v34, %v4516_v51 }
 0x256   :  { %v1964_v9 = vmul.f32 -1.442695, %v1124_v50  ;;  %v1966_v36 = vmul.f32 -1.442695, %v1125_v5 }
 0x258   :  { %2053 = vpow2.f32 %v1964_v9 }
 0x259   :  { %2055 = vpow2.f32 %v1966_v36 }
 0x25a   :  { %v1118_v19 = vpop.f32.mrf.mxu3  ;;  %v1095_v63 = vpop.f32.mrf.mxu2 }
 0x25b   :  { %v1127_v6 = vadd.f32 %v1118_v19, %v4517_v20  ;;  %v1126_v2 = vadd.f32 %v1095_v63, %v4520_v8 }
 0x25d   :  { %v1968_v18 = vmul.f32 -1.442695, %v1127_v6 }
 0x25e   :  { %v2054_v14 = vpop.eup %2053  ;;  %v1052_v17 = vpop.f32.mrf.mxu0 }
 0x25f   :  { %v1075_v7 = vpop.f32.mrf.mxu1  ;;  %v2056_v45 = vpop.eup %2055  ;;  %v1138_v31 = vadd.f32 1.0, %v2054_v14  ;;  %2057 = vpow2.f32 %v1968_v18  ;;  %v1128_v32 = vadd.f32 %v1052_v17, %v4518_v21 }
 0x260   :  { %v1129_v25 = vadd.f32 %v1075_v7, %v4519_v10  ;;  %v4069_v58 = vadd.f32 1.0, %v2056_v45  ;;  %v4533_v45 = vld [vmem:[#allocation10_spill] sm:$0xff] }
 0x261   :  { %2059 = vrcp.f32 %v1138_v31  ;;  %v1965_v29 = vmul.f32 -1.442695, %v1128_v32  ;;  %vm1145_vm0 = vweird.f32 %v1138_v31  ;;  %v1149_v3 = vand.u32 2147483647, %v1138_v31 }
 0x262   :  { %2061 = vrcp.f32 %v4069_v58  ;;  %v1967_v30 = vmul.f32 -1.442695, %v1129_v25  ;;  %v1151_v37 = vand.u32 2147483648, %v1138_v31  ;;  %vm1183_vm1 = vweird.f32 %v4069_v58 }
 0x263   :  { %2063 = vpow2.f32 %v1965_v29  ;;  %v1189_v33 = vand.u32 2147483648, %v4069_v58  ;;  %v1187_v34 = vand.u32 2147483647, %v4069_v58  ;;  %vm1150_vm4 = vcmp.eq.f32.partialorder %v1149_v3, 8.507059e+37 }
 0x264   :  { %2065 = vpow2.f32 %v1967_v30  ;;  %v1152_v14 = vor.u32 1.1754944e-38, %v1151_v37 }
 0x265   :  { %v2058_v62 = vpop.eup %2057  ;;  %v1121_v42 = vpop.f32.mrf.mxu3  ;;  %2067 = vtanh.f32 %v1126_v2  ;;  %v1190_v32 = vor.u32 1.1754944e-38, %v1189_v33  ;;  %vm1188_vm7 = vcmp.eq.f32.partialorder %v1187_v34, 8.507059e+37 }
 0x266   :  { %v4081_v53 = vadd.f32 1.0, %v2058_v62  ;;  %v1131_v56 = vadd.f32 %v1121_v42, %v4527_v57  ;;  %v1275_v13 = vpop.f32.mrf.mxu0  ;;  %v1098_v9 = vpop.f32.mrf.mxu2 }
 0x267   :  { %v2060_v26 = vpop.eup %2059  ;;  %v1350_v59 = vadd.f32 %v1275_v13, %v342_v15  ;;  %v1298_v35 = vpop.f32.mrf.mxu1  ;;  %v1130_v21 = vadd.f32 %v1098_v9, %v4533_v45  ;;  %v4534_v15 = vld [vmem:[#allocation69_spill] sm:$0xff] }
 0x268   :  { %v2062_v23 = vpop.eup %2061  ;;  %v1141_v4 = vmul.f32 %v2060_v26, %v1138_v31  ;;  %2069 = vrcp.f32 %v4081_v53  ;;  %v1969_v28 = vmul.f32 -1.442695, %v1131_v56  ;;  %v1351_v41 = vadd.f32 %v1298_v35, %v377_v49 }
 0x269   :  { %v1179_v39 = vmul.f32 %v2062_v23, %v4069_v58  ;;  %v1970_v16 = vmul.f32 -1.442695, %v1350_v59  ;;  %v2064_v60 = vpop.eup %2063  ;;  %vm1146_vm2 = vweird.f32 %v2060_v26  ;;  %vm1184_vm3 = vweird.f32 %v2062_v23 }
 0x26a   :  { %v1142_v1 = vsub.f32 1.0, %v1141_v4  ;;  %v2066_v50 = vpop.eup %2065  ;;  %v4105_v5 = vadd.f32 1.0, %v2064_v60  ;;  %2071 = vpow2.f32 %v1969_v28  ;;  %vm1147_vm5 = vmor %vm1145_vm0, %vm1146_vm2  ;;  %v1227_v25 = vand.u32 2147483647, %v4081_v53 }
 0x26b   :  { %v1180_v22 = vsub.f32 1.0, %v1179_v39  ;;  %v2068_v36 = vpop.eup %2067  ;;  %v4107_v20 = vadd.f32 1.0, %v2066_v50  ;;  %2073 = vpow2.f32 %v1970_v16  ;;  %vm1185_vm6 = vmor %vm1183_vm1, %vm1184_vm3  ;;  %v1972_v63 = vmul.f32 -1.442695, %v1351_v41 }
 0x26c   :  { %v1143_v51 = vmul.f32 %v2060_v26, %v1142_v1  ;;  %2075 = vrcp.f32 %v4105_v5  ;;  %vm1223_vm8 = vweird.f32 %v4081_v53  ;;  %v1229_v46 = vand.u32 2147483648, %v4081_v53 }
 0x26d   :  { %v1181_v19 = vmul.f32 %v2062_v23, %v1180_v22  ;;  %2077 = vrcp.f32 %v4107_v20  ;;  %vm4126_vm9 = vcmp.eq.f32.partialorder %v1227_v25, 8.507059e+37  ;;  %v1164_v55 = vand.u32 2147483647, %v4105_v5  ;;  %v1344_v4 = vpop.f32.mrf.mxu3 }
 0x26e   :  { %v4109_v6 = vpop.eup %2069  ;;  %v1144_v18 = vadd.f32 %v2060_v26, %v1143_v51  ;;  %2079 = vtanh.f32 %v1130_v21  ;;  %v1204_v40 = vand.u32 2147483648, %v4107_v20  ;;  %v1166_v59 = vand.u32 2147483648, %v4105_v5  ;;  %v1321_v3 = vpop.f32.mrf.mxu2 }
 0x26f   :  { %v1182_v17 = vadd.f32 %v2062_v23, %v1181_v19  ;;  %v1219_v7 = vmul.f32 %v4109_v6, %v4081_v53  ;;  %2081 = vpow2.f32 %v1972_v63  ;;  %vm1224_vm10 = vweird.f32 %v4109_v6  ;;  %v1278_v34 = vpop.f32.mrf.mxu0 }
 0x270   :  { %v1148_v10 = vsel %vm1147_vm5, %v2060_v26, %v1144_v18  ;;  %v2072_v29 = vpop.eup %2071  ;;  %v1202_v61 = vand.u32 2147483647, %v4107_v20  ;;  %vm4143_vm11 = vmor %vm1223_vm8, %vm1224_vm10  ;;  %vm1198_vm12 = vweird.f32 %v4107_v20  ;;  %vm1160_vm13 = vweird.f32 %v4105_v5 }
 0x271   :  { %v1153_v8 = vsel %vm1150_vm4, %v1152_v14, %v1148_v10  ;;  %v1186_v2 = vsel %vm1185_vm6, %v2062_v23, %v1182_v17  ;;  %v1220_v31 = vsub.f32 1.0, %v1219_v7  ;;  %v2074_v12 = vpop.eup %2073  ;;  %v4124_v38 = vadd.f32 1.0, %v2072_v29 }
 0x272   :  { %v1191_v30 = vsel %vm1188_vm7, %v1190_v32, %v1186_v2  ;;  %v1250_v62 = vmul.f32 %v2068_v36, %v1153_v8  ;;  %v2076_v49 = vpop.eup %2075  ;;  %v4131_v57 = vadd.f32 1.0, %v2074_v12  ;;  %v1230_v23 = vor.u32 1.1754944e-38, %v1229_v46  ;;  %v1301_v36 = vpop.f32.mrf.mxu1 }
 0x273   :  { %v1248_v58 = vmul.f32 %v1191_v30, %v4534_v15  ;;  %v1221_v11 = vmul.f32 %v4109_v6, %v1220_v31  ;;  %v2078_v56 = vpop.eup %2077  ;;  %v1156_v24 = vmul.f32 %v2076_v49, %v4105_v5  ;;  %2083 = vrcp.f32 %v4124_v38 }
 0x274   :  { %v1194_v52 = vmul.f32 %v2078_v56, %v4107_v20  ;;  %v2080_v37 = vpop.eup %2079  ;;  %vm1161_vm14 = vweird.f32 %v2076_v49  ;;  %vm4153_vm15 = vcmp.eq.f32.partialorder %v1164_v55, 8.507059e+37  ;;  %vm1199_vm0 = vweird.f32 %v2078_v56 }
 0x275   :  { %v1252_v13 = vadd.f32 %v1250_v62, %v1248_v58  ;;  %v1222_v26 = vadd.f32 %v4109_v6, %v1221_v11  ;;  %v1157_v0 = vsub.f32 1.0, %v1156_v24  ;;  %v2082_v16 = vpop.eup %2081  ;;  %v1205_v22 = vor.u32 1.1754944e-38, %v1204_v40  ;;  %vm1162_vm2 = vmor %vm1160_vm13, %vm1161_vm14  ;;  %v1347_v58 = vpop.f32.mrf.mxu3 }
 0x276   :  { %v1195_v39 = vsub.f32 1.0, %v1194_v52  ;;  %v1167_v33 = vor.u32 1.1754944e-38, %v1166_v59  ;;  %vm4157_vm1 = vcmp.eq.f32.partialorder %v1202_v61, 8.507059e+37  ;;  %v4161_v51 = vadd.f32 1.0, %v2082_v16  ;;  %vm1200_vm4 = vmor %vm1198_vm12, %vm1199_vm0 }
 0x277   :  { %2085 = vtanh.f32 %v1252_v13  ;;  %v1226_v1 = vsel %vm4143_vm11, %v4109_v6, %v1222_v26  ;;  %v1158_v28 = vmul.f32 %v2076_v49, %v1157_v0  ;;  %v1352_v9 = vadd.f32 %v1321_v3, %v4079_v43 }
 0x278   :  { %2087 = vrcp.f32 %v4131_v57  ;;  %v1196_v60 = vmul.f32 %v2078_v56, %v1195_v39  ;;  %v1231_v6 = vsel %vm4126_vm9, %v1230_v23, %v1226_v1  ;;  %vm1238_vm3 = vweird.f32 %v4124_v38 }
 0x279   :  { %v1159_v41 = vadd.f32 %v2076_v49, %v1158_v28  ;;  %v4164_v19 = vpop.eup %2083  ;;  %v1242_v14 = vand.u32 2147483647, %v4124_v38  ;;  %v1353_v17 = vadd.f32 %v1344_v4, %v4086_v47  ;;  %2089 = vrcp.f32 %v4161_v51 }
 0x27a   :  { %v1197_v18 = vadd.f32 %v2078_v56, %v1196_v60  ;;  %v1234_v45 = vmul.f32 %v4164_v19, %v4124_v38  ;;  %v1354_v5 = vadd.f32 %v1278_v34, %v4090_v48  ;;  %v1355_v47 = vadd.f32 %v1301_v36, %v4094_v44  ;;  %v4543_v48 = vld [vmem:[#allocation70_spill] sm:$0xff] }
 0x27b   :  { %v1163_v43 = vsel %vm1162_vm2, %v2076_v49, %v1159_v41  ;;  %v1244_v29 = vand.u32 2147483648, %v4124_v38  ;;  %v1375_v30 = vand.u32 2147483647, %v4131_v57  ;;  %v1377_v62 = vand.u32 2147483648, %v4131_v57 }
 0x27c   :  { %v1168_v10 = vsel %vm4153_vm15, %v1167_v33, %v1163_v43  ;;  %v1201_v25 = vsel %vm1200_vm4, %v2078_v56, %v1197_v18  ;;  %v1235_v8 = vsub.f32 1.0, %v1234_v45  ;;  %v1974_v12 = vmul.f32 -1.442695, %v1353_v17  ;;  %v4546_v18 = vld [vmem:[#allocation37_spill] sm:$0xff] }
 0x27d   :  { %v2086_v7 = vpop.eup %2085  ;;  %v1206_v20 = vsel %vm4157_vm1, %v1205_v22, %v1201_v25  ;;  %v1251_v63 = vmul.f32 %v2080_v37, %v1168_v10  ;;  %v1971_v15 = vmul.f32 -1.442695, %v1354_v5  ;;  %vm1239_vm5 = vweird.f32 %v4164_v19 }
 0x27e   :  { %v2088_v21 = vpop.eup %2087  ;;  %v1256_v32 = vmul.f32 %v2086_v7, %v1231_v6  ;;  %v1249_v31 = vmul.f32 %v1206_v20, %v4543_v48  ;;  %v1236_v44 = vmul.f32 %v4164_v19, %v1235_v8  ;;  %2091 = vtanh.f32 %v1352_v9  ;;  %vm4202_vm8 = vmor %vm1238_vm3, %vm1239_vm5 }
 0x27f   :  { %v1367_v2 = vmul.f32 %v2088_v21, %v4131_v57  ;;  %v1973_v49 = vmul.f32 -1.442695, %v1355_v47  ;;  %v2090_v42 = vpop.eup %2089  ;;  %vm1372_vm6 = vweird.f32 %v2088_v21  ;;  %2093 = vpow2.f32 %v1974_v12 }
 0x280   :  { %1940 = vst [vmem:[%s4320_s5 + $0x20] sm:$0xff] %v1256_v32  ;;  %v1253_v11 = vadd.f32 %v1251_v63, %v1249_v31  ;;  %v1237_v55 = vadd.f32 %v4164_v19, %v1236_v44  ;;  %v1405_v13 = vmul.f32 %v2090_v42, %v4161_v51  ;;  %vm1371_vm7 = vweird.f32 %v4131_v57 }
 0x281   :  { %v1368_v46 = vsub.f32 1.0, %v1367_v2  ;;  %v1357_v26 = vadd.f32 %v1347_v58, %v4098_v27  ;;  %v1245_v52 = vor.u32 1.1754944e-38, %v1244_v29  ;;  %vm1376_vm9 = vcmp.eq.f32.partialorder %v1375_v30, 8.507059e+37  ;;  %vm1373_vm10 = vmor %vm1371_vm7, %vm1372_vm6 }
 0x282   :  { %2095 = vtanh.f32 %v1253_v11  ;;  %v1406_v59 = vsub.f32 1.0, %v1405_v13  ;;  %v1378_v23 = vor.u32 1.1754944e-38, %v1377_v62  ;;  %v1241_v57 = vsel %vm4202_vm8, %v4164_v19, %v1237_v55 }
 0x283   :  { %v1369_v56 = vmul.f32 %v2088_v21, %v1368_v46  ;;  %2097 = vpow2.f32 %v1971_v15  ;;  %v1975_v0 = vmul.f32 -1.442695, %v1357_v26  ;;  %v1415_v27 = vand.u32 2147483648, %v4161_v51 }
 0x284   :  { %2099 = vpow2.f32 %v1973_v49  ;;  %v1413_v61 = vand.u32 2147483647, %v4161_v51  ;;  %v2092_v4 = vpop.eup %2091  ;;  %v1407_v35 = vmul.f32 %v2090_v42, %v1406_v59  ;;  %vm1410_vm11 = vweird.f32 %v2090_v42 }
 0x285   :  { %v1370_v40 = vadd.f32 %v2088_v21, %v1369_v56  ;;  %2101 = vpow2.f32 %v1975_v0  ;;  %v2094_v3 = vpop.eup %2093  ;;  %vm1243_vm12 = vcmp.eq.f32.partialorder %v1242_v14, 8.507059e+37  ;;  %vm1409_vm13 = vweird.f32 %v4161_v51  ;;  %v1324_v51 = vpop.f32.mrf.mxu2 }
 0x286   :  { %v1246_v28 = vsel %vm1243_vm12, %v1245_v52, %v1241_v57  ;;  %v1408_v53 = vadd.f32 %v2090_v42, %v1407_v35  ;;  %v1442_v16 = vadd.f32 1.0, %v2094_v3  ;;  %v1416_v33 = vor.u32 1.1754944e-38, %v1415_v27  ;;  %vm1411_vm14 = vmor %vm1409_vm13, %vm1410_vm11 }
 0x287   :  { %v1374_v38 = vsel %vm1373_vm10, %v2088_v21, %v1370_v40  ;;  %vm1414_vm15 = vcmp.eq.f32.partialorder %v1413_v61, 8.507059e+37  ;;  %v415_v14 = vadd.f32 %v4546_v18, %v4525_v54 }
 0x288   :  { %v1379_v39 = vsel %vm1376_vm9, %v1378_v23, %v1374_v38  ;;  %v2096_v1 = vpop.eup %2095  ;;  %v1412_v41 = vsel %vm1411_vm14, %v2090_v42, %v1408_v53  ;;  %2103 = vrcp.f32 %v1442_v16  ;;  %v1455_v21 = vand.u32 2147483648, %v1442_v16 }
 0x289   :  { %v1476_v37 = vmul.f32 %v2092_v4, %v1379_v39  ;;  %v2098_v60 = vpop.eup %2097  ;;  %v1257_v22 = vmul.f32 %v2096_v1, %v1246_v28  ;;  %v1417_v50 = vsel %vm1414_vm15, %v1416_v33, %v1412_v41  ;;  %v1356_v45 = vadd.f32 %v1324_v51, %v415_v14  ;;  %v4547_v33 = vld [vmem:[#allocation22_spill] sm:$0xff]  ;;  %v4548_v41 = vld [vmem:[#allocation23_spill] sm:$0xff] }
 0x28a   :  { %v2100_v34 = vpop.eup %2099  ;;  %v1365_v9 = vadd.f32 1.0, %v2098_v60  ;;  %v1474_v6 = vmul.f32 0.0, %v1417_v50  ;;  %v1453_v63 = vand.u32 2147483647, %v1442_v16  ;;  %vm1449_vm1 = vweird.f32 %v1442_v16 }
 0x28b   :  { %1946 = vst [vmem:[%s4320_s5 + $0x50] sm:$0xff] %v1257_v22  ;;  %v1403_v36 = vadd.f32 1.0, %v2100_v34  ;;  %v2102_v19 = vpop.eup %2101  ;;  %v1456_v8 = vor.u32 1.1754944e-38, %v1455_v21 }
 0x28c   :  { %2105 = vrcp.f32 %v1365_v9  ;;  %v4217_v17 = vadd.f32 %v1476_v37, %v1474_v6  ;;  %v4219_v7 = vadd.f32 1.0, %v2102_v19  ;;  %v1390_v30 = vand.u32 2147483647, %v1365_v9  ;;  %v4549_v6 = vld [vmem:[#allocation25_spill] sm:$0xff] }
 0x28d   :  { %2107 = vrcp.f32 %v1403_v36  ;;  %v1430_v48 = vand.u32 2147483648, %v1403_v36  ;;  %v1392_v62 = vand.u32 2147483648, %v1365_v9  ;;  %v1428_v15 = vand.u32 2147483647, %v1403_v36 }
 0x28e   :  { %v2104_v43 = vpop.eup %2103  ;;  %2109 = vrcp.f32 %v4219_v7  ;;  %vm1454_vm5 = vcmp.eq.f32.partialorder %v1453_v63, 8.507059e+37  ;;  %vm1386_vm6 = vweird.f32 %v1365_v9  ;;  %vm1424_vm7 = vweird.f32 %v1403_v36 }
 0x28f   :  { %v1445_v5 = vmul.f32 %v2104_v43, %v1442_v16  ;;  %2111 = vtanh.f32 %v4217_v17  ;;  %vm1450_vm0 = vweird.f32 %v2104_v43  ;;  %v1393_v26 = vor.u32 1.1754944e-38, %v1392_v62 }
 0x290   :  { %2113 = vtanh.f32 %v1356_v45  ;;  %vm1451_vm2 = vmor %vm1449_vm1, %vm1450_vm0  ;;  %v1431_v40 = vor.u32 1.1754944e-38, %v1430_v48  ;;  %vm1391_vm9 = vcmp.eq.f32.partialorder %v1390_v30, 8.507059e+37  ;;  %vm1429_vm11 = vcmp.eq.f32.partialorder %v1428_v15, 8.507059e+37  ;;  %v4553_v15 = vld [vmem:[#allocation29_spill] sm:$0xff] }
 0x291   :  { %v1446_v10 = vsub.f32 1.0, %v1445_v5  ;;  %v1470_v39 = vand.u32 2147483648, %v4219_v7  ;;  %vm1464_vm13 = vweird.f32 %v4219_v7  ;;  %v1468_v3 = vand.u32 2147483647, %v4219_v7 }
 0x292   :  { %v2106_v32 = vpop.eup %2105 }
 0x293   :  { %v2108_v25 = vpop.eup %2107  ;;  %v1382_v47 = vmul.f32 %v2106_v32, %v1365_v9  ;;  %v1447_v20 = vmul.f32 %v2104_v43, %v1446_v10  ;;  %vm1387_vm3 = vweird.f32 %v2106_v32  ;;  %v1471_v1 = vor.u32 1.1754944e-38, %v1470_v39 }
 0x294   :  { %v1420_v54 = vmul.f32 %v2108_v25, %v1403_v36  ;;  %v2110_v31 = vpop.eup %2109  ;;  %vm1425_vm4 = vweird.f32 %v2108_v25  ;;  %vm1388_vm8 = vmor %vm1386_vm6, %vm1387_vm3  ;;  %vm1469_vm15 = vcmp.eq.f32.partialorder %v1468_v3, 8.507059e+37 }
 0x295   :  { %v1383_v2 = vsub.f32 1.0, %v1382_v47  ;;  %v1448_v44 = vadd.f32 %v2104_v43, %v1447_v20  ;;  %v2112_v46 = vpop.eup %2111  ;;  %v1460_v58 = vmul.f32 %v2110_v31, %v4219_v7  ;;  %vm1426_vm10 = vmor %vm1424_vm7, %vm1425_vm4  ;;  %vm1465_vm12 = vweird.f32 %v2110_v31 }
 0x296   :  { %v1421_v29 = vsub.f32 1.0, %v1420_v54  ;;  %v2114_v42 = vpop.eup %2113  ;;  %vm1466_vm14 = vmor %vm1464_vm13, %vm1465_vm12 }
 0x297   :  { %v1384_v12 = vmul.f32 %v2106_v32, %v1383_v2  ;;  %v1452_v49 = vsel %vm1451_vm2, %v2104_v43, %v1448_v44  ;;  %v1461_v56 = vsub.f32 1.0, %v1460_v58 }
 0x298   :  { %v1422_v11 = vmul.f32 %v2108_v25, %v1421_v29  ;;  %v1457_v13 = vsel %vm1454_vm5, %v1456_v8, %v1452_v49 }
 0x299   :  { %v1385_v55 = vadd.f32 %v2106_v32, %v1384_v12  ;;  %v1482_v52 = vmul.f32 %v2112_v46, %v1457_v13  ;;  %v1462_v38 = vmul.f32 %v2110_v31, %v1461_v56 }
 0x29a   :  { %v1423_v24 = vadd.f32 %v2108_v25, %v1422_v11 }
 0x29b   :  { %v1389_v59 = vsel %vm1388_vm8, %v2106_v32, %v1385_v55  ;;  %1500 = vmatmul.f32.vlgmr.msra.gmra.mxu0 %v1482_v52  ;;  %1941 = vst [vmem:[%s4320_s5 + $0x28] sm:$0xff] %v1482_v52  ;;  %1523 = vmatmul.f32.vlgmr.msra.gmra.mxu1 %v1482_v52  ;;  %v1463_v35 = vadd.f32 %v2110_v31, %v1462_v38  ;;  %v4550_v32 = vld [vmem:[#allocation26_spill] sm:$0xff] }
 0x29c   :  { %v1394_v23 = vsel %vm1391_vm9, %v1393_v26, %v1389_v59  ;;  %v1427_v0 = vsel %vm1426_vm10, %v2108_v25, %v1423_v24  ;;  %1546 = vmatmul.f32.vlgmr.msra.gmra.mxu2 %v1482_v52  ;;  %1569 = vmatmul.f32.vlgmr.msra.gmra.mxu3 %v1482_v52  ;;  %v4551_v25 = vld [vmem:[#allocation27_spill] sm:$0xff] }
 0x29d   :  { %v1432_v57 = vsel %vm1429_vm11, %v1431_v40, %v1427_v0  ;;  %v1477_v27 = vmul.f32 %v2114_v42, %v1394_v23  ;;  %v1467_v37 = vsel %vm1466_vm14, %v2110_v31, %v1463_v35  ;;  %v4552_v31 = vld [vmem:[#allocation24_spill] sm:$0xff] }
 0x29e   :  { %v1475_v61 = vmul.f32 0.0, %v1432_v57  ;;  %v1472_v53 = vsel %vm1469_vm15, %v1471_v1, %v1467_v37 }
 0x2a0   :  { %v4228_v4 = vadd.f32 %v1477_v27, %v1475_v61 }
 0x2a2   :  { %2115 = vtanh.f32 %v4228_v4 }
 0x2a8   :  { %v2116_v28 = vpop.eup %2115 }
 0x2a9   :  { %v1483_v16 = vmul.f32 %v2116_v28, %v1472_v53 }
 0x2ab   :  { %1503 = vmatmul.f32.gmra.mxu0 %v1483_v16  ;;  %1947 = vst [vmem:[%s4320_s5 + $0x58] sm:$0xff] %v1483_v16  ;;  %1526 = vmatmul.f32.gmra.mxu1 %v1483_v16 }
 0x2ac   :  { %1549 = vmatmul.f32.gmra.mxu2 %v1483_v16  ;;  %1572 = vmatmul.f32.gmra.mxu3 %v1483_v16 }
 0x318   :  { %v1501_v60 = vpop.f32.mrf.mxu0  ;;  %v1524_v22 = vpop.f32.mrf.mxu1 }
 0x319   :  { %v1576_v34 = vadd.f32 %v1501_v60, %v4547_v33  ;;  %v1577_v50 = vadd.f32 %v1524_v22, %v4548_v41 }
 0x31b   :  { %v1976_v9 = vmul.f32 -1.442695, %v1576_v34  ;;  %v1978_v36 = vmul.f32 -1.442695, %v1577_v50 }
 0x31d   :  { %2117 = vpow2.f32 %v1976_v9 }
 0x31e   :  { %2119 = vpow2.f32 %v1978_v36 }
 0x31f   :  { %v1570_v19 = vpop.f32.mrf.mxu3  ;;  %v1547_v20 = vpop.f32.mrf.mxu2 }
 0x320   :  { %v1579_v51 = vadd.f32 %v1570_v19, %v4549_v6  ;;  %v1578_v29 = vadd.f32 %v1547_v20, %v4552_v31  ;;  %v4554_v19 = vld [vmem:[#allocation28_spill] sm:$0xff] }
 0x322   :  { %v1980_v18 = vmul.f32 -1.442695, %v1579_v51 }
 0x323   :  { %v2118_v14 = vpop.eup %2117 }
 0x324   :  { %v2120_v7 = vpop.eup %2119  ;;  %v1590_v43 = vadd.f32 1.0, %v2118_v14  ;;  %2121 = vpow2.f32 %v1980_v18 }
 0x325   :  { %v1628_v45 = vadd.f32 1.0, %v2120_v7  ;;  %v4562_v7 = vld [vmem:[#allocation16_spill] sm:$0xff] }
 0x326   :  { %2123 = vrcp.f32 %v1590_v43  ;;  %v1601_v49 = vand.u32 2147483647, %v1590_v43  ;;  %v1603_v42 = vand.u32 2147483648, %v1590_v43  ;;  %vm1597_vm2 = vweird.f32 %v1590_v43 }
 0x327   :  { %2125 = vrcp.f32 %v1628_v45  ;;  %v1641_v55 = vand.u32 2147483648, %v1628_v45  ;;  %v1639_v52 = vand.u32 2147483647, %v1628_v45  ;;  %vm1635_vm3 = vweird.f32 %v1628_v45 }
 0x328   :  { %v1504_v5 = vpop.f32.mrf.mxu0  ;;  %v1527_v21 = vpop.f32.mrf.mxu1  ;;  %vm1602_vm5 = vcmp.eq.f32.partialorder %v1601_v49, 8.507059e+37  ;;  %v1604_v57 = vor.u32 1.1754944e-38, %v1603_v42 }
 0x329   :  { %v1580_v10 = vadd.f32 %v1504_v5, %v4550_v32  ;;  %v1581_v47 = vadd.f32 %v1527_v21, %v4551_v25  ;;  %v1642_v61 = vor.u32 1.1754944e-38, %v1641_v55  ;;  %vm1640_vm7 = vcmp.eq.f32.partialorder %v1639_v52, 8.507059e+37 }
 0x32a   :  { %v2122_v54 = vpop.eup %2121 }
 0x32b   :  { %v1977_v63 = vmul.f32 -1.442695, %v1580_v10  ;;  %v1979_v8 = vmul.f32 -1.442695, %v1581_v47  ;;  %v4242_v2 = vadd.f32 1.0, %v2122_v54 }
 0x32c   :  { %v2124_v48 = vpop.eup %2123 }
 0x32d   :  { %2127 = vpow2.f32 %v1977_v63  ;;  %v2126_v30 = vpop.eup %2125  ;;  %v1593_v62 = vmul.f32 %v2124_v48, %v1590_v43  ;;  %vm1598_vm0 = vweird.f32 %v2124_v48  ;;  %v1681_v36 = vand.u32 2147483648, %v4242_v2 }
 0x32e   :  { %2129 = vrcp.f32 %v4242_v2  ;;  %v1631_v44 = vmul.f32 %v2126_v30, %v1628_v45  ;;  %vm1636_vm1 = vweird.f32 %v2126_v30  ;;  %vm1599_vm4 = vmor %vm1597_vm2, %vm1598_vm0  ;;  %vm1675_vm9 = vweird.f32 %v4242_v2 }
 0x32f   :  { %2131 = vpow2.f32 %v1979_v8  ;;  %v1573_v46 = vpop.f32.mrf.mxu3  ;;  %v1594_v12 = vsub.f32 1.0, %v1593_v62  ;;  %vm1637_vm6 = vmor %vm1635_vm3, %vm1636_vm1  ;;  %v1550_v33 = vpop.f32.mrf.mxu2  ;;  %v1682_v5 = vor.u32 1.1754944e-38, %v1681_v36 }
 0x330   :  { %v1583_v58 = vadd.f32 %v1573_v46, %v4553_v15  ;;  %v1632_v11 = vsub.f32 1.0, %v1631_v44  ;;  %2133 = vtanh.f32 %v1578_v29  ;;  %v1582_v6 = vadd.f32 %v1550_v33, %v4554_v19 }
 0x331   :  { %v1595_v56 = vmul.f32 %v2124_v48, %v1594_v12 }
 0x332   :  { %v1981_v13 = vmul.f32 -1.442695, %v1583_v58  ;;  %v1633_v24 = vmul.f32 %v2126_v30, %v1632_v11 }
 0x333   :  { %v2128_v26 = vpop.eup %2127  ;;  %v1596_v59 = vadd.f32 %v2124_v48, %v1595_v56 }
 0x334   :  { %v2130_v40 = vpop.eup %2129  ;;  %v4247_v23 = vadd.f32 1.0, %v2128_v26  ;;  %2135 = vpow2.f32 %v1981_v13  ;;  %v1634_v27 = vadd.f32 %v2126_v30, %v1633_v24 }
 0x335   :  { %v2132_v0 = vpop.eup %2131  ;;  %v1671_v38 = vmul.f32 %v2130_v40, %v4242_v2  ;;  %v1600_v35 = vsel %vm1599_vm4, %v2124_v48, %v1596_v59  ;;  %vm1676_vm8 = vweird.f32 %v2130_v40 }
 0x336   :  { %2137 = vrcp.f32 %v4247_v23  ;;  %v4251_v39 = vadd.f32 1.0, %v2132_v0  ;;  %v2134_v3 = vpop.eup %2133  ;;  %v1605_v37 = vsel %vm1602_vm5, %v1604_v57, %v1600_v35  ;;  %v1638_v1 = vsel %vm1637_vm6, %v2126_v30, %v1634_v27  ;;  %vm4266_vm10 = vmor %vm1675_vm9, %vm1676_vm8 }
 0x337   :  { %v1672_v28 = vsub.f32 1.0, %v1671_v38  ;;  %v1643_v53 = vsel %vm1640_vm7, %v1642_v61, %v1638_v1  ;;  %v1702_v16 = vmul.f32 %v2134_v3, %v1605_v37  ;;  %v1618_v21 = vand.u32 2147483648, %v4247_v23  ;;  %v4557_v61 = vld [vmem:[#allocation12_spill] sm:$0xff] }
 0x338   :  { %2139 = vrcp.f32 %v4251_v39  ;;  %v1700_v60 = vmul.f32 %v1643_v53, %v4217_v17  ;;  %v1679_v17 = vand.u32 2147483647, %v4242_v2  ;;  %v1616_v47 = vand.u32 2147483647, %v4247_v23  ;;  %v4559_v53 = vld [vmem:[#allocation17_spill] sm:$0xff] }
 0x339   :  { %v1673_v22 = vmul.f32 %v2130_v40, %v1672_v28  ;;  %v1656_v20 = vand.u32 2147483648, %v4251_v39  ;;  %vm1612_vm12 = vweird.f32 %v4247_v23  ;;  %v1654_v54 = vand.u32 2147483647, %v4251_v39 }
 0x33a   :  { %v2136_v34 = vpop.eup %2135  ;;  %v4255_v41 = vadd.f32 %v1702_v16, %v1700_v60  ;;  %vm1680_vm13 = vcmp.eq.f32.partialorder %v1679_v17, 8.507059e+37  ;;  %vm1650_vm15 = vweird.f32 %v4251_v39  ;;  %v1619_v29 = vor.u32 1.1754944e-38, %v1618_v21 }
 0x33b   :  { %v4257_v50 = vadd.f32 1.0, %v2136_v34  ;;  %v1674_v51 = vadd.f32 %v2130_v40, %v1673_v22  ;;  %vm1617_vm1 = vcmp.eq.f32.partialorder %v1616_v47, 8.507059e+37  ;;  %v1657_v15 = vor.u32 1.1754944e-38, %v1656_v20 }
 0x33c   :  { %v2138_v9 = vpop.eup %2137  ;;  %2141 = vtanh.f32 %v4255_v41  ;;  %vm1655_vm3 = vcmp.eq.f32.partialorder %v1654_v54, 8.507059e+37 }
 0x33d   :  { %v1608_v18 = vmul.f32 %v2138_v9, %v4247_v23  ;;  %2143 = vrcp.f32 %v4257_v50  ;;  %v1678_v32 = vsel %vm4266_vm10, %v2130_v40, %v1674_v51  ;;  %vm1613_vm11 = vweird.f32 %v2138_v9 }
 0x33e   :  { %v2140_v14 = vpop.eup %2139  ;;  %2145 = vtanh.f32 %v1582_v6  ;;  %v1683_v48 = vsel %vm1680_vm13, %v1682_v5, %v1678_v32  ;;  %vm1614_vm0 = vmor %vm1612_vm12, %vm1613_vm11  ;;  %v1696_v52 = vand.u32 2147483648, %v4257_v50  ;;  %vm1690_vm5 = vweird.f32 %v4257_v50  ;;  %v4560_v6 = vld [vmem:[#allocation18_spill] sm:$0xff] }
 0x33f   :  { %v1609_v43 = vsub.f32 1.0, %v1608_v18  ;;  %v1646_v45 = vmul.f32 %v2140_v14, %v4251_v39  ;;  %vm1651_vm14 = vweird.f32 %v2140_v14  ;;  %v1694_v40 = vand.u32 2147483647, %v4257_v50  ;;  %v4558_v39 = vld [vmem:[#allocation13_spill] sm:$0xff]  ;;  %v4561_v18 = vld [vmem:[#allocation19_spill] sm:$0xff] }
 0x340   :  { %vm1652_vm2 = vmor %vm1650_vm15, %vm1651_vm14  ;;  %v1697_v23 = vor.u32 1.1754944e-38, %v1696_v52 }
 0x341   :  { %v1647_v10 = vsub.f32 1.0, %v1646_v45  ;;  %v1610_v25 = vmul.f32 %v2138_v9, %v1609_v43  ;;  %vm1695_vm7 = vcmp.eq.f32.partialorder %v1694_v40, 8.507059e+37 }
 0x342   :  { %v2142_v63 = vpop.eup %2141 }
 0x343   :  { %v1648_v8 = vmul.f32 %v2140_v14, %v1647_v10  ;;  %v1611_v2 = vadd.f32 %v2138_v9, %v1610_v25  ;;  %v2144_v31 = vpop.eup %2143  ;;  %v1708_v30 = vmul.f32 %v2142_v63, %v1683_v48 }
 0x344   :  { %v1686_v46 = vmul.f32 %v2144_v31, %v4257_v50  ;;  %v2146_v12 = vpop.eup %2145  ;;  %vm1691_vm4 = vweird.f32 %v2144_v31 }
 0x345   :  { %v1615_v62 = vsel %vm1614_vm0, %v2138_v9, %v1611_v2  ;;  %v1649_v44 = vadd.f32 %v2140_v14, %v1648_v8  ;;  %1726 = vmatmul.f32.vlgmr.msrb.gmra.mxu0 %v1708_v30  ;;  %1939 = vst [vmem:[%s4320_s5 + $0x18] sm:$0xff] %v1708_v30  ;;  %1749 = vmatmul.f32.vlgmr.msrb.gmra.mxu1 %v1708_v30  ;;  %vm1692_vm6 = vmor %vm1690_vm5, %vm1691_vm4 }
 0x346   :  { %v1620_v58 = vsel %vm1617_vm1, %v1619_v29, %v1615_v62  ;;  %v1687_v42 = vsub.f32 1.0, %v1686_v46  ;;  %1772 = vmatmul.f32.vlgmr.msrb.gmra.mxu2 %v1708_v30  ;;  %1795 = vmatmul.f32.vlgmr.msrb.gmra.mxu3 %v1708_v30  ;;  %v4563_v30 = vld [vmem:[#allocation21_spill] sm:$0xff] }
 0x347   :  { %v1653_v11 = vsel %vm1652_vm2, %v2140_v14, %v1649_v44  ;;  %v1703_v49 = vmul.f32 %v2146_v12, %v1620_v58 }
 0x348   :  { %v1658_v55 = vsel %vm1655_vm3, %v1657_v15, %v1653_v11  ;;  %v1688_v13 = vmul.f32 %v2144_v31, %v1687_v42 }
 0x349   :  { %v1701_v56 = vmul.f32 %v1658_v55, %v4228_v4 }
 0x34a   :  { %v1689_v24 = vadd.f32 %v2144_v31, %v1688_v13 }
 0x34b   :  { %v4284_v26 = vadd.f32 %v1703_v49, %v1701_v56 }
 0x34c   :  { %v1693_v59 = vsel %vm1692_vm6, %v2144_v31, %v1689_v24 }
 0x34d   :  { %2147 = vtanh.f32 %v4284_v26  ;;  %v1698_v57 = vsel %vm1695_vm7, %v1697_v23, %v1693_v59 }
 0x353   :  { %v2148_v0 = vpop.eup %2147 }
 0x354   :  { %v1709_v4 = vmul.f32 %v2148_v0, %v1698_v57 }
 0x356   :  { %1729 = vmatmul.f32.gmra.mxu0 %v1709_v4  ;;  %1945 = vst [vmem:[%s4320_s5 + $0x48] sm:$0xff] %v1709_v4  ;;  %1752 = vmatmul.f32.gmra.mxu1 %v1709_v4 }
 0x357   :  { %1775 = vmatmul.f32.gmra.mxu2 %v1709_v4  ;;  %1798 = vmatmul.f32.gmra.mxu3 %v1709_v4 }
 0x3c2   :  { %v1727_v27 = vpop.f32.mrf.mxu0  ;;  %v1750_v38 = vpop.f32.mrf.mxu1 }
 0x3c3   :  { %v1802_v35 = vadd.f32 %v1727_v27, %v4557_v61  ;;  %v1803_v3 = vadd.f32 %v1750_v38, %v4558_v39 }
 0x3c5   :  { %v1982_v37 = vmul.f32 -1.442695, %v1802_v35  ;;  %v1984_v1 = vmul.f32 -1.442695, %v1803_v3 }
 0x3c7   :  { %2149 = vpow2.f32 %v1982_v37 }
 0x3c8   :  { %2151 = vpow2.f32 %v1984_v1 }
 0x3c9   :  { %v1796_v28 = vpop.f32.mrf.mxu3  ;;  %v1773_v9 = vpop.f32.mrf.mxu2 }
 0x3ca   :  { %v1805_v16 = vadd.f32 %v1796_v28, %v4559_v53  ;;  %v1804_v43 = vadd.f32 %v1773_v9, %v4562_v7  ;;  %v4564_v28 = vld [vmem:[#allocation20_spill] sm:$0xff] }
 0x3cc   :  { %v1986_v60 = vmul.f32 -1.442695, %v1805_v16 }
 0x3cd   :  { %v2150_v22 = vpop.eup %2149 }
 0x3ce   :  { %v2152_v33 = vpop.eup %2151  ;;  %v1816_v34 = vadd.f32 1.0, %v2150_v22  ;;  %2153 = vpow2.f32 %v1986_v60 }
 0x3cf   :  { %v1854_v50 = vadd.f32 1.0, %v2152_v33 }
 0x3d0   :  { %2155 = vrcp.f32 %v1816_v34  ;;  %v1827_v54 = vand.u32 2147483647, %v1816_v34  ;;  %v1829_v48 = vand.u32 2147483648, %v1816_v34  ;;  %vm1823_vm11 = vweird.f32 %v1816_v34 }
 0x3d1   :  { %2157 = vrcp.f32 %v1854_v50  ;;  %v1867_v2 = vand.u32 2147483648, %v1854_v50  ;;  %v1865_v29 = vand.u32 2147483647, %v1854_v50  ;;  %vm1861_vm10 = vweird.f32 %v1854_v50 }
 0x3d2   :  { %vm1828_vm13 = vcmp.eq.f32.partialorder %v1827_v54, 8.507059e+37  ;;  %v1830_v11 = vor.u32 1.1754944e-38, %v1829_v48 }
 0x3d3   :  { %v1730_v36 = vpop.f32.mrf.mxu0  ;;  %v1753_v19 = vpop.f32.mrf.mxu1  ;;  %v1868_v56 = vor.u32 1.1754944e-38, %v1867_v2  ;;  %vm1866_vm15 = vcmp.eq.f32.partialorder %v1865_v29, 8.507059e+37 }
 0x3d4   :  { %v1806_v51 = vadd.f32 %v1730_v36, %v4560_v6  ;;  %v1807_v14 = vadd.f32 %v1753_v19, %v4561_v18  ;;  %v2154_v17 = vpop.eup %2153 }
 0x3d5   :  { %v4299_v45 = vadd.f32 1.0, %v2154_v17 }
 0x3d6   :  { %v1983_v5 = vmul.f32 -1.442695, %v1806_v51  ;;  %v2156_v21 = vpop.eup %2155  ;;  %v1985_v32 = vmul.f32 -1.442695, %v1807_v14 }
 0x3d7   :  { %v2158_v10 = vpop.eup %2157  ;;  %v1819_v25 = vmul.f32 %v2156_v21, %v1816_v34  ;;  %2159 = vrcp.f32 %v4299_v45  ;;  %vm1824_vm8 = vweird.f32 %v2156_v21  ;;  %v1907_v37 = vand.u32 2147483648, %v4299_v45 }
 0x3d8   :  { %v1857_v47 = vmul.f32 %v2158_v10, %v1854_v50  ;;  %2161 = vtanh.f32 %v1804_v43  ;;  %vm1862_vm9 = vweird.f32 %v2158_v10  ;;  %vm1825_vm12 = vmor %vm1823_vm11, %vm1824_vm8  ;;  %vm1901_vm1 = vweird.f32 %v4299_v45 }
 0x3d9   :  { %v1820_v20 = vsub.f32 1.0, %v1819_v25  ;;  %2163 = vpow2.f32 %v1983_v5  ;;  %vm1863_vm14 = vmor %vm1861_vm10, %vm1862_vm9  ;;  %v1905_v1 = vand.u32 2147483647, %v4299_v45  ;;  %v1908_v34 = vor.u32 1.1754944e-38, %v1907_v37 }
 0x3da   :  { %v1799_v63 = vpop.f32.mrf.mxu3  ;;  %v1858_v8 = vsub.f32 1.0, %v1857_v47  ;;  %2165 = vpow2.f32 %v1985_v32  ;;  %v1776_v35 = vpop.f32.mrf.mxu2 }
 0x3db   :  { %v1821_v31 = vmul.f32 %v2156_v21, %v1820_v20  ;;  %v1809_v62 = vadd.f32 %v1799_v63, %v4563_v30  ;;  %v1808_v53 = vadd.f32 %v1776_v35, %v4564_v28  ;;  %vm1906_vm3 = vcmp.eq.f32.partialorder %v1905_v1, 8.507059e+37 }
 0x3dc   :  { %v1859_v44 = vmul.f32 %v2158_v10, %v1858_v8 }
 0x3dd   :  { %v2160_v46 = vpop.eup %2159  ;;  %v1822_v12 = vadd.f32 %v2156_v21, %v1821_v31  ;;  %v1987_v15 = vmul.f32 -1.442695, %v1809_v62 }
 0x3de   :  { %v2162_v58 = vpop.eup %2161  ;;  %v1860_v49 = vadd.f32 %v2158_v10, %v1859_v44  ;;  %v1897_v42 = vmul.f32 %v2160_v46, %v4299_v45  ;;  %vm1902_vm0 = vweird.f32 %v2160_v46 }
 0x3df   :  { %v2164_v55 = vpop.eup %2163  ;;  %v1826_v13 = vsel %vm1825_vm12, %v2156_v21, %v1822_v12  ;;  %2167 = vpow2.f32 %v1987_v15  ;;  %vm1903_vm2 = vmor %vm1901_vm1, %vm1902_vm0 }
 0x3e0   :  { %v2166_v24 = vpop.eup %2165  ;;  %v1831_v52 = vsel %vm1828_vm13, %v1830_v11, %v1826_v13  ;;  %v1864_v40 = vsel %vm1863_vm14, %v2158_v10, %v1860_v49  ;;  %v1898_v59 = vsub.f32 1.0, %v1897_v42  ;;  %v1817_v23 = vadd.f32 1.0, %v2164_v55 }
 0x3e1   :  { %v1869_v0 = vsel %vm1866_vm15, %v1868_v56, %v1864_v40  ;;  %v1928_v57 = vmul.f32 %v2162_v58, %v1831_v52  ;;  %v1855_v4 = vadd.f32 1.0, %v2166_v24 }
 0x3e2   :  { %v1926_v27 = vmul.f32 %v1869_v0, %v4255_v41  ;;  %v1899_v38 = vmul.f32 %v2160_v46, %v1898_v59  ;;  %2169 = vrcp.f32 %v1817_v23  ;;  %v1844_v18 = vand.u32 2147483648, %v1817_v23 }
 0x3e3   :  { %2171 = vrcp.f32 %v1855_v4  ;;  %v1882_v51 = vand.u32 2147483648, %v1855_v4  ;;  %v1842_v7 = vand.u32 2147483647, %v1817_v23  ;;  %v1880_v45 = vand.u32 2147483647, %v1855_v4 }
 0x3e4   :  { %v1930_v61 = vadd.f32 %v1928_v57, %v1926_v27  ;;  %v1900_v3 = vadd.f32 %v2160_v46, %v1899_v38  ;;  %vm1838_vm6 = vweird.f32 %v1817_v23  ;;  %vm1876_vm7 = vweird.f32 %v1855_v4 }
 0x3e5   :  { %v2168_v39 = vpop.eup %2167  ;;  %v1845_v32 = vor.u32 1.1754944e-38, %v1844_v18  ;;  %v1883_v20 = vor.u32 1.1754944e-38, %v1882_v51  ;;  %vm1843_vm10 = vcmp.eq.f32.partialorder %v1842_v7, 8.507059e+37  ;;  %vm1881_vm11 = vcmp.eq.f32.partialorder %v1880_v45, 8.507059e+37 }
 0x3e6   :  { %2173 = vtanh.f32 %v1930_v61  ;;  %v1895_v16 = vadd.f32 1.0, %v2168_v39  ;;  %v1904_v22 = vsel %vm1903_vm2, %v2160_v46, %v1900_v3 }
 0x3e7   :  { %v1909_v19 = vsel %vm1906_vm3, %v1908_v34, %v1904_v22 }
 0x3e8   :  { %v2170_v60 = vpop.eup %2169  ;;  %2175 = vrcp.f32 %v1895_v16  ;;  %v1922_v46 = vand.u32 2147483648, %v1895_v16  ;;  %vm1916_vm13 = vweird.f32 %v1895_v16  ;;  %v1920_v12 = vand.u32 2147483647, %v1895_v16 }
 0x3e9   :  { %v2172_v41 = vpop.eup %2171  ;;  %v1834_v33 = vmul.f32 %v2170_v60, %v1817_v23  ;;  %2177 = vtanh.f32 %v1808_v53  ;;  %vm1839_vm4 = vweird.f32 %v2170_v60 }
 0x3ea   :  { %v1872_v50 = vmul.f32 %v2172_v41, %v1855_v4  ;;  %vm1877_vm5 = vweird.f32 %v2172_v41  ;;  %vm1840_vm8 = vmor %vm1838_vm6, %vm1839_vm4  ;;  %v1923_v58 = vor.u32 1.1754944e-38, %v1922_v46  ;;  %vm1921_vm15 = vcmp.eq.f32.partialorder %v1920_v12, 8.507059e+37 }
 0x3eb   :  { %v1835_v9 = vsub.f32 1.0, %v1834_v33  ;;  %vm1878_vm9 = vmor %vm1876_vm7, %vm1877_vm5 }
 0x3ec   :  { %v2174_v36 = vpop.eup %2173  ;;  %v1873_v6 = vsub.f32 1.0, %v1872_v50 }
 0x3ed   :  { %v1934_v14 = vmul.f32 %v2174_v36, %v1909_v19  ;;  %v1836_v17 = vmul.f32 %v2170_v60, %v1835_v9 }
 0x3ee   :  { %v1874_v43 = vmul.f32 %v2172_v41, %v1873_v6  ;;  %v2176_v5 = vpop.eup %2175 }
 0x3ef   :  { %1937 = vst [vmem:[%s4320_s5 + $0x8] sm:$0xff] %v1934_v14  ;;  %v1837_v21 = vadd.f32 %v2170_v60, %v1836_v17  ;;  %v1912_v25 = vmul.f32 %v2176_v5, %v1895_v16  ;;  %v2178_v47 = vpop.eup %2177  ;;  %vm1917_vm12 = vweird.f32 %v2176_v5 }
 0x3f0   :  { %v1875_v10 = vadd.f32 %v2172_v41, %v1874_v43  ;;  %vm1918_vm14 = vmor %vm1916_vm13, %vm1917_vm12 }
 0x3f1   :  { %v1841_v54 = vsel %vm1840_vm8, %v2170_v60, %v1837_v21  ;;  %v1913_v2 = vsub.f32 1.0, %v1912_v25 }
 0x3f2   :  { %v1846_v63 = vsel %vm1843_vm10, %v1845_v32, %v1841_v54  ;;  %v1879_v8 = vsel %vm1878_vm9, %v2172_v41, %v1875_v10 }
 0x3f3   :  { %v1884_v48 = vsel %vm1881_vm11, %v1883_v20, %v1879_v8  ;;  %v1929_v31 = vmul.f32 %v2178_v47, %v1846_v63  ;;  %v1914_v30 = vmul.f32 %v2176_v5, %v1913_v2 }
 0x3f4   :  { %v1927_v29 = vmul.f32 %v1884_v48, %v4284_v26 }
 0x3f5   :  { %v1915_v44 = vadd.f32 %v2176_v5, %v1914_v30 }
 0x3f6   :  { %v1931_v62 = vadd.f32 %v1929_v31, %v1927_v29 }
 0x3f7   :  { %v1919_v15 = vsel %vm1918_vm14, %v2176_v5, %v1915_v44 }
 0x3f8   :  { %2179 = vtanh.f32 %v1931_v62  ;;  %v1924_v49 = vsel %vm1921_vm15, %v1923_v58, %v1919_v15 }
 0x3fe   :  { %v2180_v11 = vpop.eup %2179 }
 0x3ff   :  { %v1935_v42 = vmul.f32 %v2180_v11, %v1924_v49 }
 0x401   :  { %1943 = vst [vmem:[%s4320_s5 + $0x38] sm:$0xff] %v1935_v42 }

// kernel: bilstm_attention_forward.8
= control target key start
LH: loop header
LB: loop body
LE: loop exit
PB: predicated region body
PF: predicated region fallthrough
CT: control target
= control target key end

     0   :  { %vm28_vm0 = vcmask 1043456   ;;  %vm238_vm1 = vcmask 1040384   ;;  %vm78_vm2 = vcmask 1041409   ;;  %vm313_vm3 = vcmask 1041408   ;;  %s1156_s1 = inlined_call_operand.vmem [shape: f32[1,256], index: 1, kind: input, shape index: {}]   ;;  %s1157_s2 = inlined_call_operand.vmem [shape: f32[1,256], index: 2, kind: input, shape index: {}]   ;;  %s1158_s0 = inlined_call_operand.vmem [shape: f32[8,4,256], index: 0, kind: input, shape index: {}]   ;;  %s1159_s3 = inlined_call_operand.vmem [shape: f32[8,256], index: 3, kind: output, shape index: {}]  }
   0x1   :  { %v22_v0 = vld [vmem:[%s1156_s1] sm:$0x3]  ;;  %v798_v8 = vld [vmem:[%s1158_s0 + $0x30] sm:$0xff]  ;;  %v819_v15 = vld [vmem:[%s1158_s0 + $0x38] sm:$0xff]  ;;  %vm80_vm4 = vcmask 1042434   ;;  %vm82_vm5 = vcmask 1043459  }
   0x2   :  { %v105_v1 = vperm.slane %v22_v0, 0  ;;  %v106_v2 = vperm.slane %v22_v0, 1  ;;  %v23_v4 = vld [vmem:[%s1157_s2] sm:$0x3]  ;;  %v808_v11 = vld [vmem:[%s1158_s0 + $0x10] sm:$0xff]  ;;  %v842_v24 = vld [vmem:[%s1158_s0 + $0x8] sm:$0xff] }
   0x3   :  { %v25_v5 = vperm.slane %v23_v4, 0  ;;  %v26_v6 = vperm.slane %v23_v4, 1  ;;  %v837_v23 = vld [vmem:[%s1158_s0] sm:$0xff]  ;;  %v857_v42 = vld [vmem:[%s1158_s0 + $0x18] sm:$0xff]  ;;  %v867_v44 = vld [vmem:[%s1158_s0 + $0x28] sm:$0xff]  ;;  %vm84_vm6 = vcmask 1044484  }
   0x4   :  { %v107_v3 = vrot.slane %v106_v2, 4  ;;  %v862_v43 = vld [vmem:[%s1158_s0 + $0x20] sm:$0xff]  ;;  %vm86_vm7 = vcmask 1045509   ;;  %vm88_vm8 = vcmask 1046534   ;;  %vm90_vm9 = vcmask 1047559  }
   0x5   :  { %v27_v12 = vrot.slane %v26_v6, 4  ;;  %vm307_vm10 = vcmask 1047554   ;;  %vm232_vm11 = vcmask 1047553   ;;  %vm387_vm12 = vcmask 1042432  }
   0x6   :  { %v109_v7 = vsel %vm28_vm0, %v107_v3, %v105_v1  ;;  %v801_v9 = vsel %vm28_vm0, %v105_v1, %v107_v3  ;;  %vm381_vm13 = vcmask 1047555  }
   0x7   :  { %v803_v10 = vrot.slane %v109_v7, 4  ;;  %v811_v13 = vrot.slane %v801_v9, 1  ;;  %v814_v14 = vrot.slane %v801_v9, 7  ;;  %v255_v16 = vrot.slane %v801_v9, 6 }
   0x8   :  { %v824_v17 = vmul.f32 %v801_v9, %v808_v11  ;;  %v112_v18 = vrot.slane %v801_v9, 2  ;;  %v113_v19 = vrot.slane %v801_v9, 3  ;;  %v29_v25 = vsel %vm28_vm0, %v25_v5, %v27_v12 }
   0x9   :  { %v115_v20 = vrot.slane %v803_v10, 2  ;;  %v830_v21 = vrot.slane %v803_v10, 1  ;;  %v265_v22 = vmul.f32 %v803_v10, %v798_v8  ;;  %v30_v26 = vsel %vm28_vm0, %v27_v12, %v25_v5 }
   0xa   :  { %v32_v27 = vrot.slane %v29_v25, 1  ;;  %v33_v28 = vrot.slane %v29_v25, 2  ;;  %v34_v29 = vrot.slane %v29_v25, 3  ;;  %v31_v35 = vrot.slane %v30_v26, 4 }
   0xb   :  { %v191_v30 = vmul.f32 %v115_v20, %v819_v15  ;;  %v848_v31 = vmul.f32 %v115_v20, %v798_v8  ;;  %v266_v32 = vmul.f32 %v830_v21, %v819_v15  ;;  %v287_v33 = vperm.slane %v265_v22, 2 }
   0xc   :  { %v288_v34 = vperm.slane %v265_v22, 6  ;;  %v46_v36 = vmul.f32 %v29_v25, %v837_v23  ;;  %v47_v37 = vmul.f32 %v32_v27, %v842_v24  ;;  %v35_v45 = vrot.slane %v31_v35, 1 }
   0xd   :  { %v214_v38 = vperm.slane %v191_v30, 1  ;;  %v215_v39 = vperm.slane %v191_v30, 5  ;;  %v289_v40 = vperm.slane %v266_v32, 2  ;;  %v290_v41 = vperm.slane %v266_v32, 6 }
   0xe   :  { %v36_v46 = vrot.slane %v31_v35, 2  ;;  %v37_v47 = vrot.slane %v31_v35, 3  ;;  %v48_v48 = vmul.f32 %v33_v28, %v808_v11  ;;  %v49_v56 = vmul.f32 %v34_v29, %v857_v42 }
   0xf   :  { %v239_v49 = vsel %vm238_vm1, %v214_v38, 0.0  ;;  %v240_v50 = vsel %vm238_vm1, %v215_v39, 0.0  ;;  %v301_v51 = vsel %vm78_vm2, %v289_v40, %v287_v33  ;;  %v302_v52 = vsel %vm78_vm2, %v290_v41, %v288_v34 }
  0x10   :  { %v241_v53 = vadd.f32 %v240_v50, %v239_v49  ;;  %v314_v54 = vsel %vm313_vm3, %v301_v51, 0.0  ;;  %v315_v55 = vsel %vm313_vm3, %v302_v52, 0.0  ;;  %v50_v58 = vmul.f32 %v31_v35, %v862_v43 }
  0x11   :  { %v316_v57 = vadd.f32 %v315_v55, %v314_v54  ;;  %v51_v59 = vmul.f32 %v35_v45, %v867_v44  ;;  %v52_v60 = vmul.f32 %v36_v46, %v798_v8  ;;  %v53_v61 = vmul.f32 %v37_v47, %v819_v15 }
  0x12   :  { %242 = vadd.xlane.f32.xlu1 %v241_v53  ;;  %v62_v62 = vperm.slane %v46_v36, 0  ;;  %v63_v63 = vperm.slane %v46_v36, 4  ;;  %v64_v0 = vperm.slane %v47_v37, 0  ;;  %v65_v1 = vperm.slane %v47_v37, 4 }
  0x13   :  { %317 = vadd.xlane.f32.xlu2 %v316_v57  ;;  %v66_v2 = vperm.slane %v48_v48, 0  ;;  %v67_v3 = vperm.slane %v48_v48, 4  ;;  %v68_v4 = vperm.slane %v49_v56, 0  ;;  %v69_v5 = vperm.slane %v49_v56, 4 }
  0x14   :  { %v70_v6 = vperm.slane %v50_v58, 0  ;;  %v71_v7 = vperm.slane %v50_v58, 4  ;;  %v72_v12 = vperm.slane %v51_v59, 0  ;;  %v73_v20 = vperm.slane %v51_v59, 4 }
  0x15   :  { %v74_v22 = vperm.slane %v52_v60, 0  ;;  %v75_v25 = vperm.slane %v52_v60, 4  ;;  %v76_v26 = vperm.slane %v53_v61, 0  ;;  %v77_v27 = vperm.slane %v53_v61, 4 }
  0x16   :  { %v79_v28 = vsel %vm78_vm2, %v64_v0, %v62_v62  ;;  %v92_v29 = vsel %vm78_vm2, %v65_v1, %v63_v63  ;;  %v884_v30 = vrot.slane %v803_v10, 7  ;;  %v256_v34 = vrot.slane %v803_v10, 6 }
  0x17   :  { %v81_v32 = vsel %vm80_vm4, %v66_v2, %v79_v28  ;;  %v93_v33 = vsel %vm80_vm4, %v67_v3, %v92_v29  ;;  %v259_v35 = vmul.f32 %v255_v16, %v837_v23  ;;  %v260_v38 = vmul.f32 %v814_v14, %v842_v24 }
  0x18   :  { %v83_v36 = vsel %vm82_vm5, %v68_v4, %v81_v32  ;;  %v94_v37 = vsel %vm82_vm5, %v69_v5, %v93_v33  ;;  %v262_v39 = vmul.f32 %v811_v13, %v857_v42  ;;  %v263_v45 = vmul.f32 %v256_v34, %v862_v43 }
  0x19   :  { %v85_v40 = vsel %vm84_vm6, %v70_v6, %v83_v36  ;;  %v95_v41 = vsel %vm84_vm6, %v71_v7, %v94_v37  ;;  %v264_v46 = vmul.f32 %v884_v30, %v867_v44  ;;  %v275_v49 = vperm.slane %v259_v35, 2 }
  0x1a   :  { %v87_v47 = vsel %vm86_vm7, %v72_v12, %v85_v40  ;;  %v96_v48 = vsel %vm86_vm7, %v73_v20, %v95_v41  ;;  %v276_v50 = vperm.slane %v259_v35, 6  ;;  %v277_v53 = vperm.slane %v260_v38, 2 }
  0x1b   :  { %v89_v51 = vsel %vm88_vm8, %v74_v22, %v87_v47  ;;  %v97_v52 = vsel %vm88_vm8, %v75_v25, %v96_v48  ;;  %v278_v54 = vperm.slane %v260_v38, 6  ;;  %v279_v57 = vperm.slane %v824_v17, 2 }
  0x1c   :  { %v91_v55 = vsel %vm90_vm9, %v76_v26, %v89_v51  ;;  %v98_v56 = vsel %vm90_vm9, %v77_v27, %v97_v52  ;;  %v280_v58 = vperm.slane %v824_v17, 6  ;;  %v281_v60 = vperm.slane %v262_v39, 2 }
  0x1d   :  { %v101_v59 = vadd.f32 %v98_v56, %v91_v55  ;;  %v282_v61 = vperm.slane %v262_v39, 6  ;;  %v283_v62 = vperm.slane %v263_v45, 2  ;;  %v284_v63 = vperm.slane %v263_v45, 6 }
  0x1e   :  { %v285_v0 = vperm.slane %v264_v46, 2  ;;  %v286_v1 = vperm.slane %v264_v46, 6  ;;  %v291_v2 = vsel %vm82_vm5, %v277_v53, %v275_v49  ;;  %v296_v4 = vsel %vm82_vm5, %v278_v54, %v276_v50 }
  0x1f   :  { %102 = vadd.xlane.f32.xlu0 %v101_v59  ;;  %v292_v3 = vsel %vm84_vm6, %v279_v57, %v291_v2  ;;  %v116_v5 = vrot.slane %v803_v10, 3  ;;  %v125_v6 = vmul.f32 %v801_v9, %v837_v23  ;;  %v297_v7 = vsel %vm84_vm6, %v280_v58, %v296_v4 }
  0x20   :  { %v293_v17 = vsel %vm86_vm7, %v281_v60, %v292_v3  ;;  %v126_v12 = vmul.f32 %v811_v13, %v842_v24  ;;  %v127_v20 = vmul.f32 %v112_v18, %v808_v11  ;;  %v298_v25 = vsel %vm86_vm7, %v282_v61, %v297_v7 }
  0x21   :  { %v294_v22 = vsel %vm88_vm8, %v283_v62, %v293_v17  ;;  %v128_v26 = vmul.f32 %v113_v19, %v857_v42  ;;  %v129_v27 = vmul.f32 %v803_v10, %v862_v43  ;;  %v299_v29 = vsel %vm88_vm8, %v284_v63, %v298_v25 }
  0x22   :  { %v295_v28 = vsel %vm90_vm9, %v285_v0, %v294_v22  ;;  %v130_v32 = vmul.f32 %v830_v21, %v867_v44  ;;  %v132_v33 = vmul.f32 %v116_v5, %v819_v15  ;;  %v300_v35 = vsel %vm90_vm9, %v286_v1, %v299_v29 }
  0x23   :  { %v308_v36 = vsel %vm307_vm10, %v295_v28, 0.0  ;;  %v141_v37 = vperm.slane %v125_v6, 0  ;;  %v142_v38 = vperm.slane %v125_v6, 4  ;;  %v309_v19 = vsel %vm307_vm10, %v300_v35, 0.0 }
  0x24   :  { %v143_v39 = vperm.slane %v126_v12, 0  ;;  %v144_v40 = vperm.slane %v126_v12, 4  ;;  %v145_v41 = vperm.slane %v127_v20, 0  ;;  %v310_v45 = vadd.f32 %v309_v19, %v308_v36 }
  0x25   :  { %v146_v46 = vperm.slane %v127_v20, 4  ;;  %v147_v47 = vperm.slane %v128_v26, 0  ;;  %v148_v48 = vperm.slane %v128_v26, 4  ;;  %v149_v49 = vperm.slane %v129_v27, 0 }
  0x26   :  { %v150_v50 = vperm.slane %v129_v27, 4  ;;  %v151_v51 = vperm.slane %v130_v32, 0  ;;  %v152_v52 = vperm.slane %v130_v32, 4  ;;  %311 = vadd.xlane.f32.xlu1 %v310_v45  ;;  %v153_v53 = vperm.slane %v848_v31, 0 }
  0x27   :  { %v154_v54 = vperm.slane %v848_v31, 4  ;;  %v155_v55 = vperm.slane %v132_v33, 0  ;;  %v156_v56 = vperm.slane %v132_v33, 4  ;;  %v157_v57 = vsel %vm78_vm2, %v143_v39, %v141_v37 }
  0x28   :  { %v164_v58 = vsel %vm78_vm2, %v144_v40, %v142_v38  ;;  %v184_v59 = vmul.f32 %v814_v14, %v837_v23  ;;  %v185_v60 = vmul.f32 %v801_v9, %v842_v24  ;;  %v158_v61 = vsel %vm80_vm4, %v145_v41, %v157_v57 }
  0x29   :  { %v165_v62 = vsel %vm80_vm4, %v146_v46, %v164_v58  ;;  %v186_v63 = vmul.f32 %v811_v13, %v808_v11  ;;  %v187_v31 = vmul.f32 %v112_v18, %v857_v42  ;;  %v159_v0 = vsel %vm82_vm5, %v147_v47, %v158_v61 }
  0x2a   :  { %v166_v1 = vsel %vm82_vm5, %v148_v48, %v165_v62  ;;  %v188_v2 = vmul.f32 %v884_v30, %v862_v43  ;;  %v189_v3 = vmul.f32 %v803_v10, %v867_v44  ;;  %v160_v4 = vsel %vm84_vm6, %v149_v49, %v159_v0 }
  0x2b   :  { %v167_v5 = vsel %vm84_vm6, %v150_v50, %v166_v1  ;;  %v190_v13 = vmul.f32 %v830_v21, %v798_v8  ;;  %v200_v6 = vperm.slane %v184_v59, 1  ;;  %v161_v18 = vsel %vm86_vm7, %v151_v51, %v160_v4 }
  0x2c   :  { %v168_v17 = vsel %vm86_vm7, %v152_v52, %v167_v5  ;;  %v201_v7 = vperm.slane %v184_v59, 5  ;;  %v202_v12 = vperm.slane %v185_v60, 1  ;;  %v162_v20 = vsel %vm88_vm8, %v153_v53, %v161_v18 }
  0x2d   :  { %v169_v22 = vsel %vm88_vm8, %v154_v54, %v168_v17  ;;  %v203_v25 = vperm.slane %v185_v60, 5  ;;  %v204_v26 = vperm.slane %v186_v63, 1  ;;  %v163_v27 = vsel %vm90_vm9, %v155_v55, %v162_v20 }
  0x2e   :  { %v170_v28 = vsel %vm90_vm9, %v156_v56, %v169_v22  ;;  %v205_v29 = vperm.slane %v186_v63, 5  ;;  %v206_v32 = vperm.slane %v187_v31, 1  ;;  %v207_v33 = vperm.slane %v187_v31, 5 }
  0x2f   :  { %v173_v21 = vadd.f32 %v170_v28, %v163_v27  ;;  %v208_v35 = vperm.slane %v188_v2, 1  ;;  %v209_v36 = vperm.slane %v188_v2, 5  ;;  %v210_v37 = vperm.slane %v189_v3, 1 }
  0x30   :  { %v211_v38 = vperm.slane %v189_v3, 5  ;;  %v212_v19 = vperm.slane %v190_v13, 1  ;;  %v213_v39 = vperm.slane %v190_v13, 5  ;;  %v216_v40 = vsel %vm80_vm4, %v202_v12, %v200_v6 }
  0x31   :  { %174 = vadd.xlane.f32.xlu2 %v173_v21  ;;  %v222_v41 = vsel %vm80_vm4, %v203_v25, %v201_v7  ;;  %v338_v45 = vmul.f32 %v256_v34, %v867_v44  ;;  %v217_v46 = vsel %vm82_vm5, %v204_v26, %v216_v40  ;;  %v339_v48 = vmul.f32 %v884_v30, %v798_v8 }
  0x32   :  { %v223_v47 = vsel %vm82_vm5, %v205_v29, %v222_v41  ;;  %v340_v49 = vmul.f32 %v803_v10, %v819_v15  ;;  %v218_v50 = vsel %vm84_vm6, %v206_v32, %v217_v46  ;;  %v329_v4 = vrot.slane %v801_v9, 5 }
  0x33   :  { %v224_v51 = vsel %vm84_vm6, %v207_v33, %v223_v47  ;;  %v359_v52 = vperm.slane %v338_v45, 3  ;;  %v360_v53 = vperm.slane %v338_v45, 7  ;;  %v219_v54 = vsel %vm86_vm7, %v208_v35, %v218_v50 }
  0x34   :  { %v225_v34 = vsel %vm86_vm7, %v209_v36, %v224_v51  ;;  %v361_v55 = vperm.slane %v339_v48, 3  ;;  %v362_v56 = vperm.slane %v339_v48, 7  ;;  %v220_v57 = vsel %vm88_vm8, %v210_v37, %v219_v54 }
  0x35   :  { %v226_v58 = vsel %vm88_vm8, %v211_v38, %v225_v34  ;;  %v363_v30 = vperm.slane %v340_v49, 3  ;;  %v364_v59 = vperm.slane %v340_v49, 7  ;;  %v221_v60 = vsel %vm90_vm9, %v212_v19, %v220_v57 }
  0x36   :  { %v227_v61 = vsel %vm90_vm9, %v213_v39, %v226_v58  ;;  %v373_v62 = vsel %vm78_vm2, %v361_v55, %v359_v52  ;;  %v375_v63 = vsel %vm78_vm2, %v362_v56, %v360_v53  ;;  %v233_v31 = vsel %vm232_vm11, %v221_v60, 0.0 }
  0x37   :  { %v234_v0 = vsel %vm232_vm11, %v227_v61, 0.0  ;;  %v374_v1 = vsel %vm80_vm4, %v363_v30, %v373_v62  ;;  %v376_v2 = vsel %vm80_vm4, %v364_v59, %v375_v63  ;;  %v330_v5 = vrot.slane %v803_v10, 5 }
  0x38   :  { %v235_v3 = vadd.f32 %v234_v0, %v233_v31  ;;  %v388_v13 = vsel %vm387_vm12, %v374_v1, 0.0  ;;  %v389_v6 = vsel %vm387_vm12, %v376_v2, 0.0  ;;  %v334_v18 = vmul.f32 %v255_v16, %v842_v24 }
  0x39   :  { %v335_v17 = vmul.f32 %v814_v14, %v808_v11  ;;  %v390_v7 = vadd.f32 %v389_v6, %v388_v13  ;;  %v333_v12 = vmul.f32 %v329_v4, %v837_v23  ;;  %v336_v20 = vmul.f32 %v801_v9, %v857_v42 }
  0x3a   :  { %236 = vadd.xlane.f32.xlu0 %v235_v3  ;;  %v337_v22 = vmul.f32 %v330_v5, %v862_v43  ;;  %v351_v25 = vperm.slane %v334_v18, 3  ;;  %v352_v10 = vperm.slane %v334_v18, 7  ;;  %vm405_vm1 = vcmask 1046528  }
  0x3b   :  { %v353_v26 = vperm.slane %v335_v17, 3  ;;  %v354_v27 = vperm.slane %v335_v17, 7  ;;  %391 = vadd.xlane.f32.xlu1 %v390_v7  ;;  %v349_v28 = vperm.slane %v333_v12, 3  ;;  %v350_v29 = vperm.slane %v333_v12, 7 }
  0x3c   :  { %v355_v16 = vperm.slane %v336_v20, 3  ;;  %v356_v32 = vperm.slane %v336_v20, 7  ;;  %v357_v21 = vperm.slane %v337_v22, 3  ;;  %v358_v14 = vperm.slane %v337_v22, 7 }
  0x3d   :  { %v365_v33 = vsel %vm84_vm6, %v351_v25, %v349_v28  ;;  %v369_v35 = vsel %vm84_vm6, %v352_v10, %v350_v29  ;;  %v767_v4 = vmov 0   ;;  %vm413_vm12 = vcmask 1045504  }
  0x3e   :  { %v366_v36 = vsel %vm86_vm7, %v353_v26, %v365_v33  ;;  %v370_v9 = vsel %vm86_vm7, %v354_v27, %v369_v35  ;;  %750 = vset.pattern.permute.xlu1 %v767_v4  ;;  %749 = vset.pattern.permute.xlu0 %v767_v4 }
  0x3f   :  { %v367_v37 = vsel %vm88_vm8, %v355_v16, %v366_v36  ;;  %v371_v38 = vsel %vm88_vm8, %v356_v32, %v370_v9  ;;  %748 = vset.pattern.permute.xlu2 %v767_v4 }
  0x40   :  { %v368_v19 = vsel %vm90_vm9, %v357_v21, %v367_v37  ;;  %v372_v39 = vsel %vm90_vm9, %v358_v14, %v371_v38 }
  0x41   :  { %v382_v40 = vsel %vm381_vm13, %v368_v19, 0.0  ;;  %v383_v41 = vsel %vm381_vm13, %v372_v39, 0.0 }
  0x42   :  { %v384_v45 = vadd.f32 %v383_v41, %v382_v40 }
  0x44   :  { %385 = vadd.xlane.f32.xlu0 %v384_v45 }
  0x85   :  { %v243_v46 = vpop.xlane.xlu1 %242 }
  0x86   :  { %v318_v48 = vpop.xlane.xlu2 %317 }
  0x92   :  { %v103_v47 = vpop.xlane.xlu0 %102 }
  0x93   :  { %v245_v50 = vrot.slane %v103_v47, 7  ;;  %v319_v52 = vrot.slane %v103_v47, 6  ;;  %v393_v59 = vrot.slane %v103_v47, 5 }
  0x95   :  { %v248_v51 = vadd.f32 %v245_v50, %v243_v46  ;;  %v322_v30 = vadd.f32 %v319_v52, %v318_v48 }
  0x97   :  { %v252_v56 = vmul.f32 0.2, %v248_v51  ;;  %vm250_vm14 = vcmp.gt.f32.partialorder %v248_v51, 0.0  ;;  %v326_v1 = vmul.f32 0.2, %v322_v30  ;;  %vm324_vm3 = vcmp.gt.f32.partialorder %v322_v30, 0.0 }
  0x99   :  { %v312_v49 = vpop.xlane.xlu1 %311  ;;  %v254_v63 = vsel %vm250_vm14, %v248_v51, %v252_v56  ;;  %v328_v17 = vsel %vm324_vm3, %v322_v30, %v326_v1  ;;  %vm421_vm14 = vcmask 1044480  }
  0x9a   :  { %v321_v34 = vadd.f32 %v319_v52, %v312_v49  ;;  %v407_v3 = vrot.slane %v254_v63, 1  ;;  %v415_v26 = vrot.slane %v328_v17, 2 }
  0x9c   :  { %v325_v62 = vmul.f32 0.2, %v321_v34  ;;  %vm323_vm0 = vcmp.gt.f32.partialorder %v321_v34, 0.0 }
  0x9e   :  { %v327_v5 = vsel %vm323_vm0, %v321_v34, %v325_v62 }
  0x9f   :  { %v414_v12 = vrot.slane %v327_v5, 2 }
  0xa1   :  { %v416_v28 = vsel %vm413_vm12, %v414_v12, %v415_v26 }
  0xa4   :  { %v175_v55 = vpop.xlane.xlu2 %174 }
  0xa5   :  { %v176_v60 = vadd.f32 %v175_v55, %v103_v47 }
  0xa7   :  { %v178_v2 = vmul.f32 0.2, %v176_v60  ;;  %vm177_vm10 = vcmp.gt.f32.partialorder %v176_v60, 0.0 }
  0xa9   :  { %v179_v20 = vsel %vm177_vm10, %v176_v60, %v178_v2 }
  0xad   :  { %v237_v53 = vpop.xlane.xlu0 %236 }
  0xae   :  { %v247_v54 = vadd.f32 %v245_v50, %v237_v53  ;;  %v392_v58 = vpop.xlane.xlu1 %391 }
  0xaf   :  { %v396_v31 = vadd.f32 %v393_v59, %v392_v58 }
  0xb0   :  { %vm249_vm15 = vcmp.gt.f32.partialorder %v247_v54, 0.0  ;;  %v251_v57 = vmul.f32 0.2, %v247_v54 }
  0xb1   :  { %v400_v13 = vmul.f32 0.2, %v396_v31  ;;  %vm398_vm11 = vcmp.gt.f32.partialorder %v396_v31, 0.0 }
  0xb2   :  { %v253_v61 = vsel %vm249_vm15, %v247_v54, %v251_v57 }
  0xb3   :  { %v406_v0 = vrot.slane %v253_v61, 1  ;;  %v402_v25 = vsel %vm398_vm11, %v396_v31, %v400_v13 }
  0xb4   :  { %v423_v29 = vrot.slane %v402_v25, 3 }
  0xb5   :  { %v408_v6 = vsel %vm405_vm1, %v406_v0, %v407_v3 }
  0xb6   :  { %v410_v22 = vmax.f32 %v179_v20, %v408_v6 }
  0xb7   :  { %v386_v18 = vpop.xlane.xlu0 %385 }
  0xb8   :  { %v395_v7 = vadd.f32 %v393_v59, %v386_v18  ;;  %v418_v32 = vmax.f32 %v410_v22, %v416_v28 }
  0xba   :  { %vm397_vm13 = vcmp.gt.f32.partialorder %v395_v7, 0.0  ;;  %v399_v10 = vmul.f32 0.2, %v395_v7 }
  0xbc   :  { %v401_v27 = vsel %vm397_vm13, %v395_v7, %v399_v10 }
  0xbd   :  { %v422_v16 = vrot.slane %v401_v27, 3 }
  0xbf   :  { %v424_v21 = vsel %vm421_vm14, %v422_v16, %v423_v29 }
  0xc0   :  { %v426_v14 = vmax.f32 %v418_v32, %v424_v21 }
  0xc2   :  { %v427_v33 = vsub.f32 %v179_v20, %v426_v14  ;;  %v431_v35 = vrot.slane %v426_v14, 7  ;;  %v447_v36 = vrot.slane %v426_v14, 5  ;;  %v439_v9 = vrot.slane %v426_v14, 6 }
  0xc4   :  { %v428_v37 = vmul.f32 1.442695, %v427_v33  ;;  %v433_v38 = vsub.f32 %v253_v61, %v431_v35  ;;  %v434_v19 = vsub.f32 %v254_v63, %v431_v35  ;;  %v449_v39 = vsub.f32 %v401_v27, %v447_v36 }
  0xc5   :  { %v450_v40 = vsub.f32 %v402_v25, %v447_v36  ;;  %v441_v41 = vsub.f32 %v327_v5, %v439_v9  ;;  %v442_v45 = vsub.f32 %v328_v17, %v439_v9 }
  0xc6   :  { %v435_v46 = vmul.f32 1.442695, %v433_v38  ;;  %v437_v47 = vmul.f32 1.442695, %v434_v19  ;;  %v451_v48 = vmul.f32 1.442695, %v449_v39  ;;  %751 = vpow2.f32 %v428_v37 }
  0xc7   :  { %v453_v49 = vmul.f32 1.442695, %v450_v40  ;;  %v443_v50 = vmul.f32 1.442695, %v441_v41  ;;  %v445_v51 = vmul.f32 1.442695, %v442_v45 }
  0xc8   :  { %753 = vpow2.f32 %v435_v46  ;;  %v548_v38 = vperm.slane %v837_v23, 1  ;;  %v549_v19 = vperm.slane %v837_v23, 5  ;;  %v550_v39 = vperm.slane %v842_v24, 1 }
  0xc9   :  { %755 = vpow2.f32 %v437_v47  ;;  %v551_v40 = vperm.slane %v842_v24, 5  ;;  %v493_v41 = vperm.slane %v837_v23, 0  ;;  %v494_v45 = vperm.slane %v837_v23, 4 }
  0xca   :  { %757 = vpow2.f32 %v451_v48  ;;  %v495_v46 = vperm.slane %v842_v24, 0  ;;  %v496_v47 = vperm.slane %v842_v24, 4  ;;  %v552_v48 = vperm.slane %v808_v11, 1 }
  0xcb   :  { %759 = vpow2.f32 %v453_v49  ;;  %v553_v49 = vperm.slane %v808_v11, 5 }
  0xcc   :  { %761 = vpow2.f32 %v443_v50  ;;  %v752_v52 = vpop.eup %751  ;;  %v564_v50 = vsel %vm80_vm4, %v550_v39, %v548_v38 }
  0xcd   :  { %763 = vpow2.f32 %v445_v51  ;;  %v570_v51 = vsel %vm80_vm4, %v551_v40, %v549_v19 }
  0xce   :  { %v754_v53 = vpop.eup %753 }
  0xcf   :  { %v756_v54 = vpop.eup %755  ;;  %v457_v34 = vrot.slane %v754_v53, 1 }
  0xd0   :  { %v758_v55 = vpop.eup %757  ;;  %v458_v56 = vrot.slane %v756_v54, 1 }
  0xd1   :  { %v760_v57 = vpop.eup %759  ;;  %v471_v62 = vrot.slane %v758_v55, 3 }
  0xd2   :  { %v762_v58 = vpop.eup %761  ;;  %v459_v30 = vsel %vm405_vm1, %v457_v34, %v458_v56  ;;  %v472_v63 = vrot.slane %v760_v57, 3  ;;  %v516_v34 = vsel %vm78_vm2, %v496_v47, %v494_v45  ;;  %v555_v56 = vperm.slane %v857_v42, 5 }
  0xd3   :  { %v764_v59 = vpop.eup %763  ;;  %v461_v60 = vadd.f32 %v752_v52, %v459_v30  ;;  %v464_v61 = vrot.slane %v762_v58, 2  ;;  %v499_v30 = vperm.slane %v857_v42, 0  ;;  %v508_v45 = vperm.slane %v819_v15, 4 }
  0xd4   :  { %v465_v31 = vrot.slane %v764_v59, 2  ;;  %v473_v2 = vsel %vm421_vm14, %v471_v62, %v472_v63  ;;  %v556_v62 = vperm.slane %v862_v43, 1  ;;  %v557_v63 = vperm.slane %v862_v43, 5 }
  0xd5   :  { %v629_v47 = vperm.slane %v798_v8, 6 }
  0xd6   :  { %v466_v0 = vsel %vm413_vm12, %v464_v61, %v465_v31 }
  0xd7   :  { %v468_v1 = vadd.f32 %v466_v0, %v461_v60 }
  0xd9   :  { %v475_v3 = vadd.f32 %v473_v2, %v468_v1  ;;  %v501_v2 = vperm.slane %v862_v43, 0 }
  0xdb   :  { %765 = vrcp.f32 %v475_v3  ;;  %v502_v3 = vperm.slane %v862_v43, 4 }
  0xe1   :  { %v766_v4 = vpop.eup %765 }
  0xe2   :  { %v598_v5 = vrot.slane %v766_v4, 6  ;;  %v530_v13 = vrot.slane %v766_v4, 7  ;;  %v666_v7 = vrot.slane %v766_v4, 5  ;;  %v477_v28 = vmul.f32 %v766_v4, %v752_v52 }
  0xe3   :  { %v497_v52 = vperm.slane %v808_v11, 0 }
  0xe4   :  { %v600_v6 = vmul.f32 %v762_v58, %v598_v5  ;;  %v533_v18 = vmul.f32 %v756_v54, %v530_v13  ;;  %v532_v17 = vmul.f32 %v754_v53, %v530_v13  ;;  %v668_v27 = vmul.f32 %v758_v55, %v666_v7 }
  0xe5   :  { %v740_v16 = vadd.f32 -0.001, %v477_v28  ;;  %v601_v14 = vmul.f32 %v764_v59, %v598_v5  ;;  %v669_v36 = vmul.f32 %v760_v57, %v666_v7  ;;  %v498_v53 = vperm.slane %v808_v11, 4 }
  0xe6   :  { %v743_v12 = vadd.f32 -0.001, %v600_v6  ;;  %v742_v20 = vadd.f32 -0.001, %v533_v18  ;;  %v741_v22 = vadd.f32 -0.001, %v532_v17  ;;  %v509_v54 = vsel %vm78_vm2, %v495_v46, %v493_v41 }
  0xe7   :  { %v745_v29 = vadd.f32 -0.001, %v668_v27  ;;  %v479_v21 = vmax.f32 %v740_v16, 0.0  ;;  %v744_v33 = vadd.f32 -0.001, %v601_v14  ;;  %v554_v55 = vperm.slane %v857_v42, 1 }
  0xe8   :  { %v604_v25 = vmax.f32 %v743_v12, 0.0  ;;  %v537_v10 = vmax.f32 %v742_v20, 0.0  ;;  %v536_v26 = vmax.f32 %v741_v22, 0.0  ;;  %v746_v9 = vadd.f32 -0.001, %v669_v36 }
  0xe9   :  { %v672_v32 = vmax.f32 %v745_v29, 0.0  ;;  %v605_v35 = vmax.f32 %v744_v33, 0.0  ;;  %v565_v57 = vsel %vm82_vm5, %v552_v48, %v564_v50  ;;  %v571_v58 = vsel %vm82_vm5, %v553_v49, %v570_v51 }
  0xea   :  { %608 = vperm.xlu1 %750, %v604_v25   ;;  %545 = vperm.xlu0 %749, %v537_v10   ;;  %v673_v37 = vmax.f32 %v746_v9, 0.0  ;;  %v500_v59 = vperm.slane %v857_v42, 4  ;;  %v510_v60 = vsel %vm80_vm4, %v497_v52, %v509_v54  ;;  %v517_v61 = vsel %vm80_vm4, %v498_v53, %v516_v34 }
  0xeb   :  { %540 = vperm.xlu2 %748, %v536_v26   ;;  %v566_v0 = vsel %vm84_vm6, %v554_v55, %v565_v57  ;;  %v572_v1 = vsel %vm84_vm6, %v555_v56, %v571_v58  ;;  %v511_v4 = vsel %vm82_vm5, %v499_v30, %v510_v60  ;;  %v558_v13 = vperm.slane %v867_v44, 1 }
  0xec   :  { %v518_v5 = vsel %vm82_vm5, %v500_v59, %v517_v61  ;;  %v559_v6 = vperm.slane %v867_v44, 5  ;;  %v560_v18 = vperm.slane %v798_v8, 1  ;;  %v561_v17 = vperm.slane %v798_v8, 5 }
  0xed   :  { %v567_v7 = vsel %vm86_vm7, %v556_v62, %v566_v0  ;;  %v573_v12 = vsel %vm86_vm7, %v557_v63, %v572_v1  ;;  %v503_v20 = vperm.slane %v867_v44, 0  ;;  %v504_v22 = vperm.slane %v867_v44, 4 }
  0xee   :  { %v512_v25 = vsel %vm84_vm6, %v501_v2, %v511_v4  ;;  %v519_v10 = vsel %vm84_vm6, %v502_v3, %v518_v5  ;;  %v616_v26 = vperm.slane %v837_v23, 2  ;;  %v617_v27 = vperm.slane %v837_v23, 6 }
  0xef   :  { %v618_v28 = vperm.slane %v842_v24, 2  ;;  %v619_v29 = vperm.slane %v842_v24, 6  ;;  %v568_v16 = vsel %vm88_vm8, %v558_v13, %v567_v7  ;;  %v506_v14 = vperm.slane %v798_v8, 4 }
  0xf0   :  { %v520_v36 = vsel %vm86_vm7, %v504_v22, %v519_v10  ;;  %v620_v9 = vperm.slane %v808_v11, 2  ;;  %v569_v38 = vsel %vm90_vm9, %v560_v18, %v568_v16  ;;  %v507_v41 = vperm.slane %v819_v15, 0 }
  0xf1   :  { %v632_v39 = vsel %vm82_vm5, %v618_v28, %v616_v26  ;;  %v637_v40 = vsel %vm82_vm5, %v619_v29, %v617_v27  ;;  %v628_v46 = vperm.slane %v798_v8, 2  ;;  %v521_v49 = vsel %vm88_vm8, %v506_v14, %v520_v36 }
  0xf2   :  { %676 = vperm.xlu1 %750, %v672_v32   ;;  %v574_v32 = vsel %vm88_vm8, %v559_v6, %v573_v12  ;;  %v622_v50 = vperm.slane %v857_v42, 2  ;;  %v623_v51 = vperm.slane %v857_v42, 6  ;;  %v630_v52 = vperm.slane %v819_v15, 2 }
  0xf3   :  { %482 = vperm.xlu2 %748, %v479_v21   ;;  %v505_v21 = vperm.slane %v798_v8, 0  ;;  %v575_v19 = vsel %vm90_vm9, %v561_v17, %v574_v32  ;;  %v631_v53 = vperm.slane %v819_v15, 6  ;;  %v633_v54 = vsel %vm84_vm6, %v620_v9, %v632_v39 }
  0xf4   :  { %v684_v55 = vperm.slane %v837_v23, 3  ;;  %v685_v56 = vperm.slane %v837_v23, 7  ;;  %v686_v57 = vperm.slane %v842_v24, 3  ;;  %v687_v58 = vperm.slane %v842_v24, 7 }
  0xf5   :  { %v522_v59 = vsel %vm90_vm9, %v508_v45, %v521_v49  ;;  %v624_v60 = vperm.slane %v862_v43, 2  ;;  %v625_v61 = vperm.slane %v862_v43, 6  ;;  %v626_v63 = vperm.slane %v867_v44, 2 }
  0xf6   :  { %v627_v0 = vperm.slane %v867_v44, 6  ;;  %v634_v1 = vsel %vm86_vm7, %v622_v50, %v633_v54  ;;  %v694_v2 = vperm.slane %v867_v44, 3  ;;  %v695_v24 = vperm.slane %v867_v44, 7 }
  0xf7   :  { %v688_v3 = vperm.slane %v808_v11, 3  ;;  %v689_v4 = vperm.slane %v808_v11, 7  ;;  %v696_v5 = vperm.slane %v798_v8, 3  ;;  %v697_v13 = vperm.slane %v798_v8, 7 }
  0xf8   :  { %v700_v6 = vsel %vm84_vm6, %v686_v57, %v684_v55  ;;  %v704_v18 = vsel %vm84_vm6, %v687_v58, %v685_v56  ;;  %v635_v17 = vsel %vm88_vm8, %v624_v60, %v634_v1  ;;  %v562_v12 = vperm.slane %v819_v15, 1 }
  0xf9   :  { %v563_v44 = vperm.slane %v819_v15, 5  ;;  %v690_v22 = vperm.slane %v857_v42, 3  ;;  %v691_v8 = vperm.slane %v857_v42, 7  ;;  %v701_v26 = vsel %vm86_vm7, %v688_v3, %v700_v6 }
  0xfa   :  { %v705_v27 = vsel %vm86_vm7, %v689_v4, %v704_v18  ;;  %v642_v28 = vsel %vm78_vm2, %v630_v52, %v628_v46  ;;  %v643_v29 = vsel %vm78_vm2, %v631_v53, %v629_v47  ;;  %v708_v16 = vsel %vm78_vm2, %v696_v5, %v694_v2 }
  0xfb   :  { %613 = vperm.xlu2 %748, %v605_v35   ;;  %v513_v35 = vsel %vm86_vm7, %v503_v20, %v512_v25  ;;  %v698_v20 = vperm.slane %v819_v15, 3  ;;  %v636_v32 = vsel %vm90_vm9, %v626_v63, %v635_v17 }
  0xfc   :  { %v514_v48 = vsel %vm88_vm8, %v505_v21, %v513_v35  ;;  %v693_v35 = vperm.slane %v862_v43, 7 }
  0xfd   :  { %v515_v30 = vsel %vm90_vm9, %v507_v41, %v514_v48 }
 0x103   :  { %681 = vperm.xlu2 %748, %v673_v37   ;;  %v621_v37 = vperm.slane %v808_v11, 6  ;;  %v699_v11 = vperm.slane %v819_v15, 7  ;;  %v710_v15 = vsel %vm78_vm2, %v697_v13, %v695_v24 }
 0x105   :  { %v638_v34 = vsel %vm84_vm6, %v621_v37, %v637_v40  ;;  %v702_v37 = vsel %vm88_vm8, %v690_v22, %v701_v26  ;;  %v709_v40 = vsel %vm80_vm4, %v698_v20, %v708_v16  ;;  %v711_v41 = vsel %vm80_vm4, %v699_v11, %v710_v15 }
 0x106   :  { %v639_v23 = vsel %vm86_vm7, %v623_v51, %v638_v34 }
 0x107   :  { %v640_v7 = vsel %vm88_vm8, %v625_v61, %v639_v23 }
 0x108   :  { %v641_v42 = vsel %vm90_vm9, %v627_v0, %v640_v7 }
 0x145   :  { %v1048_v31 = vpop.permute.xlu2 %540 }
 0x146   :  { %v580_v25 = vmul.f32 %v569_v38, %v1048_v31  ;;  %v581_v10 = vmul.f32 %v575_v19, %v1048_v31  ;;  %v692_v31 = vperm.slane %v862_v43, 3  ;;  %v706_v38 = vsel %vm88_vm8, %v691_v8, %v705_v27 }
 0x147   :  { %v707_v43 = vsel %vm90_vm9, %v693_v35, %v706_v38 }
 0x148   :  { %v588_v19 = vrot.slane %v580_v25, 1  ;;  %v591_v39 = vrot.slane %v581_v10, 1  ;;  %v703_v50 = vsel %vm90_vm9, %v692_v31, %v702_v37 }
 0x14d   :  { %v1074_v33 = vpop.permute.xlu2 %482 }
 0x14e   :  { %v525_v34 = vmul.f32 %v515_v30, %v1074_v33  ;;  %v526_v55 = vmul.f32 %v522_v59, %v1074_v33 }
 0x155   :  { %v614_v62 = vpop.permute.xlu2 %613 }
 0x156   :  { %v650_v51 = vmul.f32 %v642_v28, %v614_v62  ;;  %v651_v52 = vmul.f32 %v643_v29, %v614_v62 }
 0x158   :  { %v657_v1 = vrot.slane %v650_v51, 2  ;;  %v660_v23 = vrot.slane %v651_v52, 2 }
 0x15c   :  { %v609_v21 = vpop.permute.xlu1 %608  ;;  %v546_v14 = vpop.permute.xlu0 %545 }
 0x15d   :  { %v582_v36 = vmul.f32 %v562_v12, %v546_v14  ;;  %v583_v9 = vmul.f32 %v563_v44, %v546_v14  ;;  %v648_v45 = vmul.f32 %v636_v32, %v609_v21  ;;  %v649_v46 = vmul.f32 %v641_v42, %v609_v21  ;;  %v682_v49 = vpop.permute.xlu2 %681 }
 0x15e   :  { %v718_v56 = vmul.f32 %v709_v40, %v682_v49  ;;  %v719_v57 = vmul.f32 %v711_v41, %v682_v49 }
 0x15f   :  { %v589_v47 = vrot.slane %v582_v36, 1  ;;  %v592_v48 = vrot.slane %v583_v9, 1  ;;  %v656_v58 = vrot.slane %v648_v45, 2  ;;  %v659_v60 = vrot.slane %v649_v46, 2 }
 0x160   :  { %v725_v62 = vrot.slane %v718_v56, 3  ;;  %v728_v3 = vrot.slane %v719_v57, 3 }
 0x161   :  { %v590_v53 = vsel %vm405_vm1, %v588_v19, %v589_v47  ;;  %v593_v54 = vsel %vm405_vm1, %v591_v39, %v592_v48  ;;  %v658_v4 = vsel %vm413_vm12, %v656_v58, %v657_v1  ;;  %v661_v5 = vsel %vm413_vm12, %v659_v60, %v660_v23 }
 0x162   :  { %v596_v61 = vadd.f32 %v590_v53, %v525_v34  ;;  %v597_v63 = vadd.f32 %v593_v54, %v526_v55 }
 0x164   :  { %v677_v0 = vpop.permute.xlu1 %676  ;;  %v664_v33 = vadd.f32 %v658_v4, %v596_v61  ;;  %v665_v59 = vadd.f32 %v661_v5, %v597_v63 }
 0x165   :  { %v716_v2 = vmul.f32 %v703_v50, %v677_v0  ;;  %v717_v24 = vmul.f32 %v707_v43, %v677_v0 }
 0x167   :  { %v724_v30 = vrot.slane %v716_v2, 3  ;;  %v727_v13 = vrot.slane %v717_v24, 3 }
 0x169   :  { %v726_v6 = vsel %vm421_vm14, %v724_v30, %v725_v62  ;;  %v729_v18 = vsel %vm421_vm14, %v727_v13, %v728_v3 }
 0x16a   :  { %v732_v17 = vadd.f32 %v726_v6, %v664_v33  ;;  %v733_v7 = vadd.f32 %v729_v18, %v665_v59 }
 0x16c   :  { %734 = vst [vmem:[%s1159_s3] sm:$0xff] %v732_v17 }
 0x16d   :  { %735 = vst [vmem:[%s1159_s3 + $0x8] sm:$0xff] %v733_v7 }

</bundles_post_ra>
